<compile_context>
chip_gen: v5e
topology: v5e:2x2
jax: 0.10.0
libtpu: 0.0.40
codegen_flags: <defaults>
</compile_context>

<pallas_src>
import functools

import jax
import jax.numpy as jnp
from jax.experimental import pallas as pl
from jax.experimental.pallas import tpu as pltpu


def _round_up(x, m):
    return (x + m - 1) // m * m


def _pick_tile_rows(r):
    # >= 2 row tiles whenever possible (keeps both v7x TensorCores busy),
    # rows a multiple of 8 (sublane), capped so VMEM stays small on all gens.
    return min(512, _round_up(max(8, -(-r // 2)), 8))


# --------------------------------------------------------------------------
# Shifted-row matmul kernel: the conv / deconv engine.
#   out[q, :] = bias + sum_t x[q + offsets[t], :] @ W[t]
# The input is resident in VMEM; taps are pl.ds row shifts (fused im2col).
# --------------------------------------------------------------------------
def _shift_matmul_kernel(x_ref, w_ref, b_ref, o_ref, *, offsets, tile_rows):
    q0 = pl.program_id(0) * tile_rows
    acc = jnp.zeros(o_ref.shape, jnp.float32)
    for t, off in enumerate(offsets):
        a = x_ref[pl.ds(q0 + off, tile_rows), :].astype(jnp.bfloat16)
        acc = acc + jnp.dot(a, w_ref[t], preferred_element_type=jnp.float32)
    o_ref[...] = acc + b_ref[...]


def pallas_shift_matmul(x2d, w3, b2, offsets):
    """x2d: (R, Cin) f32; w3: (T, Cin, Cout) bf16; b2: (1, Cout) f32."""
    r, cin = x2d.shape
    ntap, _, cout = w3.shape
    offsets = tuple(int(o) for o in offsets)
    max_off = max(offsets)
    tile_rows = _pick_tile_rows(r)
    rp = _round_up(r, tile_rows)
    rx = _round_up(rp + max_off, 8)
    x_p = jnp.pad(x2d, ((0, rx - r), (0, 0)))
    out = pl.pallas_call(
        functools.partial(_shift_matmul_kernel, offsets=offsets,
                          tile_rows=tile_rows),
        out_shape=jax.ShapeDtypeStruct((rp, cout), jnp.float32),
        grid=(rp // tile_rows,),
        in_specs=[
            pl.BlockSpec((rx, cin), lambda i: (0, 0)),          # resident input
            pl.BlockSpec((ntap, cin, cout), lambda i: (0, 0, 0)),  # resident W
            pl.BlockSpec((1, cout), lambda i: (0, 0)),          # resident bias
        ],
        out_specs=pl.BlockSpec((tile_rows, cout), lambda i: (i, 0)),
        compiler_params=pltpu.CompilerParams(
            dimension_semantics=("parallel",)),
    )(x_p, w3, b2)
    return out[:r]


# --------------------------------------------------------------------------
# Conv / deconv wrappers (NHWC).  All reduce to a stride-1 VALID 3x3 conv
# (or a plain 1x1 matmul) evaluated with the shifted-row matmul kernel.
# --------------------------------------------------------------------------
def _conv3x3_valid(xs, w9, b2):
    n, hs, ws, cin = xs.shape
    cout = w9.shape[2]
    ho, wo = hs - 2, ws - 2
    # Full-grid correlation: rows outside the valid (ho, wo) window are
    # computed but discarded (small inflation, no k^2 HBM traffic).
    offsets = tuple(i * ws + j for i in range(3) for j in range(3))
    out2 = pallas_shift_matmul(xs.reshape(n * hs * ws, cin), w9, b2, offsets)
    return out2.reshape(n, hs, ws, cout)[:, :ho, :wo, :]


def conv_s1_k3(x, w9, b2):
    """Conv2d(k=3, s=1, p=1), NHWC."""
    xp = jnp.pad(x, ((0, 0), (1, 1), (1, 1), (0, 0)))
    return _conv3x3_valid(xp, w9, b2)


def conv_s2_k5(x, w9, b2):
    """Conv2d(k=5, s=2, p=2), NHWC, via space-to-depth -> stride-1 3x3."""
    n, h, w, cin = x.shape
    xp = jnp.pad(x, ((0, 0), (2, 2), (2, 2), (0, 0)))
    hs, ws = (h + 4) // 2, (w + 4) // 2
    xs = xp.reshape(n, hs, 2, ws, 2, cin).transpose(0, 1, 3, 2, 4, 5)
    xs = xs.reshape(n, hs, ws, 4 * cin)
    return _conv3x3_valid(xs, w9, b2)


def conv_1x1(x2d, w1, b2):
    return pallas_shift_matmul(x2d, w1, b2, (0,))


def deconv_s2_k5(x, w9_phase, b_phase):
    """ConvTranspose2d(k=5, s=2, p=2, op=1) via 4 sub-pixel phase convs."""
    n, h, w, _ = x.shape
    cout = w9_phase.shape[2] // 4
    ph = conv_s1_k3(x, w9_phase, b_phase)                   # (n, h, w, 4*cout)
    y = ph.reshape(n, h, w, 2, 2, cout).transpose(0, 1, 3, 2, 4, 5)
    return y.reshape(n, 2 * h, 2 * w, cout)                 # depth-to-space


# --------------------------------------------------------------------------
# GroupNorm (+ optional fused residual add and ReLU), NHWC layout.
# --------------------------------------------------------------------------
def _sum_keep_last(x):
    for ax in range(x.ndim - 1):
        x = jnp.sum(x, axis=ax, keepdims=True)
    return x


def _gn_kernel(x_ref, g_ref, b_ref, m_ref, *refs,
               eps, cnt, relu, has_skip, num_groups):
    o_ref = refs[-1]
    x = x_ref[...]                                   # (1, H, W, C) f32
    masks = m_ref[...]                               # (G, C) one-hot groups
    inv_cnt = 1.0 / cnt

    s1 = _sum_keep_last(x)                           # (1, 1, 1, C)
    mean_c = jnp.zeros_like(s1)
    for g in range(num_groups):
        mg = masks[g:g + 1, :].reshape(1, 1, 1, -1)
        mean_c = mean_c + (jnp.sum(s1 * mg) * inv_cnt) * mg
    d = x - mean_c
    s2 = _sum_keep_last(d * d)
    var_c = jnp.zeros_like(s2)
    for g in range(num_groups):
        mg = masks[g:g + 1, :].reshape(1, 1, 1, -1)
        var_c = var_c + (jnp.sum(s2 * mg) * inv_cnt) * mg

    y = d * jax.lax.rsqrt(var_c + eps)
    y = y * g_ref[...].reshape(1, 1, 1, -1) + b_ref[...].reshape(1, 1, 1, -1)
    if has_skip:
        y = y + refs[0][...]
    if relu:
        y = jnp.maximum(y, 0.0)
    o_ref[...] = y


def group_norm_nhwc(x, gamma, beta, num_groups, *, relu, skip=None, eps=1e-5):
    n, h, w, c = x.shape
    cg = c // num_groups
    cnt = float(cg * h * w)
    masks = (jnp.arange(c)[None, :] // cg
             == jnp.arange(num_groups)[:, None]).astype(jnp.float32)
    in_specs = [
        pl.BlockSpec((1, h, w, c), lambda i: (i, 0, 0, 0)),
        pl.BlockSpec((1, c), lambda i: (0, 0)),
        pl.BlockSpec((1, c), lambda i: (0, 0)),
        pl.BlockSpec((num_groups, c), lambda i: (0, 0)),
    ]
    args = [x, gamma.reshape(1, c), beta.reshape(1, c), masks]
    if skip is not None:
        in_specs.append(pl.BlockSpec((1, h, w, c), lambda i: (i, 0, 0, 0)))
        args.append(skip)
    return pl.pallas_call(
        functools.partial(_gn_kernel, eps=eps, cnt=cnt, relu=relu,
                          has_skip=skip is not None, num_groups=num_groups),
        out_shape=jax.ShapeDtypeStruct(x.shape, jnp.float32),
        grid=(n,),
        in_specs=in_specs,
        out_specs=pl.BlockSpec((1, h, w, c), lambda i: (i, 0, 0, 0)),
        compiler_params=pltpu.CompilerParams(
            dimension_semantics=("parallel",)),
    )(*args)


# --------------------------------------------------------------------------
# Pass 1: tiled abs-max reduction -> adaptive quantizer scale (SMEM scalar).
# Pass 2: fused quantize + factorized entropy-bottleneck likelihoods,
#         tiled over rows, per-channel params resident, lower/upper logits
#         evaluated in one stacked pass.
# --------------------------------------------------------------------------
def _absmax_scale_kernel(x_ref, o_ref, acc_ref):
    @pl.when(pl.program_id(0) == 0)
    def _():
        acc_ref[0] = jnp.zeros((), jnp.float32)

    acc_ref[0] = jnp.maximum(acc_ref[0], jnp.max(jnp.abs(x_ref[...])))

    @pl.when(pl.program_id(0) == pl.num_programs(0) - 1)
    def _():
        r = acc_ref[0]
        s = jnp.where(r < 0.02, 50.0,
            jnp.where(r < 0.05, 20.0,
            jnp.where(r < 0.1, 10.0,
            jnp.where(r < 0.5, 4.0, 1.0))))
        o_ref[0, 0] = s


def _quant_entropy_kernel(scale_ref, y_ref, med_ref, m0_ref, mmid_ref, m4_ref,
                          bmid_ref, b4_ref, tf_ref, yq_ref, yhat_ref, lik_ref):
    s = scale_ref[0, 0]
    y = y_ref[...]                                    # (tile, C) f32
    yq = jnp.round(y * s) / s
    med = med_ref[...]                                # (1, C)
    yhat = jnp.round(yq - med) + med

    tr = y.shape[0]
    v = jnp.concatenate([yhat - 0.5, yhat + 0.5], axis=0)   # (2*tile, C)

    m0 = m0_ref[...]
    mmid = mmid_ref[...]
    m4 = m4_ref[...]
    bmid = bmid_ref[...]
    b4 = b4_ref[...]
    tf = tf_ref[...]

    def row(p, i):                                    # (1, C) broadcast row
        return p[i:i + 1, :]

    h = []
    for j in range(3):
        hj = row(m0, j) * v + row(bmid, j)
        hj = hj + row(tf, j) * jnp.tanh(hj)
        h.append(hj)
    for l in range(3):
        hn = []
        for j in range(3):
            a = (row(bmid, (l + 1) * 3 + j)
                 + row(mmid, l * 9 + j * 3 + 0) * h[0]
                 + row(mmid, l * 9 + j * 3 + 1) * h[1]
                 + row(mmid, l * 9 + j * 3 + 2) * h[2])
            a = a + row(tf, (l + 1) * 3 + j) * jnp.tanh(a)
            hn.append(a)
        h = hn
    logits = b4 + row(m4, 0) * h[0] + row(m4, 1) * h[1] + row(m4, 2) * h[2]

    lower = logits[:tr]
    upper = logits[tr:]
    sp = lower + upper
    sign = jnp.where(sp > 0, -1.0, jnp.where(sp < 0, 1.0, 0.0))
    lik = jnp.abs(jax.nn.sigmoid(sign * upper) - jax.nn.sigmoid(sign * lower))
    lik = jnp.maximum(lik, 1e-9)

    yq_ref[...] = yq
    yhat_ref[...] = yhat
    lik_ref[...] = lik


def quantize_and_entropy(y, eb):
    n, h, w, c = y.shape
    r = n * h * w
    tile = _pick_tile_rows(r)
    rp = _round_up(r, tile)
    y2 = jnp.pad(y.reshape(r, c), ((0, rp - r), (0, 0)))

    scale = pl.pallas_call(
        _absmax_scale_kernel,
        out_shape=jax.ShapeDtypeStruct((1, 1), jnp.float32),
        grid=(rp // tile,),
        in_specs=[pl.BlockSpec((tile, c), lambda i: (i, 0))],
        out_specs=pl.BlockSpec(memory_space=pltpu.MemorySpace.SMEM),
        scratch_shapes=[pltpu.SMEM((1,), jnp.float32)],
        compiler_params=pltpu.CompilerParams(
            dimension_semantics=("arbitrary",)),
    )(y2)

    row_spec = pl.BlockSpec((tile, c), lambda i: (i, 0))
    const = lambda rows: pl.BlockSpec((rows, c), lambda i: (0, 0))
    yq2, yhat2, lik2 = pl.pallas_call(
        _quant_entropy_kernel,
        out_shape=tuple(jax.ShapeDtypeStruct((rp, c), jnp.float32)
                        for _ in range(3)),
        grid=(rp // tile,),
        in_specs=[
            pl.BlockSpec(memory_space=pltpu.MemorySpace.SMEM),   # scale
            row_spec,                                            # y
            const(1), const(3), const(27), const(3),             # med, m0, mmid, m4
            const(12), const(1), const(12),                      # bmid, b4, tf
        ],
        out_specs=(row_spec, row_spec, row_spec),
        compiler_params=pltpu.CompilerParams(
            dimension_semantics=("parallel",)),
    )(scale, y2, eb['med'], eb['m0'], eb['mmid'], eb['m4'],
      eb['bmid'], eb['b4'], eb['tf'])

    unpack = lambda a: a[:r].reshape(n, h, w, c)
    return unpack(yq2), unpack(yhat2), unpack(lik2)


# --------------------------------------------------------------------------
# Model: analysis / synthesis transforms + full forward (NHWC internally)
# --------------------------------------------------------------------------
def analysis_transform(p, x):
    out = conv_s2_k5(x, p['a_conv1_w'], p['a_conv1_b'])
    out = group_norm_nhwc(out, p['a_gn1_g'], p['a_gn1_b'], 8, relu=True)
    out = conv_s2_k5(out, p['a_conv2_w'], p['a_conv2_b'])
    out = group_norm_nhwc(out, p['a_gn2_g'], p['a_gn2_b'], 8, relu=True)
    out = conv_s1_k3(out, p['a_conv3_w'], p['a_conv3_b'])
    xs = x[:, ::4, ::4, :]                                   # 1x1 stride-4 conv
    n, h, w, cin = xs.shape
    skip = conv_1x1(xs.reshape(n * h * w, cin), p['a_skip_w'],
                    p['a_skip_b']).reshape(n, h, w, -1)
    # GroupNorm3 + residual add + ReLU fused into one kernel epilogue.
    return group_norm_nhwc(out, p['a_gn3_g'], p['a_gn3_b'], 8,
                           relu=True, skip=skip)


def synthesis_transform(p, y_hat):
    out = conv_s1_k3(y_hat, p['s_deconv1_w'], p['s_deconv1_b'])
    out = group_norm_nhwc(out, p['s_gn1_g'], p['s_gn1_b'], 8, relu=True)
    out = deconv_s2_k5(out, p['s_deconv2_w'], p['s_deconv2_b'])
    out = group_norm_nhwc(out, p['s_gn2_g'], p['s_gn2_b'], 8, relu=True)
    out = deconv_s2_k5(out, p['s_deconv3_w'], p['s_deconv3_b'])  # skip bias folded in
    n, h, w, c = y_hat.shape
    z = conv_1x1(y_hat.reshape(n * h * w, c), p['s_skip_w'],
                 p['s_skip_b']).reshape(n, h, w, -1)
    # ConvTranspose2d(k=1, s=4, op=3) only touches every 4th pixel; its bias
    # was folded into deconv3's bias, so only a tiny strided add remains.
    return out.at[:, ::4, ::4, :].add(z)


def forward(p, x_nchw):
    x = jnp.transpose(x_nchw, (0, 2, 3, 1))            # NCHW -> NHWC (boundary)
    y = analysis_transform(p, x)
    y_q, y_hat, likelihoods = quantize_and_entropy(y, p['eb'])
    x_hat = synthesis_transform(p, y_hat)
    nchw = lambda a: jnp.transpose(a, (0, 3, 1, 2))
    return nchw(x_hat), nchw(likelihoods), nchw(y_q)


# --------------------------------------------------------------------------
# Weight preparation (PyTorch layouts -> kernel-friendly tap matrices, bf16)
# --------------------------------------------------------------------------
def _prep_conv_s1_k3(w, b):                # w: (Cout, Cin, 3, 3)
    ws = jnp.transpose(w, (2, 3, 1, 0))    # (3, 3, Cin, Cout)
    return (ws.reshape(9, w.shape[1], w.shape[0]).astype(jnp.bfloat16),
            b.reshape(1, -1).astype(jnp.float32))


def _prep_conv_s2_k5(w, b):                # w: (Cout, Cin, 5, 5)
    cout, cin = w.shape[0], w.shape[1]
    ws = jnp.zeros((3, 3, 4 * cin, cout), jnp.float32)
    for qi in range(3):
        for ri in range(2):
            i = 2 * qi + ri
            if i >= 5:
                continue
            for qj in range(3):
                for rj in range(2):
                    j = 2 * qj + rj
                    if j >= 5:
                        continue
                    blk = (ri * 2 + rj) * cin
                    ws = ws.at[qi, qj, blk:blk + cin, :].set(w[:, :, i, j].T)
    return (ws.reshape(9, 4 * cin, cout).astype(jnp.bfloat16),
            b.reshape(1, -1).astype(jnp.float32))


def _prep_conv_1x1(w, b):                  # w: (Cout, Cin, 1, 1)
    return (w[:, :, 0, 0].T.reshape(1, w.shape[1], w.shape[0]).astype(jnp.bfloat16),
            b.reshape(1, -1).astype(jnp.float32))


def _prep_deconv_s1_k3(wT, b):             # wT: (Cin, Cout, 3, 3)
    wc = jnp.flip(wT, axis=(2, 3))
    ws = jnp.transpose(wc, (2, 3, 0, 1))   # (3, 3, Cin, Cout)
    return (ws.reshape(9, wT.shape[0], wT.shape[1]).astype(jnp.bfloat16),
            b.reshape(1, -1).astype(jnp.float32))


def _prep_deconv_s2_k5(wT, b, extra_bias=None):   # wT: (Cin, Cout, 5, 5)
    cin, cout = wT.shape[0], wT.shape[1]
    idx = ((4, 2, 0), (None, 3, 1))        # phase r -> tap d -> kernel index
    wp = jnp.zeros((3, 3, cin, 4 * cout), jnp.float32)
    for r in range(2):
        for t in range(2):
            for di in range(3):
                i = idx[r][di]
                if i is None:
                    continue
                for dj in range(3):
                    j = idx[t][dj]
                    if j is None:
                        continue
                    blk = (r * 2 + t) * cout
                    wp = wp.at[di, dj, :, blk:blk + cout].set(wT[:, :, i, j])
    bb = b if extra_bias is None else b + extra_bias
    bp = jnp.tile(bb, (4,)).reshape(1, 4 * cout)
    return (wp.reshape(9, cin, 4 * cout).astype(jnp.bfloat16),
            bp.astype(jnp.float32))


def _prep_deconv_1x1(wT):                  # wT: (Cin, Cout, 1, 1), bias folded
    cin, cout = wT.shape[0], wT.shape[1]
    return (wT[:, :, 0, 0].reshape(1, cin, cout).astype(jnp.bfloat16),
            jnp.zeros((1, cout), jnp.float32))


# --------------------------------------------------------------------------
# Deterministic parameter init (PyTorch-like) + entropy-bottleneck packing
# --------------------------------------------------------------------------
def init_entropy_bottleneck(key, c, init_scale=0.2, filters=(3, 3, 3, 3)):
    ff = (1,) + filters + (1,)
    scale = init_scale ** (1.0 / (len(filters) + 1))
    ks = iter(jax.random.split(key, len(filters) + 1))
    softplus = jax.nn.softplus
    mats, biases, factors = [], [], []
    for i in range(len(filters) + 1):
        init = float(jnp.log(jnp.expm1(1.0 / scale / ff[i + 1])))
        mats.append(jnp.full((c, ff[i + 1], ff[i]), init, jnp.float32))
        biases.append(jax.random.uniform(next(ks), (c, ff[i + 1], 1),
                                         jnp.float32, -0.5, 0.5))
        if i < len(filters):
            factors.append(jnp.zeros((c, ff[i + 1], 1), jnp.float32))
    # Pack channel-LAST (rows = unit index, lanes = channel).
    m0 = softplus(mats[0])[:, :, 0].T                            # (3, C)
    mmid_rows = []
    for l in range(1, 4):
        m = softplus(mats[l])                                    # (C, 3, 3)
        for j in range(3):
            for i in range(3):
                mmid_rows.append(m[:, j, i])
    mmid = jnp.stack(mmid_rows, axis=0)                          # (27, C)
    m4 = softplus(mats[4])[:, 0, :].T                            # (3, C)
    bmid = jnp.concatenate([biases[l][:, :, 0].T for l in range(4)], axis=0)
    b4 = biases[4][:, :, 0].T                                    # (1, C)
    tf = jnp.concatenate([jnp.tanh(factors[l])[:, :, 0].T for l in range(4)],
                         axis=0)                                 # (12, C)
    med = jnp.zeros((1, c), jnp.float32)   # quantile init median = 0.0
    return dict(m0=m0, mmid=mmid, m4=m4, bmid=bmid, b4=b4, tf=tf, med=med)


def init_params(key, cin, cl):
    ki = iter(jax.random.split(key, 24))

    def uconv(co, ci, k):
        fan_in = ci * k * k
        bound = 1.0 / (fan_in ** 0.5)
        w = jax.random.uniform(next(ki), (co, ci, k, k), jnp.float32, -bound, bound)
        b = jax.random.uniform(next(ki), (co,), jnp.float32, -bound, bound)
        return w, b

    def udeconv(ci, co, k):
        fan_in = co * k * k
        bound = 1.0 / (fan_in ** 0.5)
        w = jax.random.uniform(next(ki), (ci, co, k, k), jnp.float32, -bound, bound)
        b = jax.random.uniform(next(ki), (co,), jnp.float32, -bound, bound)
        return w, b

    raw = {
        'a_conv1': uconv(cl, cin, 5),
        'a_conv2': uconv(cl, cl, 5),
        'a_conv3': uconv(cl, cl, 3),
        'a_skip': uconv(cl, cin, 1),
        's_deconv1': udeconv(cl, cl, 3),
        's_deconv2': udeconv(cl, cl, 5),
        's_deconv3': udeconv(cl, cin, 5),
        's_skip': udeconv(cl, cin, 1),
    }
    gn = {}
    for nm in ('a_gn1', 'a_gn2', 'a_gn3', 's_gn1', 's_gn2'):
        gn[nm + '_g'] = jnp.ones((cl,), jnp.float32)
        gn[nm + '_b'] = jnp.zeros((cl,), jnp.float32)
    eb = init_entropy_bottleneck(next(ki), cl)
    return raw, gn, eb


def prepare_params(raw, gn, eb):
    p = {}
    p['a_conv1_w'], p['a_conv1_b'] = _prep_conv_s2_k5(*raw['a_conv1'])
    p['a_conv2_w'], p['a_conv2_b'] = _prep_conv_s2_k5(*raw['a_conv2'])
    p['a_conv3_w'], p['a_conv3_b'] = _prep_conv_s1_k3(*raw['a_conv3'])
    p['a_skip_w'], p['a_skip_b'] = _prep_conv_1x1(*raw['a_skip'])
    p['s_deconv1_w'], p['s_deconv1_b'] = _prep_deconv_s1_k3(*raw['s_deconv1'])
    p['s_deconv2_w'], p['s_deconv2_b'] = _prep_deconv_s2_k5(*raw['s_deconv2'])
    # fold skip_deconv's bias into deconv3's phase bias (residual-add fusion)
    p['s_deconv3_w'], p['s_deconv3_b'] = _prep_deconv_s2_k5(
        raw['s_deconv3'][0], raw['s_deconv3'][1], extra_bias=raw['s_skip'][1])
    p['s_skip_w'], p['s_skip_b'] = _prep_deconv_1x1(raw['s_skip'][0])
    p.update(gn)
    p['eb'] = eb
    return p


if __name__ == "__main__":
    key = jax.random.PRNGKey(0)
    k_params, k_x = jax.random.split(key)

    # Small shapes consistent with the module (channels divisible by 8 for
    # GroupNorm(8, C); spatial divisible by 4 for the stride-4 skips).
    N, Cin, Cl, H, W = 2, 16, 16, 16, 16
    raw, gn, eb = init_params(k_params, Cin, Cl)
    params = prepare_params(raw, gn, eb)
    x = jax.random.normal(k_x, (N, Cin, H, W), jnp.float32)

    fwd = jax.jit(forward)
    x_hat, likelihoods, y_q = fwd(params, x)
    jax.block_until_ready((x_hat, likelihoods, y_q))

    assert x_hat.shape == (N, Cin, H, W)
    assert likelihoods.shape == (N, Cl, H // 4, W // 4)
    assert y_q.shape == (N, Cl, H // 4, W // 4)
    assert bool(jnp.all(jnp.isfinite(x_hat)))
    assert bool(jnp.all(jnp.isfinite(likelihoods)))
    assert bool(jnp.all(likelihoods >= 1e-9))

    print("KERNEL_OK")
</pallas_src>

<mosaic_0001>
module attributes {stable_mosaic.version = 11 : i64} {
  func.func @_shift_matmul_kernel(%arg0: i32, %arg1: memref<232x64xf32, #tpu.memory_space<vmem>>, %arg2: memref<9x64x16xbf16, #tpu.memory_space<vmem>>, %arg3: memref<1x16xf32, #tpu.memory_space<vmem>>, %arg4: memref<104x16xf32, #tpu.memory_space<vmem>>) attributes {dimension_semantics = [#tpu.dimension_semantics<parallel>], iteration_bounds = array<i64: 2>, scalar_prefetch = 0 : i64, scratch_operands = 0 : i64, tpu.core_type = #tpu.core_type<tc>, window_params = [{pipeline_mode = #tpu.pipeline_mode<synchronous>, transform_indices = @transform_0, window_bounds = array<i64: 232, 64>}, {pipeline_mode = #tpu.pipeline_mode<synchronous>, transform_indices = @transform_1, window_bounds = array<i64: 9, 64, 16>}, {pipeline_mode = #tpu.pipeline_mode<synchronous>, transform_indices = @transform_2, window_bounds = array<i64: 1, 16>}, {transform_indices = @transform_3, window_bounds = array<i64: 104, 16>}]} {
    %c104_i32 = arith.constant 104 : i32
    %0 = arith.muli %arg0, %c104_i32 : i32
    %cst = arith.constant 0.000000e+00 : f32
    %1 = vector.broadcast %cst : f32 to vector<104x16xf32>
    %c0_i32 = arith.constant 0 : i32
    %2 = arith.addi %0, %c0_i32 : i32
    %3 = arith.index_cast %2 : i32 to index
    %c0 = arith.constant 0 : index
    %4 = vector.load %arg1[%3, %c0] : memref<232x64xf32, #tpu.memory_space<vmem>>, vector<104x64xf32>
    %5 = arith.truncf %4 : vector<104x64xf32> to vector<104x64xbf16>
    %c0_0 = arith.constant 0 : index
    %c0_1 = arith.constant 0 : index
    %c0_2 = arith.constant 0 : index
    %6 = vector.load %arg2[%c0_0, %c0_1, %c0_2] : memref<9x64x16xbf16, #tpu.memory_space<vmem>>, vector<1x64x16xbf16>
    %7 = vector.shape_cast %6 : vector<1x64x16xbf16> to vector<64x16xbf16>
    %cst_3 = arith.constant dense<0.000000e+00> : vector<104x16xf32>
    %8 = tpu.matmul %5, %7, %cst_3 {dimension_numbers = #tpu.dot_dimension_numbers<[1], [0], [0], [1], [0, 0, 1, 1], [], []>} : vector<104x64xbf16>, vector<64x16xbf16>, vector<104x16xf32> -> vector<104x16xf32>
    %9 = arith.addf %1, %8 : vector<104x16xf32>
    %c1_i32 = arith.constant 1 : i32
    %10 = arith.addi %0, %c1_i32 : i32
    %11 = arith.index_cast %10 : i32 to index
    %c0_4 = arith.constant 0 : index
    %12 = vector.load %arg1[%11, %c0_4] : memref<232x64xf32, #tpu.memory_space<vmem>>, vector<104x64xf32>
    %13 = arith.truncf %12 : vector<104x64xf32> to vector<104x64xbf16>
    %c1 = arith.constant 1 : index
    %c0_5 = arith.constant 0 : index
    %c0_6 = arith.constant 0 : index
    %14 = vector.load %arg2[%c1, %c0_5, %c0_6] : memref<9x64x16xbf16, #tpu.memory_space<vmem>>, vector<1x64x16xbf16>
    %15 = vector.shape_cast %14 : vector<1x64x16xbf16> to vector<64x16xbf16>
    %cst_7 = arith.constant dense<0.000000e+00> : vector<104x16xf32>
    %16 = tpu.matmul %13, %15, %cst_7 {dimension_numbers = #tpu.dot_dimension_numbers<[1], [0], [0], [1], [0, 0, 1, 1], [], []>} : vector<104x64xbf16>, vector<64x16xbf16>, vector<104x16xf32> -> vector<104x16xf32>
    %17 = arith.addf %9, %16 : vector<104x16xf32>
    %c2_i32 = arith.constant 2 : i32
    %18 = arith.addi %0, %c2_i32 : i32
    %19 = arith.index_cast %18 : i32 to index
    %c0_8 = arith.constant 0 : index
    %20 = vector.load %arg1[%19, %c0_8] : memref<232x64xf32, #tpu.memory_space<vmem>>, vector<104x64xf32>
    %21 = arith.truncf %20 : vector<104x64xf32> to vector<104x64xbf16>
    %c2 = arith.constant 2 : index
    %c0_9 = arith.constant 0 : index
    %c0_10 = arith.constant 0 : index
    %22 = vector.load %arg2[%c2, %c0_9, %c0_10] : memref<9x64x16xbf16, #tpu.memory_space<vmem>>, vector<1x64x16xbf16>
    %23 = vector.shape_cast %22 : vector<1x64x16xbf16> to vector<64x16xbf16>
    %cst_11 = arith.constant dense<0.000000e+00> : vector<104x16xf32>
    %24 = tpu.matmul %21, %23, %cst_11 {dimension_numbers = #tpu.dot_dimension_numbers<[1], [0], [0], [1], [0, 0, 1, 1], [], []>} : vector<104x64xbf16>, vector<64x16xbf16>, vector<104x16xf32> -> vector<104x16xf32>
    %25 = arith.addf %17, %24 : vector<104x16xf32>
    %c10_i32 = arith.constant 10 : i32
    %26 = arith.addi %0, %c10_i32 : i32
    %27 = arith.index_cast %26 : i32 to index
    %c0_12 = arith.constant 0 : index
    %28 = vector.load %arg1[%27, %c0_12] : memref<232x64xf32, #tpu.memory_space<vmem>>, vector<104x64xf32>
    %29 = arith.truncf %28 : vector<104x64xf32> to vector<104x64xbf16>
    %c3 = arith.constant 3 : index
    %c0_13 = arith.constant 0 : index
    %c0_14 = arith.constant 0 : index
    %30 = vector.load %arg2[%c3, %c0_13, %c0_14] : memref<9x64x16xbf16, #tpu.memory_space<vmem>>, vector<1x64x16xbf16>
    %31 = vector.shape_cast %30 : vector<1x64x16xbf16> to vector<64x16xbf16>
    %cst_15 = arith.constant dense<0.000000e+00> : vector<104x16xf32>
    %32 = tpu.matmul %29, %31, %cst_15 {dimension_numbers = #tpu.dot_dimension_numbers<[1], [0], [0], [1], [0, 0, 1, 1], [], []>} : vector<104x64xbf16>, vector<64x16xbf16>, vector<104x16xf32> -> vector<104x16xf32>
    %33 = arith.addf %25, %32 : vector<104x16xf32>
    %c11_i32 = arith.constant 11 : i32
    %34 = arith.addi %0, %c11_i32 : i32
    %35 = arith.index_cast %34 : i32 to index
    %c0_16 = arith.constant 0 : index
    %36 = vector.load %arg1[%35, %c0_16] : memref<232x64xf32, #tpu.memory_space<vmem>>, vector<104x64xf32>
    %37 = arith.truncf %36 : vector<104x64xf32> to vector<104x64xbf16>
    %c4 = arith.constant 4 : index
    %c0_17 = arith.constant 0 : index
    %c0_18 = arith.constant 0 : index
    %38 = vector.load %arg2[%c4, %c0_17, %c0_18] : memref<9x64x16xbf16, #tpu.memory_space<vmem>>, vector<1x64x16xbf16>
    %39 = vector.shape_cast %38 : vector<1x64x16xbf16> to vector<64x16xbf16>
    %cst_19 = arith.constant dense<0.000000e+00> : vector<104x16xf32>
    %40 = tpu.matmul %37, %39, %cst_19 {dimension_numbers = #tpu.dot_dimension_numbers<[1], [0], [0], [1], [0, 0, 1, 1], [], []>} : vector<104x64xbf16>, vector<64x16xbf16>, vector<104x16xf32> -> vector<104x16xf32>
    %41 = arith.addf %33, %40 : vector<104x16xf32>
    %c12_i32 = arith.constant 12 : i32
    %42 = arith.addi %0, %c12_i32 : i32
    %43 = arith.index_cast %42 : i32 to index
    %c0_20 = arith.constant 0 : index
    %44 = vector.load %arg1[%43, %c0_20] : memref<232x64xf32, #tpu.memory_space<vmem>>, vector<104x64xf32>
    %45 = arith.truncf %44 : vector<104x64xf32> to vector<104x64xbf16>
    %c5 = arith.constant 5 : index
    %c0_21 = arith.constant 0 : index
    %c0_22 = arith.constant 0 : index
    %46 = vector.load %arg2[%c5, %c0_21, %c0_22] : memref<9x64x16xbf16, #tpu.memory_space<vmem>>, vector<1x64x16xbf16>
    %47 = vector.shape_cast %46 : vector<1x64x16xbf16> to vector<64x16xbf16>
    %cst_23 = arith.constant dense<0.000000e+00> : vector<104x16xf32>
    %48 = tpu.matmul %45, %47, %cst_23 {dimension_numbers = #tpu.dot_dimension_numbers<[1], [0], [0], [1], [0, 0, 1, 1], [], []>} : vector<104x64xbf16>, vector<64x16xbf16>, vector<104x16xf32> -> vector<104x16xf32>
    %49 = arith.addf %41, %48 : vector<104x16xf32>
    %c20_i32 = arith.constant 20 : i32
    %50 = arith.addi %0, %c20_i32 : i32
    %51 = arith.index_cast %50 : i32 to index
    %c0_24 = arith.constant 0 : index
    %52 = vector.load %arg1[%51, %c0_24] : memref<232x64xf32, #tpu.memory_space<vmem>>, vector<104x64xf32>
    %53 = arith.truncf %52 : vector<104x64xf32> to vector<104x64xbf16>
    %c6 = arith.constant 6 : index
    %c0_25 = arith.constant 0 : index
    %c0_26 = arith.constant 0 : index
    %54 = vector.load %arg2[%c6, %c0_25, %c0_26] : memref<9x64x16xbf16, #tpu.memory_space<vmem>>, vector<1x64x16xbf16>
    %55 = vector.shape_cast %54 : vector<1x64x16xbf16> to vector<64x16xbf16>
    %cst_27 = arith.constant dense<0.000000e+00> : vector<104x16xf32>
    %56 = tpu.matmul %53, %55, %cst_27 {dimension_numbers = #tpu.dot_dimension_numbers<[1], [0], [0], [1], [0, 0, 1, 1], [], []>} : vector<104x64xbf16>, vector<64x16xbf16>, vector<104x16xf32> -> vector<104x16xf32>
    %57 = arith.addf %49, %56 : vector<104x16xf32>
    %c21_i32 = arith.constant 21 : i32
    %58 = arith.addi %0, %c21_i32 : i32
    %59 = arith.index_cast %58 : i32 to index
    %c0_28 = arith.constant 0 : index
    %60 = vector.load %arg1[%59, %c0_28] : memref<232x64xf32, #tpu.memory_space<vmem>>, vector<104x64xf32>
    %61 = arith.truncf %60 : vector<104x64xf32> to vector<104x64xbf16>
    %c7 = arith.constant 7 : index
    %c0_29 = arith.constant 0 : index
    %c0_30 = arith.constant 0 : index
    %62 = vector.load %arg2[%c7, %c0_29, %c0_30] : memref<9x64x16xbf16, #tpu.memory_space<vmem>>, vector<1x64x16xbf16>
    %63 = vector.shape_cast %62 : vector<1x64x16xbf16> to vector<64x16xbf16>
    %cst_31 = arith.constant dense<0.000000e+00> : vector<104x16xf32>
    %64 = tpu.matmul %61, %63, %cst_31 {dimension_numbers = #tpu.dot_dimension_numbers<[1], [0], [0], [1], [0, 0, 1, 1], [], []>} : vector<104x64xbf16>, vector<64x16xbf16>, vector<104x16xf32> -> vector<104x16xf32>
    %65 = arith.addf %57, %64 : vector<104x16xf32>
    %c22_i32 = arith.constant 22 : i32
    %66 = arith.addi %0, %c22_i32 : i32
    %67 = arith.index_cast %66 : i32 to index
    %c0_32 = arith.constant 0 : index
    %68 = vector.load %arg1[%67, %c0_32] : memref<232x64xf32, #tpu.memory_space<vmem>>, vector<104x64xf32>
    %69 = arith.truncf %68 : vector<104x64xf32> to vector<104x64xbf16>
    %c8 = arith.constant 8 : index
    %c0_33 = arith.constant 0 : index
    %c0_34 = arith.constant 0 : index
    %70 = vector.load %arg2[%c8, %c0_33, %c0_34] : memref<9x64x16xbf16, #tpu.memory_space<vmem>>, vector<1x64x16xbf16>
    %71 = vector.shape_cast %70 : vector<1x64x16xbf16> to vector<64x16xbf16>
    %cst_35 = arith.constant dense<0.000000e+00> : vector<104x16xf32>
    %72 = tpu.matmul %69, %71, %cst_35 {dimension_numbers = #tpu.dot_dimension_numbers<[1], [0], [0], [1], [0, 0, 1, 1], [], []>} : vector<104x64xbf16>, vector<64x16xbf16>, vector<104x16xf32> -> vector<104x16xf32>
    %73 = arith.addf %65, %72 : vector<104x16xf32>
    %c0_36 = arith.constant 0 : index
    %c0_37 = arith.constant 0 : index
    %74 = vector.load %arg3[%c0_36, %c0_37] : memref<1x16xf32, #tpu.memory_space<vmem>>, vector<1x16xf32>
    %75 = vector.broadcast %74 : vector<1x16xf32> to vector<104x16xf32>
    %76 = arith.addf %73, %75 : vector<104x16xf32>
    %c0_38 = arith.constant 0 : index
    %c0_39 = arith.constant 0 : index
    %77 = vector.load %arg4[%c0_38, %c0_39] : memref<104x16xf32, #tpu.memory_space<vmem>>, vector<104x16xf32>
    tpu.vector_store %arg4[%c0_38, %c0_39], %76 {strides = array<i32>} : memref<104x16xf32, #tpu.memory_space<vmem>>, vector<104x16xf32>,
    return
  }
  func.func @transform_0(%arg0: i32) -> (i32, i32) {
    %c0_i32 = arith.constant 0 : i32
    %c0_i32_0 = arith.constant 0 : i32
    %c0_i32_1 = arith.constant 0 : i32
    return %c0_i32, %c0_i32_0 : i32, i32
  }
  func.func @transform_1(%arg0: i32) -> (i32, i32, i32) {
    %c0_i32 = arith.constant 0 : i32
    %c0_i32_0 = arith.constant 0 : i32
    %c0_i32_1 = arith.constant 0 : i32
    %c0_i32_2 = arith.constant 0 : i32
    return %c0_i32, %c0_i32_0, %c0_i32_1 : i32, i32, i32
  }
  func.func @transform_2(%arg0: i32) -> (i32, i32) {
    %c0_i32 = arith.constant 0 : i32
    %c0_i32_0 = arith.constant 0 : i32
    %c0_i32_1 = arith.constant 0 : i32
    return %c0_i32, %c0_i32_0 : i32, i32
  }
  func.func @transform_3(%arg0: i32) -> (i32, i32) {
    %c0_i32 = arith.constant 0 : i32
    %c0_i32_0 = arith.constant 0 : i32
    return %arg0, %c0_i32 : i32, i32
  }
}

module attributes {stable_mosaic.version = 11 : i64} {
  func.func @_gn_kernel(%arg0: i32, %arg1: memref<1x8x8x16xf32, #tpu.memory_space<vmem>>, %arg2: memref<1x16xf32, #tpu.memory_space<vmem>>, %arg3: memref<1x16xf32, #tpu.memory_space<vmem>>, %arg4: memref<8x16xf32, #tpu.memory_space<vmem>>, %arg5: memref<1x8x8x16xf32, #tpu.memory_space<vmem>>) attributes {dimension_semantics = [#tpu.dimension_semantics<parallel>], iteration_bounds = array<i64: 2>, scalar_prefetch = 0 : i64, scratch_operands = 0 : i64, tpu.core_type = #tpu.core_type<tc>, window_params = [{transform_indices = @transform_0, window_bounds = array<i64: 1, 8, 8, 16>}, {pipeline_mode = #tpu.pipeline_mode<synchronous>, transform_indices = @transform_1, window_bounds = array<i64: 1, 16>}, {pipeline_mode = #tpu.pipeline_mode<synchronous>, transform_indices = @transform_2, window_bounds = array<i64: 1, 16>}, {pipeline_mode = #tpu.pipeline_mode<synchronous>, transform_indices = @transform_3, window_bounds = array<i64: 8, 16>}, {transform_indices = @transform_4, window_bounds = array<i64: 1, 8, 8, 16>}]} {
    %c0 = arith.constant 0 : index
    %c0_0 = arith.constant 0 : index
    %c0_1 = arith.constant 0 : index
    %c0_2 = arith.constant 0 : index
    %0 = vector.load %arg1[%c0, %c0_0, %c0_1, %c0_2] : memref<1x8x8x16xf32, #tpu.memory_space<vmem>>, vector<1x8x8x16xf32>
    %c0_3 = arith.constant 0 : index
    %c0_4 = arith.constant 0 : index
    %1 = vector.load %arg4[%c0_3, %c0_4] : memref<8x16xf32, #tpu.memory_space<vmem>>, vector<8x16xf32>
    %cst = arith.constant dense<0.000000e+00> : vector<8x8x16xf32>
    %2 = vector.multi_reduction <add>, %0, %cst [0] : vector<1x8x8x16xf32> to vector<8x8x16xf32>
    %3 = vector.shape_cast %2 : vector<8x8x16xf32> to vector<1x8x8x16xf32>
    %cst_5 = arith.constant dense<0.000000e+00> : vector<1x8x16xf32>
    %4 = vector.multi_reduction <add>, %3, %cst_5 [1] : vector<1x8x8x16xf32> to vector<1x8x16xf32>
    %5 = vector.shape_cast %4 : vector<1x8x16xf32> to vector<1x1x8x16xf32>
    %cst_6 = arith.constant dense<0.000000e+00> : vector<1x1x16xf32>
    %6 = vector.multi_reduction <add>, %5, %cst_6 [2] : vector<1x1x8x16xf32> to vector<1x1x16xf32>
    %7 = vector.shape_cast %6 : vector<1x1x16xf32> to vector<1x1x1x16xf32>
    %cst_7 = arith.constant 0.000000e+00 : f32
    %8 = vector.broadcast %cst_7 : f32 to vector<1x1x1x16xf32>
    %9 = vector.extract_strided_slice %1 {offsets = [0, 0], sizes = [1, 16], strides = [1, 1]} : vector<8x16xf32> to vector<1x16xf32>
    %10 = vector.shape_cast %9 : vector<1x16xf32> to vector<1x1x1x16xf32>
    %11 = arith.mulf %7, %10 : vector<1x1x1x16xf32>
    %12 = vector.shape_cast %11 : vector<1x1x1x16xf32> to vector<1x1x1x1x16xf32>
    %cst_8 = arith.constant dense<0.000000e+00> : vector<1xf32>
    %13 = vector.multi_reduction <add>, %12, %cst_8 [1, 2, 3, 4] : vector<1x1x1x1x16xf32> to vector<1xf32>
    %14 = vector.shape_cast %13 : vector<1xf32> to vector<1x1x1x1x1xf32>
    %15 = vector.extract %14[0, 0, 0, 0, 0] : f32 from vector<1x1x1x1x1xf32>
    %cst_9 = arith.constant 7.812500e-03 : f32
    %16 = arith.mulf %15, %cst_9 : f32
    %17 = vector.broadcast %16 : f32 to vector<1x1x1x16xf32>
    %18 = arith.mulf %17, %10 : vector<1x1x1x16xf32>
    %19 = arith.addf %8, %18 : vector<1x1x1x16xf32>
    %20 = vector.extract_strided_slice %1 {offsets = [1, 0], sizes = [1, 16], strides = [1, 1]} : vector<8x16xf32> to vector<1x16xf32>
    %21 = vector.shape_cast %20 : vector<1x16xf32> to vector<1x1x1x16xf32>
    %22 = arith.mulf %7, %21 : vector<1x1x1x16xf32>
    %23 = vector.shape_cast %22 : vector<1x1x1x16xf32> to vector<1x1x1x1x16xf32>
    %cst_10 = arith.constant dense<0.000000e+00> : vector<1xf32>
    %24 = vector.multi_reduction <add>, %23, %cst_10 [1, 2, 3, 4] : vector<1x1x1x1x16xf32> to vector<1xf32>
    %25 = vector.shape_cast %24 : vector<1xf32> to vector<1x1x1x1x1xf32>
    %26 = vector.extract %25[0, 0, 0, 0, 0] : f32 from vector<1x1x1x1x1xf32>
    %cst_11 = arith.constant 7.812500e-03 : f32
    %27 = arith.mulf %26, %cst_11 : f32
    %28 = vector.broadcast %27 : f32 to vector<1x1x1x16xf32>
    %29 = arith.mulf %28, %21 : vector<1x1x1x16xf32>
    %30 = arith.addf %19, %29 : vector<1x1x1x16xf32>
    %31 = vector.extract_strided_slice %1 {offsets = [2, 0], sizes = [1, 16], strides = [1, 1]} : vector<8x16xf32> to vector<1x16xf32>
    %32 = vector.shape_cast %31 : vector<1x16xf32> to vector<1x1x1x16xf32>
    %33 = arith.mulf %7, %32 : vector<1x1x1x16xf32>
    %34 = vector.shape_cast %33 : vector<1x1x1x16xf32> to vector<1x1x1x1x16xf32>
    %cst_12 = arith.constant dense<0.000000e+00> : vector<1xf32>
    %35 = vector.multi_reduction <add>, %34, %cst_12 [1, 2, 3, 4] : vector<1x1x1x1x16xf32> to vector<1xf32>
    %36 = vector.shape_cast %35 : vector<1xf32> to vector<1x1x1x1x1xf32>
    %37 = vector.extract %36[0, 0, 0, 0, 0] : f32 from vector<1x1x1x1x1xf32>
    %cst_13 = arith.constant 7.812500e-03 : f32
    %38 = arith.mulf %37, %cst_13 : f32
    %39 = vector.broadcast %38 : f32 to vector<1x1x1x16xf32>
    %40 = arith.mulf %39, %32 : vector<1x1x1x16xf32>
    %41 = arith.addf %30, %40 : vector<1x1x1x16xf32>
    %42 = vector.extract_strided_slice %1 {offsets = [3, 0], sizes = [1, 16], strides = [1, 1]} : vector<8x16xf32> to vector<1x16xf32>
    %43 = vector.shape_cast %42 : vector<1x16xf32> to vector<1x1x1x16xf32>
    %44 = arith.mulf %7, %43 : vector<1x1x1x16xf32>
    %45 = vector.shape_cast %44 : vector<1x1x1x16xf32> to vector<1x1x1x1x16xf32>
    %cst_14 = arith.constant dense<0.000000e+00> : vector<1xf32>
    %46 = vector.multi_reduction <add>, %45, %cst_14 [1, 2, 3, 4] : vector<1x1x1x1x16xf32> to vector<1xf32>
    %47 = vector.shape_cast %46 : vector<1xf32> to vector<1x1x1x1x1xf32>
    %48 = vector.extract %47[0, 0, 0, 0, 0] : f32 from vector<1x1x1x1x1xf32>
    %cst_15 = arith.constant 7.812500e-03 : f32
    %49 = arith.mulf %48, %cst_15 : f32
    %50 = vector.broadcast %49 : f32 to vector<1x1x1x16xf32>
    %51 = arith.mulf %50, %43 : vector<1x1x1x16xf32>
    %52 = arith.addf %41, %51 : vector<1x1x1x16xf32>
    %53 = vector.extract_strided_slice %1 {offsets = [4, 0], sizes = [1, 16], strides = [1, 1]} : vector<8x16xf32> to vector<1x16xf32>
    %54 = vector.shape_cast %53 : vector<1x16xf32> to vector<1x1x1x16xf32>
    %55 = arith.mulf %7, %54 : vector<1x1x1x16xf32>
    %56 = vector.shape_cast %55 : vector<1x1x1x16xf32> to vector<1x1x1x1x16xf32>
    %cst_16 = arith.constant dense<0.000000e+00> : vector<1xf32>
    %57 = vector.multi_reduction <add>, %56, %cst_16 [1, 2, 3, 4] : vector<1x1x1x1x16xf32> to vector<1xf32>
    %58 = vector.shape_cast %57 : vector<1xf32> to vector<1x1x1x1x1xf32>
    %59 = vector.extract %58[0, 0, 0, 0, 0] : f32 from vector<1x1x1x1x1xf32>
    %cst_17 = arith.constant 7.812500e-03 : f32
    %60 = arith.mulf %59, %cst_17 : f32
    %61 = vector.broadcast %60 : f32 to vector<1x1x1x16xf32>
    %62 = arith.mulf %61, %54 : vector<1x1x1x16xf32>
    %63 = arith.addf %52, %62 : vector<1x1x1x16xf32>
    %64 = vector.extract_strided_slice %1 {offsets = [5, 0], sizes = [1, 16], strides = [1, 1]} : vector<8x16xf32> to vector<1x16xf32>
    %65 = vector.shape_cast %64 : vector<1x16xf32> to vector<1x1x1x16xf32>
    %66 = arith.mulf %7, %65 : vector<1x1x1x16xf32>
    %67 = vector.shape_cast %66 : vector<1x1x1x16xf32> to vector<1x1x1x1x16xf32>
    %cst_18 = arith.constant dense<0.000000e+00> : vector<1xf32>
    %68 = vector.multi_reduction <add>, %67, %cst_18 [1, 2, 3, 4] : vector<1x1x1x1x16xf32> to vector<1xf32>
    %69 = vector.shape_cast %68 : vector<1xf32> to vector<1x1x1x1x1xf32>
    %70 = vector.extract %69[0, 0, 0, 0, 0] : f32 from vector<1x1x1x1x1xf32>
    %cst_19 = arith.constant 7.812500e-03 : f32
    %71 = arith.mulf %70, %cst_19 : f32
    %72 = vector.broadcast %71 : f32 to vector<1x1x1x16xf32>
    %73 = arith.mulf %72, %65 : vector<1x1x1x16xf32>
    %74 = arith.addf %63, %73 : vector<1x1x1x16xf32>
    %75 = vector.extract_strided_slice %1 {offsets = [6, 0], sizes = [1, 16], strides = [1, 1]} : vector<8x16xf32> to vector<1x16xf32>
    %76 = vector.shape_cast %75 : vector<1x16xf32> to vector<1x1x1x16xf32>
    %77 = arith.mulf %7, %76 : vector<1x1x1x16xf32>
    %78 = vector.shape_cast %77 : vector<1x1x1x16xf32> to vector<1x1x1x1x16xf32>
    %cst_20 = arith.constant dense<0.000000e+00> : vector<1xf32>
    %79 = vector.multi_reduction <add>, %78, %cst_20 [1, 2, 3, 4] : vector<1x1x1x1x16xf32> to vector<1xf32>
    %80 = vector.shape_cast %79 : vector<1xf32> to vector<1x1x1x1x1xf32>
    %81 = vector.extract %80[0, 0, 0, 0, 0] : f32 from vector<1x1x1x1x1xf32>
    %cst_21 = arith.constant 7.812500e-03 : f32
    %82 = arith.mulf %81, %cst_21 : f32
    %83 = vector.broadcast %82 : f32 to vector<1x1x1x16xf32>
    %84 = arith.mulf %83, %76 : vector<1x1x1x16xf32>
    %85 = arith.addf %74, %84 : vector<1x1x1x16xf32>
    %86 = vector.extract_strided_slice %1 {offsets = [7, 0], sizes = [1, 16], strides = [1, 1]} : vector<8x16xf32> to vector<1x16xf32>
    %87 = vector.shape_cast %86 : vector<1x16xf32> to vector<1x1x1x16xf32>
    %88 = arith.mulf %7, %87 : vector<1x1x1x16xf32>
    %89 = vector.shape_cast %88 : vector<1x1x1x16xf32> to vector<1x1x1x1x16xf32>
    %cst_22 = arith.constant dense<0.000000e+00> : vector<1xf32>
    %90 = vector.multi_reduction <add>, %89, %cst_22 [1, 2, 3, 4] : vector<1x1x1x1x16xf32> to vector<1xf32>
    %91 = vector.shape_cast %90 : vector<1xf32> to vector<1x1x1x1x1xf32>
    %92 = vector.extract %91[0, 0, 0, 0, 0] : f32 from vector<1x1x1x1x1xf32>
    %cst_23 = arith.constant 7.812500e-03 : f32
    %93 = arith.mulf %92, %cst_23 : f32
    %94 = vector.broadcast %93 : f32 to vector<1x1x1x16xf32>
    %95 = arith.mulf %94, %87 : vector<1x1x1x16xf32>
    %96 = arith.addf %85, %95 : vector<1x1x1x16xf32>
    %97 = vector.broadcast %96 : vector<1x1x1x16xf32> to vector<1x8x8x16xf32>
    %98 = arith.subf %0, %97 : vector<1x8x8x16xf32>
    %99 = arith.mulf %98, %98 : vector<1x8x8x16xf32>
    %cst_24 = arith.constant dense<0.000000e+00> : vector<8x8x16xf32>
    %100 = vector.multi_reduction <add>, %99, %cst_24 [0] : vector<1x8x8x16xf32> to vector<8x8x16xf32>
    %101 = vector.shape_cast %100 : vector<8x8x16xf32> to vector<1x8x8x16xf32>
    %cst_25 = arith.constant dense<0.000000e+00> : vector<1x8x16xf32>
    %102 = vector.multi_reduction <add>, %101, %cst_25 [1] : vector<1x8x8x16xf32> to vector<1x8x16xf32>
    %103 = vector.shape_cast %102 : vector<1x8x16xf32> to vector<1x1x8x16xf32>
    %cst_26 = arith.constant dense<0.000000e+00> : vector<1x1x16xf32>
    %104 = vector.multi_reduction <add>, %103, %cst_26 [2] : vector<1x1x8x16xf32> to vector<1x1x16xf32>
    %105 = vector.shape_cast %104 : vector<1x1x16xf32> to vector<1x1x1x16xf32>
    %cst_27 = arith.constant 0.000000e+00 : f32
    %106 = vector.broadcast %cst_27 : f32 to vector<1x1x1x16xf32>
    %107 = vector.extract_strided_slice %1 {offsets = [0, 0], sizes = [1, 16], strides = [1, 1]} : vector<8x16xf32> to vector<1x16xf32>
    %108 = vector.shape_cast %107 : vector<1x16xf32> to vector<1x1x1x16xf32>
    %109 = arith.mulf %105, %108 : vector<1x1x1x16xf32>
    %110 = vector.shape_cast %109 : vector<1x1x1x16xf32> to vector<1x1x1x1x16xf32>
    %cst_28 = arith.constant dense<0.000000e+00> : vector<1xf32>
    %111 = vector.multi_reduction <add>, %110, %cst_28 [1, 2, 3, 4] : vector<1x1x1x1x16xf32> to vector<1xf32>
    %112 = vector.shape_cast %111 : vector<1xf32> to vector<1x1x1x1x1xf32>
    %113 = vector.extract %112[0, 0, 0, 0, 0] : f32 from vector<1x1x1x1x1xf32>
    %cst_29 = arith.constant 7.812500e-03 : f32
    %114 = arith.mulf %113, %cst_29 : f32
    %115 = vector.broadcast %114 : f32 to vector<1x1x1x16xf32>
    %116 = arith.mulf %115, %108 : vector<1x1x1x16xf32>
    %117 = arith.addf %106, %116 : vector<1x1x1x16xf32>
    %118 = vector.extract_strided_slice %1 {offsets = [1, 0], sizes = [1, 16], strides = [1, 1]} : vector<8x16xf32> to vector<1x16xf32>
    %119 = vector.shape_cast %118 : vector<1x16xf32> to vector<1x1x1x16xf32>
    %120 = arith.mulf %105, %119 : vector<1x1x1x16xf32>
    %121 = vector.shape_cast %120 : vector<1x1x1x16xf32> to vector<1x1x1x1x16xf32>
    %cst_30 = arith.constant dense<0.000000e+00> : vector<1xf32>
    %122 = vector.multi_reduction <add>, %121, %cst_30 [1, 2, 3, 4] : vector<1x1x1x1x16xf32> to vector<1xf32>
    %123 = vector.shape_cast %122 : vector<1xf32> to vector<1x1x1x1x1xf32>
    %124 = vector.extract %123[0, 0, 0, 0, 0] : f32 from vector<1x1x1x1x1xf32>
    %cst_31 = arith.constant 7.812500e-03 : f32
    %125 = arith.mulf %124, %cst_31 : f32
    %126 = vector.broadcast %125 : f32 to vector<1x1x1x16xf32>
    %127 = arith.mulf %126, %119 : vector<1x1x1x16xf32>
    %128 = arith.addf %117, %127 : vector<1x1x1x16xf32>
    %129 = vector.extract_strided_slice %1 {offsets = [2, 0], sizes = [1, 16], strides = [1, 1]} : vector<8x16xf32> to vector<1x16xf32>
    %130 = vector.shape_cast %129 : vector<1x16xf32> to vector<1x1x1x16xf32>
    %131 = arith.mulf %105, %130 : vector<1x1x1x16xf32>
    %132 = vector.shape_cast %131 : vector<1x1x1x16xf32> to vector<1x1x1x1x16xf32>
    %cst_32 = arith.constant dense<0.000000e+00> : vector<1xf32>
    %133 = vector.multi_reduction <add>, %132, %cst_32 [1, 2, 3, 4] : vector<1x1x1x1x16xf32> to vector<1xf32>
    %134 = vector.shape_cast %133 : vector<1xf32> to vector<1x1x1x1x1xf32>
    %135 = vector.extract %134[0, 0, 0, 0, 0] : f32 from vector<1x1x1x1x1xf32>
    %cst_33 = arith.constant 7.812500e-03 : f32
    %136 = arith.mulf %135, %cst_33 : f32
    %137 = vector.broadcast %136 : f32 to vector<1x1x1x16xf32>
    %138 = arith.mulf %137, %130 : vector<1x1x1x16xf32>
    %139 = arith.addf %128, %138 : vector<1x1x1x16xf32>
    %140 = vector.extract_strided_slice %1 {offsets = [3, 0], sizes = [1, 16], strides = [1, 1]} : vector<8x16xf32> to vector<1x16xf32>
    %141 = vector.shape_cast %140 : vector<1x16xf32> to vector<1x1x1x16xf32>
    %142 = arith.mulf %105, %141 : vector<1x1x1x16xf32>
    %143 = vector.shape_cast %142 : vector<1x1x1x16xf32> to vector<1x1x1x1x16xf32>
    %cst_34 = arith.constant dense<0.000000e+00> : vector<1xf32>
    %144 = vector.multi_reduction <add>, %143, %cst_34 [1, 2, 3, 4] : vector<1x1x1x1x16xf32> to vector<1xf32>
    %145 = vector.shape_cast %144 : vector<1xf32> to vector<1x1x1x1x1xf32>
    %146 = vector.extract %145[0, 0, 0, 0, 0] : f32 from vector<1x1x1x1x1xf32>
    %cst_35 = arith.constant 7.812500e-03 : f32
    %147 = arith.mulf %146, %cst_35 : f32
    %148 = vector.broadcast %147 : f32 to vector<1x1x1x16xf32>
    %149 = arith.mulf %148, %141 : vector<1x1x1x16xf32>
    %150 = arith.addf %139, %149 : vector<1x1x1x16xf32>
    %151 = vector.extract_strided_slice %1 {offsets = [4, 0], sizes = [1, 16], strides = [1, 1]} : vector<8x16xf32> to vector<1x16xf32>
    %152 = vector.shape_cast %151 : vector<1x16xf32> to vector<1x1x1x16xf32>
    %153 = arith.mulf %105, %152 : vector<1x1x1x16xf32>
    %154 = vector.shape_cast %153 : vector<1x1x1x16xf32> to vector<1x1x1x1x16xf32>
    %cst_36 = arith.constant dense<0.000000e+00> : vector<1xf32>
    %155 = vector.multi_reduction <add>, %154, %cst_36 [1, 2, 3, 4] : vector<1x1x1x1x16xf32> to vector<1xf32>
    %156 = vector.shape_cast %155 : vector<1xf32> to vector<1x1x1x1x1xf32>
    %157 = vector.extract %156[0, 0, 0, 0, 0] : f32 from vector<1x1x1x1x1xf32>
    %cst_37 = arith.constant 7.812500e-03 : f32
    %158 = arith.mulf %157, %cst_37 : f32
    %159 = vector.broadcast %158 : f32 to vector<1x1x1x16xf32>
    %160 = arith.mulf %159, %152 : vector<1x1x1x16xf32>
    %161 = arith.addf %150, %160 : vector<1x1x1x16xf32>
    %162 = vector.extract_strided_slice %1 {offsets = [5, 0], sizes = [1, 16], strides = [1, 1]} : vector<8x16xf32> to vector<1x16xf32>
    %163 = vector.shape_cast %162 : vector<1x16xf32> to vector<1x1x1x16xf32>
    %164 = arith.mulf %105, %163 : vector<1x1x1x16xf32>
    %165 = vector.shape_cast %164 : vector<1x1x1x16xf32> to vector<1x1x1x1x16xf32>
    %cst_38 = arith.constant dense<0.000000e+00> : vector<1xf32>
    %166 = vector.multi_reduction <add>, %165, %cst_38 [1, 2, 3, 4] : vector<1x1x1x1x16xf32> to vector<1xf32>
    %167 = vector.shape_cast %166 : vector<1xf32> to vector<1x1x1x1x1xf32>
    %168 = vector.extract %167[0, 0, 0, 0, 0] : f32 from vector<1x1x1x1x1xf32>
    %cst_39 = arith.constant 7.812500e-03 : f32
    %169 = arith.mulf %168, %cst_39 : f32
    %170 = vector.broadcast %169 : f32 to vector<1x1x1x16xf32>
    %171 = arith.mulf %170, %163 : vector<1x1x1x16xf32>
    %172 = arith.addf %161, %171 : vector<1x1x1x16xf32>
    %173 = vector.extract_strided_slice %1 {offsets = [6, 0], sizes = [1, 16], strides = [1, 1]} : vector<8x16xf32> to vector<1x16xf32>
    %174 = vector.shape_cast %173 : vector<1x16xf32> to vector<1x1x1x16xf32>
    %175 = arith.mulf %105, %174 : vector<1x1x1x16xf32>
    %176 = vector.shape_cast %175 : vector<1x1x1x16xf32> to vector<1x1x1x1x16xf32>
    %cst_40 = arith.constant dense<0.000000e+00> : vector<1xf32>
    %177 = vector.multi_reduction <add>, %176, %cst_40 [1, 2, 3, 4] : vector<1x1x1x1x16xf32> to vector<1xf32>
    %178 = vector.shape_cast %177 : vector<1xf32> to vector<1x1x1x1x1xf32>
    %179 = vector.extract %178[0, 0, 0, 0, 0] : f32 from vector<1x1x1x1x1xf32>
    %cst_41 = arith.constant 7.812500e-03 : f32
    %180 = arith.mulf %179, %cst_41 : f32
    %181 = vector.broadcast %180 : f32 to vector<1x1x1x16xf32>
    %182 = arith.mulf %181, %174 : vector<1x1x1x16xf32>
    %183 = arith.addf %172, %182 : vector<1x1x1x16xf32>
    %184 = vector.extract_strided_slice %1 {offsets = [7, 0], sizes = [1, 16], strides = [1, 1]} : vector<8x16xf32> to vector<1x16xf32>
    %185 = vector.shape_cast %184 : vector<1x16xf32> to vector<1x1x1x16xf32>
    %186 = arith.mulf %105, %185 : vector<1x1x1x16xf32>
    %187 = vector.shape_cast %186 : vector<1x1x1x16xf32> to vector<1x1x1x1x16xf32>
    %cst_42 = arith.constant dense<0.000000e+00> : vector<1xf32>
    %188 = vector.multi_reduction <add>, %187, %cst_42 [1, 2, 3, 4] : vector<1x1x1x1x16xf32> to vector<1xf32>
    %189 = vector.shape_cast %188 : vector<1xf32> to vector<1x1x1x1x1xf32>
    %190 = vector.extract %189[0, 0, 0, 0, 0] : f32 from vector<1x1x1x1x1xf32>
    %cst_43 = arith.constant 7.812500e-03 : f32
    %191 = arith.mulf %190, %cst_43 : f32
    %192 = vector.broadcast %191 : f32 to vector<1x1x1x16xf32>
    %193 = arith.mulf %192, %185 : vector<1x1x1x16xf32>
    %194 = arith.addf %183, %193 : vector<1x1x1x16xf32>
    %cst_44 = arith.constant 9.99999974E-6 : f32
    %195 = vector.broadcast %cst_44 : f32 to vector<1x1x1x16xf32>
    %196 = arith.addf %194, %195 : vector<1x1x1x16xf32>
    %197 = math.rsqrt %196 : vector<1x1x1x16xf32>
    %198 = vector.broadcast %197 : vector<1x1x1x16xf32> to vector<1x8x8x16xf32>
    %199 = arith.mulf %98, %198 : vector<1x8x8x16xf32>
    %c0_45 = arith.constant 0 : index
    %c0_46 = arith.constant 0 : index
    %200 = vector.load %arg2[%c0_45, %c0_46] : memref<1x16xf32, #tpu.memory_space<vmem>>, vector<1x16xf32>
    %201 = vector.shape_cast %200 : vector<1x16xf32> to vector<1x1x1x16xf32>
    %202 = vector.broadcast %201 : vector<1x1x1x16xf32> to vector<1x8x8x16xf32>
    %203 = arith.mulf %199, %202 : vector<1x8x8x16xf32>
    %c0_47 = arith.constant 0 : index
    %c0_48 = arith.constant 0 : index
    %204 = vector.load %arg3[%c0_47, %c0_48] : memref<1x16xf32, #tpu.memory_space<vmem>>, vector<1x16xf32>
    %205 = vector.shape_cast %204 : vector<1x16xf32> to vector<1x1x1x16xf32>
    %206 = vector.broadcast %205 : vector<1x1x1x16xf32> to vector<1x8x8x16xf32>
    %207 = arith.addf %203, %206 : vector<1x8x8x16xf32>
    %cst_49 = arith.constant 0.000000e+00 : f32
    %208 = vector.broadcast %cst_49 : f32 to vector<1x8x8x16xf32>
    %209 = arith.maximumf %207, %208 : vector<1x8x8x16xf32>
    %c0_50 = arith.constant 0 : index
    %c0_51 = arith.constant 0 : index
    %c0_52 = arith.constant 0 : index
    %c0_53 = arith.constant 0 : index
    %210 = vector.load %arg5[%c0_50, %c0_51, %c0_52, %c0_53] : memref<1x8x8x16xf32, #tpu.memory_space<vmem>>, vector<1x8x8x16xf32>
    tpu.vector_store %arg5[%c0_50, %c0_51, %c0_52, %c0_53], %209 {strides = array<i32>} : memref<1x8x8x16xf32, #tpu.memory_space<vmem>>, vector<1x8x8x16xf32>,
    return
  }
  func.func @transform_0(%arg0: i32) -> (i32, i32, i32, i32) {
    %c0_i32 = arith.constant 0 : i32
    %c0_i32_0 = arith.constant 0 : i32
    %c0_i32_1 = arith.constant 0 : i32
    %c0_i32_2 = arith.constant 0 : i32
    return %arg0, %c0_i32, %c0_i32_0, %c0_i32_1 : i32, i32, i32, i32
  }
  func.func @transform_1(%arg0: i32) -> (i32, i32) {
    %c0_i32 = arith.constant 0 : i32
    %c0_i32_0 = arith.constant 0 : i32
    %c0_i32_1 = arith.constant 0 : i32
    return %c0_i32, %c0_i32_0 : i32, i32
  }
  func.func @transform_2(%arg0: i32) -> (i32, i32) {
    %c0_i32 = arith.constant 0 : i32
    %c0_i32_0 = arith.constant 0 : i32
    %c0_i32_1 = arith.constant 0 : i32
    return %c0_i32, %c0_i32_0 : i32, i32
  }
  func.func @transform_3(%arg0: i32) -> (i32, i32) {
    %c0_i32 = arith.constant 0 : i32
    %c0_i32_0 = arith.constant 0 : i32
    %c0_i32_1 = arith.constant 0 : i32
    return %c0_i32, %c0_i32_0 : i32, i32
  }
  func.func @transform_4(%arg0: i32) -> (i32, i32, i32, i32) {
    %c0_i32 = arith.constant 0 : i32
    %c0_i32_0 = arith.constant 0 : i32
    %c0_i32_1 = arith.constant 0 : i32
    %c0_i32_2 = arith.constant 0 : i32
    return %arg0, %c0_i32, %c0_i32_0, %c0_i32_1 : i32, i32, i32, i32
  }
}

module attributes {stable_mosaic.version = 11 : i64} {
  func.func @_shift_matmul_kernel(%arg0: i32, %arg1: memref<96x64xf32, #tpu.memory_space<vmem>>, %arg2: memref<9x64x16xbf16, #tpu.memory_space<vmem>>, %arg3: memref<1x16xf32, #tpu.memory_space<vmem>>, %arg4: memref<40x16xf32, #tpu.memory_space<vmem>>) attributes {dimension_semantics = [#tpu.dimension_semantics<parallel>], iteration_bounds = array<i64: 2>, scalar_prefetch = 0 : i64, scratch_operands = 0 : i64, tpu.core_type = #tpu.core_type<tc>, window_params = [{pipeline_mode = #tpu.pipeline_mode<synchronous>, transform_indices = @transform_0, window_bounds = array<i64: 96, 64>}, {pipeline_mode = #tpu.pipeline_mode<synchronous>, transform_indices = @transform_1, window_bounds = array<i64: 9, 64, 16>}, {pipeline_mode = #tpu.pipeline_mode<synchronous>, transform_indices = @transform_2, window_bounds = array<i64: 1, 16>}, {transform_indices = @transform_3, window_bounds = array<i64: 40, 16>}]} {
    %c40_i32 = arith.constant 40 : i32
    %0 = arith.muli %arg0, %c40_i32 : i32
    %cst = arith.constant 0.000000e+00 : f32
    %1 = vector.broadcast %cst : f32 to vector<40x16xf32>
    %c0_i32 = arith.constant 0 : i32
    %2 = arith.addi %0, %c0_i32 : i32
    %3 = arith.index_cast %2 : i32 to index
    %c0 = arith.constant 0 : index
    %4 = vector.load %arg1[%3, %c0] : memref<96x64xf32, #tpu.memory_space<vmem>>, vector<40x64xf32>
    %5 = arith.truncf %4 : vector<40x64xf32> to vector<40x64xbf16>
    %c0_0 = arith.constant 0 : index
    %c0_1 = arith.constant 0 : index
    %c0_2 = arith.constant 0 : index
    %6 = vector.load %arg2[%c0_0, %c0_1, %c0_2] : memref<9x64x16xbf16, #tpu.memory_space<vmem>>, vector<1x64x16xbf16>
    %7 = vector.shape_cast %6 : vector<1x64x16xbf16> to vector<64x16xbf16>
    %cst_3 = arith.constant dense<0.000000e+00> : vector<40x16xf32>
    %8 = tpu.matmul %5, %7, %cst_3 {dimension_numbers = #tpu.dot_dimension_numbers<[1], [0], [0], [1], [0, 0, 1, 1], [], []>} : vector<40x64xbf16>, vector<64x16xbf16>, vector<40x16xf32> -> vector<40x16xf32>
    %9 = arith.addf %1, %8 : vector<40x16xf32>
    %c1_i32 = arith.constant 1 : i32
    %10 = arith.addi %0, %c1_i32 : i32
    %11 = arith.index_cast %10 : i32 to index
    %c0_4 = arith.constant 0 : index
    %12 = vector.load %arg1[%11, %c0_4] : memref<96x64xf32, #tpu.memory_space<vmem>>, vector<40x64xf32>
    %13 = arith.truncf %12 : vector<40x64xf32> to vector<40x64xbf16>
    %c1 = arith.constant 1 : index
    %c0_5 = arith.constant 0 : index
    %c0_6 = arith.constant 0 : index
    %14 = vector.load %arg2[%c1, %c0_5, %c0_6] : memref<9x64x16xbf16, #tpu.memory_space<vmem>>, vector<1x64x16xbf16>
    %15 = vector.shape_cast %14 : vector<1x64x16xbf16> to vector<64x16xbf16>
    %cst_7 = arith.constant dense<0.000000e+00> : vector<40x16xf32>
    %16 = tpu.matmul %13, %15, %cst_7 {dimension_numbers = #tpu.dot_dimension_numbers<[1], [0], [0], [1], [0, 0, 1, 1], [], []>} : vector<40x64xbf16>, vector<64x16xbf16>, vector<40x16xf32> -> vector<40x16xf32>
    %17 = arith.addf %9, %16 : vector<40x16xf32>
    %c2_i32 = arith.constant 2 : i32
    %18 = arith.addi %0, %c2_i32 : i32
    %19 = arith.index_cast %18 : i32 to index
    %c0_8 = arith.constant 0 : index
    %20 = vector.load %arg1[%19, %c0_8] : memref<96x64xf32, #tpu.memory_space<vmem>>, vector<40x64xf32>
    %21 = arith.truncf %20 : vector<40x64xf32> to vector<40x64xbf16>
    %c2 = arith.constant 2 : index
    %c0_9 = arith.constant 0 : index
    %c0_10 = arith.constant 0 : index
    %22 = vector.load %arg2[%c2, %c0_9, %c0_10] : memref<9x64x16xbf16, #tpu.memory_space<vmem>>, vector<1x64x16xbf16>
    %23 = vector.shape_cast %22 : vector<1x64x16xbf16> to vector<64x16xbf16>
    %cst_11 = arith.constant dense<0.000000e+00> : vector<40x16xf32>
    %24 = tpu.matmul %21, %23, %cst_11 {dimension_numbers = #tpu.dot_dimension_numbers<[1], [0], [0], [1], [0, 0, 1, 1], [], []>} : vector<40x64xbf16>, vector<64x16xbf16>, vector<40x16xf32> -> vector<40x16xf32>
    %25 = arith.addf %17, %24 : vector<40x16xf32>
    %c6_i32 = arith.constant 6 : i32
    %26 = arith.addi %0, %c6_i32 : i32
    %27 = arith.index_cast %26 : i32 to index
    %c0_12 = arith.constant 0 : index
    %28 = vector.load %arg1[%27, %c0_12] : memref<96x64xf32, #tpu.memory_space<vmem>>, vector<40x64xf32>
    %29 = arith.truncf %28 : vector<40x64xf32> to vector<40x64xbf16>
    %c3 = arith.constant 3 : index
    %c0_13 = arith.constant 0 : index
    %c0_14 = arith.constant 0 : index
    %30 = vector.load %arg2[%c3, %c0_13, %c0_14] : memref<9x64x16xbf16, #tpu.memory_space<vmem>>, vector<1x64x16xbf16>
    %31 = vector.shape_cast %30 : vector<1x64x16xbf16> to vector<64x16xbf16>
    %cst_15 = arith.constant dense<0.000000e+00> : vector<40x16xf32>
    %32 = tpu.matmul %29, %31, %cst_15 {dimension_numbers = #tpu.dot_dimension_numbers<[1], [0], [0], [1], [0, 0, 1, 1], [], []>} : vector<40x64xbf16>, vector<64x16xbf16>, vector<40x16xf32> -> vector<40x16xf32>
    %33 = arith.addf %25, %32 : vector<40x16xf32>
    %c7_i32 = arith.constant 7 : i32
    %34 = arith.addi %0, %c7_i32 : i32
    %35 = arith.index_cast %34 : i32 to index
    %c0_16 = arith.constant 0 : index
    %36 = vector.load %arg1[%35, %c0_16] : memref<96x64xf32, #tpu.memory_space<vmem>>, vector<40x64xf32>
    %37 = arith.truncf %36 : vector<40x64xf32> to vector<40x64xbf16>
    %c4 = arith.constant 4 : index
    %c0_17 = arith.constant 0 : index
    %c0_18 = arith.constant 0 : index
    %38 = vector.load %arg2[%c4, %c0_17, %c0_18] : memref<9x64x16xbf16, #tpu.memory_space<vmem>>, vector<1x64x16xbf16>
    %39 = vector.shape_cast %38 : vector<1x64x16xbf16> to vector<64x16xbf16>
    %cst_19 = arith.constant dense<0.000000e+00> : vector<40x16xf32>
    %40 = tpu.matmul %37, %39, %cst_19 {dimension_numbers = #tpu.dot_dimension_numbers<[1], [0], [0], [1], [0, 0, 1, 1], [], []>} : vector<40x64xbf16>, vector<64x16xbf16>, vector<40x16xf32> -> vector<40x16xf32>
    %41 = arith.addf %33, %40 : vector<40x16xf32>
    %c8_i32 = arith.constant 8 : i32
    %42 = arith.addi %0, %c8_i32 : i32
    %43 = arith.index_cast %42 : i32 to index
    %c0_20 = arith.constant 0 : index
    %44 = vector.load %arg1[%43, %c0_20] : memref<96x64xf32, #tpu.memory_space<vmem>>, vector<40x64xf32>
    %45 = arith.truncf %44 : vector<40x64xf32> to vector<40x64xbf16>
    %c5 = arith.constant 5 : index
    %c0_21 = arith.constant 0 : index
    %c0_22 = arith.constant 0 : index
    %46 = vector.load %arg2[%c5, %c0_21, %c0_22] : memref<9x64x16xbf16, #tpu.memory_space<vmem>>, vector<1x64x16xbf16>
    %47 = vector.shape_cast %46 : vector<1x64x16xbf16> to vector<64x16xbf16>
    %cst_23 = arith.constant dense<0.000000e+00> : vector<40x16xf32>
    %48 = tpu.matmul %45, %47, %cst_23 {dimension_numbers = #tpu.dot_dimension_numbers<[1], [0], [0], [1], [0, 0, 1, 1], [], []>} : vector<40x64xbf16>, vector<64x16xbf16>, vector<40x16xf32> -> vector<40x16xf32>
    %49 = arith.addf %41, %48 : vector<40x16xf32>
    %c12_i32 = arith.constant 12 : i32
    %50 = arith.addi %0, %c12_i32 : i32
    %51 = arith.index_cast %50 : i32 to index
    %c0_24 = arith.constant 0 : index
    %52 = vector.load %arg1[%51, %c0_24] : memref<96x64xf32, #tpu.memory_space<vmem>>, vector<40x64xf32>
    %53 = arith.truncf %52 : vector<40x64xf32> to vector<40x64xbf16>
    %c6 = arith.constant 6 : index
    %c0_25 = arith.constant 0 : index
    %c0_26 = arith.constant 0 : index
    %54 = vector.load %arg2[%c6, %c0_25, %c0_26] : memref<9x64x16xbf16, #tpu.memory_space<vmem>>, vector<1x64x16xbf16>
    %55 = vector.shape_cast %54 : vector<1x64x16xbf16> to vector<64x16xbf16>
    %cst_27 = arith.constant dense<0.000000e+00> : vector<40x16xf32>
    %56 = tpu.matmul %53, %55, %cst_27 {dimension_numbers = #tpu.dot_dimension_numbers<[1], [0], [0], [1], [0, 0, 1, 1], [], []>} : vector<40x64xbf16>, vector<64x16xbf16>, vector<40x16xf32> -> vector<40x16xf32>
    %57 = arith.addf %49, %56 : vector<40x16xf32>
    %c13_i32 = arith.constant 13 : i32
    %58 = arith.addi %0, %c13_i32 : i32
    %59 = arith.index_cast %58 : i32 to index
    %c0_28 = arith.constant 0 : index
    %60 = vector.load %arg1[%59, %c0_28] : memref<96x64xf32, #tpu.memory_space<vmem>>, vector<40x64xf32>
    %61 = arith.truncf %60 : vector<40x64xf32> to vector<40x64xbf16>
    %c7 = arith.constant 7 : index
    %c0_29 = arith.constant 0 : index
    %c0_30 = arith.constant 0 : index
    %62 = vector.load %arg2[%c7, %c0_29, %c0_30] : memref<9x64x16xbf16, #tpu.memory_space<vmem>>, vector<1x64x16xbf16>
    %63 = vector.shape_cast %62 : vector<1x64x16xbf16> to vector<64x16xbf16>
    %cst_31 = arith.constant dense<0.000000e+00> : vector<40x16xf32>
    %64 = tpu.matmul %61, %63, %cst_31 {dimension_numbers = #tpu.dot_dimension_numbers<[1], [0], [0], [1], [0, 0, 1, 1], [], []>} : vector<40x64xbf16>, vector<64x16xbf16>, vector<40x16xf32> -> vector<40x16xf32>
    %65 = arith.addf %57, %64 : vector<40x16xf32>
    %c14_i32 = arith.constant 14 : i32
    %66 = arith.addi %0, %c14_i32 : i32
    %67 = arith.index_cast %66 : i32 to index
    %c0_32 = arith.constant 0 : index
    %68 = vector.load %arg1[%67, %c0_32] : memref<96x64xf32, #tpu.memory_space<vmem>>, vector<40x64xf32>
    %69 = arith.truncf %68 : vector<40x64xf32> to vector<40x64xbf16>
    %c8 = arith.constant 8 : index
    %c0_33 = arith.constant 0 : index
    %c0_34 = arith.constant 0 : index
    %70 = vector.load %arg2[%c8, %c0_33, %c0_34] : memref<9x64x16xbf16, #tpu.memory_space<vmem>>, vector<1x64x16xbf16>
    %71 = vector.shape_cast %70 : vector<1x64x16xbf16> to vector<64x16xbf16>
    %cst_35 = arith.constant dense<0.000000e+00> : vector<40x16xf32>
    %72 = tpu.matmul %69, %71, %cst_35 {dimension_numbers = #tpu.dot_dimension_numbers<[1], [0], [0], [1], [0, 0, 1, 1], [], []>} : vector<40x64xbf16>, vector<64x16xbf16>, vector<40x16xf32> -> vector<40x16xf32>
    %73 = arith.addf %65, %72 : vector<40x16xf32>
    %c0_36 = arith.constant 0 : index
    %c0_37 = arith.constant 0 : index
    %74 = vector.load %arg3[%c0_36, %c0_37] : memref<1x16xf32, #tpu.memory_space<vmem>>, vector<1x16xf32>
    %75 = vector.broadcast %74 : vector<1x16xf32> to vector<40x16xf32>
    %76 = arith.addf %73, %75 : vector<40x16xf32>
    %c0_38 = arith.constant 0 : index
    %c0_39 = arith.constant 0 : index
    %77 = vector.load %arg4[%c0_38, %c0_39] : memref<40x16xf32, #tpu.memory_space<vmem>>, vector<40x16xf32>
    tpu.vector_store %arg4[%c0_38, %c0_39], %76 {strides = array<i32>} : memref<40x16xf32, #tpu.memory_space<vmem>>, vector<40x16xf32>,
    return
  }
  func.func @transform_0(%arg0: i32) -> (i32, i32) {
    %c0_i32 = arith.constant 0 : i32
    %c0_i32_0 = arith.constant 0 : i32
    %c0_i32_1 = arith.constant 0 : i32
    return %c0_i32, %c0_i32_0 : i32, i32
  }
  func.func @transform_1(%arg0: i32) -> (i32, i32, i32) {
    %c0_i32 = arith.constant 0 : i32
    %c0_i32_0 = arith.constant 0 : i32
    %c0_i32_1 = arith.constant 0 : i32
    %c0_i32_2 = arith.constant 0 : i32
    return %c0_i32, %c0_i32_0, %c0_i32_1 : i32, i32, i32
  }
  func.func @transform_2(%arg0: i32) -> (i32, i32) {
    %c0_i32 = arith.constant 0 : i32
    %c0_i32_0 = arith.constant 0 : i32
    %c0_i32_1 = arith.constant 0 : i32
    return %c0_i32, %c0_i32_0 : i32, i32
  }
  func.func @transform_3(%arg0: i32) -> (i32, i32) {
    %c0_i32 = arith.constant 0 : i32
    %c0_i32_0 = arith.constant 0 : i32
    return %arg0, %c0_i32 : i32, i32
  }
}

module attributes {stable_mosaic.version = 11 : i64} {
  func.func @_gn_kernel(%arg0: i32, %arg1: memref<1x4x4x16xf32, #tpu.memory_space<vmem>>, %arg2: memref<1x16xf32, #tpu.memory_space<vmem>>, %arg3: memref<1x16xf32, #tpu.memory_space<vmem>>, %arg4: memref<8x16xf32, #tpu.memory_space<vmem>>, %arg5: memref<1x4x4x16xf32, #tpu.memory_space<vmem>>) attributes {dimension_semantics = [#tpu.dimension_semantics<parallel>], iteration_bounds = array<i64: 2>, scalar_prefetch = 0 : i64, scratch_operands = 0 : i64, tpu.core_type = #tpu.core_type<tc>, window_params = [{transform_indices = @transform_0, window_bounds = array<i64: 1, 4, 4, 16>}, {pipeline_mode = #tpu.pipeline_mode<synchronous>, transform_indices = @transform_1, window_bounds = array<i64: 1, 16>}, {pipeline_mode = #tpu.pipeline_mode<synchronous>, transform_indices = @transform_2, window_bounds = array<i64: 1, 16>}, {pipeline_mode = #tpu.pipeline_mode<synchronous>, transform_indices = @transform_3, window_bounds = array<i64: 8, 16>}, {transform_indices = @transform_4, window_bounds = array<i64: 1, 4, 4, 16>}]} {
    %c0 = arith.constant 0 : index
    %c0_0 = arith.constant 0 : index
    %c0_1 = arith.constant 0 : index
    %c0_2 = arith.constant 0 : index
    %0 = vector.load %arg1[%c0, %c0_0, %c0_1, %c0_2] : memref<1x4x4x16xf32, #tpu.memory_space<vmem>>, vector<1x4x4x16xf32>
    %c0_3 = arith.constant 0 : index
    %c0_4 = arith.constant 0 : index
    %1 = vector.load %arg4[%c0_3, %c0_4] : memref<8x16xf32, #tpu.memory_space<vmem>>, vector<8x16xf32>
    %cst = arith.constant dense<0.000000e+00> : vector<4x4x16xf32>
    %2 = vector.multi_reduction <add>, %0, %cst [0] : vector<1x4x4x16xf32> to vector<4x4x16xf32>
    %3 = vector.shape_cast %2 : vector<4x4x16xf32> to vector<1x4x4x16xf32>
    %cst_5 = arith.constant dense<0.000000e+00> : vector<1x4x16xf32>
    %4 = vector.multi_reduction <add>, %3, %cst_5 [1] : vector<1x4x4x16xf32> to vector<1x4x16xf32>
    %5 = vector.shape_cast %4 : vector<1x4x16xf32> to vector<1x1x4x16xf32>
    %cst_6 = arith.constant dense<0.000000e+00> : vector<1x1x16xf32>
    %6 = vector.multi_reduction <add>, %5, %cst_6 [2] : vector<1x1x4x16xf32> to vector<1x1x16xf32>
    %7 = vector.shape_cast %6 : vector<1x1x16xf32> to vector<1x1x1x16xf32>
    %cst_7 = arith.constant 0.000000e+00 : f32
    %8 = vector.broadcast %cst_7 : f32 to vector<1x1x1x16xf32>
    %9 = vector.extract_strided_slice %1 {offsets = [0, 0], sizes = [1, 16], strides = [1, 1]} : vector<8x16xf32> to vector<1x16xf32>
    %10 = vector.shape_cast %9 : vector<1x16xf32> to vector<1x1x1x16xf32>
    %11 = arith.mulf %7, %10 : vector<1x1x1x16xf32>
    %12 = vector.shape_cast %11 : vector<1x1x1x16xf32> to vector<1x1x1x1x16xf32>
    %cst_8 = arith.constant dense<0.000000e+00> : vector<1xf32>
    %13 = vector.multi_reduction <add>, %12, %cst_8 [1, 2, 3, 4] : vector<1x1x1x1x16xf32> to vector<1xf32>
    %14 = vector.shape_cast %13 : vector<1xf32> to vector<1x1x1x1x1xf32>
    %15 = vector.extract %14[0, 0, 0, 0, 0] : f32 from vector<1x1x1x1x1xf32>
    %cst_9 = arith.constant 3.125000e-02 : f32
    %16 = arith.mulf %15, %cst_9 : f32
    %17 = vector.broadcast %16 : f32 to vector<1x1x1x16xf32>
    %18 = arith.mulf %17, %10 : vector<1x1x1x16xf32>
    %19 = arith.addf %8, %18 : vector<1x1x1x16xf32>
    %20 = vector.extract_strided_slice %1 {offsets = [1, 0], sizes = [1, 16], strides = [1, 1]} : vector<8x16xf32> to vector<1x16xf32>
    %21 = vector.shape_cast %20 : vector<1x16xf32> to vector<1x1x1x16xf32>
    %22 = arith.mulf %7, %21 : vector<1x1x1x16xf32>
    %23 = vector.shape_cast %22 : vector<1x1x1x16xf32> to vector<1x1x1x1x16xf32>
    %cst_10 = arith.constant dense<0.000000e+00> : vector<1xf32>
    %24 = vector.multi_reduction <add>, %23, %cst_10 [1, 2, 3, 4] : vector<1x1x1x1x16xf32> to vector<1xf32>
    %25 = vector.shape_cast %24 : vector<1xf32> to vector<1x1x1x1x1xf32>
    %26 = vector.extract %25[0, 0, 0, 0, 0] : f32 from vector<1x1x1x1x1xf32>
    %cst_11 = arith.constant 3.125000e-02 : f32
    %27 = arith.mulf %26, %cst_11 : f32
    %28 = vector.broadcast %27 : f32 to vector<1x1x1x16xf32>
    %29 = arith.mulf %28, %21 : vector<1x1x1x16xf32>
    %30 = arith.addf %19, %29 : vector<1x1x1x16xf32>
    %31 = vector.extract_strided_slice %1 {offsets = [2, 0], sizes = [1, 16], strides = [1, 1]} : vector<8x16xf32> to vector<1x16xf32>
    %32 = vector.shape_cast %31 : vector<1x16xf32> to vector<1x1x1x16xf32>
    %33 = arith.mulf %7, %32 : vector<1x1x1x16xf32>
    %34 = vector.shape_cast %33 : vector<1x1x1x16xf32> to vector<1x1x1x1x16xf32>
    %cst_12 = arith.constant dense<0.000000e+00> : vector<1xf32>
    %35 = vector.multi_reduction <add>, %34, %cst_12 [1, 2, 3, 4] : vector<1x1x1x1x16xf32> to vector<1xf32>
    %36 = vector.shape_cast %35 : vector<1xf32> to vector<1x1x1x1x1xf32>
    %37 = vector.extract %36[0, 0, 0, 0, 0] : f32 from vector<1x1x1x1x1xf32>
    %cst_13 = arith.constant 3.125000e-02 : f32
    %38 = arith.mulf %37, %cst_13 : f32
    %39 = vector.broadcast %38 : f32 to vector<1x1x1x16xf32>
    %40 = arith.mulf %39, %32 : vector<1x1x1x16xf32>
    %41 = arith.addf %30, %40 : vector<1x1x1x16xf32>
    %42 = vector.extract_strided_slice %1 {offsets = [3, 0], sizes = [1, 16], strides = [1, 1]} : vector<8x16xf32> to vector<1x16xf32>
    %43 = vector.shape_cast %42 : vector<1x16xf32> to vector<1x1x1x16xf32>
    %44 = arith.mulf %7, %43 : vector<1x1x1x16xf32>
    %45 = vector.shape_cast %44 : vector<1x1x1x16xf32> to vector<1x1x1x1x16xf32>
    %cst_14 = arith.constant dense<0.000000e+00> : vector<1xf32>
    %46 = vector.multi_reduction <add>, %45, %cst_14 [1, 2, 3, 4] : vector<1x1x1x1x16xf32> to vector<1xf32>
    %47 = vector.shape_cast %46 : vector<1xf32> to vector<1x1x1x1x1xf32>
    %48 = vector.extract %47[0, 0, 0, 0, 0] : f32 from vector<1x1x1x1x1xf32>
    %cst_15 = arith.constant 3.125000e-02 : f32
    %49 = arith.mulf %48, %cst_15 : f32
    %50 = vector.broadcast %49 : f32 to vector<1x1x1x16xf32>
    %51 = arith.mulf %50, %43 : vector<1x1x1x16xf32>
    %52 = arith.addf %41, %51 : vector<1x1x1x16xf32>
    %53 = vector.extract_strided_slice %1 {offsets = [4, 0], sizes = [1, 16], strides = [1, 1]} : vector<8x16xf32> to vector<1x16xf32>
    %54 = vector.shape_cast %53 : vector<1x16xf32> to vector<1x1x1x16xf32>
    %55 = arith.mulf %7, %54 : vector<1x1x1x16xf32>
    %56 = vector.shape_cast %55 : vector<1x1x1x16xf32> to vector<1x1x1x1x16xf32>
    %cst_16 = arith.constant dense<0.000000e+00> : vector<1xf32>
    %57 = vector.multi_reduction <add>, %56, %cst_16 [1, 2, 3, 4] : vector<1x1x1x1x16xf32> to vector<1xf32>
    %58 = vector.shape_cast %57 : vector<1xf32> to vector<1x1x1x1x1xf32>
    %59 = vector.extract %58[0, 0, 0, 0, 0] : f32 from vector<1x1x1x1x1xf32>
    %cst_17 = arith.constant 3.125000e-02 : f32
    %60 = arith.mulf %59, %cst_17 : f32
    %61 = vector.broadcast %60 : f32 to vector<1x1x1x16xf32>
    %62 = arith.mulf %61, %54 : vector<1x1x1x16xf32>
    %63 = arith.addf %52, %62 : vector<1x1x1x16xf32>
    %64 = vector.extract_strided_slice %1 {offsets = [5, 0], sizes = [1, 16], strides = [1, 1]} : vector<8x16xf32> to vector<1x16xf32>
    %65 = vector.shape_cast %64 : vector<1x16xf32> to vector<1x1x1x16xf32>
    %66 = arith.mulf %7, %65 : vector<1x1x1x16xf32>
    %67 = vector.shape_cast %66 : vector<1x1x1x16xf32> to vector<1x1x1x1x16xf32>
    %cst_18 = arith.constant dense<0.000000e+00> : vector<1xf32>
    %68 = vector.multi_reduction <add>, %67, %cst_18 [1, 2, 3, 4] : vector<1x1x1x1x16xf32> to vector<1xf32>
    %69 = vector.shape_cast %68 : vector<1xf32> to vector<1x1x1x1x1xf32>
    %70 = vector.extract %69[0, 0, 0, 0, 0] : f32 from vector<1x1x1x1x1xf32>
    %cst_19 = arith.constant 3.125000e-02 : f32
    %71 = arith.mulf %70, %cst_19 : f32
    %72 = vector.broadcast %71 : f32 to vector<1x1x1x16xf32>
    %73 = arith.mulf %72, %65 : vector<1x1x1x16xf32>
    %74 = arith.addf %63, %73 : vector<1x1x1x16xf32>
    %75 = vector.extract_strided_slice %1 {offsets = [6, 0], sizes = [1, 16], strides = [1, 1]} : vector<8x16xf32> to vector<1x16xf32>
    %76 = vector.shape_cast %75 : vector<1x16xf32> to vector<1x1x1x16xf32>
    %77 = arith.mulf %7, %76 : vector<1x1x1x16xf32>
    %78 = vector.shape_cast %77 : vector<1x1x1x16xf32> to vector<1x1x1x1x16xf32>
    %cst_20 = arith.constant dense<0.000000e+00> : vector<1xf32>
    %79 = vector.multi_reduction <add>, %78, %cst_20 [1, 2, 3, 4] : vector<1x1x1x1x16xf32> to vector<1xf32>
    %80 = vector.shape_cast %79 : vector<1xf32> to vector<1x1x1x1x1xf32>
    %81 = vector.extract %80[0, 0, 0, 0, 0] : f32 from vector<1x1x1x1x1xf32>
    %cst_21 = arith.constant 3.125000e-02 : f32
    %82 = arith.mulf %81, %cst_21 : f32
    %83 = vector.broadcast %82 : f32 to vector<1x1x1x16xf32>
    %84 = arith.mulf %83, %76 : vector<1x1x1x16xf32>
    %85 = arith.addf %74, %84 : vector<1x1x1x16xf32>
    %86 = vector.extract_strided_slice %1 {offsets = [7, 0], sizes = [1, 16], strides = [1, 1]} : vector<8x16xf32> to vector<1x16xf32>
    %87 = vector.shape_cast %86 : vector<1x16xf32> to vector<1x1x1x16xf32>
    %88 = arith.mulf %7, %87 : vector<1x1x1x16xf32>
    %89 = vector.shape_cast %88 : vector<1x1x1x16xf32> to vector<1x1x1x1x16xf32>
    %cst_22 = arith.constant dense<0.000000e+00> : vector<1xf32>
    %90 = vector.multi_reduction <add>, %89, %cst_22 [1, 2, 3, 4] : vector<1x1x1x1x16xf32> to vector<1xf32>
    %91 = vector.shape_cast %90 : vector<1xf32> to vector<1x1x1x1x1xf32>
    %92 = vector.extract %91[0, 0, 0, 0, 0] : f32 from vector<1x1x1x1x1xf32>
    %cst_23 = arith.constant 3.125000e-02 : f32
    %93 = arith.mulf %92, %cst_23 : f32
    %94 = vector.broadcast %93 : f32 to vector<1x1x1x16xf32>
    %95 = arith.mulf %94, %87 : vector<1x1x1x16xf32>
    %96 = arith.addf %85, %95 : vector<1x1x1x16xf32>
    %97 = vector.broadcast %96 : vector<1x1x1x16xf32> to vector<1x4x4x16xf32>
    %98 = arith.subf %0, %97 : vector<1x4x4x16xf32>
    %99 = arith.mulf %98, %98 : vector<1x4x4x16xf32>
    %cst_24 = arith.constant dense<0.000000e+00> : vector<4x4x16xf32>
    %100 = vector.multi_reduction <add>, %99, %cst_24 [0] : vector<1x4x4x16xf32> to vector<4x4x16xf32>
    %101 = vector.shape_cast %100 : vector<4x4x16xf32> to vector<1x4x4x16xf32>
    %cst_25 = arith.constant dense<0.000000e+00> : vector<1x4x16xf32>
    %102 = vector.multi_reduction <add>, %101, %cst_25 [1] : vector<1x4x4x16xf32> to vector<1x4x16xf32>
    %103 = vector.shape_cast %102 : vector<1x4x16xf32> to vector<1x1x4x16xf32>
    %cst_26 = arith.constant dense<0.000000e+00> : vector<1x1x16xf32>
    %104 = vector.multi_reduction <add>, %103, %cst_26 [2] : vector<1x1x4x16xf32> to vector<1x1x16xf32>
    %105 = vector.shape_cast %104 : vector<1x1x16xf32> to vector<1x1x1x16xf32>
    %cst_27 = arith.constant 0.000000e+00 : f32
    %106 = vector.broadcast %cst_27 : f32 to vector<1x1x1x16xf32>
    %107 = vector.extract_strided_slice %1 {offsets = [0, 0], sizes = [1, 16], strides = [1, 1]} : vector<8x16xf32> to vector<1x16xf32>
    %108 = vector.shape_cast %107 : vector<1x16xf32> to vector<1x1x1x16xf32>
    %109 = arith.mulf %105, %108 : vector<1x1x1x16xf32>
    %110 = vector.shape_cast %109 : vector<1x1x1x16xf32> to vector<1x1x1x1x16xf32>
    %cst_28 = arith.constant dense<0.000000e+00> : vector<1xf32>
    %111 = vector.multi_reduction <add>, %110, %cst_28 [1, 2, 3, 4] : vector<1x1x1x1x16xf32> to vector<1xf32>
    %112 = vector.shape_cast %111 : vector<1xf32> to vector<1x1x1x1x1xf32>
    %113 = vector.extract %112[0, 0, 0, 0, 0] : f32 from vector<1x1x1x1x1xf32>
    %cst_29 = arith.constant 3.125000e-02 : f32
    %114 = arith.mulf %113, %cst_29 : f32
    %115 = vector.broadcast %114 : f32 to vector<1x1x1x16xf32>
    %116 = arith.mulf %115, %108 : vector<1x1x1x16xf32>
    %117 = arith.addf %106, %116 : vector<1x1x1x16xf32>
    %118 = vector.extract_strided_slice %1 {offsets = [1, 0], sizes = [1, 16], strides = [1, 1]} : vector<8x16xf32> to vector<1x16xf32>
    %119 = vector.shape_cast %118 : vector<1x16xf32> to vector<1x1x1x16xf32>
    %120 = arith.mulf %105, %119 : vector<1x1x1x16xf32>
    %121 = vector.shape_cast %120 : vector<1x1x1x16xf32> to vector<1x1x1x1x16xf32>
    %cst_30 = arith.constant dense<0.000000e+00> : vector<1xf32>
    %122 = vector.multi_reduction <add>, %121, %cst_30 [1, 2, 3, 4] : vector<1x1x1x1x16xf32> to vector<1xf32>
    %123 = vector.shape_cast %122 : vector<1xf32> to vector<1x1x1x1x1xf32>
    %124 = vector.extract %123[0, 0, 0, 0, 0] : f32 from vector<1x1x1x1x1xf32>
    %cst_31 = arith.constant 3.125000e-02 : f32
    %125 = arith.mulf %124, %cst_31 : f32
    %126 = vector.broadcast %125 : f32 to vector<1x1x1x16xf32>
    %127 = arith.mulf %126, %119 : vector<1x1x1x16xf32>
    %128 = arith.addf %117, %127 : vector<1x1x1x16xf32>
    %129 = vector.extract_strided_slice %1 {offsets = [2, 0], sizes = [1, 16], strides = [1, 1]} : vector<8x16xf32> to vector<1x16xf32>
    %130 = vector.shape_cast %129 : vector<1x16xf32> to vector<1x1x1x16xf32>
    %131 = arith.mulf %105, %130 : vector<1x1x1x16xf32>
    %132 = vector.shape_cast %131 : vector<1x1x1x16xf32> to vector<1x1x1x1x16xf32>
    %cst_32 = arith.constant dense<0.000000e+00> : vector<1xf32>
    %133 = vector.multi_reduction <add>, %132, %cst_32 [1, 2, 3, 4] : vector<1x1x1x1x16xf32> to vector<1xf32>
    %134 = vector.shape_cast %133 : vector<1xf32> to vector<1x1x1x1x1xf32>
    %135 = vector.extract %134[0, 0, 0, 0, 0] : f32 from vector<1x1x1x1x1xf32>
    %cst_33 = arith.constant 3.125000e-02 : f32
    %136 = arith.mulf %135, %cst_33 : f32
    %137 = vector.broadcast %136 : f32 to vector<1x1x1x16xf32>
    %138 = arith.mulf %137, %130 : vector<1x1x1x16xf32>
    %139 = arith.addf %128, %138 : vector<1x1x1x16xf32>
    %140 = vector.extract_strided_slice %1 {offsets = [3, 0], sizes = [1, 16], strides = [1, 1]} : vector<8x16xf32> to vector<1x16xf32>
    %141 = vector.shape_cast %140 : vector<1x16xf32> to vector<1x1x1x16xf32>
    %142 = arith.mulf %105, %141 : vector<1x1x1x16xf32>
    %143 = vector.shape_cast %142 : vector<1x1x1x16xf32> to vector<1x1x1x1x16xf32>
    %cst_34 = arith.constant dense<0.000000e+00> : vector<1xf32>
    %144 = vector.multi_reduction <add>, %143, %cst_34 [1, 2, 3, 4] : vector<1x1x1x1x16xf32> to vector<1xf32>
    %145 = vector.shape_cast %144 : vector<1xf32> to vector<1x1x1x1x1xf32>
    %146 = vector.extract %145[0, 0, 0, 0, 0] : f32 from vector<1x1x1x1x1xf32>
    %cst_35 = arith.constant 3.125000e-02 : f32
    %147 = arith.mulf %146, %cst_35 : f32
    %148 = vector.broadcast %147 : f32 to vector<1x1x1x16xf32>
    %149 = arith.mulf %148, %141 : vector<1x1x1x16xf32>
    %150 = arith.addf %139, %149 : vector<1x1x1x16xf32>
    %151 = vector.extract_strided_slice %1 {offsets = [4, 0], sizes = [1, 16], strides = [1, 1]} : vector<8x16xf32> to vector<1x16xf32>
    %152 = vector.shape_cast %151 : vector<1x16xf32> to vector<1x1x1x16xf32>
    %153 = arith.mulf %105, %152 : vector<1x1x1x16xf32>
    %154 = vector.shape_cast %153 : vector<1x1x1x16xf32> to vector<1x1x1x1x16xf32>
    %cst_36 = arith.constant dense<0.000000e+00> : vector<1xf32>
    %155 = vector.multi_reduction <add>, %154, %cst_36 [1, 2, 3, 4] : vector<1x1x1x1x16xf32> to vector<1xf32>
    %156 = vector.shape_cast %155 : vector<1xf32> to vector<1x1x1x1x1xf32>
    %157 = vector.extract %156[0, 0, 0, 0, 0] : f32 from vector<1x1x1x1x1xf32>
    %cst_37 = arith.constant 3.125000e-02 : f32
    %158 = arith.mulf %157, %cst_37 : f32
    %159 = vector.broadcast %158 : f32 to vector<1x1x1x16xf32>
    %160 = arith.mulf %159, %152 : vector<1x1x1x16xf32>
    %161 = arith.addf %150, %160 : vector<1x1x1x16xf32>
    %162 = vector.extract_strided_slice %1 {offsets = [5, 0], sizes = [1, 16], strides = [1, 1]} : vector<8x16xf32> to vector<1x16xf32>
    %163 = vector.shape_cast %162 : vector<1x16xf32> to vector<1x1x1x16xf32>
    %164 = arith.mulf %105, %163 : vector<1x1x1x16xf32>
    %165 = vector.shape_cast %164 : vector<1x1x1x16xf32> to vector<1x1x1x1x16xf32>
    %cst_38 = arith.constant dense<0.000000e+00> : vector<1xf32>
    %166 = vector.multi_reduction <add>, %165, %cst_38 [1, 2, 3, 4] : vector<1x1x1x1x16xf32> to vector<1xf32>
    %167 = vector.shape_cast %166 : vector<1xf32> to vector<1x1x1x1x1xf32>
    %168 = vector.extract %167[0, 0, 0, 0, 0] : f32 from vector<1x1x1x1x1xf32>
    %cst_39 = arith.constant 3.125000e-02 : f32
    %169 = arith.mulf %168, %cst_39 : f32
    %170 = vector.broadcast %169 : f32 to vector<1x1x1x16xf32>
    %171 = arith.mulf %170, %163 : vector<1x1x1x16xf32>
    %172 = arith.addf %161, %171 : vector<1x1x1x16xf32>
    %173 = vector.extract_strided_slice %1 {offsets = [6, 0], sizes = [1, 16], strides = [1, 1]} : vector<8x16xf32> to vector<1x16xf32>
    %174 = vector.shape_cast %173 : vector<1x16xf32> to vector<1x1x1x16xf32>
    %175 = arith.mulf %105, %174 : vector<1x1x1x16xf32>
    %176 = vector.shape_cast %175 : vector<1x1x1x16xf32> to vector<1x1x1x1x16xf32>
    %cst_40 = arith.constant dense<0.000000e+00> : vector<1xf32>
    %177 = vector.multi_reduction <add>, %176, %cst_40 [1, 2, 3, 4] : vector<1x1x1x1x16xf32> to vector<1xf32>
    %178 = vector.shape_cast %177 : vector<1xf32> to vector<1x1x1x1x1xf32>
    %179 = vector.extract %178[0, 0, 0, 0, 0] : f32 from vector<1x1x1x1x1xf32>
    %cst_41 = arith.constant 3.125000e-02 : f32
    %180 = arith.mulf %179, %cst_41 : f32
    %181 = vector.broadcast %180 : f32 to vector<1x1x1x16xf32>
    %182 = arith.mulf %181, %174 : vector<1x1x1x16xf32>
    %183 = arith.addf %172, %182 : vector<1x1x1x16xf32>
    %184 = vector.extract_strided_slice %1 {offsets = [7, 0], sizes = [1, 16], strides = [1, 1]} : vector<8x16xf32> to vector<1x16xf32>
    %185 = vector.shape_cast %184 : vector<1x16xf32> to vector<1x1x1x16xf32>
    %186 = arith.mulf %105, %185 : vector<1x1x1x16xf32>
    %187 = vector.shape_cast %186 : vector<1x1x1x16xf32> to vector<1x1x1x1x16xf32>
    %cst_42 = arith.constant dense<0.000000e+00> : vector<1xf32>
    %188 = vector.multi_reduction <add>, %187, %cst_42 [1, 2, 3, 4] : vector<1x1x1x1x16xf32> to vector<1xf32>
    %189 = vector.shape_cast %188 : vector<1xf32> to vector<1x1x1x1x1xf32>
    %190 = vector.extract %189[0, 0, 0, 0, 0] : f32 from vector<1x1x1x1x1xf32>
    %cst_43 = arith.constant 3.125000e-02 : f32
    %191 = arith.mulf %190, %cst_43 : f32
    %192 = vector.broadcast %191 : f32 to vector<1x1x1x16xf32>
    %193 = arith.mulf %192, %185 : vector<1x1x1x16xf32>
    %194 = arith.addf %183, %193 : vector<1x1x1x16xf32>
    %cst_44 = arith.constant 9.99999974E-6 : f32
    %195 = vector.broadcast %cst_44 : f32 to vector<1x1x1x16xf32>
    %196 = arith.addf %194, %195 : vector<1x1x1x16xf32>
    %197 = math.rsqrt %196 : vector<1x1x1x16xf32>
    %198 = vector.broadcast %197 : vector<1x1x1x16xf32> to vector<1x4x4x16xf32>
    %199 = arith.mulf %98, %198 : vector<1x4x4x16xf32>
    %c0_45 = arith.constant 0 : index
    %c0_46 = arith.constant 0 : index
    %200 = vector.load %arg2[%c0_45, %c0_46] : memref<1x16xf32, #tpu.memory_space<vmem>>, vector<1x16xf32>
    %201 = vector.shape_cast %200 : vector<1x16xf32> to vector<1x1x1x16xf32>
    %202 = vector.broadcast %201 : vector<1x1x1x16xf32> to vector<1x4x4x16xf32>
    %203 = arith.mulf %199, %202 : vector<1x4x4x16xf32>
    %c0_47 = arith.constant 0 : index
    %c0_48 = arith.constant 0 : index
    %204 = vector.load %arg3[%c0_47, %c0_48] : memref<1x16xf32, #tpu.memory_space<vmem>>, vector<1x16xf32>
    %205 = vector.shape_cast %204 : vector<1x16xf32> to vector<1x1x1x16xf32>
    %206 = vector.broadcast %205 : vector<1x1x1x16xf32> to vector<1x4x4x16xf32>
    %207 = arith.addf %203, %206 : vector<1x4x4x16xf32>
    %cst_49 = arith.constant 0.000000e+00 : f32
    %208 = vector.broadcast %cst_49 : f32 to vector<1x4x4x16xf32>
    %209 = arith.maximumf %207, %208 : vector<1x4x4x16xf32>
    %c0_50 = arith.constant 0 : index
    %c0_51 = arith.constant 0 : index
    %c0_52 = arith.constant 0 : index
    %c0_53 = arith.constant 0 : index
    %210 = vector.load %arg5[%c0_50, %c0_51, %c0_52, %c0_53] : memref<1x4x4x16xf32, #tpu.memory_space<vmem>>, vector<1x4x4x16xf32>
    tpu.vector_store %arg5[%c0_50, %c0_51, %c0_52, %c0_53], %209 {strides = array<i32>} : memref<1x4x4x16xf32, #tpu.memory_space<vmem>>, vector<1x4x4x16xf32>,
    return
  }
  func.func @transform_0(%arg0: i32) -> (i32, i32, i32, i32) {
    %c0_i32 = arith.constant 0 : i32
    %c0_i32_0 = arith.constant 0 : i32
    %c0_i32_1 = arith.constant 0 : i32
    %c0_i32_2 = arith.constant 0 : i32
    return %arg0, %c0_i32, %c0_i32_0, %c0_i32_1 : i32, i32, i32, i32
  }
  func.func @transform_1(%arg0: i32) -> (i32, i32) {
    %c0_i32 = arith.constant 0 : i32
    %c0_i32_0 = arith.constant 0 : i32
    %c0_i32_1 = arith.constant 0 : i32
    return %c0_i32, %c0_i32_0 : i32, i32
  }
  func.func @transform_2(%arg0: i32) -> (i32, i32) {
    %c0_i32 = arith.constant 0 : i32
    %c0_i32_0 = arith.constant 0 : i32
    %c0_i32_1 = arith.constant 0 : i32
    return %c0_i32, %c0_i32_0 : i32, i32
  }
  func.func @transform_3(%arg0: i32) -> (i32, i32) {
    %c0_i32 = arith.constant 0 : i32
    %c0_i32_0 = arith.constant 0 : i32
    %c0_i32_1 = arith.constant 0 : i32
    return %c0_i32, %c0_i32_0 : i32, i32
  }
  func.func @transform_4(%arg0: i32) -> (i32, i32, i32, i32) {
    %c0_i32 = arith.constant 0 : i32
    %c0_i32_0 = arith.constant 0 : i32
    %c0_i32_1 = arith.constant 0 : i32
    %c0_i32_2 = arith.constant 0 : i32
    return %arg0, %c0_i32, %c0_i32_0, %c0_i32_1 : i32, i32, i32, i32
  }
}

module attributes {stable_mosaic.version = 11 : i64} {
  func.func @_shift_matmul_kernel(%arg0: i32, %arg1: memref<96x16xf32, #tpu.memory_space<vmem>>, %arg2: memref<9x16x16xbf16, #tpu.memory_space<vmem>>, %arg3: memref<1x16xf32, #tpu.memory_space<vmem>>, %arg4: memref<40x16xf32, #tpu.memory_space<vmem>>) attributes {dimension_semantics = [#tpu.dimension_semantics<parallel>], iteration_bounds = array<i64: 2>, scalar_prefetch = 0 : i64, scratch_operands = 0 : i64, tpu.core_type = #tpu.core_type<tc>, window_params = [{pipeline_mode = #tpu.pipeline_mode<synchronous>, transform_indices = @transform_0, window_bounds = array<i64: 96, 16>}, {pipeline_mode = #tpu.pipeline_mode<synchronous>, transform_indices = @transform_1, window_bounds = array<i64: 9, 16, 16>}, {pipeline_mode = #tpu.pipeline_mode<synchronous>, transform_indices = @transform_2, window_bounds = array<i64: 1, 16>}, {transform_indices = @transform_3, window_bounds = array<i64: 40, 16>}]} {
    %c40_i32 = arith.constant 40 : i32
    %0 = arith.muli %arg0, %c40_i32 : i32
    %cst = arith.constant 0.000000e+00 : f32
    %1 = vector.broadcast %cst : f32 to vector<40x16xf32>
    %c0_i32 = arith.constant 0 : i32
    %2 = arith.addi %0, %c0_i32 : i32
    %3 = arith.index_cast %2 : i32 to index
    %c0 = arith.constant 0 : index
    %4 = vector.load %arg1[%3, %c0] : memref<96x16xf32, #tpu.memory_space<vmem>>, vector<40x16xf32>
    %5 = arith.truncf %4 : vector<40x16xf32> to vector<40x16xbf16>
    %c0_0 = arith.constant 0 : index
    %c0_1 = arith.constant 0 : index
    %c0_2 = arith.constant 0 : index
    %6 = vector.load %arg2[%c0_0, %c0_1, %c0_2] : memref<9x16x16xbf16, #tpu.memory_space<vmem>>, vector<1x16x16xbf16>
    %7 = vector.shape_cast %6 : vector<1x16x16xbf16> to vector<16x16xbf16>
    %cst_3 = arith.constant dense<0.000000e+00> : vector<40x16xf32>
    %8 = tpu.matmul %5, %7, %cst_3 {dimension_numbers = #tpu.dot_dimension_numbers<[1], [0], [0], [1], [0, 0, 1, 1], [], []>} : vector<40x16xbf16>, vector<16x16xbf16>, vector<40x16xf32> -> vector<40x16xf32>
    %9 = arith.addf %1, %8 : vector<40x16xf32>
    %c1_i32 = arith.constant 1 : i32
    %10 = arith.addi %0, %c1_i32 : i32
    %11 = arith.index_cast %10 : i32 to index
    %c0_4 = arith.constant 0 : index
    %12 = vector.load %arg1[%11, %c0_4] : memref<96x16xf32, #tpu.memory_space<vmem>>, vector<40x16xf32>
    %13 = arith.truncf %12 : vector<40x16xf32> to vector<40x16xbf16>
    %c1 = arith.constant 1 : index
    %c0_5 = arith.constant 0 : index
    %c0_6 = arith.constant 0 : index
    %14 = vector.load %arg2[%c1, %c0_5, %c0_6] : memref<9x16x16xbf16, #tpu.memory_space<vmem>>, vector<1x16x16xbf16>
    %15 = vector.shape_cast %14 : vector<1x16x16xbf16> to vector<16x16xbf16>
    %cst_7 = arith.constant dense<0.000000e+00> : vector<40x16xf32>
    %16 = tpu.matmul %13, %15, %cst_7 {dimension_numbers = #tpu.dot_dimension_numbers<[1], [0], [0], [1], [0, 0, 1, 1], [], []>} : vector<40x16xbf16>, vector<16x16xbf16>, vector<40x16xf32> -> vector<40x16xf32>
    %17 = arith.addf %9, %16 : vector<40x16xf32>
    %c2_i32 = arith.constant 2 : i32
    %18 = arith.addi %0, %c2_i32 : i32
    %19 = arith.index_cast %18 : i32 to index
    %c0_8 = arith.constant 0 : index
    %20 = vector.load %arg1[%19, %c0_8] : memref<96x16xf32, #tpu.memory_space<vmem>>, vector<40x16xf32>
    %21 = arith.truncf %20 : vector<40x16xf32> to vector<40x16xbf16>
    %c2 = arith.constant 2 : index
    %c0_9 = arith.constant 0 : index
    %c0_10 = arith.constant 0 : index
    %22 = vector.load %arg2[%c2, %c0_9, %c0_10] : memref<9x16x16xbf16, #tpu.memory_space<vmem>>, vector<1x16x16xbf16>
    %23 = vector.shape_cast %22 : vector<1x16x16xbf16> to vector<16x16xbf16>
    %cst_11 = arith.constant dense<0.000000e+00> : vector<40x16xf32>
    %24 = tpu.matmul %21, %23, %cst_11 {dimension_numbers = #tpu.dot_dimension_numbers<[1], [0], [0], [1], [0, 0, 1, 1], [], []>} : vector<40x16xbf16>, vector<16x16xbf16>, vector<40x16xf32> -> vector<40x16xf32>
    %25 = arith.addf %17, %24 : vector<40x16xf32>
    %c6_i32 = arith.constant 6 : i32
    %26 = arith.addi %0, %c6_i32 : i32
    %27 = arith.index_cast %26 : i32 to index
    %c0_12 = arith.constant 0 : index
    %28 = vector.load %arg1[%27, %c0_12] : memref<96x16xf32, #tpu.memory_space<vmem>>, vector<40x16xf32>
    %29 = arith.truncf %28 : vector<40x16xf32> to vector<40x16xbf16>
    %c3 = arith.constant 3 : index
    %c0_13 = arith.constant 0 : index
    %c0_14 = arith.constant 0 : index
    %30 = vector.load %arg2[%c3, %c0_13, %c0_14] : memref<9x16x16xbf16, #tpu.memory_space<vmem>>, vector<1x16x16xbf16>
    %31 = vector.shape_cast %30 : vector<1x16x16xbf16> to vector<16x16xbf16>
    %cst_15 = arith.constant dense<0.000000e+00> : vector<40x16xf32>
    %32 = tpu.matmul %29, %31, %cst_15 {dimension_numbers = #tpu.dot_dimension_numbers<[1], [0], [0], [1], [0, 0, 1, 1], [], []>} : vector<40x16xbf16>, vector<16x16xbf16>, vector<40x16xf32> -> vector<40x16xf32>
    %33 = arith.addf %25, %32 : vector<40x16xf32>
    %c7_i32 = arith.constant 7 : i32
    %34 = arith.addi %0, %c7_i32 : i32
    %35 = arith.index_cast %34 : i32 to index
    %c0_16 = arith.constant 0 : index
    %36 = vector.load %arg1[%35, %c0_16] : memref<96x16xf32, #tpu.memory_space<vmem>>, vector<40x16xf32>
    %37 = arith.truncf %36 : vector<40x16xf32> to vector<40x16xbf16>
    %c4 = arith.constant 4 : index
    %c0_17 = arith.constant 0 : index
    %c0_18 = arith.constant 0 : index
    %38 = vector.load %arg2[%c4, %c0_17, %c0_18] : memref<9x16x16xbf16, #tpu.memory_space<vmem>>, vector<1x16x16xbf16>
    %39 = vector.shape_cast %38 : vector<1x16x16xbf16> to vector<16x16xbf16>
    %cst_19 = arith.constant dense<0.000000e+00> : vector<40x16xf32>
    %40 = tpu.matmul %37, %39, %cst_19 {dimension_numbers = #tpu.dot_dimension_numbers<[1], [0], [0], [1], [0, 0, 1, 1], [], []>} : vector<40x16xbf16>, vector<16x16xbf16>, vector<40x16xf32> -> vector<40x16xf32>
    %41 = arith.addf %33, %40 : vector<40x16xf32>
    %c8_i32 = arith.constant 8 : i32
    %42 = arith.addi %0, %c8_i32 : i32
    %43 = arith.index_cast %42 : i32 to index
    %c0_20 = arith.constant 0 : index
    %44 = vector.load %arg1[%43, %c0_20] : memref<96x16xf32, #tpu.memory_space<vmem>>, vector<40x16xf32>
    %45 = arith.truncf %44 : vector<40x16xf32> to vector<40x16xbf16>
    %c5 = arith.constant 5 : index
    %c0_21 = arith.constant 0 : index
    %c0_22 = arith.constant 0 : index
    %46 = vector.load %arg2[%c5, %c0_21, %c0_22] : memref<9x16x16xbf16, #tpu.memory_space<vmem>>, vector<1x16x16xbf16>
    %47 = vector.shape_cast %46 : vector<1x16x16xbf16> to vector<16x16xbf16>
    %cst_23 = arith.constant dense<0.000000e+00> : vector<40x16xf32>
    %48 = tpu.matmul %45, %47, %cst_23 {dimension_numbers = #tpu.dot_dimension_numbers<[1], [0], [0], [1], [0, 0, 1, 1], [], []>} : vector<40x16xbf16>, vector<16x16xbf16>, vector<40x16xf32> -> vector<40x16xf32>
    %49 = arith.addf %41, %48 : vector<40x16xf32>
    %c12_i32 = arith.constant 12 : i32
    %50 = arith.addi %0, %c12_i32 : i32
    %51 = arith.index_cast %50 : i32 to index
    %c0_24 = arith.constant 0 : index
    %52 = vector.load %arg1[%51, %c0_24] : memref<96x16xf32, #tpu.memory_space<vmem>>, vector<40x16xf32>
    %53 = arith.truncf %52 : vector<40x16xf32> to vector<40x16xbf16>
    %c6 = arith.constant 6 : index
    %c0_25 = arith.constant 0 : index
    %c0_26 = arith.constant 0 : index
    %54 = vector.load %arg2[%c6, %c0_25, %c0_26] : memref<9x16x16xbf16, #tpu.memory_space<vmem>>, vector<1x16x16xbf16>
    %55 = vector.shape_cast %54 : vector<1x16x16xbf16> to vector<16x16xbf16>
    %cst_27 = arith.constant dense<0.000000e+00> : vector<40x16xf32>
    %56 = tpu.matmul %53, %55, %cst_27 {dimension_numbers = #tpu.dot_dimension_numbers<[1], [0], [0], [1], [0, 0, 1, 1], [], []>} : vector<40x16xbf16>, vector<16x16xbf16>, vector<40x16xf32> -> vector<40x16xf32>
    %57 = arith.addf %49, %56 : vector<40x16xf32>
    %c13_i32 = arith.constant 13 : i32
    %58 = arith.addi %0, %c13_i32 : i32
    %59 = arith.index_cast %58 : i32 to index
    %c0_28 = arith.constant 0 : index
    %60 = vector.load %arg1[%59, %c0_28] : memref<96x16xf32, #tpu.memory_space<vmem>>, vector<40x16xf32>
    %61 = arith.truncf %60 : vector<40x16xf32> to vector<40x16xbf16>
    %c7 = arith.constant 7 : index
    %c0_29 = arith.constant 0 : index
    %c0_30 = arith.constant 0 : index
    %62 = vector.load %arg2[%c7, %c0_29, %c0_30] : memref<9x16x16xbf16, #tpu.memory_space<vmem>>, vector<1x16x16xbf16>
    %63 = vector.shape_cast %62 : vector<1x16x16xbf16> to vector<16x16xbf16>
    %cst_31 = arith.constant dense<0.000000e+00> : vector<40x16xf32>
    %64 = tpu.matmul %61, %63, %cst_31 {dimension_numbers = #tpu.dot_dimension_numbers<[1], [0], [0], [1], [0, 0, 1, 1], [], []>} : vector<40x16xbf16>, vector<16x16xbf16>, vector<40x16xf32> -> vector<40x16xf32>
    %65 = arith.addf %57, %64 : vector<40x16xf32>
    %c14_i32 = arith.constant 14 : i32
    %66 = arith.addi %0, %c14_i32 : i32
    %67 = arith.index_cast %66 : i32 to index
    %c0_32 = arith.constant 0 : index
    %68 = vector.load %arg1[%67, %c0_32] : memref<96x16xf32, #tpu.memory_space<vmem>>, vector<40x16xf32>
    %69 = arith.truncf %68 : vector<40x16xf32> to vector<40x16xbf16>
    %c8 = arith.constant 8 : index
    %c0_33 = arith.constant 0 : index
    %c0_34 = arith.constant 0 : index
    %70 = vector.load %arg2[%c8, %c0_33, %c0_34] : memref<9x16x16xbf16, #tpu.memory_space<vmem>>, vector<1x16x16xbf16>
    %71 = vector.shape_cast %70 : vector<1x16x16xbf16> to vector<16x16xbf16>
    %cst_35 = arith.constant dense<0.000000e+00> : vector<40x16xf32>
    %72 = tpu.matmul %69, %71, %cst_35 {dimension_numbers = #tpu.dot_dimension_numbers<[1], [0], [0], [1], [0, 0, 1, 1], [], []>} : vector<40x16xbf16>, vector<16x16xbf16>, vector<40x16xf32> -> vector<40x16xf32>
    %73 = arith.addf %65, %72 : vector<40x16xf32>
    %c0_36 = arith.constant 0 : index
    %c0_37 = arith.constant 0 : index
    %74 = vector.load %arg3[%c0_36, %c0_37] : memref<1x16xf32, #tpu.memory_space<vmem>>, vector<1x16xf32>
    %75 = vector.broadcast %74 : vector<1x16xf32> to vector<40x16xf32>
    %76 = arith.addf %73, %75 : vector<40x16xf32>
    %c0_38 = arith.constant 0 : index
    %c0_39 = arith.constant 0 : index
    %77 = vector.load %arg4[%c0_38, %c0_39] : memref<40x16xf32, #tpu.memory_space<vmem>>, vector<40x16xf32>
    tpu.vector_store %arg4[%c0_38, %c0_39], %76 {strides = array<i32>} : memref<40x16xf32, #tpu.memory_space<vmem>>, vector<40x16xf32>,
    return
  }
  func.func @transform_0(%arg0: i32) -> (i32, i32) {
    %c0_i32 = arith.constant 0 : i32
    %c0_i32_0 = arith.constant 0 : i32
    %c0_i32_1 = arith.constant 0 : i32
    return %c0_i32, %c0_i32_0 : i32, i32
  }
  func.func @transform_1(%arg0: i32) -> (i32, i32, i32) {
    %c0_i32 = arith.constant 0 : i32
    %c0_i32_0 = arith.constant 0 : i32
    %c0_i32_1 = arith.constant 0 : i32
    %c0_i32_2 = arith.constant 0 : i32
    return %c0_i32, %c0_i32_0, %c0_i32_1 : i32, i32, i32
  }
  func.func @transform_2(%arg0: i32) -> (i32, i32) {
    %c0_i32 = arith.constant 0 : i32
    %c0_i32_0 = arith.constant 0 : i32
    %c0_i32_1 = arith.constant 0 : i32
    return %c0_i32, %c0_i32_0 : i32, i32
  }
  func.func @transform_3(%arg0: i32) -> (i32, i32) {
    %c0_i32 = arith.constant 0 : i32
    %c0_i32_0 = arith.constant 0 : i32
    return %arg0, %c0_i32 : i32, i32
  }
}

module attributes {stable_mosaic.version = 11 : i64} {
  func.func @_shift_matmul_kernel(%arg0: i32, %arg1: memref<32x16xf32, #tpu.memory_space<vmem>>, %arg2: memref<1x16x16xbf16, #tpu.memory_space<vmem>>, %arg3: memref<1x16xf32, #tpu.memory_space<vmem>>, %arg4: memref<16x16xf32, #tpu.memory_space<vmem>>) attributes {dimension_semantics = [#tpu.dimension_semantics<parallel>], iteration_bounds = array<i64: 2>, scalar_prefetch = 0 : i64, scratch_operands = 0 : i64, tpu.core_type = #tpu.core_type<tc>, window_params = [{pipeline_mode = #tpu.pipeline_mode<synchronous>, transform_indices = @transform_0, window_bounds = array<i64: 32, 16>}, {pipeline_mode = #tpu.pipeline_mode<synchronous>, transform_indices = @transform_1, window_bounds = array<i64: 1, 16, 16>}, {pipeline_mode = #tpu.pipeline_mode<synchronous>, transform_indices = @transform_2, window_bounds = array<i64: 1, 16>}, {transform_indices = @transform_3, window_bounds = array<i64: 16, 16>}]} {
    %c16_i32 = arith.constant 16 : i32
    %0 = arith.muli %arg0, %c16_i32 : i32
    %cst = arith.constant 0.000000e+00 : f32
    %1 = vector.broadcast %cst : f32 to vector<16x16xf32>
    %c0_i32 = arith.constant 0 : i32
    %2 = arith.addi %0, %c0_i32 : i32
    %3 = arith.index_cast %2 : i32 to index
    %c0 = arith.constant 0 : index
    %4 = vector.load %arg1[%3, %c0] : memref<32x16xf32, #tpu.memory_space<vmem>>, vector<16x16xf32>
    %5 = arith.truncf %4 : vector<16x16xf32> to vector<16x16xbf16>
    %c0_0 = arith.constant 0 : index
    %c0_1 = arith.constant 0 : index
    %c0_2 = arith.constant 0 : index
    %6 = vector.load %arg2[%c0_0, %c0_1, %c0_2] : memref<1x16x16xbf16, #tpu.memory_space<vmem>>, vector<1x16x16xbf16>
    %7 = vector.shape_cast %6 : vector<1x16x16xbf16> to vector<16x16xbf16>
    %cst_3 = arith.constant dense<0.000000e+00> : vector<16x16xf32>
    %8 = tpu.matmul %5, %7, %cst_3 {dimension_numbers = #tpu.dot_dimension_numbers<[1], [0], [0], [1], [0, 0, 1, 1], [], []>} : vector<16x16xbf16>, vector<16x16xbf16>, vector<16x16xf32> -> vector<16x16xf32>
    %9 = arith.addf %1, %8 : vector<16x16xf32>
    %c0_4 = arith.constant 0 : index
    %c0_5 = arith.constant 0 : index
    %10 = vector.load %arg3[%c0_4, %c0_5] : memref<1x16xf32, #tpu.memory_space<vmem>>, vector<1x16xf32>
    %11 = vector.broadcast %10 : vector<1x16xf32> to vector<16x16xf32>
    %12 = arith.addf %9, %11 : vector<16x16xf32>
    %c0_6 = arith.constant 0 : index
    %c0_7 = arith.constant 0 : index
    %13 = vector.load %arg4[%c0_6, %c0_7] : memref<16x16xf32, #tpu.memory_space<vmem>>, vector<16x16xf32>
    tpu.vector_store %arg4[%c0_6, %c0_7], %12 {strides = array<i32>} : memref<16x16xf32, #tpu.memory_space<vmem>>, vector<16x16xf32>,
    return
  }
  func.func @transform_0(%arg0: i32) -> (i32, i32) {
    %c0_i32 = arith.constant 0 : i32
    %c0_i32_0 = arith.constant 0 : i32
    %c0_i32_1 = arith.constant 0 : i32
    return %c0_i32, %c0_i32_0 : i32, i32
  }
  func.func @transform_1(%arg0: i32) -> (i32, i32, i32) {
    %c0_i32 = arith.constant 0 : i32
    %c0_i32_0 = arith.constant 0 : i32
    %c0_i32_1 = arith.constant 0 : i32
    %c0_i32_2 = arith.constant 0 : i32
    return %c0_i32, %c0_i32_0, %c0_i32_1 : i32, i32, i32
  }
  func.func @transform_2(%arg0: i32) -> (i32, i32) {
    %c0_i32 = arith.constant 0 : i32
    %c0_i32_0 = arith.constant 0 : i32
    %c0_i32_1 = arith.constant 0 : i32
    return %c0_i32, %c0_i32_0 : i32, i32
  }
  func.func @transform_3(%arg0: i32) -> (i32, i32) {
    %c0_i32 = arith.constant 0 : i32
    %c0_i32_0 = arith.constant 0 : i32
    return %arg0, %c0_i32 : i32, i32
  }
}

module attributes {stable_mosaic.version = 11 : i64} {
  func.func @_gn_kernel(%arg0: i32, %arg1: memref<1x4x4x16xf32, #tpu.memory_space<vmem>>, %arg2: memref<1x16xf32, #tpu.memory_space<vmem>>, %arg3: memref<1x16xf32, #tpu.memory_space<vmem>>, %arg4: memref<8x16xf32, #tpu.memory_space<vmem>>, %arg5: memref<1x4x4x16xf32, #tpu.memory_space<vmem>>, %arg6: memref<1x4x4x16xf32, #tpu.memory_space<vmem>>) attributes {dimension_semantics = [#tpu.dimension_semantics<parallel>], iteration_bounds = array<i64: 2>, scalar_prefetch = 0 : i64, scratch_operands = 0 : i64, tpu.core_type = #tpu.core_type<tc>, window_params = [{transform_indices = @transform_0, window_bounds = array<i64: 1, 4, 4, 16>}, {pipeline_mode = #tpu.pipeline_mode<synchronous>, transform_indices = @transform_1, window_bounds = array<i64: 1, 16>}, {pipeline_mode = #tpu.pipeline_mode<synchronous>, transform_indices = @transform_2, window_bounds = array<i64: 1, 16>}, {pipeline_mode = #tpu.pipeline_mode<synchronous>, transform_indices = @transform_3, window_bounds = array<i64: 8, 16>}, {transform_indices = @transform_4, window_bounds = array<i64: 1, 4, 4, 16>}, {transform_indices = @transform_5, window_bounds = array<i64: 1, 4, 4, 16>}]} {
    %c0 = arith.constant 0 : index
    %c0_0 = arith.constant 0 : index
    %c0_1 = arith.constant 0 : index
    %c0_2 = arith.constant 0 : index
    %0 = vector.load %arg1[%c0, %c0_0, %c0_1, %c0_2] : memref<1x4x4x16xf32, #tpu.memory_space<vmem>>, vector<1x4x4x16xf32>
    %c0_3 = arith.constant 0 : index
    %c0_4 = arith.constant 0 : index
    %1 = vector.load %arg4[%c0_3, %c0_4] : memref<8x16xf32, #tpu.memory_space<vmem>>, vector<8x16xf32>
    %cst = arith.constant dense<0.000000e+00> : vector<4x4x16xf32>
    %2 = vector.multi_reduction <add>, %0, %cst [0] : vector<1x4x4x16xf32> to vector<4x4x16xf32>
    %3 = vector.shape_cast %2 : vector<4x4x16xf32> to vector<1x4x4x16xf32>
    %cst_5 = arith.constant dense<0.000000e+00> : vector<1x4x16xf32>
    %4 = vector.multi_reduction <add>, %3, %cst_5 [1] : vector<1x4x4x16xf32> to vector<1x4x16xf32>
    %5 = vector.shape_cast %4 : vector<1x4x16xf32> to vector<1x1x4x16xf32>
    %cst_6 = arith.constant dense<0.000000e+00> : vector<1x1x16xf32>
    %6 = vector.multi_reduction <add>, %5, %cst_6 [2] : vector<1x1x4x16xf32> to vector<1x1x16xf32>
    %7 = vector.shape_cast %6 : vector<1x1x16xf32> to vector<1x1x1x16xf32>
    %cst_7 = arith.constant 0.000000e+00 : f32
    %8 = vector.broadcast %cst_7 : f32 to vector<1x1x1x16xf32>
    %9 = vector.extract_strided_slice %1 {offsets = [0, 0], sizes = [1, 16], strides = [1, 1]} : vector<8x16xf32> to vector<1x16xf32>
    %10 = vector.shape_cast %9 : vector<1x16xf32> to vector<1x1x1x16xf32>
    %11 = arith.mulf %7, %10 : vector<1x1x1x16xf32>
    %12 = vector.shape_cast %11 : vector<1x1x1x16xf32> to vector<1x1x1x1x16xf32>
    %cst_8 = arith.constant dense<0.000000e+00> : vector<1xf32>
    %13 = vector.multi_reduction <add>, %12, %cst_8 [1, 2, 3, 4] : vector<1x1x1x1x16xf32> to vector<1xf32>
    %14 = vector.shape_cast %13 : vector<1xf32> to vector<1x1x1x1x1xf32>
    %15 = vector.extract %14[0, 0, 0, 0, 0] : f32 from vector<1x1x1x1x1xf32>
    %cst_9 = arith.constant 3.125000e-02 : f32
    %16 = arith.mulf %15, %cst_9 : f32
    %17 = vector.broadcast %16 : f32 to vector<1x1x1x16xf32>
    %18 = arith.mulf %17, %10 : vector<1x1x1x16xf32>
    %19 = arith.addf %8, %18 : vector<1x1x1x16xf32>
    %20 = vector.extract_strided_slice %1 {offsets = [1, 0], sizes = [1, 16], strides = [1, 1]} : vector<8x16xf32> to vector<1x16xf32>
    %21 = vector.shape_cast %20 : vector<1x16xf32> to vector<1x1x1x16xf32>
    %22 = arith.mulf %7, %21 : vector<1x1x1x16xf32>
    %23 = vector.shape_cast %22 : vector<1x1x1x16xf32> to vector<1x1x1x1x16xf32>
    %cst_10 = arith.constant dense<0.000000e+00> : vector<1xf32>
    %24 = vector.multi_reduction <add>, %23, %cst_10 [1, 2, 3, 4] : vector<1x1x1x1x16xf32> to vector<1xf32>
    %25 = vector.shape_cast %24 : vector<1xf32> to vector<1x1x1x1x1xf32>
    %26 = vector.extract %25[0, 0, 0, 0, 0] : f32 from vector<1x1x1x1x1xf32>
    %cst_11 = arith.constant 3.125000e-02 : f32
    %27 = arith.mulf %26, %cst_11 : f32
    %28 = vector.broadcast %27 : f32 to vector<1x1x1x16xf32>
    %29 = arith.mulf %28, %21 : vector<1x1x1x16xf32>
    %30 = arith.addf %19, %29 : vector<1x1x1x16xf32>
    %31 = vector.extract_strided_slice %1 {offsets = [2, 0], sizes = [1, 16], strides = [1, 1]} : vector<8x16xf32> to vector<1x16xf32>
    %32 = vector.shape_cast %31 : vector<1x16xf32> to vector<1x1x1x16xf32>
    %33 = arith.mulf %7, %32 : vector<1x1x1x16xf32>
    %34 = vector.shape_cast %33 : vector<1x1x1x16xf32> to vector<1x1x1x1x16xf32>
    %cst_12 = arith.constant dense<0.000000e+00> : vector<1xf32>
    %35 = vector.multi_reduction <add>, %34, %cst_12 [1, 2, 3, 4] : vector<1x1x1x1x16xf32> to vector<1xf32>
    %36 = vector.shape_cast %35 : vector<1xf32> to vector<1x1x1x1x1xf32>
    %37 = vector.extract %36[0, 0, 0, 0, 0] : f32 from vector<1x1x1x1x1xf32>
    %cst_13 = arith.constant 3.125000e-02 : f32
    %38 = arith.mulf %37, %cst_13 : f32
    %39 = vector.broadcast %38 : f32 to vector<1x1x1x16xf32>
    %40 = arith.mulf %39, %32 : vector<1x1x1x16xf32>
    %41 = arith.addf %30, %40 : vector<1x1x1x16xf32>
    %42 = vector.extract_strided_slice %1 {offsets = [3, 0], sizes = [1, 16], strides = [1, 1]} : vector<8x16xf32> to vector<1x16xf32>
    %43 = vector.shape_cast %42 : vector<1x16xf32> to vector<1x1x1x16xf32>
    %44 = arith.mulf %7, %43 : vector<1x1x1x16xf32>
    %45 = vector.shape_cast %44 : vector<1x1x1x16xf32> to vector<1x1x1x1x16xf32>
    %cst_14 = arith.constant dense<0.000000e+00> : vector<1xf32>
    %46 = vector.multi_reduction <add>, %45, %cst_14 [1, 2, 3, 4] : vector<1x1x1x1x16xf32> to vector<1xf32>
    %47 = vector.shape_cast %46 : vector<1xf32> to vector<1x1x1x1x1xf32>
    %48 = vector.extract %47[0, 0, 0, 0, 0] : f32 from vector<1x1x1x1x1xf32>
    %cst_15 = arith.constant 3.125000e-02 : f32
    %49 = arith.mulf %48, %cst_15 : f32
    %50 = vector.broadcast %49 : f32 to vector<1x1x1x16xf32>
    %51 = arith.mulf %50, %43 : vector<1x1x1x16xf32>
    %52 = arith.addf %41, %51 : vector<1x1x1x16xf32>
    %53 = vector.extract_strided_slice %1 {offsets = [4, 0], sizes = [1, 16], strides = [1, 1]} : vector<8x16xf32> to vector<1x16xf32>
    %54 = vector.shape_cast %53 : vector<1x16xf32> to vector<1x1x1x16xf32>
    %55 = arith.mulf %7, %54 : vector<1x1x1x16xf32>
    %56 = vector.shape_cast %55 : vector<1x1x1x16xf32> to vector<1x1x1x1x16xf32>
    %cst_16 = arith.constant dense<0.000000e+00> : vector<1xf32>
    %57 = vector.multi_reduction <add>, %56, %cst_16 [1, 2, 3, 4] : vector<1x1x1x1x16xf32> to vector<1xf32>
    %58 = vector.shape_cast %57 : vector<1xf32> to vector<1x1x1x1x1xf32>
    %59 = vector.extract %58[0, 0, 0, 0, 0] : f32 from vector<1x1x1x1x1xf32>
    %cst_17 = arith.constant 3.125000e-02 : f32
    %60 = arith.mulf %59, %cst_17 : f32
    %61 = vector.broadcast %60 : f32 to vector<1x1x1x16xf32>
    %62 = arith.mulf %61, %54 : vector<1x1x1x16xf32>
    %63 = arith.addf %52, %62 : vector<1x1x1x16xf32>
    %64 = vector.extract_strided_slice %1 {offsets = [5, 0], sizes = [1, 16], strides = [1, 1]} : vector<8x16xf32> to vector<1x16xf32>
    %65 = vector.shape_cast %64 : vector<1x16xf32> to vector<1x1x1x16xf32>
    %66 = arith.mulf %7, %65 : vector<1x1x1x16xf32>
    %67 = vector.shape_cast %66 : vector<1x1x1x16xf32> to vector<1x1x1x1x16xf32>
    %cst_18 = arith.constant dense<0.000000e+00> : vector<1xf32>
    %68 = vector.multi_reduction <add>, %67, %cst_18 [1, 2, 3, 4] : vector<1x1x1x1x16xf32> to vector<1xf32>
    %69 = vector.shape_cast %68 : vector<1xf32> to vector<1x1x1x1x1xf32>
    %70 = vector.extract %69[0, 0, 0, 0, 0] : f32 from vector<1x1x1x1x1xf32>
    %cst_19 = arith.constant 3.125000e-02 : f32
    %71 = arith.mulf %70, %cst_19 : f32
    %72 = vector.broadcast %71 : f32 to vector<1x1x1x16xf32>
    %73 = arith.mulf %72, %65 : vector<1x1x1x16xf32>
    %74 = arith.addf %63, %73 : vector<1x1x1x16xf32>
    %75 = vector.extract_strided_slice %1 {offsets = [6, 0], sizes = [1, 16], strides = [1, 1]} : vector<8x16xf32> to vector<1x16xf32>
    %76 = vector.shape_cast %75 : vector<1x16xf32> to vector<1x1x1x16xf32>
    %77 = arith.mulf %7, %76 : vector<1x1x1x16xf32>
    %78 = vector.shape_cast %77 : vector<1x1x1x16xf32> to vector<1x1x1x1x16xf32>
    %cst_20 = arith.constant dense<0.000000e+00> : vector<1xf32>
    %79 = vector.multi_reduction <add>, %78, %cst_20 [1, 2, 3, 4] : vector<1x1x1x1x16xf32> to vector<1xf32>
    %80 = vector.shape_cast %79 : vector<1xf32> to vector<1x1x1x1x1xf32>
    %81 = vector.extract %80[0, 0, 0, 0, 0] : f32 from vector<1x1x1x1x1xf32>
    %cst_21 = arith.constant 3.125000e-02 : f32
    %82 = arith.mulf %81, %cst_21 : f32
    %83 = vector.broadcast %82 : f32 to vector<1x1x1x16xf32>
    %84 = arith.mulf %83, %76 : vector<1x1x1x16xf32>
    %85 = arith.addf %74, %84 : vector<1x1x1x16xf32>
    %86 = vector.extract_strided_slice %1 {offsets = [7, 0], sizes = [1, 16], strides = [1, 1]} : vector<8x16xf32> to vector<1x16xf32>
    %87 = vector.shape_cast %86 : vector<1x16xf32> to vector<1x1x1x16xf32>
    %88 = arith.mulf %7, %87 : vector<1x1x1x16xf32>
    %89 = vector.shape_cast %88 : vector<1x1x1x16xf32> to vector<1x1x1x1x16xf32>
    %cst_22 = arith.constant dense<0.000000e+00> : vector<1xf32>
    %90 = vector.multi_reduction <add>, %89, %cst_22 [1, 2, 3, 4] : vector<1x1x1x1x16xf32> to vector<1xf32>
    %91 = vector.shape_cast %90 : vector<1xf32> to vector<1x1x1x1x1xf32>
    %92 = vector.extract %91[0, 0, 0, 0, 0] : f32 from vector<1x1x1x1x1xf32>
    %cst_23 = arith.constant 3.125000e-02 : f32
    %93 = arith.mulf %92, %cst_23 : f32
    %94 = vector.broadcast %93 : f32 to vector<1x1x1x16xf32>
    %95 = arith.mulf %94, %87 : vector<1x1x1x16xf32>
    %96 = arith.addf %85, %95 : vector<1x1x1x16xf32>
    %97 = vector.broadcast %96 : vector<1x1x1x16xf32> to vector<1x4x4x16xf32>
    %98 = arith.subf %0, %97 : vector<1x4x4x16xf32>
    %99 = arith.mulf %98, %98 : vector<1x4x4x16xf32>
    %cst_24 = arith.constant dense<0.000000e+00> : vector<4x4x16xf32>
    %100 = vector.multi_reduction <add>, %99, %cst_24 [0] : vector<1x4x4x16xf32> to vector<4x4x16xf32>
    %101 = vector.shape_cast %100 : vector<4x4x16xf32> to vector<1x4x4x16xf32>
    %cst_25 = arith.constant dense<0.000000e+00> : vector<1x4x16xf32>
    %102 = vector.multi_reduction <add>, %101, %cst_25 [1] : vector<1x4x4x16xf32> to vector<1x4x16xf32>
    %103 = vector.shape_cast %102 : vector<1x4x16xf32> to vector<1x1x4x16xf32>
    %cst_26 = arith.constant dense<0.000000e+00> : vector<1x1x16xf32>
    %104 = vector.multi_reduction <add>, %103, %cst_26 [2] : vector<1x1x4x16xf32> to vector<1x1x16xf32>
    %105 = vector.shape_cast %104 : vector<1x1x16xf32> to vector<1x1x1x16xf32>
    %cst_27 = arith.constant 0.000000e+00 : f32
    %106 = vector.broadcast %cst_27 : f32 to vector<1x1x1x16xf32>
    %107 = vector.extract_strided_slice %1 {offsets = [0, 0], sizes = [1, 16], strides = [1, 1]} : vector<8x16xf32> to vector<1x16xf32>
    %108 = vector.shape_cast %107 : vector<1x16xf32> to vector<1x1x1x16xf32>
    %109 = arith.mulf %105, %108 : vector<1x1x1x16xf32>
    %110 = vector.shape_cast %109 : vector<1x1x1x16xf32> to vector<1x1x1x1x16xf32>
    %cst_28 = arith.constant dense<0.000000e+00> : vector<1xf32>
    %111 = vector.multi_reduction <add>, %110, %cst_28 [1, 2, 3, 4] : vector<1x1x1x1x16xf32> to vector<1xf32>
    %112 = vector.shape_cast %111 : vector<1xf32> to vector<1x1x1x1x1xf32>
    %113 = vector.extract %112[0, 0, 0, 0, 0] : f32 from vector<1x1x1x1x1xf32>
    %cst_29 = arith.constant 3.125000e-02 : f32
    %114 = arith.mulf %113, %cst_29 : f32
    %115 = vector.broadcast %114 : f32 to vector<1x1x1x16xf32>
    %116 = arith.mulf %115, %108 : vector<1x1x1x16xf32>
    %117 = arith.addf %106, %116 : vector<1x1x1x16xf32>
    %118 = vector.extract_strided_slice %1 {offsets = [1, 0], sizes = [1, 16], strides = [1, 1]} : vector<8x16xf32> to vector<1x16xf32>
    %119 = vector.shape_cast %118 : vector<1x16xf32> to vector<1x1x1x16xf32>
    %120 = arith.mulf %105, %119 : vector<1x1x1x16xf32>
    %121 = vector.shape_cast %120 : vector<1x1x1x16xf32> to vector<1x1x1x1x16xf32>
    %cst_30 = arith.constant dense<0.000000e+00> : vector<1xf32>
    %122 = vector.multi_reduction <add>, %121, %cst_30 [1, 2, 3, 4] : vector<1x1x1x1x16xf32> to vector<1xf32>
    %123 = vector.shape_cast %122 : vector<1xf32> to vector<1x1x1x1x1xf32>
    %124 = vector.extract %123[0, 0, 0, 0, 0] : f32 from vector<1x1x1x1x1xf32>
    %cst_31 = arith.constant 3.125000e-02 : f32
    %125 = arith.mulf %124, %cst_31 : f32
    %126 = vector.broadcast %125 : f32 to vector<1x1x1x16xf32>
    %127 = arith.mulf %126, %119 : vector<1x1x1x16xf32>
    %128 = arith.addf %117, %127 : vector<1x1x1x16xf32>
    %129 = vector.extract_strided_slice %1 {offsets = [2, 0], sizes = [1, 16], strides = [1, 1]} : vector<8x16xf32> to vector<1x16xf32>
    %130 = vector.shape_cast %129 : vector<1x16xf32> to vector<1x1x1x16xf32>
    %131 = arith.mulf %105, %130 : vector<1x1x1x16xf32>
    %132 = vector.shape_cast %131 : vector<1x1x1x16xf32> to vector<1x1x1x1x16xf32>
    %cst_32 = arith.constant dense<0.000000e+00> : vector<1xf32>
    %133 = vector.multi_reduction <add>, %132, %cst_32 [1, 2, 3, 4] : vector<1x1x1x1x16xf32> to vector<1xf32>
    %134 = vector.shape_cast %133 : vector<1xf32> to vector<1x1x1x1x1xf32>
    %135 = vector.extract %134[0, 0, 0, 0, 0] : f32 from vector<1x1x1x1x1xf32>
    %cst_33 = arith.constant 3.125000e-02 : f32
    %136 = arith.mulf %135, %cst_33 : f32
    %137 = vector.broadcast %136 : f32 to vector<1x1x1x16xf32>
    %138 = arith.mulf %137, %130 : vector<1x1x1x16xf32>
    %139 = arith.addf %128, %138 : vector<1x1x1x16xf32>
    %140 = vector.extract_strided_slice %1 {offsets = [3, 0], sizes = [1, 16], strides = [1, 1]} : vector<8x16xf32> to vector<1x16xf32>
    %141 = vector.shape_cast %140 : vector<1x16xf32> to vector<1x1x1x16xf32>
    %142 = arith.mulf %105, %141 : vector<1x1x1x16xf32>
    %143 = vector.shape_cast %142 : vector<1x1x1x16xf32> to vector<1x1x1x1x16xf32>
    %cst_34 = arith.constant dense<0.000000e+00> : vector<1xf32>
    %144 = vector.multi_reduction <add>, %143, %cst_34 [1, 2, 3, 4] : vector<1x1x1x1x16xf32> to vector<1xf32>
    %145 = vector.shape_cast %144 : vector<1xf32> to vector<1x1x1x1x1xf32>
    %146 = vector.extract %145[0, 0, 0, 0, 0] : f32 from vector<1x1x1x1x1xf32>
    %cst_35 = arith.constant 3.125000e-02 : f32
    %147 = arith.mulf %146, %cst_35 : f32
    %148 = vector.broadcast %147 : f32 to vector<1x1x1x16xf32>
    %149 = arith.mulf %148, %141 : vector<1x1x1x16xf32>
    %150 = arith.addf %139, %149 : vector<1x1x1x16xf32>
    %151 = vector.extract_strided_slice %1 {offsets = [4, 0], sizes = [1, 16], strides = [1, 1]} : vector<8x16xf32> to vector<1x16xf32>
    %152 = vector.shape_cast %151 : vector<1x16xf32> to vector<1x1x1x16xf32>
    %153 = arith.mulf %105, %152 : vector<1x1x1x16xf32>
    %154 = vector.shape_cast %153 : vector<1x1x1x16xf32> to vector<1x1x1x1x16xf32>
    %cst_36 = arith.constant dense<0.000000e+00> : vector<1xf32>
    %155 = vector.multi_reduction <add>, %154, %cst_36 [1, 2, 3, 4] : vector<1x1x1x1x16xf32> to vector<1xf32>
    %156 = vector.shape_cast %155 : vector<1xf32> to vector<1x1x1x1x1xf32>
    %157 = vector.extract %156[0, 0, 0, 0, 0] : f32 from vector<1x1x1x1x1xf32>
    %cst_37 = arith.constant 3.125000e-02 : f32
    %158 = arith.mulf %157, %cst_37 : f32
    %159 = vector.broadcast %158 : f32 to vector<1x1x1x16xf32>
    %160 = arith.mulf %159, %152 : vector<1x1x1x16xf32>
    %161 = arith.addf %150, %160 : vector<1x1x1x16xf32>
    %162 = vector.extract_strided_slice %1 {offsets = [5, 0], sizes = [1, 16], strides = [1, 1]} : vector<8x16xf32> to vector<1x16xf32>
    %163 = vector.shape_cast %162 : vector<1x16xf32> to vector<1x1x1x16xf32>
    %164 = arith.mulf %105, %163 : vector<1x1x1x16xf32>
    %165 = vector.shape_cast %164 : vector<1x1x1x16xf32> to vector<1x1x1x1x16xf32>
    %cst_38 = arith.constant dense<0.000000e+00> : vector<1xf32>
    %166 = vector.multi_reduction <add>, %165, %cst_38 [1, 2, 3, 4] : vector<1x1x1x1x16xf32> to vector<1xf32>
    %167 = vector.shape_cast %166 : vector<1xf32> to vector<1x1x1x1x1xf32>
    %168 = vector.extract %167[0, 0, 0, 0, 0] : f32 from vector<1x1x1x1x1xf32>
    %cst_39 = arith.constant 3.125000e-02 : f32
    %169 = arith.mulf %168, %cst_39 : f32
    %170 = vector.broadcast %169 : f32 to vector<1x1x1x16xf32>
    %171 = arith.mulf %170, %163 : vector<1x1x1x16xf32>
    %172 = arith.addf %161, %171 : vector<1x1x1x16xf32>
    %173 = vector.extract_strided_slice %1 {offsets = [6, 0], sizes = [1, 16], strides = [1, 1]} : vector<8x16xf32> to vector<1x16xf32>
    %174 = vector.shape_cast %173 : vector<1x16xf32> to vector<1x1x1x16xf32>
    %175 = arith.mulf %105, %174 : vector<1x1x1x16xf32>
    %176 = vector.shape_cast %175 : vector<1x1x1x16xf32> to vector<1x1x1x1x16xf32>
    %cst_40 = arith.constant dense<0.000000e+00> : vector<1xf32>
    %177 = vector.multi_reduction <add>, %176, %cst_40 [1, 2, 3, 4] : vector<1x1x1x1x16xf32> to vector<1xf32>
    %178 = vector.shape_cast %177 : vector<1xf32> to vector<1x1x1x1x1xf32>
    %179 = vector.extract %178[0, 0, 0, 0, 0] : f32 from vector<1x1x1x1x1xf32>
    %cst_41 = arith.constant 3.125000e-02 : f32
    %180 = arith.mulf %179, %cst_41 : f32
    %181 = vector.broadcast %180 : f32 to vector<1x1x1x16xf32>
    %182 = arith.mulf %181, %174 : vector<1x1x1x16xf32>
    %183 = arith.addf %172, %182 : vector<1x1x1x16xf32>
    %184 = vector.extract_strided_slice %1 {offsets = [7, 0], sizes = [1, 16], strides = [1, 1]} : vector<8x16xf32> to vector<1x16xf32>
    %185 = vector.shape_cast %184 : vector<1x16xf32> to vector<1x1x1x16xf32>
    %186 = arith.mulf %105, %185 : vector<1x1x1x16xf32>
    %187 = vector.shape_cast %186 : vector<1x1x1x16xf32> to vector<1x1x1x1x16xf32>
    %cst_42 = arith.constant dense<0.000000e+00> : vector<1xf32>
    %188 = vector.multi_reduction <add>, %187, %cst_42 [1, 2, 3, 4] : vector<1x1x1x1x16xf32> to vector<1xf32>
    %189 = vector.shape_cast %188 : vector<1xf32> to vector<1x1x1x1x1xf32>
    %190 = vector.extract %189[0, 0, 0, 0, 0] : f32 from vector<1x1x1x1x1xf32>
    %cst_43 = arith.constant 3.125000e-02 : f32
    %191 = arith.mulf %190, %cst_43 : f32
    %192 = vector.broadcast %191 : f32 to vector<1x1x1x16xf32>
    %193 = arith.mulf %192, %185 : vector<1x1x1x16xf32>
    %194 = arith.addf %183, %193 : vector<1x1x1x16xf32>
    %cst_44 = arith.constant 9.99999974E-6 : f32
    %195 = vector.broadcast %cst_44 : f32 to vector<1x1x1x16xf32>
    %196 = arith.addf %194, %195 : vector<1x1x1x16xf32>
    %197 = math.rsqrt %196 : vector<1x1x1x16xf32>
    %198 = vector.broadcast %197 : vector<1x1x1x16xf32> to vector<1x4x4x16xf32>
    %199 = arith.mulf %98, %198 : vector<1x4x4x16xf32>
    %c0_45 = arith.constant 0 : index
    %c0_46 = arith.constant 0 : index
    %200 = vector.load %arg2[%c0_45, %c0_46] : memref<1x16xf32, #tpu.memory_space<vmem>>, vector<1x16xf32>
    %201 = vector.shape_cast %200 : vector<1x16xf32> to vector<1x1x1x16xf32>
    %202 = vector.broadcast %201 : vector<1x1x1x16xf32> to vector<1x4x4x16xf32>
    %203 = arith.mulf %199, %202 : vector<1x4x4x16xf32>
    %c0_47 = arith.constant 0 : index
    %c0_48 = arith.constant 0 : index
    %204 = vector.load %arg3[%c0_47, %c0_48] : memref<1x16xf32, #tpu.memory_space<vmem>>, vector<1x16xf32>
    %205 = vector.shape_cast %204 : vector<1x16xf32> to vector<1x1x1x16xf32>
    %206 = vector.broadcast %205 : vector<1x1x1x16xf32> to vector<1x4x4x16xf32>
    %207 = arith.addf %203, %206 : vector<1x4x4x16xf32>
    %c0_49 = arith.constant 0 : index
    %c0_50 = arith.constant 0 : index
    %c0_51 = arith.constant 0 : index
    %c0_52 = arith.constant 0 : index
    %208 = vector.load %arg5[%c0_49, %c0_50, %c0_51, %c0_52] : memref<1x4x4x16xf32, #tpu.memory_space<vmem>>, vector<1x4x4x16xf32>
    %209 = arith.addf %207, %208 : vector<1x4x4x16xf32>
    %cst_53 = arith.constant 0.000000e+00 : f32
    %210 = vector.broadcast %cst_53 : f32 to vector<1x4x4x16xf32>
    %211 = arith.maximumf %209, %210 : vector<1x4x4x16xf32>
    %c0_54 = arith.constant 0 : index
    %c0_55 = arith.constant 0 : index
    %c0_56 = arith.constant 0 : index
    %c0_57 = arith.constant 0 : index
    %212 = vector.load %arg6[%c0_54, %c0_55, %c0_56, %c0_57] : memref<1x4x4x16xf32, #tpu.memory_space<vmem>>, vector<1x4x4x16xf32>
    tpu.vector_store %arg6[%c0_54, %c0_55, %c0_56, %c0_57], %211 {strides = array<i32>} : memref<1x4x4x16xf32, #tpu.memory_space<vmem>>, vector<1x4x4x16xf32>,
    return
  }
  func.func @transform_0(%arg0: i32) -> (i32, i32, i32, i32) {
    %c0_i32 = arith.constant 0 : i32
    %c0_i32_0 = arith.constant 0 : i32
    %c0_i32_1 = arith.constant 0 : i32
    %c0_i32_2 = arith.constant 0 : i32
    return %arg0, %c0_i32, %c0_i32_0, %c0_i32_1 : i32, i32, i32, i32
  }
  func.func @transform_1(%arg0: i32) -> (i32, i32) {
    %c0_i32 = arith.constant 0 : i32
    %c0_i32_0 = arith.constant 0 : i32
    %c0_i32_1 = arith.constant 0 : i32
    return %c0_i32, %c0_i32_0 : i32, i32
  }
  func.func @transform_2(%arg0: i32) -> (i32, i32) {
    %c0_i32 = arith.constant 0 : i32
    %c0_i32_0 = arith.constant 0 : i32
    %c0_i32_1 = arith.constant 0 : i32
    return %c0_i32, %c0_i32_0 : i32, i32
  }
  func.func @transform_3(%arg0: i32) -> (i32, i32) {
    %c0_i32 = arith.constant 0 : i32
    %c0_i32_0 = arith.constant 0 : i32
    %c0_i32_1 = arith.constant 0 : i32
    return %c0_i32, %c0_i32_0 : i32, i32
  }
  func.func @transform_4(%arg0: i32) -> (i32, i32, i32, i32) {
    %c0_i32 = arith.constant 0 : i32
    %c0_i32_0 = arith.constant 0 : i32
    %c0_i32_1 = arith.constant 0 : i32
    %c0_i32_2 = arith.constant 0 : i32
    return %arg0, %c0_i32, %c0_i32_0, %c0_i32_1 : i32, i32, i32, i32
  }
  func.func @transform_5(%arg0: i32) -> (i32, i32, i32, i32) {
    %c0_i32 = arith.constant 0 : i32
    %c0_i32_0 = arith.constant 0 : i32
    %c0_i32_1 = arith.constant 0 : i32
    %c0_i32_2 = arith.constant 0 : i32
    return %arg0, %c0_i32, %c0_i32_0, %c0_i32_1 : i32, i32, i32, i32
  }
}

module attributes {stable_mosaic.version = 11 : i64} {
  func.func @_absmax_scale_kernel(%arg0: i32, %arg1: memref<16x16xf32, #tpu.memory_space<vmem>>, %arg2: memref<1x1xf32, #tpu.memory_space<smem>>, %arg3: memref<1xf32, #tpu.memory_space<smem>>) attributes {dimension_semantics = [#tpu.dimension_semantics<arbitrary>], iteration_bounds = array<i64: 2>, scalar_prefetch = 0 : i64, scratch_operands = 1 : i64, tpu.core_type = #tpu.core_type<tc>, window_params = [{transform_indices = @transform_0, window_bounds = array<i64: 16, 16>}, {transform_indices = @transform_1, window_bounds = array<i64: 1, 1>}]} {
    %c0_i32 = arith.constant 0 : i32
    %0 = arith.cmpi eq, %arg0, %c0_i32 : i32
    %1 = arith.extui %0 : i1 to i32
    %c0_i32_0 = arith.constant 0 : i32
    %2 = arith.cmpi ne, %1, %c0_i32_0 : i32
    scf.if %2 {
      %cst_5 = arith.constant 0.000000e+00 : f32
      %c0_6 = arith.constant 0 : index
      %15 = memref.load %arg3[%c0_6] : memref<1xf32, #tpu.memory_space<smem>>
      memref.store %cst_5, %arg3[%c0_6] : memref<1xf32, #tpu.memory_space<smem>>
    } else {
    }
    %c0 = arith.constant 0 : index
    %3 = memref.load %arg3[%c0] : memref<1xf32, #tpu.memory_space<smem>>
    %c0_1 = arith.constant 0 : index
    %c0_2 = arith.constant 0 : index
    %4 = vector.load %arg1[%c0_1, %c0_2] : memref<16x16xf32, #tpu.memory_space<vmem>>, vector<16x16xf32>
    %5 = math.absf %4 : vector<16x16xf32>
    %6 = vector.shape_cast %5 : vector<16x16xf32> to vector<1x16x16xf32>
    %cst = arith.constant dense<0xFF800000> : vector<1xf32>
    %7 = vector.multi_reduction <maximumf>, %6, %cst [1, 2] : vector<1x16x16xf32> to vector<1xf32>
    %8 = vector.shape_cast %7 : vector<1xf32> to vector<1x1x1xf32>
    %9 = vector.extract %8[0, 0, 0] : f32 from vector<1x1x1xf32>
    %10 = arith.maximumf %3, %9 : f32
    %c0_3 = arith.constant 0 : index
    %11 = memref.load %arg3[%c0_3] : memref<1xf32, #tpu.memory_space<smem>>
    memref.store %10, %arg3[%c0_3] : memref<1xf32, #tpu.memory_space<smem>>
    %c1_i32 = arith.constant 1 : i32
    %12 = arith.cmpi eq, %arg0, %c1_i32 : i32
    %13 = arith.extui %12 : i1 to i32
    %c0_i32_4 = arith.constant 0 : i32
    %14 = arith.cmpi ne, %13, %c0_i32_4 : i32
    scf.if %14 {
      %c0_5 = arith.constant 0 : index
      %15 = memref.load %arg3[%c0_5] : memref<1xf32, #tpu.memory_space<smem>>
      %cst_6 = arith.constant 2.000000e-02 : f32
      %16 = arith.cmpf olt, %15, %cst_6 : f32
      %cst_7 = arith.constant 5.000000e-02 : f32
      %17 = arith.cmpf olt, %15, %cst_7 : f32
      %cst_8 = arith.constant 1.000000e-01 : f32
      %18 = arith.cmpf olt, %15, %cst_8 : f32
      %cst_9 = arith.constant 5.000000e-01 : f32
      %19 = arith.cmpf olt, %15, %cst_9 : f32
      %cst_10 = arith.constant 4.000000e+00 : f32
      %cst_11 = arith.constant 1.000000e+00 : f32
      %20 = arith.select %19, %cst_10, %cst_11 : f32
      %cst_12 = arith.constant 1.000000e+01 : f32
      %21 = arith.select %18, %cst_12, %20 : f32
      %cst_13 = arith.constant 2.000000e+01 : f32
      %22 = arith.select %17, %cst_13, %21 : f32
      %cst_14 = arith.constant 5.000000e+01 : f32
      %23 = arith.select %16, %cst_14, %22 : f32
      %c0_15 = arith.constant 0 : index
      %c0_16 = arith.constant 0 : index
      %24 = memref.load %arg2[%c0_15, %c0_16] : memref<1x1xf32, #tpu.memory_space<smem>>
      memref.store %23, %arg2[%c0_15, %c0_16] : memref<1x1xf32, #tpu.memory_space<smem>>
    } else {
    }
    return
  }
  func.func @transform_0(%arg0: i32) -> (i32, i32) {
    %c0_i32 = arith.constant 0 : i32
    %c0_i32_0 = arith.constant 0 : i32
    return %arg0, %c0_i32 : i32, i32
  }
  func.func @transform_1(%arg0: i32) -> (i32, i32) {
    %c0_i32 = arith.constant 0 : i32
    %c0_i32_0 = arith.constant 0 : i32
    %c0_i32_1 = arith.constant 0 : i32
    return %c0_i32, %c0_i32_0 : i32, i32
  }
}

module attributes {stable_mosaic.version = 11 : i64} {
  func.func @_shift_matmul_kernel(%arg0: i32, %arg1: memref<96x16xf32, #tpu.memory_space<vmem>>, %arg2: memref<9x16x64xbf16, #tpu.memory_space<vmem>>, %arg3: memref<1x64xf32, #tpu.memory_space<vmem>>, %arg4: memref<40x64xf32, #tpu.memory_space<vmem>>) attributes {dimension_semantics = [#tpu.dimension_semantics<parallel>], iteration_bounds = array<i64: 2>, scalar_prefetch = 0 : i64, scratch_operands = 0 : i64, tpu.core_type = #tpu.core_type<tc>, window_params = [{pipeline_mode = #tpu.pipeline_mode<synchronous>, transform_indices = @transform_0, window_bounds = array<i64: 96, 16>}, {pipeline_mode = #tpu.pipeline_mode<synchronous>, transform_indices = @transform_1, window_bounds = array<i64: 9, 16, 64>}, {pipeline_mode = #tpu.pipeline_mode<synchronous>, transform_indices = @transform_2, window_bounds = array<i64: 1, 64>}, {transform_indices = @transform_3, window_bounds = array<i64: 40, 64>}]} {
    %c40_i32 = arith.constant 40 : i32
    %0 = arith.muli %arg0, %c40_i32 : i32
    %cst = arith.constant 0.000000e+00 : f32
    %1 = vector.broadcast %cst : f32 to vector<40x64xf32>
    %c0_i32 = arith.constant 0 : i32
    %2 = arith.addi %0, %c0_i32 : i32
    %3 = arith.index_cast %2 : i32 to index
    %c0 = arith.constant 0 : index
    %4 = vector.load %arg1[%3, %c0] : memref<96x16xf32, #tpu.memory_space<vmem>>, vector<40x16xf32>
    %5 = arith.truncf %4 : vector<40x16xf32> to vector<40x16xbf16>
    %c0_0 = arith.constant 0 : index
    %c0_1 = arith.constant 0 : index
    %c0_2 = arith.constant 0 : index
    %6 = vector.load %arg2[%c0_0, %c0_1, %c0_2] : memref<9x16x64xbf16, #tpu.memory_space<vmem>>, vector<1x16x64xbf16>
    %7 = vector.shape_cast %6 : vector<1x16x64xbf16> to vector<16x64xbf16>
    %cst_3 = arith.constant dense<0.000000e+00> : vector<40x64xf32>
    %8 = tpu.matmul %5, %7, %cst_3 {dimension_numbers = #tpu.dot_dimension_numbers<[1], [0], [0], [1], [0, 0, 1, 1], [], []>} : vector<40x16xbf16>, vector<16x64xbf16>, vector<40x64xf32> -> vector<40x64xf32>
    %9 = arith.addf %1, %8 : vector<40x64xf32>
    %c1_i32 = arith.constant 1 : i32
    %10 = arith.addi %0, %c1_i32 : i32
    %11 = arith.index_cast %10 : i32 to index
    %c0_4 = arith.constant 0 : index
    %12 = vector.load %arg1[%11, %c0_4] : memref<96x16xf32, #tpu.memory_space<vmem>>, vector<40x16xf32>
    %13 = arith.truncf %12 : vector<40x16xf32> to vector<40x16xbf16>
    %c1 = arith.constant 1 : index
    %c0_5 = arith.constant 0 : index
    %c0_6 = arith.constant 0 : index
    %14 = vector.load %arg2[%c1, %c0_5, %c0_6] : memref<9x16x64xbf16, #tpu.memory_space<vmem>>, vector<1x16x64xbf16>
    %15 = vector.shape_cast %14 : vector<1x16x64xbf16> to vector<16x64xbf16>
    %cst_7 = arith.constant dense<0.000000e+00> : vector<40x64xf32>
    %16 = tpu.matmul %13, %15, %cst_7 {dimension_numbers = #tpu.dot_dimension_numbers<[1], [0], [0], [1], [0, 0, 1, 1], [], []>} : vector<40x16xbf16>, vector<16x64xbf16>, vector<40x64xf32> -> vector<40x64xf32>
    %17 = arith.addf %9, %16 : vector<40x64xf32>
    %c2_i32 = arith.constant 2 : i32
    %18 = arith.addi %0, %c2_i32 : i32
    %19 = arith.index_cast %18 : i32 to index
    %c0_8 = arith.constant 0 : index
    %20 = vector.load %arg1[%19, %c0_8] : memref<96x16xf32, #tpu.memory_space<vmem>>, vector<40x16xf32>
    %21 = arith.truncf %20 : vector<40x16xf32> to vector<40x16xbf16>
    %c2 = arith.constant 2 : index
    %c0_9 = arith.constant 0 : index
    %c0_10 = arith.constant 0 : index
    %22 = vector.load %arg2[%c2, %c0_9, %c0_10] : memref<9x16x64xbf16, #tpu.memory_space<vmem>>, vector<1x16x64xbf16>
    %23 = vector.shape_cast %22 : vector<1x16x64xbf16> to vector<16x64xbf16>
    %cst_11 = arith.constant dense<0.000000e+00> : vector<40x64xf32>
    %24 = tpu.matmul %21, %23, %cst_11 {dimension_numbers = #tpu.dot_dimension_numbers<[1], [0], [0], [1], [0, 0, 1, 1], [], []>} : vector<40x16xbf16>, vector<16x64xbf16>, vector<40x64xf32> -> vector<40x64xf32>
    %25 = arith.addf %17, %24 : vector<40x64xf32>
    %c6_i32 = arith.constant 6 : i32
    %26 = arith.addi %0, %c6_i32 : i32
    %27 = arith.index_cast %26 : i32 to index
    %c0_12 = arith.constant 0 : index
    %28 = vector.load %arg1[%27, %c0_12] : memref<96x16xf32, #tpu.memory_space<vmem>>, vector<40x16xf32>
    %29 = arith.truncf %28 : vector<40x16xf32> to vector<40x16xbf16>
    %c3 = arith.constant 3 : index
    %c0_13 = arith.constant 0 : index
    %c0_14 = arith.constant 0 : index
    %30 = vector.load %arg2[%c3, %c0_13, %c0_14] : memref<9x16x64xbf16, #tpu.memory_space<vmem>>, vector<1x16x64xbf16>
    %31 = vector.shape_cast %30 : vector<1x16x64xbf16> to vector<16x64xbf16>
    %cst_15 = arith.constant dense<0.000000e+00> : vector<40x64xf32>
    %32 = tpu.matmul %29, %31, %cst_15 {dimension_numbers = #tpu.dot_dimension_numbers<[1], [0], [0], [1], [0, 0, 1, 1], [], []>} : vector<40x16xbf16>, vector<16x64xbf16>, vector<40x64xf32> -> vector<40x64xf32>
    %33 = arith.addf %25, %32 : vector<40x64xf32>
    %c7_i32 = arith.constant 7 : i32
    %34 = arith.addi %0, %c7_i32 : i32
    %35 = arith.index_cast %34 : i32 to index
    %c0_16 = arith.constant 0 : index
    %36 = vector.load %arg1[%35, %c0_16] : memref<96x16xf32, #tpu.memory_space<vmem>>, vector<40x16xf32>
    %37 = arith.truncf %36 : vector<40x16xf32> to vector<40x16xbf16>
    %c4 = arith.constant 4 : index
    %c0_17 = arith.constant 0 : index
    %c0_18 = arith.constant 0 : index
    %38 = vector.load %arg2[%c4, %c0_17, %c0_18] : memref<9x16x64xbf16, #tpu.memory_space<vmem>>, vector<1x16x64xbf16>
    %39 = vector.shape_cast %38 : vector<1x16x64xbf16> to vector<16x64xbf16>
    %cst_19 = arith.constant dense<0.000000e+00> : vector<40x64xf32>
    %40 = tpu.matmul %37, %39, %cst_19 {dimension_numbers = #tpu.dot_dimension_numbers<[1], [0], [0], [1], [0, 0, 1, 1], [], []>} : vector<40x16xbf16>, vector<16x64xbf16>, vector<40x64xf32> -> vector<40x64xf32>
    %41 = arith.addf %33, %40 : vector<40x64xf32>
    %c8_i32 = arith.constant 8 : i32
    %42 = arith.addi %0, %c8_i32 : i32
    %43 = arith.index_cast %42 : i32 to index
    %c0_20 = arith.constant 0 : index
    %44 = vector.load %arg1[%43, %c0_20] : memref<96x16xf32, #tpu.memory_space<vmem>>, vector<40x16xf32>
    %45 = arith.truncf %44 : vector<40x16xf32> to vector<40x16xbf16>
    %c5 = arith.constant 5 : index
    %c0_21 = arith.constant 0 : index
    %c0_22 = arith.constant 0 : index
    %46 = vector.load %arg2[%c5, %c0_21, %c0_22] : memref<9x16x64xbf16, #tpu.memory_space<vmem>>, vector<1x16x64xbf16>
    %47 = vector.shape_cast %46 : vector<1x16x64xbf16> to vector<16x64xbf16>
    %cst_23 = arith.constant dense<0.000000e+00> : vector<40x64xf32>
    %48 = tpu.matmul %45, %47, %cst_23 {dimension_numbers = #tpu.dot_dimension_numbers<[1], [0], [0], [1], [0, 0, 1, 1], [], []>} : vector<40x16xbf16>, vector<16x64xbf16>, vector<40x64xf32> -> vector<40x64xf32>
    %49 = arith.addf %41, %48 : vector<40x64xf32>
    %c12_i32 = arith.constant 12 : i32
    %50 = arith.addi %0, %c12_i32 : i32
    %51 = arith.index_cast %50 : i32 to index
    %c0_24 = arith.constant 0 : index
    %52 = vector.load %arg1[%51, %c0_24] : memref<96x16xf32, #tpu.memory_space<vmem>>, vector<40x16xf32>
    %53 = arith.truncf %52 : vector<40x16xf32> to vector<40x16xbf16>
    %c6 = arith.constant 6 : index
    %c0_25 = arith.constant 0 : index
    %c0_26 = arith.constant 0 : index
    %54 = vector.load %arg2[%c6, %c0_25, %c0_26] : memref<9x16x64xbf16, #tpu.memory_space<vmem>>, vector<1x16x64xbf16>
    %55 = vector.shape_cast %54 : vector<1x16x64xbf16> to vector<16x64xbf16>
    %cst_27 = arith.constant dense<0.000000e+00> : vector<40x64xf32>
    %56 = tpu.matmul %53, %55, %cst_27 {dimension_numbers = #tpu.dot_dimension_numbers<[1], [0], [0], [1], [0, 0, 1, 1], [], []>} : vector<40x16xbf16>, vector<16x64xbf16>, vector<40x64xf32> -> vector<40x64xf32>
    %57 = arith.addf %49, %56 : vector<40x64xf32>
    %c13_i32 = arith.constant 13 : i32
    %58 = arith.addi %0, %c13_i32 : i32
    %59 = arith.index_cast %58 : i32 to index
    %c0_28 = arith.constant 0 : index
    %60 = vector.load %arg1[%59, %c0_28] : memref<96x16xf32, #tpu.memory_space<vmem>>, vector<40x16xf32>
    %61 = arith.truncf %60 : vector<40x16xf32> to vector<40x16xbf16>
    %c7 = arith.constant 7 : index
    %c0_29 = arith.constant 0 : index
    %c0_30 = arith.constant 0 : index
    %62 = vector.load %arg2[%c7, %c0_29, %c0_30] : memref<9x16x64xbf16, #tpu.memory_space<vmem>>, vector<1x16x64xbf16>
    %63 = vector.shape_cast %62 : vector<1x16x64xbf16> to vector<16x64xbf16>
    %cst_31 = arith.constant dense<0.000000e+00> : vector<40x64xf32>
    %64 = tpu.matmul %61, %63, %cst_31 {dimension_numbers = #tpu.dot_dimension_numbers<[1], [0], [0], [1], [0, 0, 1, 1], [], []>} : vector<40x16xbf16>, vector<16x64xbf16>, vector<40x64xf32> -> vector<40x64xf32>
    %65 = arith.addf %57, %64 : vector<40x64xf32>
    %c14_i32 = arith.constant 14 : i32
    %66 = arith.addi %0, %c14_i32 : i32
    %67 = arith.index_cast %66 : i32 to index
    %c0_32 = arith.constant 0 : index
    %68 = vector.load %arg1[%67, %c0_32] : memref<96x16xf32, #tpu.memory_space<vmem>>, vector<40x16xf32>
    %69 = arith.truncf %68 : vector<40x16xf32> to vector<40x16xbf16>
    %c8 = arith.constant 8 : index
    %c0_33 = arith.constant 0 : index
    %c0_34 = arith.constant 0 : index
    %70 = vector.load %arg2[%c8, %c0_33, %c0_34] : memref<9x16x64xbf16, #tpu.memory_space<vmem>>, vector<1x16x64xbf16>
    %71 = vector.shape_cast %70 : vector<1x16x64xbf16> to vector<16x64xbf16>
    %cst_35 = arith.constant dense<0.000000e+00> : vector<40x64xf32>
    %72 = tpu.matmul %69, %71, %cst_35 {dimension_numbers = #tpu.dot_dimension_numbers<[1], [0], [0], [1], [0, 0, 1, 1], [], []>} : vector<40x16xbf16>, vector<16x64xbf16>, vector<40x64xf32> -> vector<40x64xf32>
    %73 = arith.addf %65, %72 : vector<40x64xf32>
    %c0_36 = arith.constant 0 : index
    %c0_37 = arith.constant 0 : index
    %74 = vector.load %arg3[%c0_36, %c0_37] : memref<1x64xf32, #tpu.memory_space<vmem>>, vector<1x64xf32>
    %75 = vector.broadcast %74 : vector<1x64xf32> to vector<40x64xf32>
    %76 = arith.addf %73, %75 : vector<40x64xf32>
    %c0_38 = arith.constant 0 : index
    %c0_39 = arith.constant 0 : index
    %77 = vector.load %arg4[%c0_38, %c0_39] : memref<40x64xf32, #tpu.memory_space<vmem>>, vector<40x64xf32>
    tpu.vector_store %arg4[%c0_38, %c0_39], %76 {strides = array<i32>} : memref<40x64xf32, #tpu.memory_space<vmem>>, vector<40x64xf32>,
    return
  }
  func.func @transform_0(%arg0: i32) -> (i32, i32) {
    %c0_i32 = arith.constant 0 : i32
    %c0_i32_0 = arith.constant 0 : i32
    %c0_i32_1 = arith.constant 0 : i32
    return %c0_i32, %c0_i32_0 : i32, i32
  }
  func.func @transform_1(%arg0: i32) -> (i32, i32, i32) {
    %c0_i32 = arith.constant 0 : i32
    %c0_i32_0 = arith.constant 0 : i32
    %c0_i32_1 = arith.constant 0 : i32
    %c0_i32_2 = arith.constant 0 : i32
    return %c0_i32, %c0_i32_0, %c0_i32_1 : i32, i32, i32
  }
  func.func @transform_2(%arg0: i32) -> (i32, i32) {
    %c0_i32 = arith.constant 0 : i32
    %c0_i32_0 = arith.constant 0 : i32
    %c0_i32_1 = arith.constant 0 : i32
    return %c0_i32, %c0_i32_0 : i32, i32
  }
  func.func @transform_3(%arg0: i32) -> (i32, i32) {
    %c0_i32 = arith.constant 0 : i32
    %c0_i32_0 = arith.constant 0 : i32
    return %arg0, %c0_i32 : i32, i32
  }
}

module attributes {stable_mosaic.version = 11 : i64} {
  func.func @_quant_entropy_kernel(%arg0: i32, %arg1: memref<1x1xf32, #tpu.memory_space<smem>>, %arg2: memref<16x16xf32, #tpu.memory_space<vmem>>, %arg3: memref<1x16xf32, #tpu.memory_space<vmem>>, %arg4: memref<3x16xf32, #tpu.memory_space<vmem>>, %arg5: memref<27x16xf32, #tpu.memory_space<vmem>>, %arg6: memref<3x16xf32, #tpu.memory_space<vmem>>, %arg7: memref<12x16xf32, #tpu.memory_space<vmem>>, %arg8: memref<1x16xf32, #tpu.memory_space<vmem>>, %arg9: memref<12x16xf32, #tpu.memory_space<vmem>>, %arg10: memref<16x16xf32, #tpu.memory_space<vmem>>, %arg11: memref<16x16xf32, #tpu.memory_space<vmem>>, %arg12: memref<16x16xf32, #tpu.memory_space<vmem>>) attributes {dimension_semantics = [#tpu.dimension_semantics<parallel>], iteration_bounds = array<i64: 2>, scalar_prefetch = 0 : i64, scratch_operands = 0 : i64, tpu.core_type = #tpu.core_type<tc>, window_params = [{transform_indices = @transform_0, window_bounds = array<i64: 1, 1>}, {transform_indices = @transform_1, window_bounds = array<i64: 16, 16>}, {pipeline_mode = #tpu.pipeline_mode<synchronous>, transform_indices = @transform_2, window_bounds = array<i64: 1, 16>}, {pipeline_mode = #tpu.pipeline_mode<synchronous>, transform_indices = @transform_3, window_bounds = array<i64: 3, 16>}, {pipeline_mode = #tpu.pipeline_mode<synchronous>, transform_indices = @transform_4, window_bounds = array<i64: 27, 16>}, {pipeline_mode = #tpu.pipeline_mode<synchronous>, transform_indices = @transform_5, window_bounds = array<i64: 3, 16>}, {pipeline_mode = #tpu.pipeline_mode<synchronous>, transform_indices = @transform_6, window_bounds = array<i64: 12, 16>}, {pipeline_mode = #tpu.pipeline_mode<synchronous>, transform_indices = @transform_7, window_bounds = array<i64: 1, 16>}, {pipeline_mode = #tpu.pipeline_mode<synchronous>, transform_indices = @transform_8, window_bounds = array<i64: 12, 16>}, {transform_indices = @transform_9, window_bounds = array<i64: 16, 16>}, {transform_indices = @transform_10, window_bounds = array<i64: 16, 16>}, {transform_indices = @transform_11, window_bounds = array<i64: 16, 16>}]} {
    %c0 = arith.constant 0 : index
    %c0_0 = arith.constant 0 : index
    %0 = memref.load %arg1[%c0, %c0_0] : memref<1x1xf32, #tpu.memory_space<smem>>
    %c0_1 = arith.constant 0 : index
    %c0_2 = arith.constant 0 : index
    %1 = vector.load %arg2[%c0_1, %c0_2] : memref<16x16xf32, #tpu.memory_space<vmem>>, vector<16x16xf32>
    %2 = vector.broadcast %0 : f32 to vector<16x16xf32>
    %3 = arith.mulf %1, %2 : vector<16x16xf32>
    %4 = math.roundeven %3 : vector<16x16xf32>
    %5 = vector.broadcast %0 : f32 to vector<16x16xf32>
    %6 = arith.divf %4, %5 : vector<16x16xf32>
    %c0_3 = arith.constant 0 : index
    %c0_4 = arith.constant 0 : index
    %7 = vector.load %arg3[%c0_3, %c0_4] : memref<1x16xf32, #tpu.memory_space<vmem>>, vector<1x16xf32>
    %8 = vector.broadcast %7 : vector<1x16xf32> to vector<16x16xf32>
    %9 = arith.subf %6, %8 : vector<16x16xf32>
    %10 = math.roundeven %9 : vector<16x16xf32>
    %11 = vector.broadcast %7 : vector<1x16xf32> to vector<16x16xf32>
    %12 = arith.addf %10, %11 : vector<16x16xf32>
    %cst = arith.constant 5.000000e-01 : f32
    %13 = vector.broadcast %cst : f32 to vector<16x16xf32>
    %14 = arith.subf %12, %13 : vector<16x16xf32>
    %cst_5 = arith.constant 5.000000e-01 : f32
    %15 = vector.broadcast %cst_5 : f32 to vector<16x16xf32>
    %16 = arith.addf %12, %15 : vector<16x16xf32>
    %17 = tpu.concatenate %14, %16 in 0 : vector<16x16xf32>, vector<16x16xf32> -> vector<32x16xf32>
    %c0_6 = arith.constant 0 : index
    %c0_7 = arith.constant 0 : index
    %18 = vector.load %arg4[%c0_6, %c0_7] : memref<3x16xf32, #tpu.memory_space<vmem>>, vector<3x16xf32>
    %c0_8 = arith.constant 0 : index
    %c0_9 = arith.constant 0 : index
    %19 = vector.load %arg5[%c0_8, %c0_9] : memref<27x16xf32, #tpu.memory_space<vmem>>, vector<27x16xf32>
    %c0_10 = arith.constant 0 : index
    %c0_11 = arith.constant 0 : index
    %20 = vector.load %arg6[%c0_10, %c0_11] : memref<3x16xf32, #tpu.memory_space<vmem>>, vector<3x16xf32>
    %c0_12 = arith.constant 0 : index
    %c0_13 = arith.constant 0 : index
    %21 = vector.load %arg7[%c0_12, %c0_13] : memref<12x16xf32, #tpu.memory_space<vmem>>, vector<12x16xf32>
    %c0_14 = arith.constant 0 : index
    %c0_15 = arith.constant 0 : index
    %22 = vector.load %arg8[%c0_14, %c0_15] : memref<1x16xf32, #tpu.memory_space<vmem>>, vector<1x16xf32>
    %c0_16 = arith.constant 0 : index
    %c0_17 = arith.constant 0 : index
    %23 = vector.load %arg9[%c0_16, %c0_17] : memref<12x16xf32, #tpu.memory_space<vmem>>, vector<12x16xf32>
    %24 = vector.extract_strided_slice %18 {offsets = [0, 0], sizes = [1, 16], strides = [1, 1]} : vector<3x16xf32> to vector<1x16xf32>
    %25 = vector.broadcast %24 : vector<1x16xf32> to vector<32x16xf32>
    %26 = arith.mulf %25, %17 : vector<32x16xf32>
    %27 = vector.extract_strided_slice %21 {offsets = [0, 0], sizes = [1, 16], strides = [1, 1]} : vector<12x16xf32> to vector<1x16xf32>
    %28 = vector.broadcast %27 : vector<1x16xf32> to vector<32x16xf32>
    %29 = arith.addf %26, %28 : vector<32x16xf32>
    %30 = vector.extract_strided_slice %23 {offsets = [0, 0], sizes = [1, 16], strides = [1, 1]} : vector<12x16xf32> to vector<1x16xf32>
    %31 = math.tanh %29 : vector<32x16xf32>
    %32 = vector.broadcast %30 : vector<1x16xf32> to vector<32x16xf32>
    %33 = arith.mulf %32, %31 : vector<32x16xf32>
    %34 = arith.addf %29, %33 : vector<32x16xf32>
    %35 = vector.extract_strided_slice %18 {offsets = [1, 0], sizes = [1, 16], strides = [1, 1]} : vector<3x16xf32> to vector<1x16xf32>
    %36 = vector.broadcast %35 : vector<1x16xf32> to vector<32x16xf32>
    %37 = arith.mulf %36, %17 : vector<32x16xf32>
    %38 = vector.extract_strided_slice %21 {offsets = [1, 0], sizes = [1, 16], strides = [1, 1]} : vector<12x16xf32> to vector<1x16xf32>
    %39 = vector.broadcast %38 : vector<1x16xf32> to vector<32x16xf32>
    %40 = arith.addf %37, %39 : vector<32x16xf32>
    %41 = vector.extract_strided_slice %23 {offsets = [1, 0], sizes = [1, 16], strides = [1, 1]} : vector<12x16xf32> to vector<1x16xf32>
    %42 = math.tanh %40 : vector<32x16xf32>
    %43 = vector.broadcast %41 : vector<1x16xf32> to vector<32x16xf32>
    %44 = arith.mulf %43, %42 : vector<32x16xf32>
    %45 = arith.addf %40, %44 : vector<32x16xf32>
    %46 = vector.extract_strided_slice %18 {offsets = [2, 0], sizes = [1, 16], strides = [1, 1]} : vector<3x16xf32> to vector<1x16xf32>
    %47 = vector.broadcast %46 : vector<1x16xf32> to vector<32x16xf32>
    %48 = arith.mulf %47, %17 : vector<32x16xf32>
    %49 = vector.extract_strided_slice %21 {offsets = [2, 0], sizes = [1, 16], strides = [1, 1]} : vector<12x16xf32> to vector<1x16xf32>
    %50 = vector.broadcast %49 : vector<1x16xf32> to vector<32x16xf32>
    %51 = arith.addf %48, %50 : vector<32x16xf32>
    %52 = vector.extract_strided_slice %23 {offsets = [2, 0], sizes = [1, 16], strides = [1, 1]} : vector<12x16xf32> to vector<1x16xf32>
    %53 = math.tanh %51 : vector<32x16xf32>
    %54 = vector.broadcast %52 : vector<1x16xf32> to vector<32x16xf32>
    %55 = arith.mulf %54, %53 : vector<32x16xf32>
    %56 = arith.addf %51, %55 : vector<32x16xf32>
    %57 = vector.extract_strided_slice %21 {offsets = [3, 0], sizes = [1, 16], strides = [1, 1]} : vector<12x16xf32> to vector<1x16xf32>
    %58 = vector.extract_strided_slice %19 {offsets = [0, 0], sizes = [1, 16], strides = [1, 1]} : vector<27x16xf32> to vector<1x16xf32>
    %59 = vector.broadcast %58 : vector<1x16xf32> to vector<32x16xf32>
    %60 = arith.mulf %59, %34 : vector<32x16xf32>
    %61 = vector.broadcast %57 : vector<1x16xf32> to vector<32x16xf32>
    %62 = arith.addf %61, %60 : vector<32x16xf32>
    %63 = vector.extract_strided_slice %19 {offsets = [1, 0], sizes = [1, 16], strides = [1, 1]} : vector<27x16xf32> to vector<1x16xf32>
    %64 = vector.broadcast %63 : vector<1x16xf32> to vector<32x16xf32>
    %65 = arith.mulf %64, %45 : vector<32x16xf32>
    %66 = arith.addf %62, %65 : vector<32x16xf32>
    %67 = vector.extract_strided_slice %19 {offsets = [2, 0], sizes = [1, 16], strides = [1, 1]} : vector<27x16xf32> to vector<1x16xf32>
    %68 = vector.broadcast %67 : vector<1x16xf32> to vector<32x16xf32>
    %69 = arith.mulf %68, %56 : vector<32x16xf32>
    %70 = arith.addf %66, %69 : vector<32x16xf32>
    %71 = vector.extract_strided_slice %23 {offsets = [3, 0], sizes = [1, 16], strides = [1, 1]} : vector<12x16xf32> to vector<1x16xf32>
    %72 = math.tanh %70 : vector<32x16xf32>
    %73 = vector.broadcast %71 : vector<1x16xf32> to vector<32x16xf32>
    %74 = arith.mulf %73, %72 : vector<32x16xf32>
    %75 = arith.addf %70, %74 : vector<32x16xf32>
    %76 = vector.extract_strided_slice %21 {offsets = [4, 0], sizes = [1, 16], strides = [1, 1]} : vector<12x16xf32> to vector<1x16xf32>
    %77 = vector.extract_strided_slice %19 {offsets = [3, 0], sizes = [1, 16], strides = [1, 1]} : vector<27x16xf32> to vector<1x16xf32>
    %78 = vector.broadcast %77 : vector<1x16xf32> to vector<32x16xf32>
    %79 = arith.mulf %78, %34 : vector<32x16xf32>
    %80 = vector.broadcast %76 : vector<1x16xf32> to vector<32x16xf32>
    %81 = arith.addf %80, %79 : vector<32x16xf32>
    %82 = vector.extract_strided_slice %19 {offsets = [4, 0], sizes = [1, 16], strides = [1, 1]} : vector<27x16xf32> to vector<1x16xf32>
    %83 = vector.broadcast %82 : vector<1x16xf32> to vector<32x16xf32>
    %84 = arith.mulf %83, %45 : vector<32x16xf32>
    %85 = arith.addf %81, %84 : vector<32x16xf32>
    %86 = vector.extract_strided_slice %19 {offsets = [5, 0], sizes = [1, 16], strides = [1, 1]} : vector<27x16xf32> to vector<1x16xf32>
    %87 = vector.broadcast %86 : vector<1x16xf32> to vector<32x16xf32>
    %88 = arith.mulf %87, %56 : vector<32x16xf32>
    %89 = arith.addf %85, %88 : vector<32x16xf32>
    %90 = vector.extract_strided_slice %23 {offsets = [4, 0], sizes = [1, 16], strides = [1, 1]} : vector<12x16xf32> to vector<1x16xf32>
    %91 = math.tanh %89 : vector<32x16xf32>
    %92 = vector.broadcast %90 : vector<1x16xf32> to vector<32x16xf32>
    %93 = arith.mulf %92, %91 : vector<32x16xf32>
    %94 = arith.addf %89, %93 : vector<32x16xf32>
    %95 = vector.extract_strided_slice %21 {offsets = [5, 0], sizes = [1, 16], strides = [1, 1]} : vector<12x16xf32> to vector<1x16xf32>
    %96 = vector.extract_strided_slice %19 {offsets = [6, 0], sizes = [1, 16], strides = [1, 1]} : vector<27x16xf32> to vector<1x16xf32>
    %97 = vector.broadcast %96 : vector<1x16xf32> to vector<32x16xf32>
    %98 = arith.mulf %97, %34 : vector<32x16xf32>
    %99 = vector.broadcast %95 : vector<1x16xf32> to vector<32x16xf32>
    %100 = arith.addf %99, %98 : vector<32x16xf32>
    %101 = vector.extract_strided_slice %19 {offsets = [7, 0], sizes = [1, 16], strides = [1, 1]} : vector<27x16xf32> to vector<1x16xf32>
    %102 = vector.broadcast %101 : vector<1x16xf32> to vector<32x16xf32>
    %103 = arith.mulf %102, %45 : vector<32x16xf32>
    %104 = arith.addf %100, %103 : vector<32x16xf32>
    %105 = vector.extract_strided_slice %19 {offsets = [8, 0], sizes = [1, 16], strides = [1, 1]} : vector<27x16xf32> to vector<1x16xf32>
    %106 = vector.broadcast %105 : vector<1x16xf32> to vector<32x16xf32>
    %107 = arith.mulf %106, %56 : vector<32x16xf32>
    %108 = arith.addf %104, %107 : vector<32x16xf32>
    %109 = vector.extract_strided_slice %23 {offsets = [5, 0], sizes = [1, 16], strides = [1, 1]} : vector<12x16xf32> to vector<1x16xf32>
    %110 = math.tanh %108 : vector<32x16xf32>
    %111 = vector.broadcast %109 : vector<1x16xf32> to vector<32x16xf32>
    %112 = arith.mulf %111, %110 : vector<32x16xf32>
    %113 = arith.addf %108, %112 : vector<32x16xf32>
    %114 = vector.extract_strided_slice %21 {offsets = [6, 0], sizes = [1, 16], strides = [1, 1]} : vector<12x16xf32> to vector<1x16xf32>
    %115 = vector.extract_strided_slice %19 {offsets = [9, 0], sizes = [1, 16], strides = [1, 1]} : vector<27x16xf32> to vector<1x16xf32>
    %116 = vector.broadcast %115 : vector<1x16xf32> to vector<32x16xf32>
    %117 = arith.mulf %116, %75 : vector<32x16xf32>
    %118 = vector.broadcast %114 : vector<1x16xf32> to vector<32x16xf32>
    %119 = arith.addf %118, %117 : vector<32x16xf32>
    %120 = vector.extract_strided_slice %19 {offsets = [10, 0], sizes = [1, 16], strides = [1, 1]} : vector<27x16xf32> to vector<1x16xf32>
    %121 = vector.broadcast %120 : vector<1x16xf32> to vector<32x16xf32>
    %122 = arith.mulf %121, %94 : vector<32x16xf32>
    %123 = arith.addf %119, %122 : vector<32x16xf32>
    %124 = vector.extract_strided_slice %19 {offsets = [11, 0], sizes = [1, 16], strides = [1, 1]} : vector<27x16xf32> to vector<1x16xf32>
    %125 = vector.broadcast %124 : vector<1x16xf32> to vector<32x16xf32>
    %126 = arith.mulf %125, %113 : vector<32x16xf32>
    %127 = arith.addf %123, %126 : vector<32x16xf32>
    %128 = vector.extract_strided_slice %23 {offsets = [6, 0], sizes = [1, 16], strides = [1, 1]} : vector<12x16xf32> to vector<1x16xf32>
    %129 = math.tanh %127 : vector<32x16xf32>
    %130 = vector.broadcast %128 : vector<1x16xf32> to vector<32x16xf32>
    %131 = arith.mulf %130, %129 : vector<32x16xf32>
    %132 = arith.addf %127, %131 : vector<32x16xf32>
    %133 = vector.extract_strided_slice %21 {offsets = [7, 0], sizes = [1, 16], strides = [1, 1]} : vector<12x16xf32> to vector<1x16xf32>
    %134 = vector.extract_strided_slice %19 {offsets = [12, 0], sizes = [1, 16], strides = [1, 1]} : vector<27x16xf32> to vector<1x16xf32>
    %135 = vector.broadcast %134 : vector<1x16xf32> to vector<32x16xf32>
    %136 = arith.mulf %135, %75 : vector<32x16xf32>
    %137 = vector.broadcast %133 : vector<1x16xf32> to vector<32x16xf32>
    %138 = arith.addf %137, %136 : vector<32x16xf32>
    %139 = vector.extract_strided_slice %19 {offsets = [13, 0], sizes = [1, 16], strides = [1, 1]} : vector<27x16xf32> to vector<1x16xf32>
    %140 = vector.broadcast %139 : vector<1x16xf32> to vector<32x16xf32>
    %141 = arith.mulf %140, %94 : vector<32x16xf32>
    %142 = arith.addf %138, %141 : vector<32x16xf32>
    %143 = vector.extract_strided_slice %19 {offsets = [14, 0], sizes = [1, 16], strides = [1, 1]} : vector<27x16xf32> to vector<1x16xf32>
    %144 = vector.broadcast %143 : vector<1x16xf32> to vector<32x16xf32>
    %145 = arith.mulf %144, %113 : vector<32x16xf32>
    %146 = arith.addf %142, %145 : vector<32x16xf32>
    %147 = vector.extract_strided_slice %23 {offsets = [7, 0], sizes = [1, 16], strides = [1, 1]} : vector<12x16xf32> to vector<1x16xf32>
    %148 = math.tanh %146 : vector<32x16xf32>
    %149 = vector.broadcast %147 : vector<1x16xf32> to vector<32x16xf32>
    %150 = arith.mulf %149, %148 : vector<32x16xf32>
    %151 = arith.addf %146, %150 : vector<32x16xf32>
    %152 = vector.extract_strided_slice %21 {offsets = [8, 0], sizes = [1, 16], strides = [1, 1]} : vector<12x16xf32> to vector<1x16xf32>
    %153 = vector.extract_strided_slice %19 {offsets = [15, 0], sizes = [1, 16], strides = [1, 1]} : vector<27x16xf32> to vector<1x16xf32>
    %154 = vector.broadcast %153 : vector<1x16xf32> to vector<32x16xf32>
    %155 = arith.mulf %154, %75 : vector<32x16xf32>
    %156 = vector.broadcast %152 : vector<1x16xf32> to vector<32x16xf32>
    %157 = arith.addf %156, %155 : vector<32x16xf32>
    %158 = vector.extract_strided_slice %19 {offsets = [16, 0], sizes = [1, 16], strides = [1, 1]} : vector<27x16xf32> to vector<1x16xf32>
    %159 = vector.broadcast %158 : vector<1x16xf32> to vector<32x16xf32>
    %160 = arith.mulf %159, %94 : vector<32x16xf32>
    %161 = arith.addf %157, %160 : vector<32x16xf32>
    %162 = vector.extract_strided_slice %19 {offsets = [17, 0], sizes = [1, 16], strides = [1, 1]} : vector<27x16xf32> to vector<1x16xf32>
    %163 = vector.broadcast %162 : vector<1x16xf32> to vector<32x16xf32>
    %164 = arith.mulf %163, %113 : vector<32x16xf32>
    %165 = arith.addf %161, %164 : vector<32x16xf32>
    %166 = vector.extract_strided_slice %23 {offsets = [8, 0], sizes = [1, 16], strides = [1, 1]} : vector<12x16xf32> to vector<1x16xf32>
    %167 = math.tanh %165 : vector<32x16xf32>
    %168 = vector.broadcast %166 : vector<1x16xf32> to vector<32x16xf32>
    %169 = arith.mulf %168, %167 : vector<32x16xf32>
    %170 = arith.addf %165, %169 : vector<32x16xf32>
    %171 = vector.extract_strided_slice %21 {offsets = [9, 0], sizes = [1, 16], strides = [1, 1]} : vector<12x16xf32> to vector<1x16xf32>
    %172 = vector.extract_strided_slice %19 {offsets = [18, 0], sizes = [1, 16], strides = [1, 1]} : vector<27x16xf32> to vector<1x16xf32>
    %173 = vector.broadcast %172 : vector<1x16xf32> to vector<32x16xf32>
    %174 = arith.mulf %173, %132 : vector<32x16xf32>
    %175 = vector.broadcast %171 : vector<1x16xf32> to vector<32x16xf32>
    %176 = arith.addf %175, %174 : vector<32x16xf32>
    %177 = vector.extract_strided_slice %19 {offsets = [19, 0], sizes = [1, 16], strides = [1, 1]} : vector<27x16xf32> to vector<1x16xf32>
    %178 = vector.broadcast %177 : vector<1x16xf32> to vector<32x16xf32>
    %179 = arith.mulf %178, %151 : vector<32x16xf32>
    %180 = arith.addf %176, %179 : vector<32x16xf32>
    %181 = vector.extract_strided_slice %19 {offsets = [20, 0], sizes = [1, 16], strides = [1, 1]} : vector<27x16xf32> to vector<1x16xf32>
    %182 = vector.broadcast %181 : vector<1x16xf32> to vector<32x16xf32>
    %183 = arith.mulf %182, %170 : vector<32x16xf32>
    %184 = arith.addf %180, %183 : vector<32x16xf32>
    %185 = vector.extract_strided_slice %23 {offsets = [9, 0], sizes = [1, 16], strides = [1, 1]} : vector<12x16xf32> to vector<1x16xf32>
    %186 = math.tanh %184 : vector<32x16xf32>
    %187 = vector.broadcast %185 : vector<1x16xf32> to vector<32x16xf32>
    %188 = arith.mulf %187, %186 : vector<32x16xf32>
    %189 = arith.addf %184, %188 : vector<32x16xf32>
    %190 = vector.extract_strided_slice %21 {offsets = [10, 0], sizes = [1, 16], strides = [1, 1]} : vector<12x16xf32> to vector<1x16xf32>
    %191 = vector.extract_strided_slice %19 {offsets = [21, 0], sizes = [1, 16], strides = [1, 1]} : vector<27x16xf32> to vector<1x16xf32>
    %192 = vector.broadcast %191 : vector<1x16xf32> to vector<32x16xf32>
    %193 = arith.mulf %192, %132 : vector<32x16xf32>
    %194 = vector.broadcast %190 : vector<1x16xf32> to vector<32x16xf32>
    %195 = arith.addf %194, %193 : vector<32x16xf32>
    %196 = vector.extract_strided_slice %19 {offsets = [22, 0], sizes = [1, 16], strides = [1, 1]} : vector<27x16xf32> to vector<1x16xf32>
    %197 = vector.broadcast %196 : vector<1x16xf32> to vector<32x16xf32>
    %198 = arith.mulf %197, %151 : vector<32x16xf32>
    %199 = arith.addf %195, %198 : vector<32x16xf32>
    %200 = vector.extract_strided_slice %19 {offsets = [23, 0], sizes = [1, 16], strides = [1, 1]} : vector<27x16xf32> to vector<1x16xf32>
    %201 = vector.broadcast %200 : vector<1x16xf32> to vector<32x16xf32>
    %202 = arith.mulf %201, %170 : vector<32x16xf32>
    %203 = arith.addf %199, %202 : vector<32x16xf32>
    %204 = vector.extract_strided_slice %23 {offsets = [10, 0], sizes = [1, 16], strides = [1, 1]} : vector<12x16xf32> to vector<1x16xf32>
    %205 = math.tanh %203 : vector<32x16xf32>
    %206 = vector.broadcast %204 : vector<1x16xf32> to vector<32x16xf32>
    %207 = arith.mulf %206, %205 : vector<32x16xf32>
    %208 = arith.addf %203, %207 : vector<32x16xf32>
    %209 = vector.extract_strided_slice %21 {offsets = [11, 0], sizes = [1, 16], strides = [1, 1]} : vector<12x16xf32> to vector<1x16xf32>
    %210 = vector.extract_strided_slice %19 {offsets = [24, 0], sizes = [1, 16], strides = [1, 1]} : vector<27x16xf32> to vector<1x16xf32>
    %211 = vector.broadcast %210 : vector<1x16xf32> to vector<32x16xf32>
    %212 = arith.mulf %211, %132 : vector<32x16xf32>
    %213 = vector.broadcast %209 : vector<1x16xf32> to vector<32x16xf32>
    %214 = arith.addf %213, %212 : vector<32x16xf32>
    %215 = vector.extract_strided_slice %19 {offsets = [25, 0], sizes = [1, 16], strides = [1, 1]} : vector<27x16xf32> to vector<1x16xf32>
    %216 = vector.broadcast %215 : vector<1x16xf32> to vector<32x16xf32>
    %217 = arith.mulf %216, %151 : vector<32x16xf32>
    %218 = arith.addf %214, %217 : vector<32x16xf32>
    %219 = vector.extract_strided_slice %19 {offsets = [26, 0], sizes = [1, 16], strides = [1, 1]} : vector<27x16xf32> to vector<1x16xf32>
    %220 = vector.broadcast %219 : vector<1x16xf32> to vector<32x16xf32>
    %221 = arith.mulf %220, %170 : vector<32x16xf32>
    %222 = arith.addf %218, %221 : vector<32x16xf32>
    %223 = vector.extract_strided_slice %23 {offsets = [11, 0], sizes = [1, 16], strides = [1, 1]} : vector<12x16xf32> to vector<1x16xf32>
    %224 = math.tanh %222 : vector<32x16xf32>
    %225 = vector.broadcast %223 : vector<1x16xf32> to vector<32x16xf32>
    %226 = arith.mulf %225, %224 : vector<32x16xf32>
    %227 = arith.addf %222, %226 : vector<32x16xf32>
    %228 = vector.extract_strided_slice %20 {offsets = [0, 0], sizes = [1, 16], strides = [1, 1]} : vector<3x16xf32> to vector<1x16xf32>
    %229 = vector.broadcast %228 : vector<1x16xf32> to vector<32x16xf32>
    %230 = arith.mulf %229, %189 : vector<32x16xf32>
    %231 = vector.broadcast %22 : vector<1x16xf32> to vector<32x16xf32>
    %232 = arith.addf %231, %230 : vector<32x16xf32>
    %233 = vector.extract_strided_slice %20 {offsets = [1, 0], sizes = [1, 16], strides = [1, 1]} : vector<3x16xf32> to vector<1x16xf32>
    %234 = vector.broadcast %233 : vector<1x16xf32> to vector<32x16xf32>
    %235 = arith.mulf %234, %208 : vector<32x16xf32>
    %236 = arith.addf %232, %235 : vector<32x16xf32>
    %237 = vector.extract_strided_slice %20 {offsets = [2, 0], sizes = [1, 16], strides = [1, 1]} : vector<3x16xf32> to vector<1x16xf32>
    %238 = vector.broadcast %237 : vector<1x16xf32> to vector<32x16xf32>
    %239 = arith.mulf %238, %227 : vector<32x16xf32>
    %240 = arith.addf %236, %239 : vector<32x16xf32>
    %241 = vector.extract_strided_slice %240 {offsets = [0, 0], sizes = [16, 16], strides = [1, 1]} : vector<32x16xf32> to vector<16x16xf32>
    %242 = vector.extract_strided_slice %240 {offsets = [16, 0], sizes = [16, 16], strides = [1, 1]} : vector<32x16xf32> to vector<16x16xf32>
    %243 = arith.addf %241, %242 : vector<16x16xf32>
    %cst_18 = arith.constant 0.000000e+00 : f32
    %244 = vector.broadcast %cst_18 : f32 to vector<16x16xf32>
    %245 = arith.cmpf ogt, %243, %244 : vector<16x16xf32>
    %cst_19 = arith.constant 0.000000e+00 : f32
    %246 = vector.broadcast %cst_19 : f32 to vector<16x16xf32>
    %247 = arith.cmpf olt, %243, %246 : vector<16x16xf32>
    %cst_20 = arith.constant 1.000000e+00 : f32
    %cst_21 = arith.constant 0.000000e+00 : f32
    %248 = vector.broadcast %cst_20 : f32 to vector<16x16xf32>
    %249 = vector.broadcast %cst_21 : f32 to vector<16x16xf32>
    %250 = arith.select %247, %248, %249 : vector<16x16xi1>, vector<16x16xf32>
    %cst_22 = arith.constant -1.000000e+00 : f32
    %251 = vector.broadcast %cst_22 : f32 to vector<16x16xf32>
    %252 = arith.select %245, %251, %250 : vector<16x16xi1>, vector<16x16xf32>
    %253 = arith.mulf %252, %242 : vector<16x16xf32>
    %254 = arith.negf %253 : vector<16x16xf32>
    %255 = math.exp %254 : vector<16x16xf32>
    %cst_23 = arith.constant 1.000000e+00 : f32
    %256 = vector.broadcast %cst_23 : f32 to vector<16x16xf32>
    %257 = arith.addf %256, %255 : vector<16x16xf32>
    %258 = arith.divf %256, %257 : vector<16x16xf32>
    %259 = arith.mulf %252, %241 : vector<16x16xf32>
    %260 = arith.negf %259 : vector<16x16xf32>
    %261 = math.exp %260 : vector<16x16xf32>
    %cst_24 = arith.constant 1.000000e+00 : f32
    %262 = vector.broadcast %cst_24 : f32 to vector<16x16xf32>
    %263 = arith.addf %262, %261 : vector<16x16xf32>
    %264 = arith.divf %262, %263 : vector<16x16xf32>
    %265 = arith.subf %258, %264 : vector<16x16xf32>
    %266 = math.absf %265 : vector<16x16xf32>
    %cst_25 = arith.constant 9.99999971E-10 : f32
    %267 = vector.broadcast %cst_25 : f32 to vector<16x16xf32>
    %268 = arith.maximumf %266, %267 : vector<16x16xf32>
    %c0_26 = arith.constant 0 : index
    %c0_27 = arith.constant 0 : index
    %269 = vector.load %arg10[%c0_26, %c0_27] : memref<16x16xf32, #tpu.memory_space<vmem>>, vector<16x16xf32>
    tpu.vector_store %arg10[%c0_26, %c0_27], %6 {strides = array<i32>} : memref<16x16xf32, #tpu.memory_space<vmem>>, vector<16x16xf32>,
    %c0_28 = arith.constant 0 : index
    %c0_29 = arith.constant 0 : index
    %270 = vector.load %arg11[%c0_28, %c0_29] : memref<16x16xf32, #tpu.memory_space<vmem>>, vector<16x16xf32>
    tpu.vector_store %arg11[%c0_28, %c0_29], %12 {strides = array<i32>} : memref<16x16xf32, #tpu.memory_space<vmem>>, vector<16x16xf32>,
    %c0_30 = arith.constant 0 : index
    %c0_31 = arith.constant 0 : index
    %271 = vector.load %arg12[%c0_30, %c0_31] : memref<16x16xf32, #tpu.memory_space<vmem>>, vector<16x16xf32>
    tpu.vector_store %arg12[%c0_30, %c0_31], %268 {strides = array<i32>} : memref<16x16xf32, #tpu.memory_space<vmem>>, vector<16x16xf32>,
    return
  }
  func.func @transform_0(%arg0: i32) -> (i32, i32) {
    %c0_i32 = arith.constant 0 : i32
    %c0_i32_0 = arith.constant 0 : i32
    %c0_i32_1 = arith.constant 0 : i32
    return %c0_i32, %c0_i32_0 : i32, i32
  }
  func.func @transform_1(%arg0: i32) -> (i32, i32) {
    %c0_i32 = arith.constant 0 : i32
    %c0_i32_0 = arith.constant 0 : i32
    return %arg0, %c0_i32 : i32, i32
  }
  func.func @transform_2(%arg0: i32) -> (i32, i32) {
    %c0_i32 = arith.constant 0 : i32
    %c0_i32_0 = arith.constant 0 : i32
    %c0_i32_1 = arith.constant 0 : i32
    return %c0_i32, %c0_i32_0 : i32, i32
  }
  func.func @transform_3(%arg0: i32) -> (i32, i32) {
    %c0_i32 = arith.constant 0 : i32
    %c0_i32_0 = arith.constant 0 : i32
    %c0_i32_1 = arith.constant 0 : i32
    return %c0_i32, %c0_i32_0 : i32, i32
  }
  func.func @transform_4(%arg0: i32) -> (i32, i32) {
    %c0_i32 = arith.constant 0 : i32
    %c0_i32_0 = arith.constant 0 : i32
    %c0_i32_1 = arith.constant 0 : i32
    return %c0_i32, %c0_i32_0 : i32, i32
  }
  func.func @transform_5(%arg0: i32) -> (i32, i32) {
    %c0_i32 = arith.constant 0 : i32
    %c0_i32_0 = arith.constant 0 : i32
    %c0_i32_1 = arith.constant 0 : i32
    return %c0_i32, %c0_i32_0 : i32, i32
  }
  func.func @transform_6(%arg0: i32) -> (i32, i32) {
    %c0_i32 = arith.constant 0 : i32
    %c0_i32_0 = arith.constant 0 : i32
    %c0_i32_1 = arith.constant 0 : i32
    return %c0_i32, %c0_i32_0 : i32, i32
  }
  func.func @transform_7(%arg0: i32) -> (i32, i32) {
    %c0_i32 = arith.constant 0 : i32
    %c0_i32_0 = arith.constant 0 : i32
    %c0_i32_1 = arith.constant 0 : i32
    return %c0_i32, %c0_i32_0 : i32, i32
  }
  func.func @transform_8(%arg0: i32) -> (i32, i32) {
    %c0_i32 = arith.constant 0 : i32
    %c0_i32_0 = arith.constant 0 : i32
    %c0_i32_1 = arith.constant 0 : i32
    return %c0_i32, %c0_i32_0 : i32, i32
  }
  func.func @transform_9(%arg0: i32) -> (i32, i32) {
    %c0_i32 = arith.constant 0 : i32
    %c0_i32_0 = arith.constant 0 : i32
    return %arg0, %c0_i32 : i32, i32
  }
  func.func @transform_10(%arg0: i32) -> (i32, i32) {
    %c0_i32 = arith.constant 0 : i32
    %c0_i32_0 = arith.constant 0 : i32
    return %arg0, %c0_i32 : i32, i32
  }
  func.func @transform_11(%arg0: i32) -> (i32, i32) {
    %c0_i32 = arith.constant 0 : i32
    %c0_i32_0 = arith.constant 0 : i32
    return %arg0, %c0_i32 : i32, i32
  }
}

module attributes {stable_mosaic.version = 11 : i64} {
  func.func @_shift_matmul_kernel(%arg0: i32, %arg1: memref<232x16xf32, #tpu.memory_space<vmem>>, %arg2: memref<9x16x64xbf16, #tpu.memory_space<vmem>>, %arg3: memref<1x64xf32, #tpu.memory_space<vmem>>, %arg4: memref<104x64xf32, #tpu.memory_space<vmem>>) attributes {dimension_semantics = [#tpu.dimension_semantics<parallel>], iteration_bounds = array<i64: 2>, scalar_prefetch = 0 : i64, scratch_operands = 0 : i64, tpu.core_type = #tpu.core_type<tc>, window_params = [{pipeline_mode = #tpu.pipeline_mode<synchronous>, transform_indices = @transform_0, window_bounds = array<i64: 232, 16>}, {pipeline_mode = #tpu.pipeline_mode<synchronous>, transform_indices = @transform_1, window_bounds = array<i64: 9, 16, 64>}, {pipeline_mode = #tpu.pipeline_mode<synchronous>, transform_indices = @transform_2, window_bounds = array<i64: 1, 64>}, {transform_indices = @transform_3, window_bounds = array<i64: 104, 64>}]} {
    %c104_i32 = arith.constant 104 : i32
    %0 = arith.muli %arg0, %c104_i32 : i32
    %cst = arith.constant 0.000000e+00 : f32
    %1 = vector.broadcast %cst : f32 to vector<104x64xf32>
    %c0_i32 = arith.constant 0 : i32
    %2 = arith.addi %0, %c0_i32 : i32
    %3 = arith.index_cast %2 : i32 to index
    %c0 = arith.constant 0 : index
    %4 = vector.load %arg1[%3, %c0] : memref<232x16xf32, #tpu.memory_space<vmem>>, vector<104x16xf32>
    %5 = arith.truncf %4 : vector<104x16xf32> to vector<104x16xbf16>
    %c0_0 = arith.constant 0 : index
    %c0_1 = arith.constant 0 : index
    %c0_2 = arith.constant 0 : index
    %6 = vector.load %arg2[%c0_0, %c0_1, %c0_2] : memref<9x16x64xbf16, #tpu.memory_space<vmem>>, vector<1x16x64xbf16>
    %7 = vector.shape_cast %6 : vector<1x16x64xbf16> to vector<16x64xbf16>
    %cst_3 = arith.constant dense<0.000000e+00> : vector<104x64xf32>
    %8 = tpu.matmul %5, %7, %cst_3 {dimension_numbers = #tpu.dot_dimension_numbers<[1], [0], [0], [1], [0, 0, 1, 1], [], []>} : vector<104x16xbf16>, vector<16x64xbf16>, vector<104x64xf32> -> vector<104x64xf32>
    %9 = arith.addf %1, %8 : vector<104x64xf32>
    %c1_i32 = arith.constant 1 : i32
    %10 = arith.addi %0, %c1_i32 : i32
    %11 = arith.index_cast %10 : i32 to index
    %c0_4 = arith.constant 0 : index
    %12 = vector.load %arg1[%11, %c0_4] : memref<232x16xf32, #tpu.memory_space<vmem>>, vector<104x16xf32>
    %13 = arith.truncf %12 : vector<104x16xf32> to vector<104x16xbf16>
    %c1 = arith.constant 1 : index
    %c0_5 = arith.constant 0 : index
    %c0_6 = arith.constant 0 : index
    %14 = vector.load %arg2[%c1, %c0_5, %c0_6] : memref<9x16x64xbf16, #tpu.memory_space<vmem>>, vector<1x16x64xbf16>
    %15 = vector.shape_cast %14 : vector<1x16x64xbf16> to vector<16x64xbf16>
    %cst_7 = arith.constant dense<0.000000e+00> : vector<104x64xf32>
    %16 = tpu.matmul %13, %15, %cst_7 {dimension_numbers = #tpu.dot_dimension_numbers<[1], [0], [0], [1], [0, 0, 1, 1], [], []>} : vector<104x16xbf16>, vector<16x64xbf16>, vector<104x64xf32> -> vector<104x64xf32>
    %17 = arith.addf %9, %16 : vector<104x64xf32>
    %c2_i32 = arith.constant 2 : i32
    %18 = arith.addi %0, %c2_i32 : i32
    %19 = arith.index_cast %18 : i32 to index
    %c0_8 = arith.constant 0 : index
    %20 = vector.load %arg1[%19, %c0_8] : memref<232x16xf32, #tpu.memory_space<vmem>>, vector<104x16xf32>
    %21 = arith.truncf %20 : vector<104x16xf32> to vector<104x16xbf16>
    %c2 = arith.constant 2 : index
    %c0_9 = arith.constant 0 : index
    %c0_10 = arith.constant 0 : index
    %22 = vector.load %arg2[%c2, %c0_9, %c0_10] : memref<9x16x64xbf16, #tpu.memory_space<vmem>>, vector<1x16x64xbf16>
    %23 = vector.shape_cast %22 : vector<1x16x64xbf16> to vector<16x64xbf16>
    %cst_11 = arith.constant dense<0.000000e+00> : vector<104x64xf32>
    %24 = tpu.matmul %21, %23, %cst_11 {dimension_numbers = #tpu.dot_dimension_numbers<[1], [0], [0], [1], [0, 0, 1, 1], [], []>} : vector<104x16xbf16>, vector<16x64xbf16>, vector<104x64xf32> -> vector<104x64xf32>
    %25 = arith.addf %17, %24 : vector<104x64xf32>
    %c10_i32 = arith.constant 10 : i32
    %26 = arith.addi %0, %c10_i32 : i32
    %27 = arith.index_cast %26 : i32 to index
    %c0_12 = arith.constant 0 : index
    %28 = vector.load %arg1[%27, %c0_12] : memref<232x16xf32, #tpu.memory_space<vmem>>, vector<104x16xf32>
    %29 = arith.truncf %28 : vector<104x16xf32> to vector<104x16xbf16>
    %c3 = arith.constant 3 : index
    %c0_13 = arith.constant 0 : index
    %c0_14 = arith.constant 0 : index
    %30 = vector.load %arg2[%c3, %c0_13, %c0_14] : memref<9x16x64xbf16, #tpu.memory_space<vmem>>, vector<1x16x64xbf16>
    %31 = vector.shape_cast %30 : vector<1x16x64xbf16> to vector<16x64xbf16>
    %cst_15 = arith.constant dense<0.000000e+00> : vector<104x64xf32>
    %32 = tpu.matmul %29, %31, %cst_15 {dimension_numbers = #tpu.dot_dimension_numbers<[1], [0], [0], [1], [0, 0, 1, 1], [], []>} : vector<104x16xbf16>, vector<16x64xbf16>, vector<104x64xf32> -> vector<104x64xf32>
    %33 = arith.addf %25, %32 : vector<104x64xf32>
    %c11_i32 = arith.constant 11 : i32
    %34 = arith.addi %0, %c11_i32 : i32
    %35 = arith.index_cast %34 : i32 to index
    %c0_16 = arith.constant 0 : index
    %36 = vector.load %arg1[%35, %c0_16] : memref<232x16xf32, #tpu.memory_space<vmem>>, vector<104x16xf32>
    %37 = arith.truncf %36 : vector<104x16xf32> to vector<104x16xbf16>
    %c4 = arith.constant 4 : index
    %c0_17 = arith.constant 0 : index
    %c0_18 = arith.constant 0 : index
    %38 = vector.load %arg2[%c4, %c0_17, %c0_18] : memref<9x16x64xbf16, #tpu.memory_space<vmem>>, vector<1x16x64xbf16>
    %39 = vector.shape_cast %38 : vector<1x16x64xbf16> to vector<16x64xbf16>
    %cst_19 = arith.constant dense<0.000000e+00> : vector<104x64xf32>
    %40 = tpu.matmul %37, %39, %cst_19 {dimension_numbers = #tpu.dot_dimension_numbers<[1], [0], [0], [1], [0, 0, 1, 1], [], []>} : vector<104x16xbf16>, vector<16x64xbf16>, vector<104x64xf32> -> vector<104x64xf32>
    %41 = arith.addf %33, %40 : vector<104x64xf32>
    %c12_i32 = arith.constant 12 : i32
    %42 = arith.addi %0, %c12_i32 : i32
    %43 = arith.index_cast %42 : i32 to index
    %c0_20 = arith.constant 0 : index
    %44 = vector.load %arg1[%43, %c0_20] : memref<232x16xf32, #tpu.memory_space<vmem>>, vector<104x16xf32>
    %45 = arith.truncf %44 : vector<104x16xf32> to vector<104x16xbf16>
    %c5 = arith.constant 5 : index
    %c0_21 = arith.constant 0 : index
    %c0_22 = arith.constant 0 : index
    %46 = vector.load %arg2[%c5, %c0_21, %c0_22] : memref<9x16x64xbf16, #tpu.memory_space<vmem>>, vector<1x16x64xbf16>
    %47 = vector.shape_cast %46 : vector<1x16x64xbf16> to vector<16x64xbf16>
    %cst_23 = arith.constant dense<0.000000e+00> : vector<104x64xf32>
    %48 = tpu.matmul %45, %47, %cst_23 {dimension_numbers = #tpu.dot_dimension_numbers<[1], [0], [0], [1], [0, 0, 1, 1], [], []>} : vector<104x16xbf16>, vector<16x64xbf16>, vector<104x64xf32> -> vector<104x64xf32>
    %49 = arith.addf %41, %48 : vector<104x64xf32>
    %c20_i32 = arith.constant 20 : i32
    %50 = arith.addi %0, %c20_i32 : i32
    %51 = arith.index_cast %50 : i32 to index
    %c0_24 = arith.constant 0 : index
    %52 = vector.load %arg1[%51, %c0_24] : memref<232x16xf32, #tpu.memory_space<vmem>>, vector<104x16xf32>
    %53 = arith.truncf %52 : vector<104x16xf32> to vector<104x16xbf16>
    %c6 = arith.constant 6 : index
    %c0_25 = arith.constant 0 : index
    %c0_26 = arith.constant 0 : index
    %54 = vector.load %arg2[%c6, %c0_25, %c0_26] : memref<9x16x64xbf16, #tpu.memory_space<vmem>>, vector<1x16x64xbf16>
    %55 = vector.shape_cast %54 : vector<1x16x64xbf16> to vector<16x64xbf16>
    %cst_27 = arith.constant dense<0.000000e+00> : vector<104x64xf32>
    %56 = tpu.matmul %53, %55, %cst_27 {dimension_numbers = #tpu.dot_dimension_numbers<[1], [0], [0], [1], [0, 0, 1, 1], [], []>} : vector<104x16xbf16>, vector<16x64xbf16>, vector<104x64xf32> -> vector<104x64xf32>
    %57 = arith.addf %49, %56 : vector<104x64xf32>
    %c21_i32 = arith.constant 21 : i32
    %58 = arith.addi %0, %c21_i32 : i32
    %59 = arith.index_cast %58 : i32 to index
    %c0_28 = arith.constant 0 : index
    %60 = vector.load %arg1[%59, %c0_28] : memref<232x16xf32, #tpu.memory_space<vmem>>, vector<104x16xf32>
    %61 = arith.truncf %60 : vector<104x16xf32> to vector<104x16xbf16>
    %c7 = arith.constant 7 : index
    %c0_29 = arith.constant 0 : index
    %c0_30 = arith.constant 0 : index
    %62 = vector.load %arg2[%c7, %c0_29, %c0_30] : memref<9x16x64xbf16, #tpu.memory_space<vmem>>, vector<1x16x64xbf16>
    %63 = vector.shape_cast %62 : vector<1x16x64xbf16> to vector<16x64xbf16>
    %cst_31 = arith.constant dense<0.000000e+00> : vector<104x64xf32>
    %64 = tpu.matmul %61, %63, %cst_31 {dimension_numbers = #tpu.dot_dimension_numbers<[1], [0], [0], [1], [0, 0, 1, 1], [], []>} : vector<104x16xbf16>, vector<16x64xbf16>, vector<104x64xf32> -> vector<104x64xf32>
    %65 = arith.addf %57, %64 : vector<104x64xf32>
    %c22_i32 = arith.constant 22 : i32
    %66 = arith.addi %0, %c22_i32 : i32
    %67 = arith.index_cast %66 : i32 to index
    %c0_32 = arith.constant 0 : index
    %68 = vector.load %arg1[%67, %c0_32] : memref<232x16xf32, #tpu.memory_space<vmem>>, vector<104x16xf32>
    %69 = arith.truncf %68 : vector<104x16xf32> to vector<104x16xbf16>
    %c8 = arith.constant 8 : index
    %c0_33 = arith.constant 0 : index
    %c0_34 = arith.constant 0 : index
    %70 = vector.load %arg2[%c8, %c0_33, %c0_34] : memref<9x16x64xbf16, #tpu.memory_space<vmem>>, vector<1x16x64xbf16>
    %71 = vector.shape_cast %70 : vector<1x16x64xbf16> to vector<16x64xbf16>
    %cst_35 = arith.constant dense<0.000000e+00> : vector<104x64xf32>
    %72 = tpu.matmul %69, %71, %cst_35 {dimension_numbers = #tpu.dot_dimension_numbers<[1], [0], [0], [1], [0, 0, 1, 1], [], []>} : vector<104x16xbf16>, vector<16x64xbf16>, vector<104x64xf32> -> vector<104x64xf32>
    %73 = arith.addf %65, %72 : vector<104x64xf32>
    %c0_36 = arith.constant 0 : index
    %c0_37 = arith.constant 0 : index
    %74 = vector.load %arg3[%c0_36, %c0_37] : memref<1x64xf32, #tpu.memory_space<vmem>>, vector<1x64xf32>
    %75 = vector.broadcast %74 : vector<1x64xf32> to vector<104x64xf32>
    %76 = arith.addf %73, %75 : vector<104x64xf32>
    %c0_38 = arith.constant 0 : index
    %c0_39 = arith.constant 0 : index
    %77 = vector.load %arg4[%c0_38, %c0_39] : memref<104x64xf32, #tpu.memory_space<vmem>>, vector<104x64xf32>
    tpu.vector_store %arg4[%c0_38, %c0_39], %76 {strides = array<i32>} : memref<104x64xf32, #tpu.memory_space<vmem>>, vector<104x64xf32>,
    return
  }
  func.func @transform_0(%arg0: i32) -> (i32, i32) {
    %c0_i32 = arith.constant 0 : i32
    %c0_i32_0 = arith.constant 0 : i32
    %c0_i32_1 = arith.constant 0 : i32
    return %c0_i32, %c0_i32_0 : i32, i32
  }
  func.func @transform_1(%arg0: i32) -> (i32, i32, i32) {
    %c0_i32 = arith.constant 0 : i32
    %c0_i32_0 = arith.constant 0 : i32
    %c0_i32_1 = arith.constant 0 : i32
    %c0_i32_2 = arith.constant 0 : i32
    return %c0_i32, %c0_i32_0, %c0_i32_1 : i32, i32, i32
  }
  func.func @transform_2(%arg0: i32) -> (i32, i32) {
    %c0_i32 = arith.constant 0 : i32
    %c0_i32_0 = arith.constant 0 : i32
    %c0_i32_1 = arith.constant 0 : i32
    return %c0_i32, %c0_i32_0 : i32, i32
  }
  func.func @transform_3(%arg0: i32) -> (i32, i32) {
    %c0_i32 = arith.constant 0 : i32
    %c0_i32_0 = arith.constant 0 : i32
    return %arg0, %c0_i32 : i32, i32
  }
}

</mosaic_0001>

<bundles_post_ra>
// kernel: forward.16
= control target key start
LH: loop header
LB: loop body
LE: loop exit
PB: predicated region body
PF: predicated region fallthrough
CT: control target
= control target key end

     0   :  { %s789_s15 = smov 0   ;;  %s956_s0 = inlined_call_operand.vmem [shape: f32[2,8,8,16], index: 0, kind: input, shape index: {}]   ;;  %s957_s1 = inlined_call_operand.vmem [shape: f32[1,16], index: 1, kind: input, shape index: {}]   ;;  %s958_s2 = inlined_call_operand.vmem [shape: f32[1,16], index: 2, kind: input, shape index: {}]   ;;  %s959_s3 = inlined_call_operand.vmem [shape: f32[8,16], index: 3, kind: input, shape index: {}]   ;;  %s960_s4 = inlined_call_operand.vmem [shape: f32[2,8,8,16], index: 4, kind: output, shape index: {}]  }
   0x1 LB: > { %s699_s16 = sadd.s32 4294967295, %s762_s15   ;;  %p703_p0 = scmp.ge.s32.totalorder %s762_s15, 1  ;;  %s762_s15 = sphi %s789_s15, %s14_s15  }
   0x2   : > { %p162_p1 = scmp.lt.s32.totalorder %s762_s15, 3 }
   0x4   : > { %p163_p2 = pnand %p703_p0, %p162_p1 }
   0x5   : > { %p188_p3 = scmp.lt.s32.totalorder (!%p163_p2), %s699_s16, 1 }
   0x6   : > { %166 = sbr.rel (%p163_p2) target bundleno = 533 (0x215), region = 36 }
   0xb   : > { %s962_s16 = smov (!%p188_p3, %s699_s16), 1  ;;  %vm215_vm0 = vcmask 130048   ;;  %v841_v29 = vld [vmem:[%s959_s3] sm:$0xff]  ;;  %vm239_vm1 = vcmask 122880  }
   0xc   : > { %s710_s17 = sshll.u32 %s962_s16, 6 }
   0xd   : > { %s192_s20 = scalar_lea.vmem %s956_s0, %s710_s17 }
   0xe   : > { %v805_v0 = vld [vmem:[%s192_s20] sm:$0xff]  ;;  %v807_v1 = vld [vmem:[%s192_s20 + $0x8] sm:$0xff]  ;;  %v809_v2 = vld [vmem:[%s192_s20 + $0x10] sm:$0xff] }
   0xf   : > { %v811_v3 = vld [vmem:[%s192_s20 + $0x18] sm:$0xff]  ;;  %v216_v4 = vsel %vm215_vm0, %v805_v0, 0.0  ;;  %v217_v5 = vsel %vm215_vm0, %v807_v1, 0.0  ;;  %v219_v6 = vsel %vm215_vm0, %v809_v2, 0.0  ;;  %v819_v7 = vld [vmem:[%s192_s20 + $0x20] sm:$0xff]  ;;  %v823_v10 = vld [vmem:[%s192_s20 + $0x28] sm:$0xff] }
  0x10   : > { %v218_v8 = vadd.f32 %v217_v5, %v216_v4  ;;  %v221_v9 = vsel %vm215_vm0, %v811_v3, 0.0  ;;  %v223_v12 = vsel %vm215_vm0, %v819_v7, 0.0  ;;  %v827_v13 = vld [vmem:[%s192_s20 + $0x30] sm:$0xff]  ;;  %v225_v15 = vsel %vm215_vm0, %v823_v10, 0.0  ;;  %v831_v16 = vld [vmem:[%s192_s20 + $0x38] sm:$0xff] }
  0x11   : > { %v227_v18 = vsel %vm215_vm0, %v827_v13, 0.0  ;;  %v229_v20 = vsel %vm215_vm0, %v831_v16, 0.0 }
  0x12   : > { %v220_v11 = vadd.f32 %v219_v6, %v218_v8 }
  0x14   : > { %v222_v14 = vadd.f32 %v221_v9, %v220_v11 }
  0x16   : > { %v224_v17 = vadd.f32 %v223_v12, %v222_v14 }
  0x18   : > { %v226_v19 = vadd.f32 %v225_v15, %v224_v17 }
  0x1a   : > { %v228_v21 = vadd.f32 %v227_v18, %v226_v19 }
  0x1c   : > { %v230_v22 = vadd.f32 %v229_v20, %v228_v21 }
  0x1e   : > { %v231_v23 = vsel %vm215_vm0, %v230_v22, 0.0 }
  0x1f   : > { %v232_v24 = vrot.slane %v231_v23, 4 }
  0x21   : > { %v233_v25 = vadd.f32 %v232_v24, %v231_v23 }
  0x23   : > { %v234_v26 = vrot.slane %v233_v25, 2 }
  0x25   : > { %v235_v27 = vadd.f32 %v234_v26, %v233_v25 }
  0x27   : > { %v236_v28 = vrot.slane %v235_v27, 1 }
  0x29   : > { %v237_v30 = vadd.f32 %v236_v28, %v235_v27 }
  0x2b   : > { %v238_v31 = vmul.f32 %v237_v30, %v841_v29 }
  0x2d   : > { %v240_v32 = vsel %vm239_vm1, %v238_v31, 0.0  ;;  %v312_v33 = vrot.slane %v238_v31, 4  ;;  %v274_v34 = vrot.slane %v238_v31, 2  ;;  %v255_v37 = vrot.slane %v238_v31, 1 }
  0x2e   : > { %241 = vadd.xlane.f32.xlu0 %v240_v32  ;;  %v331_v38 = vrot.slane %v238_v31, 5  ;;  %v293_v39 = vrot.slane %v238_v31, 3  ;;  %v350_v43 = vrot.slane %v238_v31, 6  ;;  %v369_v44 = vrot.slane %v238_v31, 7 }
  0x2f   : > { %v314_v35 = vsel %vm239_vm1, %v312_v33, 0.0  ;;  %v276_v36 = vsel %vm239_vm1, %v274_v34, 0.0  ;;  %v257_v40 = vsel %vm239_vm1, %v255_v37, 0.0 }
  0x30   : > { %315 = vadd.xlane.f32.xlu2 %v314_v35  ;;  %277 = vadd.xlane.f32.xlu1 %v276_v36  ;;  %v333_v41 = vsel %vm239_vm1, %v331_v38, 0.0  ;;  %v295_v42 = vsel %vm239_vm1, %v293_v39, 0.0  ;;  %v352_v45 = vsel %vm239_vm1, %v350_v43, 0.0  ;;  %v371_v46 = vsel %vm239_vm1, %v369_v44, 0.0 }
  0x36   : > { %258 = vadd.xlane.f32.xlu0 %v257_v40 }
  0x38   : > { %334 = vadd.xlane.f32.xlu2 %v333_v41  ;;  %296 = vadd.xlane.f32.xlu1 %v295_v42 }
  0x3e   : > { %353 = vadd.xlane.f32.xlu0 %v352_v45 }
  0x40   : > { %372 = vadd.xlane.f32.xlu1 %v371_v46 }
  0xa1   : > { %v242_v47 = vpop.xlane.xlu0 %241 }
  0xa2   : > { %v243_v48 = vrot.slane %v242_v47, 4 }
  0xa3   : > { %v316_v49 = vpop.xlane.xlu2 %315  ;;  %v278_v50 = vpop.xlane.xlu1 %277 }
  0xa4   : > { %v244_v51 = vadd.f32 %v243_v48, %v242_v47  ;;  %v317_v52 = vrot.slane %v316_v49, 4  ;;  %v279_v53 = vrot.slane %v278_v50, 4 }
  0xa6   : > { %v245_v54 = vrot.slane %v244_v51, 2  ;;  %v280_v55 = vadd.f32 %v279_v53, %v278_v50  ;;  %v318_v56 = vadd.f32 %v317_v52, %v316_v49 }
  0xa8   : > { %v246_v57 = vadd.f32 %v245_v54, %v244_v51  ;;  %v281_v58 = vrot.slane %v280_v55, 2  ;;  %v319_v62 = vrot.slane %v318_v56, 2 }
  0xa9   : > { %v259_v59 = vpop.xlane.xlu0 %258 }
  0xaa   : > { %v260_v60 = vrot.slane %v259_v59, 4  ;;  %v247_v61 = vrot.slane %v246_v57, 1  ;;  %v282_v11 = vadd.f32 %v281_v58, %v280_v55  ;;  %v320_v17 = vadd.f32 %v319_v62, %v318_v56 }
  0xab   : > { %v335_v63 = vpop.xlane.xlu2 %334  ;;  %v297_v4 = vpop.xlane.xlu1 %296 }
  0xac   : > { %v261_v5 = vadd.f32 %v260_v60, %v259_v59  ;;  %v336_v6 = vrot.slane %v335_v63, 4  ;;  %v298_v8 = vrot.slane %v297_v4, 4  ;;  %v248_v9 = vadd.f32 %v247_v61, %v246_v57 }
  0xad   : > { %v283_v22 = vrot.slane %v282_v11, 1  ;;  %v321_v28 = vrot.slane %v320_v17, 1 }
  0xae   : > { %v262_v12 = vrot.slane %v261_v5, 2  ;;  %v337_v14 = vadd.f32 %v336_v6, %v335_v63  ;;  %v299_v15 = vadd.f32 %v298_v8, %v297_v4  ;;  %712 = vpush %v248_v9 }
  0xaf   : > { %v284_v34 = vadd.f32 %v283_v22, %v282_v11  ;;  %v322_v39 = vadd.f32 %v321_v28, %v320_v17 }
  0xb0   : > { %v338_v18 = vrot.slane %v337_v14, 2  ;;  %v300_v19 = vrot.slane %v299_v15, 2  ;;  %v263_v20 = vadd.f32 %v262_v12, %v261_v5 }
  0xb1   : > { %v354_v21 = vpop.xlane.xlu0 %353 }
  0xb2   : > { %v355_v23 = vrot.slane %v354_v21, 4  ;;  %v264_v24 = vrot.slane %v263_v20, 1  ;;  %v301_v25 = vadd.f32 %v300_v19, %v299_v15  ;;  %v339_v26 = vadd.f32 %v338_v18, %v337_v14 }
  0xb3   : > { %v373_v27 = vpop.xlane.xlu1 %372 }
  0xb4   : > { %v356_v30 = vadd.f32 %v355_v23, %v354_v21  ;;  %v374_v31 = vrot.slane %v373_v27, 4  ;;  %v265_v32 = vadd.f32 %v264_v24, %v263_v20  ;;  %v302_v33 = vrot.slane %v301_v25, 1 }
  0xb5   : > { %v340_v35 = vrot.slane %v339_v26, 1 }
  0xb6   : > { %v357_v36 = vrot.slane %v356_v30, 2  ;;  %v375_v37 = vadd.f32 %v374_v31, %v373_v27  ;;  %714 = vpush %v265_v32  ;;  %v303_v38 = vadd.f32 %v302_v33, %v301_v25 }
  0xb7   : > { %716 = vpush %v284_v34  ;;  %v341_v40 = vadd.f32 %v340_v35, %v339_v26 }
  0xb8   : > { %v376_v41 = vrot.slane %v375_v37, 2  ;;  %718 = vpush %v303_v38  ;;  %v358_v42 = vadd.f32 %v357_v36, %v356_v30 }
  0xb9   : > { %720 = vpush %v322_v39 }
  0xba   : > { %722 = vpush %v341_v40  ;;  %v359_v43 = vrot.slane %v358_v42, 1  ;;  %v377_v44 = vadd.f32 %v376_v41, %v375_v37 }
  0xbc   : > { %v360_v45 = vadd.f32 %v359_v43, %v358_v42  ;;  %v378_v46 = vrot.slane %v377_v44, 1 }
  0xbe   : > { %724 = vpush %v360_v45  ;;  %v379_v47 = vadd.f32 %v378_v46, %v377_v44 }
  0xc0   : > { %726 = vpush %v379_v47 }
  0xdf   : > { %s713_s23 = spop %712 }
  0xe0   : > { %s250_s24 = smul.f32 0.0078125, %s713_s23 }
  0xe2   : > { %v251_v48 = vstv %s250_s24 }
  0xe3   : > { %v252_v54 = vmul.f32 %v251_v48, %v841_v29 }
  0xe7   : > { %s715_s25 = spop %714 }
  0xe8   : > { %s267_s26 = smul.f32 0.0078125, %s715_s25  ;;  %s717_s27 = spop %716 }
  0xe9   : > { %s286_s28 = smul.f32 0.0078125, %s717_s27  ;;  %s719_s29 = spop %718 }
  0xea   : > { %v268_v49 = vstv %s267_s26  ;;  %s305_s30 = smul.f32 0.0078125, %s719_s29  ;;  %s721_s5 = spop %720 }
  0xeb   : > { %v269_v50 = vmul.f32 %v268_v49, %v841_v29  ;;  %v287_v51 = vstv %s286_s28  ;;  %s324_s6 = smul.f32 0.0078125, %s721_s5  ;;  %s723_s7 = spop %722 }
  0xec   : > { %v288_v52 = vmul.f32 %v287_v51, %v841_v29  ;;  %v306_v53 = vstv %s305_s30  ;;  %s343_s8 = smul.f32 0.0078125, %s723_s7 }
  0xed   : > { %v271_v55 = vrot.slane %v269_v50, 1  ;;  %v307_v56 = vmul.f32 %v306_v53, %v841_v29  ;;  %v325_v57 = vstv %s324_s6 }
  0xee   : > { %v344_v58 = vstv %s343_s8  ;;  %v290_v60 = vrot.slane %v288_v52, 2  ;;  %v326_v61 = vmul.f32 %v325_v57, %v841_v29 }
  0xef   : > { %v273_v59 = vadd.f32 %v271_v55, %v252_v54  ;;  %s725_s9 = spop %724  ;;  %v309_v63 = vrot.slane %v307_v56, 3  ;;  %v345_v4 = vmul.f32 %v344_v58, %v841_v29 }
  0xf0   : > { %s362_s10 = smul.f32 0.0078125, %s725_s9  ;;  %v328_v8 = vrot.slane %v326_v61, 4 }
  0xf1   : > { %v292_v62 = vadd.f32 %v290_v60, %v273_v59  ;;  %s727_s11 = spop %726  ;;  %v347_v14 = vrot.slane %v345_v4, 5 }
  0xf2   : > { %v363_v5 = vstv %s362_s10  ;;  %s381_s12 = smul.f32 0.0078125, %s727_s11 }
  0xf3   : > { %v311_v6 = vadd.f32 %v309_v63, %v292_v62  ;;  %v364_v9 = vmul.f32 %v363_v5, %v841_v29 }
  0xf4   : > { %v382_v11 = vstv %s381_s12  ;;  %s197_s12 = scalar_lea.vmem %s960_s4, %s710_s17 }
  0xf5   : > { %v330_v12 = vadd.f32 %v328_v8, %v311_v6  ;;  %v383_v15 = vmul.f32 %v382_v11, %v841_v29  ;;  %v366_v18 = vrot.slane %v364_v9, 6 }
  0xf7   : > { %v349_v17 = vadd.f32 %v347_v14, %v330_v12  ;;  %v385_v20 = vrot.slane %v383_v15, 7 }
  0xf9   : > { %v368_v19 = vadd.f32 %v366_v18, %v349_v17 }
  0xfb   : > { %v387_v21 = vadd.f32 %v385_v20, %v368_v19 }
  0xfd   : > { %v388_v22 = vperm.slane %v387_v21, 0 }
  0xff   : > { %v861_v23 = vsub.f32 %v805_v0, %v388_v22  ;;  %v864_v24 = vsub.f32 %v807_v1, %v388_v22  ;;  %v867_v25 = vsub.f32 %v809_v2, %v388_v22  ;;  %v870_v26 = vsub.f32 %v811_v3, %v388_v22 }
 0x100   : > { %v873_v27 = vsub.f32 %v819_v7, %v388_v22  ;;  %v882_v1 = vsub.f32 %v823_v10, %v388_v22  ;;  %v889_v32 = vsub.f32 %v827_v13, %v388_v22  ;;  %v895_v10 = vsub.f32 %v831_v16, %v388_v22 }
 0x101   : > { %v397_v28 = vmul.f32 %v861_v23, %v861_v23  ;;  %v398_v30 = vmul.f32 %v864_v24, %v864_v24  ;;  %v399_v0 = vmul.f32 %v867_v25, %v867_v25  ;;  %v400_v2 = vmul.f32 %v870_v26, %v870_v26 }
 0x102   : > { %v401_v33 = vmul.f32 %v873_v27, %v873_v27  ;;  %v402_v36 = vmul.f32 %v882_v1, %v882_v1  ;;  %v403_v39 = vmul.f32 %v889_v32, %v889_v32  ;;  %v404_v41 = vmul.f32 %v895_v10, %v895_v10 }
 0x103   : > { %v413_v3 = vsel %vm215_vm0, %v397_v28, 0.0  ;;  %v414_v7 = vsel %vm215_vm0, %v398_v30, 0.0  ;;  %v416_v34 = vsel %vm215_vm0, %v399_v0, 0.0  ;;  %v418_v37 = vsel %vm215_vm0, %v400_v2, 0.0 }
 0x104   : > { %v415_v31 = vadd.f32 %v414_v7, %v413_v3  ;;  %v420_v13 = vsel %vm215_vm0, %v401_v33, 0.0  ;;  %v422_v42 = vsel %vm215_vm0, %v402_v36, 0.0  ;;  %v424_v16 = vsel %vm215_vm0, %v403_v39, 0.0 }
 0x105   : > { %v426_v45 = vsel %vm215_vm0, %v404_v41, 0.0 }
 0x106   : > { %v417_v35 = vadd.f32 %v416_v34, %v415_v31 }
 0x108   : > { %v419_v38 = vadd.f32 %v418_v37, %v417_v35 }
 0x10a   : > { %v421_v40 = vadd.f32 %v420_v13, %v419_v38 }
 0x10c   : > { %v423_v43 = vadd.f32 %v422_v42, %v421_v40 }
 0x10e   : > { %v425_v44 = vadd.f32 %v424_v16, %v423_v43 }
 0x110   : > { %v427_v46 = vadd.f32 %v426_v45, %v425_v44 }
 0x112   : > { %v428_v47 = vsel %vm215_vm0, %v427_v46, 0.0 }
 0x113   : > { %v429_v48 = vrot.slane %v428_v47, 4 }
 0x115   : > { %v430_v49 = vadd.f32 %v429_v48, %v428_v47 }
 0x117   : > { %v431_v50 = vrot.slane %v430_v49, 2 }
 0x119   : > { %v432_v51 = vadd.f32 %v431_v50, %v430_v49 }
 0x11b   : > { %v433_v52 = vrot.slane %v432_v51, 1 }
 0x11d   : > { %v434_v53 = vadd.f32 %v433_v52, %v432_v51 }
 0x11f   : > { %v435_v54 = vmul.f32 %v434_v53, %v841_v29 }
 0x121   : > { %v436_v55 = vsel %vm239_vm1, %v435_v54, 0.0  ;;  %v470_v56 = vrot.slane %v435_v54, 2  ;;  %v451_v57 = vrot.slane %v435_v54, 1  ;;  %v489_v60 = vrot.slane %v435_v54, 3 }
 0x122   : > { %437 = vadd.xlane.f32.xlu2 %v436_v55  ;;  %v527_v61 = vrot.slane %v435_v54, 5  ;;  %v508_v62 = vrot.slane %v435_v54, 4  ;;  %v546_v6 = vrot.slane %v435_v54, 6  ;;  %v565_v8 = vrot.slane %v435_v54, 7 }
 0x123   : > { %v472_v58 = vsel %vm239_vm1, %v470_v56, 0.0  ;;  %v453_v59 = vsel %vm239_vm1, %v451_v57, 0.0  ;;  %v491_v63 = vsel %vm239_vm1, %v489_v60, 0.0 }
 0x124   : > { %473 = vadd.xlane.f32.xlu1 %v472_v58  ;;  %454 = vadd.xlane.f32.xlu0 %v453_v59  ;;  %v529_v4 = vsel %vm239_vm1, %v527_v61, 0.0  ;;  %v510_v5 = vsel %vm239_vm1, %v508_v62, 0.0  ;;  %v548_v9 = vsel %vm239_vm1, %v546_v6, 0.0  ;;  %v567_v11 = vsel %vm239_vm1, %v565_v8, 0.0 }
 0x12a   : > { %492 = vadd.xlane.f32.xlu2 %v491_v63 }
 0x12c   : > { %530 = vadd.xlane.f32.xlu1 %v529_v4  ;;  %511 = vadd.xlane.f32.xlu0 %v510_v5 }
 0x132   : > { %549 = vadd.xlane.f32.xlu2 %v548_v9 }
 0x134   : > { %568 = vadd.xlane.f32.xlu0 %v567_v11 }
 0x195   : > { %v438_v12 = vpop.xlane.xlu2 %437 }
 0x196   : > { %v439_v14 = vrot.slane %v438_v12, 4 }
 0x197   : > { %v474_v15 = vpop.xlane.xlu1 %473  ;;  %v455_v17 = vpop.xlane.xlu0 %454 }
 0x198   : > { %v440_v18 = vadd.f32 %v439_v14, %v438_v12  ;;  %v475_v19 = vrot.slane %v474_v15, 4  ;;  %v456_v20 = vrot.slane %v455_v17, 4 }
 0x19a   : > { %v441_v21 = vrot.slane %v440_v18, 2  ;;  %v476_v22 = vadd.f32 %v475_v19, %v474_v15  ;;  %v457_v28 = vadd.f32 %v456_v20, %v455_v17 }
 0x19c   : > { %v477_v30 = vrot.slane %v476_v22, 2  ;;  %v458_v0 = vrot.slane %v457_v28, 2  ;;  %v442_v2 = vadd.f32 %v441_v21, %v440_v18 }
 0x19d   : > { %v493_v3 = vpop.xlane.xlu2 %492 }
 0x19e   : > { %v494_v7 = vrot.slane %v493_v3, 4  ;;  %v443_v31 = vrot.slane %v442_v2, 1  ;;  %v459_v33 = vadd.f32 %v458_v0, %v457_v28  ;;  %v478_v34 = vadd.f32 %v477_v30, %v476_v22 }
 0x19f   : > { %v531_v35 = vpop.xlane.xlu1 %530  ;;  %v512_v36 = vpop.xlane.xlu0 %511 }
 0x1a0   : > { %v495_v37 = vadd.f32 %v494_v7, %v493_v3  ;;  %v532_v38 = vrot.slane %v531_v35, 4  ;;  %v513_v39 = vrot.slane %v512_v36, 4  ;;  %v444_v13 = vadd.f32 %v443_v31, %v442_v2 }
 0x1a1   : > { %v460_v40 = vrot.slane %v459_v33, 1  ;;  %v479_v41 = vrot.slane %v478_v34, 1 }
 0x1a2   : > { %v496_v42 = vrot.slane %v495_v37, 2  ;;  %v533_v43 = vadd.f32 %v532_v38, %v531_v35  ;;  %v514_v16 = vadd.f32 %v513_v39, %v512_v36  ;;  %728 = vpush %v444_v13 }
 0x1a3   : > { %v461_v44 = vadd.f32 %v460_v40, %v459_v33  ;;  %v480_v45 = vadd.f32 %v479_v41, %v478_v34 }
 0x1a4   : > { %v534_v46 = vrot.slane %v533_v43, 2  ;;  %v515_v47 = vrot.slane %v514_v16, 2  ;;  %v497_v48 = vadd.f32 %v496_v42, %v495_v37 }
 0x1a5   : > { %730 = vpush %v461_v44  ;;  %v550_v49 = vpop.xlane.xlu2 %549 }
 0x1a6   : > { %v535_v50 = vadd.f32 %v534_v46, %v533_v43  ;;  %732 = vpush %v480_v45  ;;  %v551_v51 = vrot.slane %v550_v49, 4  ;;  %v498_v52 = vrot.slane %v497_v48, 1  ;;  %v516_v53 = vadd.f32 %v515_v47, %v514_v16 }
 0x1a7   : > { %v569_v54 = vpop.xlane.xlu0 %568 }
 0x1a8   : > { %v552_v55 = vadd.f32 %v551_v51, %v550_v49  ;;  %v570_v56 = vrot.slane %v569_v54, 4  ;;  %v499_v57 = vadd.f32 %v498_v52, %v497_v48  ;;  %v517_v58 = vrot.slane %v516_v53, 1 }
 0x1a9   : > { %v536_v59 = vrot.slane %v535_v50, 1 }
 0x1aa   : > { %v553_v60 = vrot.slane %v552_v55, 2  ;;  %v571_v61 = vadd.f32 %v570_v56, %v569_v54  ;;  %734 = vpush %v499_v57  ;;  %v518_v62 = vadd.f32 %v517_v58, %v516_v53 }
 0x1ab   : > { %v537_v63 = vadd.f32 %v536_v59, %v535_v50  ;;  %v753_v59 = vld [vmem:[%s958_s2] ss:$0 sm:$0xff] }
 0x1ac   : > { %v554_v4 = vadd.f32 %v553_v60, %v552_v55  ;;  %v572_v5 = vrot.slane %v571_v61, 2  ;;  %736 = vpush %v518_v62 }
 0x1ad   : > { %738 = vpush %v537_v63 }
 0x1ae   : > { %v573_v6 = vadd.f32 %v572_v5, %v571_v61  ;;  %v555_v8 = vrot.slane %v554_v4, 1 }
 0x1b0   : > { %v556_v9 = vadd.f32 %v555_v8, %v554_v4  ;;  %v574_v11 = vrot.slane %v573_v6, 1 }
 0x1b2   : > { %740 = vpush %v556_v9  ;;  %v575_v12 = vadd.f32 %v574_v11, %v573_v6 }
 0x1b4   : > { %742 = vpush %v575_v12 }
 0x1d3   : > { %s729_s13 = spop %728 }
 0x1d4   : > { %s446_s14 = smul.f32 0.0078125, %s729_s13 }
 0x1d6   : > { %s731_s18 = spop %730  ;;  %v447_v14 = vstv %s446_s14 }
 0x1d7   : > { %s463_s19 = smul.f32 0.0078125, %s731_s18  ;;  %s733_s20 = spop %732  ;;  %v448_v20 = vmul.f32 %v447_v14, %v841_v29 }
 0x1d8   : > { %s482_s21 = smul.f32 0.0078125, %s733_s20 }
 0x1d9   : > { %v464_v15 = vstv %s463_s19 }
 0x1da   : > { %v465_v17 = vmul.f32 %v464_v15, %v841_v29  ;;  %v483_v18 = vstv %s482_s21 }
 0x1db   : > { %v484_v19 = vmul.f32 %v483_v18, %v841_v29  ;;  %s735_s22 = spop %734 }
 0x1dc   : > { %v467_v21 = vrot.slane %v465_v17, 1  ;;  %s501_s23 = smul.f32 0.0078125, %s735_s22 }
 0x1dd   : > { %s737_s24 = spop %736  ;;  %v486_v30 = vrot.slane %v484_v19, 2 }
 0x1de   : > { %v469_v22 = vadd.f32 %v467_v21, %v448_v20  ;;  %v502_v28 = vstv %s501_s23  ;;  %s520_s25 = smul.f32 0.0078125, %s737_s24  ;;  %s739_s26 = spop %738 }
 0x1df   : > { %v503_v0 = vmul.f32 %v502_v28, %v841_v29  ;;  %s539_s27 = smul.f32 0.0078125, %s739_s26 }
 0x1e0   : > { %v521_v2 = vstv %s520_s25  ;;  %v488_v3 = vadd.f32 %v486_v30, %v469_v22 }
 0x1e1   : > { %v505_v7 = vrot.slane %v503_v0, 3  ;;  %v522_v31 = vmul.f32 %v521_v2, %v841_v29  ;;  %v540_v33 = vstv %s539_s27 }
 0x1e2   : > { %v541_v36 = vmul.f32 %v540_v33, %v841_v29 }
 0x1e3   : > { %v507_v34 = vadd.f32 %v505_v7, %v488_v3  ;;  %v524_v35 = vrot.slane %v522_v31, 4  ;;  %s741_s28 = spop %740 }
 0x1e4   : > { %s558_s29 = smul.f32 0.0078125, %s741_s28  ;;  %v543_v39 = vrot.slane %v541_v36, 5 }
 0x1e5   : > { %v526_v37 = vadd.f32 %v524_v35, %v507_v34  ;;  %s743_s30 = spop %742 }
 0x1e6   : > { %v559_v38 = vstv %s558_s29  ;;  %s577_s5 = smul.f32 0.0078125, %s743_s30 }
 0x1e7   : > { %v560_v13 = vmul.f32 %v559_v38, %v841_v29  ;;  %v545_v41 = vadd.f32 %v543_v39, %v526_v37 }
 0x1e8   : > { %v578_v40 = vstv %s577_s5 }
 0x1e9   : > { %v562_v42 = vrot.slane %v560_v13, 6  ;;  %v579_v43 = vmul.f32 %v578_v40, %v841_v29  ;;  %v752_v29 = vld [vmem:[%s957_s1] ss:$0 sm:$0xff] }
 0x1eb   : > { %v564_v16 = vadd.f32 %v562_v42, %v545_v41  ;;  %v581_v44 = vrot.slane %v579_v43, 7 }
 0x1ed   : > { %v583_v45 = vadd.f32 %v581_v44, %v564_v16 }
 0x1ef   : > { %v584_v46 = vadd.f32 1e-05, %v583_v45 }
 0x1f1   : > { %754 = vrsqrt.f32 %v584_v46  ;;  %vm591_vm3 = vweird.f32 %v584_v46 }
 0x1f7   : > { %v755_v47 = vpop.eup %754 }
 0x1f8   : > { %v586_v48 = vmul.f32 %v755_v47, %v584_v46  ;;  %vm592_vm2 = vweird.f32 %v755_v47 }
 0x1f9   : > { %vm593_vm4 = vmor %vm591_vm3, %vm592_vm2 }
 0x1fa   : > { %v587_v49 = vmul.f32 %v755_v47, %v586_v48 }
 0x1fc   : > { %v588_v50 = vmul.f32 0.5, %v587_v49 }
 0x1fe   : > { %v589_v51 = vsub.f32 1.5, %v588_v50 }
 0x200   : > { %v590_v52 = vmul.f32 %v755_v47, %v589_v51 }
 0x202   : > { %v594_v53 = vsel %vm593_vm4, %v755_v47, %v590_v52 }
 0x203   : > { %v595_v54 = vperm.slane %v594_v53, 0 }
 0x205   : > { %v596_v55 = vmul.f32 %v595_v54, %v861_v23  ;;  %v597_v56 = vmul.f32 %v595_v54, %v864_v24  ;;  %v598_v57 = vmul.f32 %v595_v54, %v867_v25  ;;  %v599_v58 = vmul.f32 %v595_v54, %v870_v26 }
 0x206   : > { %v600_v60 = vmul.f32 %v595_v54, %v873_v27  ;;  %v601_v61 = vmul.f32 %v595_v54, %v882_v1  ;;  %v602_v62 = vmul.f32 %v595_v54, %v889_v32  ;;  %v603_v63 = vmul.f32 %v595_v54, %v895_v10 }
 0x207   : > { %v608_v23 = vmul.f32 %v752_v29, %v596_v55  ;;  %v609_v4 = vmul.f32 %v752_v29, %v597_v56  ;;  %v610_v24 = vmul.f32 %v752_v29, %v598_v57  ;;  %v611_v5 = vmul.f32 %v752_v29, %v599_v58 }
 0x208   : > { %v612_v25 = vmul.f32 %v752_v29, %v600_v60  ;;  %v613_v6 = vmul.f32 %v752_v29, %v601_v61  ;;  %v614_v26 = vmul.f32 %v752_v29, %v602_v62  ;;  %v615_v8 = vmul.f32 %v752_v29, %v603_v63 }
 0x209   : > { %v620_v9 = vadd.f32 %v753_v59, %v608_v23  ;;  %v621_v11 = vadd.f32 %v753_v59, %v609_v4  ;;  %v622_v12 = vadd.f32 %v753_v59, %v610_v24  ;;  %v623_v14 = vadd.f32 %v753_v59, %v611_v5 }
 0x20a   : > { %v624_v27 = vadd.f32 %v753_v59, %v612_v25  ;;  %v625_v1 = vadd.f32 %v753_v59, %v613_v6  ;;  %v626_v32 = vadd.f32 %v753_v59, %v614_v26  ;;  %v627_v18 = vadd.f32 %v753_v59, %v615_v8 }
 0x20b   : > { %v628_v10 = vmax.f32 %v620_v9, 0.0  ;;  %v629_v15 = vmax.f32 %v621_v11, 0.0  ;;  %v630_v17 = vmax.f32 %v622_v12, 0.0  ;;  %v631_v19 = vmax.f32 %v623_v14, 0.0 }
 0x20c   : > { %v632_v20 = vmax.f32 %v624_v27, 0.0  ;;  %v633_v21 = vmax.f32 %v625_v1, 0.0  ;;  %v634_v22 = vmax.f32 %v626_v32, 0.0  ;;  %v635_v28 = vmax.f32 %v627_v18, 0.0 }
 0x20d   : > { %636 = vst.msk [vmem:[%s197_s12] sm:$0xff] %vm215_vm0, %v628_v10 }
 0x20e   : > { %637 = vst.msk [vmem:[%s197_s12 + $0x8] sm:$0xff] %vm215_vm0, %v629_v15 }
 0x20f   : > { %638 = vst.msk [vmem:[%s197_s12 + $0x10] sm:$0xff] %vm215_vm0, %v630_v17 }
 0x210   : > { %639 = vst.msk [vmem:[%s197_s12 + $0x18] sm:$0xff] %vm215_vm0, %v631_v19 }
 0x211   : > { %640 = vst.msk [vmem:[%s197_s12 + $0x20] sm:$0xff] %vm215_vm0, %v632_v20 }
 0x212   : > { %641 = vst.msk [vmem:[%s197_s12 + $0x28] sm:$0xff] %vm215_vm0, %v633_v21 }
 0x213   : > { %642 = vst.msk [vmem:[%s197_s12 + $0x30] sm:$0xff] %vm215_vm0, %v634_v22 }
 0x214   : > { %643 = vst.msk [vmem:[%s197_s12 + $0x38] sm:$0xff] %vm215_vm0, %v635_v28 }
 0x215 PF: > { %s14_s15 = sadd.s32 1, %s762_s15  }
 0x216   : > { %p11_p4 = scmp.ge.s32.totalorder %s14_s15, 4  }
 0x218   :  { %13 = sbr.rel (!%p11_p4) target bundleno = 1 (0x1), region = 66 }

// kernel: forward.15
= control target key start
LH: loop header
LB: loop body
LE: loop exit
PB: predicated region body
PF: predicated region fallthrough
CT: control target
= control target key end

     0   :  { %s1883_s12 = smov 0   ;;  %s2303_s0 = inlined_call_operand.vmem [shape: f32[232,64], index: 0, kind: input, shape index: {}]   ;;  %s2304_s1 = inlined_call_operand.vmem [shape: bf16[9,64,16], index: 1, kind: input, shape index: {}]   ;;  %s2305_s2 = inlined_call_operand.vmem [shape: f32[1,16], index: 2, kind: input, shape index: {}]   ;;  %s2306_s3 = inlined_call_operand.vmem [shape: f32[208,16], index: 3, kind: output, shape index: {}]  }
   0x1 LB: > { %s1416_s13 = sadd.s32 4294967295, %s1861_s12   ;;  %p1419_p0 = scmp.ge.s32.totalorder %s1861_s12, 1  ;;  %s1861_s12 = sphi %s1883_s12, %s13_s12  }
   0x2   : > { %p127_p1 = scmp.lt.s32.totalorder %s1861_s12, 3 }
   0x4   : > { %p128_p2 = pnand %p1419_p0, %p127_p1 }
   0x5   : > { %s153_s18 = smul.u32 (!%p128_p2), 104, %s1416_s13 }
   0x6   : > { %131 = sbr.rel (%p128_p2) target bundleno = 408 (0x198), region = 32 }
   0x7   : > { %s1905_s23 = scalar_lea.vmem (!%p128_p2), %s2303_s0, %s153_s18 }
   0xb   : > { %v1805_v0 = vld [vmem:[%s2304_s1 + $0x38] sm:$0xff]  ;;  %v1804_v1 = vld [vmem:[%s2304_s1 + $0x30] sm:$0xff]  ;;  %v1803_v2 = vld [vmem:[%s2304_s1 + $0x28] sm:$0xff]  ;;  %vm238_vm0 = vcmask 523264   ;;  %vm1332_vm1 = vcmask 130048  }
   0xc   : > { %264 = vmatpush.bf16.msra.mxu0 %v1805_v0  ;;  %1834 = vmatpush.bf16.msra.mxu1 %v1805_v0  ;;  %v1802_v3 = vld [vmem:[%s2304_s1 + $0x20] sm:$0xff]  ;;  %v1422_v5 = vld [vmem:[%s1905_s23 + $0x9] sm:$0xff]  ;;  %v1813_v8 = vld [vmem:[%s2304_s1 + $0x78] sm:$0xff] }
   0xd   : > { %1836 = vmatpush.bf16.msra.mxu3 %v1805_v0  ;;  %1835 = vmatpush.bf16.msra.mxu2 %v1805_v0  ;;  %v1421_v4 = vld [vmem:[%s1905_s23 + $0x1] sm:$0xff]  ;;  %v1426_v7 = vld [vmem:[%s1905_s23 + $0x29] sm:$0xff]  ;;  %v1431_v9 = vld [vmem:[%s1905_s23 + $0x51] sm:$0xff] }
   0xe   : > { %v1425_v6 = vld [vmem:[%s1905_s23 + $0x21] sm:$0xff]  ;;  %v1432_v10 = vld [vmem:[%s1905_s23 + $0x59] sm:$0xff]  ;;  %v1430_v13 = vld [vmem:[%s1905_s23 + $0x49] sm:$0xff]  ;;  %v198_v14 = vpack.c.bf16 %v1422_v5, %v1421_v4 }
   0xf   : > { %v1801_v11 = vld [vmem:[%s2304_s1 + $0x18] sm:$0xff]  ;;  %v1429_v12 = vld [vmem:[%s1905_s23 + $0x41] sm:$0xff]  ;;  %v200_v15 = vpack.c.bf16 %v1426_v7, %v1425_v6  ;;  %v203_v16 = vpack.c.bf16 %v1432_v10, %v1431_v9  ;;  %v1800_v19 = vld [vmem:[%s2304_s1 + $0x10] sm:$0xff] }
  0x10   : > { %265 = vmatpush.bf16.msra.mxu0 %v1804_v1  ;;  %1837 = vmatpush.bf16.msra.mxu1 %v1804_v1  ;;  %v1817_v17 = vld [vmem:[%s2304_s1 + $0x98] sm:$0xff]  ;;  %v202_v18 = vpack.c.bf16 %v1430_v13, %v1429_v12  ;;  %v1812_v21 = vld [vmem:[%s2304_s1 + $0x70] sm:$0xff]  ;;  %v1799_v23 = vld [vmem:[%s2304_s1 + $0x8] sm:$0xff] }
  0x11   : > { %1839 = vmatpush.bf16.msra.mxu3 %v1804_v1  ;;  %1838 = vmatpush.bf16.msra.mxu2 %v1804_v1  ;;  %v1809_v20 = vld [vmem:[%s2304_s1 + $0x58] sm:$0xff]  ;;  %v1816_v22 = vld [vmem:[%s2304_s1 + $0x90] sm:$0xff]  ;;  %v1811_v25 = vld [vmem:[%s2304_s1 + $0x68] sm:$0xff] }
  0x12   : > { %v1808_v24 = vld [vmem:[%s2304_s1 + $0x50] sm:$0xff]  ;;  %v1815_v26 = vld [vmem:[%s2304_s1 + $0x88] sm:$0xff]  ;;  %v1798_v27 = vld [vmem:[%s2304_s1] sm:$0xff] }
  0x13   : > { %v1423_v28 = vld [vmem:[%s1905_s23 + $0x11] sm:$0xff]  ;;  %v1807_v29 = vld [vmem:[%s2304_s1 + $0x48] sm:$0xff]  ;;  %v1810_v30 = vld [vmem:[%s2304_s1 + $0x60] sm:$0xff] }
  0x14   : > { %266 = vmatpush.bf16.msra.mxu0 %v1803_v2  ;;  %1840 = vmatpush.bf16.msra.mxu1 %v1803_v2  ;;  %v1424_v31 = vld [vmem:[%s1905_s23 + $0x19] sm:$0xff]  ;;  %v1427_v34 = vld [vmem:[%s1905_s23 + $0x31] sm:$0xff]  ;;  %v1433_v37 = vld [vmem:[%s1905_s23 + $0x61] sm:$0xff] }
  0x15   : > { %1842 = vmatpush.bf16.msra.mxu3 %v1803_v2  ;;  %1841 = vmatpush.bf16.msra.mxu2 %v1803_v2  ;;  %v1829_v32 = vld [vmem:[%s2304_s1 + $0xf8] sm:$0xff]  ;;  %v1814_v36 = vld [vmem:[%s2304_s1 + $0x80] sm:$0xff]  ;;  %v1489_v41 = vld [vmem:[%s1905_s23 + $0xa] sm:$0xff]  ;;  %v199_v42 = vpack.c.bf16 %v1424_v31, %v1423_v28  ;;  %v204_v44 = vpack.c.bf16 %v1433_v37, %v1433_v37 }
  0x16   : > { %v1821_v33 = vld [vmem:[%s2304_s1 + $0xb8] sm:$0xff]  ;;  %v1806_v39 = vld [vmem:[%s2304_s1 + $0x40] sm:$0xff]  ;;  %v1824_v47 = vld [vmem:[%s2304_s1 + $0xd0] sm:$0xff] }
  0x17   : > { %v1428_v35 = vld [vmem:[%s1905_s23 + $0x39] sm:$0xff]  ;;  %v1488_v40 = vld [vmem:[%s1905_s23 + $0x2] sm:$0xff]  ;;  %v1828_v48 = vld [vmem:[%s2304_s1 + $0xf0] sm:$0xff] }
  0x18   : > { %267 = vmatpush.bf16.msra.mxu0 %v1802_v3  ;;  %1843 = vmatpush.bf16.msra.mxu1 %v1802_v3  ;;  %v1833_v38 = vld [vmem:[%s2304_s1 + $0x118] sm:$0xff]  ;;  %v201_v43 = vpack.c.bf16 %v1428_v35, %v1427_v34  ;;  %v406_v46 = vpack.c.bf16 %v1489_v41, %v1488_v40  ;;  %v1820_v49 = vld [vmem:[%s2304_s1 + $0xb0] sm:$0xff]  ;;  %v155_v50 = vld [vmem:[%s1905_s23] sm:$0xff] }
  0x19   : > { %1845 = vmatpush.bf16.msra.mxu3 %v1802_v3  ;;  %1844 = vmatpush.bf16.msra.mxu2 %v1802_v3  ;;  %v1825_v45 = vld [vmem:[%s2304_s1 + $0xd8] sm:$0xff]  ;;  %v156_v51 = vld [vmem:[%s1905_s23 + $0x8] sm:$0xff]  ;;  %v1832_v60 = vld [vmem:[%s2304_s1 + $0x110] sm:$0xff] }
  0x1a   : > { %v1576_v52 = vld [vmem:[%s1905_s23 + $0xb] sm:$0xff]  ;;  %v1577_v53 = vld [vmem:[%s1905_s23 + $0x13] sm:$0xff]  ;;  %v168_v56 = vpack.c.bf16 %v156_v51, %v155_v50  ;;  %v1578_v63 = vld [vmem:[%s1905_s23 + $0x1b] sm:$0xff] }
  0x1b   : > { %1458 = vmatmul.msk.bf16.vlgmr.msra.gmra.mxu0 %vm238_vm0, %v198_v14  ;;  %1460 = vmatmul.msk.bf16.vlgmr.msra.gmra.mxu1 %vm238_vm0, %v200_v15  ;;  %v1533_v54 = vld [vmem:[%s1905_s23 + $0x12] sm:$0xff]  ;;  %v1491_v55 = vld [vmem:[%s1905_s23 + $0x1a] sm:$0xff]  ;;  %v670_v57 = vpack.c.bf16 %v1577_v53, %v1576_v52  ;;  %v1579_v0 = vld [vmem:[%s1905_s23 + $0x23] sm:$0xff] }
  0x1c   : > { %352 = vmatpush.bf16.msrb.mxu1 %v1801_v11  ;;  %1463 = vmatmul.msk.bf16.vlgmr.msra.gmra.mxu3 %vm238_vm0, %v203_v16  ;;  %v538_v58 = vpack.c.bf16 %v1533_v54, %v1489_v41  ;;  %v407_v59 = vpack.c.bf16 %v1491_v55, %v1533_v54  ;;  %v157_v61 = vld [vmem:[%s1905_s23 + $0x10] sm:$0xff]  ;;  %v158_v62 = vld [vmem:[%s1905_s23 + $0x18] sm:$0xff]  ;;  %v1535_v1 = vld [vmem:[%s1905_s23 + $0x22] sm:$0xff]  ;;  %v671_v4 = vpack.c.bf16 %v1579_v0, %v1578_v63 }
  0x1d   : > { %603 = vmatpush.bf16.msrb.mxu3 %v1813_v8  ;;  %735 = vmatpush.bf16.msrb.mxu0 %v1817_v17  ;;  %v1493_v2 = vld [vmem:[%s1905_s23 + $0x2a] sm:$0xff]  ;;  %v169_v3 = vpack.c.bf16 %v158_v62, %v157_v61  ;;  %v539_v5 = vpack.c.bf16 %v1535_v1, %v1491_v55  ;;  %v159_v11 = vld [vmem:[%s1905_s23 + $0x20] sm:$0xff]  ;;  %v1581_v14 = vld [vmem:[%s1905_s23 + $0x33] sm:$0xff] }
  0x1e   : > { %1462 = vmatmul.msk.bf16.vlgmr.msra.gmra.mxu2 %vm238_vm0, %v202_v18  ;;  %v408_v6 = vpack.c.bf16 %v1493_v2, %v1535_v1  ;;  %v1823_v7 = vld [vmem:[%s2304_s1 + $0xc8] sm:$0xff]  ;;  %v1537_v15 = vld [vmem:[%s1905_s23 + $0x32] sm:$0xff]  ;;  %v1495_v16 = vld [vmem:[%s1905_s23 + $0x3a] sm:$0xff] }
  0x1f   : > { %471 = vmatpush.bf16.msrb.mxu2 %v1809_v20  ;;  %v1827_v8 = vld [vmem:[%s2304_s1 + $0xe8] sm:$0xff]  ;;  %v409_v20 = vpack.c.bf16 %v1495_v16, %v1537_v15  ;;  %v1822_v31 = vld [vmem:[%s2304_s1 + $0xc0] sm:$0xff] }
  0x20   : > { %353 = vmatpush.bf16.msrb.mxu1 %v1800_v19  ;;  %v1819_v9 = vld [vmem:[%s2304_s1 + $0xa8] sm:$0xff]  ;;  %v540_v19 = vpack.c.bf16 %v1537_v15, %v1493_v2  ;;  %v1830_v34 = vld [vmem:[%s2304_s1 + $0x100] sm:$0xff] }
  0x21   : > { %604 = vmatpush.bf16.msrb.mxu3 %v1812_v21  ;;  %736 = vmatpush.bf16.msrb.mxu0 %v1816_v22  ;;  %v1831_v10 = vld [vmem:[%s2304_s1 + $0x108] sm:$0xff]  ;;  %v161_v21 = vld [vmem:[%s1905_s23 + $0x30] sm:$0xff]  ;;  %v162_v22 = vld [vmem:[%s1905_s23 + $0x38] sm:$0xff] }
  0x22   : > { %v160_v12 = vld [vmem:[%s1905_s23 + $0x28] sm:$0xff]  ;;  %v163_v35 = vld [vmem:[%s1905_s23 + $0x40] sm:$0xff] }
  0x23   : > { %472 = vmatpush.bf16.msrb.mxu2 %v1808_v24  ;;  %v1580_v13 = vld [vmem:[%s1905_s23 + $0x2b] sm:$0xff]  ;;  %v170_v17 = vpack.c.bf16 %v160_v12, %v159_v11  ;;  %v1583_v24 = vld [vmem:[%s1905_s23 + $0x43] sm:$0xff]  ;;  %v1499_v40 = vld [vmem:[%s1905_s23 + $0x5a] sm:$0xff] }
  0x24   : > { %354 = vmatpush.bf16.msrb.mxu1 %v1799_v23  ;;  %v672_v18 = vpack.c.bf16 %v1581_v14, %v1580_v13  ;;  %v1582_v23 = vld [vmem:[%s1905_s23 + $0x3b] sm:$0xff]  ;;  %v1584_v37 = vld [vmem:[%s1905_s23 + $0x4b] sm:$0xff] }
  0x25   : > { %605 = vmatpush.bf16.msrb.mxu3 %v1811_v25  ;;  %737 = vmatpush.bf16.msrb.mxu0 %v1815_v26  ;;  %v1539_v25 = vld [vmem:[%s1905_s23 + $0x42] sm:$0xff]  ;;  %v1497_v26 = vld [vmem:[%s1905_s23 + $0x4a] sm:$0xff]  ;;  %v673_v28 = vpack.c.bf16 %v1583_v24, %v1582_v23 }
  0x26   : > { %v167_v54 = vld [vmem:[%s1905_s23 + $0x60] sm:$0xff]  ;;  %v1588_v55 = vld [vmem:[%s1905_s23 + $0x6b] sm:$0xff] }
  0x27   : > { %473 = vmatpush.bf16.msrb.mxu2 %v1807_v29  ;;  %v541_v29 = vpack.c.bf16 %v1539_v25, %v1495_v16  ;;  %v2112_v11 = vld [vmem:[%s1905_s23 + $0x2c] sm:$0xff] }
  0x28   : > { %355 = vmatpush.bf16.msrb.mxu1 %v1798_v27  ;;  %v171_v27 = vpack.c.bf16 %v162_v22, %v161_v21  ;;  %v1754_v24 = vld [vmem:[%s1905_s23 + $0x26] sm:$0xff] }
  0x29   : > { %606 = vmatpush.bf16.msrb.mxu3 %v1810_v30  ;;  %738 = vmatpush.bf16.msrb.mxu0 %v1814_v36  ;;  %v410_v30 = vpack.c.bf16 %v1497_v26, %v1539_v25  ;;  %v164_v36 = vld [vmem:[%s1905_s23 + $0x48] sm:$0xff] }
  0x2a   : > { %v172_v41 = vpack.c.bf16 %v164_v36, %v163_v35  ;;  %v1755_v25 = vld [vmem:[%s1905_s23 + $0x2e] sm:$0xff] }
  0x2b   : > { %474 = vmatpush.bf16.msrb.mxu2 %v1806_v39  ;;  %1459 = vmatmul.msk.bf16.gmra.mxu0 %vm238_vm0, %v199_v42  ;;  %v1541_v39 = vld [vmem:[%s1905_s23 + $0x52] sm:$0xff] }
  0x2c   : > { %867 = vmatpush.bf16.msra.mxu1 %v1821_v33  ;;  %1464 = vmatmul.msk.bf16.gmra.mxu3 %vm238_vm0, %v204_v44  ;;  %v1818_v33 = vld [vmem:[%s2304_s1 + $0xa0] sm:$0xff]  ;;  %v411_v44 = vpack.c.bf16 %v1499_v40, %v1541_v39 }
  0x2d   : > { %1131 = vmatpush.bf16.msra.mxu3 %v1829_v32  ;;  %1263 = vmatpush.bf16.msra.mxu0 %v1833_v38  ;;  %v1826_v32 = vld [vmem:[%s2304_s1 + $0xe0] sm:$0xff]  ;;  %v1585_v38 = vld [vmem:[%s1905_s23 + $0x53] sm:$0xff] }
  0x2e   : > { %1461 = vmatmul.msk.bf16.gmra.mxu1 %vm238_vm0, %v201_v43  ;;  %1525 = vmatmul.msk.bf16.vlgmr.msrb.gmra.mxu2 %vm238_vm0, %v406_v46  ;;  %v674_v42 = vpack.c.bf16 %v1585_v38, %v1584_v37  ;;  %v542_v43 = vpack.c.bf16 %v1541_v39, %v1497_v26  ;;  %v166_v46 = vld [vmem:[%s1905_s23 + $0x58] sm:$0xff]  ;;  %v1710_v26 = vld [vmem:[%s1905_s23 + $0x25] sm:$0xff] }
  0x2f   : > { %999 = vmatpush.bf16.msra.mxu2 %v1825_v45  ;;  %v165_v45 = vld [vmem:[%s1905_s23 + $0x50] sm:$0xff] }
  0x30   : > { %868 = vmatpush.bf16.msra.mxu1 %v1820_v49  ;;  %v1543_v49 = vld [vmem:[%s1905_s23 + $0x62] sm:$0xff]  ;;  %v173_v50 = vpack.c.bf16 %v166_v46, %v165_v45 }
  0x31   : > { %1132 = vmatpush.bf16.msra.mxu3 %v1828_v48  ;;  %1264 = vmatpush.bf16.msra.mxu0 %v1832_v60  ;;  %v1587_v48 = vld [vmem:[%s1905_s23 + $0x63] sm:$0xff]  ;;  %v543_v52 = vpack.c.bf16 %v1543_v49, %v1499_v40  ;;  %v412_v53 = vpack.c.bf16 %v1543_v49, %v1543_v49  ;;  %v676_v60 = vpack.c.bf16 %v1588_v55, %v1588_v55 }
  0x32   : > { %v1757_v49 = vld [vmem:[%s1905_s23 + $0x3e] sm:$0xff] }
  0x33   : > { %1000 = vmatpush.bf16.msra.mxu2 %v1824_v47  ;;  %v1586_v47 = vld [vmem:[%s1905_s23 + $0x5b] sm:$0xff] }
  0x34   : > { %869 = vmatpush.bf16.msra.mxu1 %v1819_v9  ;;  %v675_v51 = vpack.c.bf16 %v1587_v48, %v1586_v47  ;;  %v1709_v9 = vld [vmem:[%s1905_s23 + $0x1d] sm:$0xff] }
  0x35   : > { %1133 = vmatpush.bf16.msra.mxu3 %v1827_v8  ;;  %1265 = vmatpush.bf16.msra.mxu0 %v1831_v10  ;;  %v1708_v8 = vld [vmem:[%s1905_s23 + $0x15] sm:$0xff]  ;;  %v1666_v10 = vld [vmem:[%s1905_s23 + $0x24] sm:$0xff] }
  0x36   : > { %v1756_v48 = vld [vmem:[%s1905_s23 + $0x36] sm:$0xff] }
  0x37   : > { %1001 = vmatpush.bf16.msra.mxu2 %v1823_v7  ;;  %v1753_v7 = vld [vmem:[%s1905_s23 + $0x1e] sm:$0xff] }
  0x38   : > { %870 = vmatpush.bf16.msra.mxu1 %v1818_v33 }
  0x39   : > { %1134 = vmatpush.bf16.msra.mxu3 %v1826_v32  ;;  %1266 = vmatpush.bf16.msra.mxu0 %v1830_v34  ;;  %v1199_v32 = vpack.c.bf16 %v1755_v25, %v1754_v24  ;;  %v1672_v24 = vld [vmem:[%s1905_s23 + $0x54] sm:$0xff]  ;;  %v2168_v25 = vld [vmem:[%s1905_s23 + $0x5c] sm:$0xff] }
  0x3b   : > { %1613 = vmatmul.msk.bf16.vlgmr.msrb.gmra.mxu0 %vm238_vm0, %v670_v57  ;;  %1002 = vmatpush.bf16.msra.mxu2 %v1822_v31  ;;  %v1664_v57 = vld [vmem:[%s1905_s23 + $0x14] sm:$0xff] }
  0x3c   : > { %1569 = vmatmul.msk.bf16.vlgmr.msrb.gmra.mxu3 %vm238_vm0, %v538_v58  ;;  %v1665_v58 = vld [vmem:[%s1905_s23 + $0x1c] sm:$0xff] }
  0x3d   : > { %v934_v0 = vpack.c.bf16 %v1665_v58, %v1664_v57  ;;  %v803_v31 = vpack.c.bf16 %v1666_v10, %v1665_v58 }
  0x3e   : > { %1481 = vmatmul.msk.bf16.vlgmr.msrb.gmra.mxu1 %vm238_vm0, %v168_v56  ;;  %1526 = vmatmul.msk.bf16.gmra.mxu2 %vm238_vm0, %v407_v59  ;;  %v1544_v56 = vld [vmem:[%s1905_s23 + $0x6a] sm:$0xff]  ;;  %v174_v59 = vpack.c.bf16 %v167_v54, %v167_v54 }
  0x3f   : > { %v544_v63 = vpack.c.bf16 %v1544_v56, %v1544_v56  ;;  %v1200_v56 = vpack.c.bf16 %v1757_v49, %v1756_v48  ;;  %v1717_v48 = vld [vmem:[%s1905_s23 + $0x5d] sm:$0xff] }
  0x40   : > { %v1674_v49 = vld [vmem:[%s1905_s23 + $0x64] sm:$0xff] }
  0x4b   : > { %1614 = vmatmul.msk.bf16.gmra.mxu0 %vm238_vm0, %v671_v4 }
  0x4c   : > { %1570 = vmatmul.msk.bf16.gmra.mxu3 %vm238_vm0, %v539_v5  ;;  %v1620_v5 = vld [vmem:[%s1905_s23 + $0xc] sm:$0xff] }
  0x4d   : > { %v802_v13 = vpack.c.bf16 %v1664_v57, %v1620_v5 }
  0x4e   : > { %1482 = vmatmul.msk.bf16.gmra.mxu1 %vm238_vm0, %v169_v3  ;;  %1527 = vmatmul.msk.bf16.gmra.mxu2 %vm238_vm0, %v408_v6  ;;  %v1752_v6 = vld [vmem:[%s1905_s23 + $0x16] sm:$0xff] }
  0x4f   : > { %v1198_v14 = vpack.c.bf16 %v1753_v7, %v1752_v6 }
  0x5b   : > { %1615 = vmatmul.msk.bf16.gmra.mxu0 %vm238_vm0, %v672_v18 }
  0x5c   : > { %1571 = vmatmul.msk.bf16.gmra.mxu3 %vm238_vm0, %v540_v19  ;;  %v935_v19 = vpack.c.bf16 %v2112_v11, %v1666_v10 }
  0x5e   : > { %1483 = vmatmul.msk.bf16.gmra.mxu1 %vm238_vm0, %v170_v17  ;;  %1528 = vmatmul.msk.bf16.gmra.mxu2 %vm238_vm0, %v409_v20  ;;  %v1066_v17 = vpack.c.bf16 %v1709_v9, %v1708_v8 }
  0x6b   : > { %1616 = vmatmul.msk.bf16.gmra.mxu0 %vm238_vm0, %v673_v28  ;;  %v1668_v28 = vld [vmem:[%s1905_s23 + $0x34] sm:$0xff] }
  0x6c   : > { %1572 = vmatmul.msk.bf16.gmra.mxu3 %vm238_vm0, %v541_v29  ;;  %v2135_v29 = vld [vmem:[%s1905_s23 + $0x3c] sm:$0xff]  ;;  %v804_v55 = vpack.c.bf16 %v1668_v28, %v2112_v11 }
  0x6d   : > { %v936_v38 = vpack.c.bf16 %v2135_v29, %v1668_v28 }
  0x6e   : > { %1484 = vmatmul.msk.bf16.gmra.mxu1 %vm238_vm0, %v171_v27  ;;  %1529 = vmatmul.msk.bf16.gmra.mxu2 %vm238_vm0, %v410_v30  ;;  %v1711_v27 = vld [vmem:[%s1905_s23 + $0x2d] sm:$0xff] }
  0x6f   : > { %v1067_v35 = vpack.c.bf16 %v1711_v27, %v1710_v26 }
  0x7b   : > { %1617 = vmatmul.msk.bf16.gmra.mxu0 %vm238_vm0, %v674_v42 }
  0x7c   : > { %1573 = vmatmul.msk.bf16.gmra.mxu3 %vm238_vm0, %v542_v43 }
  0x7e   : > { %1485 = vmatmul.msk.bf16.gmra.mxu1 %vm238_vm0, %v172_v41  ;;  %1530 = vmatmul.msk.bf16.gmra.mxu2 %vm238_vm0, %v411_v44 }
  0x8b   : > { %1618 = vmatmul.msk.bf16.gmra.mxu0 %vm238_vm0, %v675_v51  ;;  %v1713_v51 = vld [vmem:[%s1905_s23 + $0x3d] sm:$0xff] }
  0x8c   : > { %1574 = vmatmul.msk.bf16.gmra.mxu3 %vm238_vm0, %v543_v52  ;;  %v1670_v52 = vld [vmem:[%s1905_s23 + $0x44] sm:$0xff] }
  0x8d   : > { %v805_v27 = vpack.c.bf16 %v1670_v52, %v2135_v29 }
  0x8e   : > { %1486 = vmatmul.msk.bf16.gmra.mxu1 %vm238_vm0, %v173_v50  ;;  %1531 = vmatmul.msk.bf16.gmra.mxu2 %vm238_vm0, %v412_v53  ;;  %v1712_v50 = vld [vmem:[%s1905_s23 + $0x35] sm:$0xff]  ;;  %v2150_v53 = vld [vmem:[%s1905_s23 + $0x4c] sm:$0xff] }
  0x98   : > { %v269_v61 = vpop.f32.mrf.mxu0  ;;  %v2093_v62 = vpop.f32.mrf.mxu1 }
  0x9b   : > { %1619 = vmatmul.msk.bf16.gmra.mxu0 %vm238_vm0, %v676_v60  ;;  %v1068_v60 = vpack.c.bf16 %v1713_v51, %v1712_v50  ;;  %v2188_v50 = vld [vmem:[%s1905_s23 + $0x6c] sm:$0xff] }
  0x9c   : > { %1575 = vmatmul.msk.bf16.gmra.mxu3 %vm238_vm0, %v544_v63 }
  0x9e   : > { %1487 = vmatmul.msk.bf16.gmra.mxu1 %vm238_vm0, %v174_v59  ;;  %1701 = vmatmul.msk.bf16.vlgmr.msra.gmra.mxu2 %vm238_vm0, %v934_v0  ;;  %v937_v0 = vpack.c.bf16 %v2150_v53, %v1670_v52  ;;  %v806_v52 = vpack.c.bf16 %v1672_v24, %v2150_v53 }
  0x9f   : > { %v2099_v1 = vpop.f32.mrf.mxu3 }
  0xa0   : > { %v271_v2 = vpop.f32.mrf.mxu0  ;;  %v2101_v3 = vpop.f32.mrf.mxu1 }
  0xa1   : > { %v2103_v4 = vpop.f32.mrf.mxu2 }
  0xa7   : > { %v2114_v12 = vpop.f32.mrf.mxu3 }
  0xa8   : > { %v274_v15 = vpop.f32.mrf.mxu0 }
  0xa9   : > { %v2118_v18 = vpop.f32.mrf.mxu2 }
  0xab   : > { %v2116_v16 = vpop.f32.mrf.mxu1  ;;  %1789 = vmatmul.msk.bf16.vlgmr.msra.gmra.mxu0 %vm238_vm0, %v1198_v14 }
  0xac   : > { %1745 = vmatmul.msk.bf16.vlgmr.msra.gmra.mxu3 %vm238_vm0, %v1066_v17  ;;  %v1759_v17 = vld [vmem:[%s1905_s23 + $0x4e] sm:$0xff] }
  0xae   : > { %1657 = vmatmul.msk.bf16.vlgmr.msra.gmra.mxu1 %vm238_vm0, %v802_v13  ;;  %1702 = vmatmul.msk.bf16.gmra.mxu2 %vm238_vm0, %v935_v19  ;;  %v1714_v19 = vld [vmem:[%s1905_s23 + $0x45] sm:$0xff] }
  0xaf   : > { %v2125_v20 = vpop.f32.mrf.mxu3 }
  0xb0   : > { %v276_v21 = vpop.f32.mrf.mxu0 }
  0xb1   : > { %v476_v23 = vpop.f32.mrf.mxu2 }
  0xb3   : > { %v2127_v22 = vpop.f32.mrf.mxu1 }
  0xb7   : > { %v301_v30 = vpop.f32.mrf.mxu3 }
  0xb8   : > { %v740_v34 = vpop.f32.mrf.mxu0 }
  0xb9   : > { %v478_v37 = vpop.f32.mrf.mxu2 }
  0xbb   : > { %v357_v33 = vpop.f32.mrf.mxu1  ;;  %1790 = vmatmul.msk.bf16.gmra.mxu0 %vm238_vm0, %v1199_v32 }
  0xbc   : > { %v358_v36 = vadd.f32 %v357_v33, %v269_v61  ;;  %1746 = vmatmul.msk.bf16.gmra.mxu3 %vm238_vm0, %v1067_v35  ;;  %v938_v35 = vpack.c.bf16 %v2168_v25, %v1672_v24 }
  0xbe   : > { %1658 = vmatmul.msk.bf16.gmra.mxu1 %vm238_vm0, %v803_v31  ;;  %v510_v39 = vadd.f32 %v476_v23, %v358_v36  ;;  %1703 = vmatmul.msk.bf16.gmra.mxu2 %vm238_vm0, %v936_v38  ;;  %v1715_v23 = vld [vmem:[%s1905_s23 + $0x4d] sm:$0xff] }
  0xbf   : > { %v608_v40 = vpop.f32.mrf.mxu3  ;;  %v1069_v33 = vpack.c.bf16 %v1715_v23, %v1714_v19  ;;  %v807_v23 = vpack.c.bf16 %v1674_v49, %v2168_v25 }
  0xc0   : > { %v642_v41 = vadd.f32 %v608_v40, %v510_v39  ;;  %v742_v43 = vpop.f32.mrf.mxu0 }
  0xc1   : > { %v481_v45 = vpop.f32.mrf.mxu2 }
  0xc2   : > { %v2142_v46 = vadd.f32 %v740_v34, %v642_v41 }
  0xc3   : > { %v359_v42 = vpop.f32.mrf.mxu1 }
  0xc4   : > { %v360_v44 = vadd.f32 %v359_v42, %v271_v2 }
  0xc6   : > { %v511_v47 = vadd.f32 %v478_v37, %v360_v44  ;;  %v1760_v44 = vld [vmem:[%s1905_s23 + $0x56] sm:$0xff] }
  0xc7   : > { %v610_v54 = vpop.f32.mrf.mxu3 }
  0xc8   : > { %v643_v57 = vadd.f32 %v610_v54, %v511_v47  ;;  %v745_v59 = vpop.f32.mrf.mxu0  ;;  %v1716_v47 = vld [vmem:[%s1905_s23 + $0x55] sm:$0xff] }
  0xc9   : > { %v483_v63 = vpop.f32.mrf.mxu2 }
  0xca   : > { %v2154_v2 = vadd.f32 %v742_v43, %v643_v57 }
  0xcb   : > { %v362_v58 = vpop.f32.mrf.mxu1  ;;  %1791 = vmatmul.msk.bf16.gmra.mxu0 %vm238_vm0, %v1200_v56 }
  0xcc   : > { %v363_v61 = vadd.f32 %v362_v58, %v274_v15  ;;  %1747 = vmatmul.msk.bf16.gmra.mxu3 %vm238_vm0, %v1068_v60  ;;  %v1758_v15 = vld [vmem:[%s1905_s23 + $0x46] sm:$0xff]  ;;  %v1070_v58 = vpack.c.bf16 %v1717_v48, %v1716_v47  ;;  %v939_v60 = vpack.c.bf16 %v2188_v50, %v1674_v49 }
  0xcd   : > { %v1201_v28 = vpack.c.bf16 %v1759_v17, %v1758_v15  ;;  %v1719_v15 = vld [vmem:[%s1905_s23 + $0x6d] sm:$0xff] }
  0xce   : > { %1659 = vmatmul.msk.bf16.gmra.mxu1 %vm238_vm0, %v804_v55  ;;  %v512_v5 = vadd.f32 %v481_v45, %v363_v61  ;;  %1704 = vmatmul.msk.bf16.gmra.mxu2 %vm238_vm0, %v937_v0  ;;  %v1761_v45 = vld [vmem:[%s1905_s23 + $0x5e] sm:$0xff]  ;;  %v1676_v17 = vld [vmem:[%s1905_s23 + $0x74] sm:$0xff] }
  0xcf   : > { %v613_v6 = vpop.f32.mrf.mxu3  ;;  %v1202_v54 = vpack.c.bf16 %v1761_v45, %v1760_v44 }
  0xd0   : > { %v644_v7 = vadd.f32 %v613_v6, %v512_v5  ;;  %v747_v9 = vpop.f32.mrf.mxu0 }
  0xd1   : > { %v486_v11 = vpop.f32.mrf.mxu2 }
  0xd2   : > { %v2160_v13 = vadd.f32 %v745_v59, %v644_v7 }
  0xd3   : > { %v364_v8 = vpop.f32.mrf.mxu1 }
  0xd4   : > { %v365_v10 = vadd.f32 %v364_v8, %v276_v21 }
  0xd6   : > { %v513_v14 = vadd.f32 %v483_v63, %v365_v10  ;;  %v1762_v10 = vld [vmem:[%s1905_s23 + $0x66] sm:$0xff] }
  0xd7   : > { %v615_v26 = vpop.f32.mrf.mxu3 }
  0xd8   : > { %v645_v30 = vadd.f32 %v615_v26, %v513_v14  ;;  %v750_v32 = vpop.f32.mrf.mxu0  ;;  %v1718_v14 = vld [vmem:[%s1905_s23 + $0x65] sm:$0xff] }
  0xd9   : > { %v488_v34 = vpop.f32.mrf.mxu2 }
  0xda   : > { %v2173_v36 = vadd.f32 %v747_v9, %v645_v30  ;;  %v1071_v30 = vpack.c.bf16 %v1719_v15, %v1718_v14 }
  0xdb   : > { %v367_v31 = vpop.f32.mrf.mxu1  ;;  %1792 = vmatmul.msk.bf16.gmra.mxu0 %vm238_vm0, %v1201_v28 }
  0xdc   : > { %v368_v21 = vadd.f32 %v367_v31, %v2093_v62  ;;  %1748 = vmatmul.msk.bf16.gmra.mxu3 %vm238_vm0, %v1069_v33 }
  0xde   : > { %1660 = vmatmul.msk.bf16.gmra.mxu1 %vm238_vm0, %v805_v27  ;;  %v514_v29 = vadd.f32 %v486_v11, %v368_v21  ;;  %1705 = vmatmul.msk.bf16.gmra.mxu2 %vm238_vm0, %v938_v35  ;;  %v1763_v11 = vld [vmem:[%s1905_s23 + $0x6e] sm:$0xff] }
  0xdf   : > { %v618_v62 = vpop.f32.mrf.mxu3  ;;  %v1203_v24 = vpack.c.bf16 %v1763_v11, %v1762_v10 }
  0xe0   : > { %v646_v37 = vadd.f32 %v618_v62, %v514_v29  ;;  %v752_v39 = vpop.f32.mrf.mxu0 }
  0xe1   : > { %v491_v41 = vpop.f32.mrf.mxu2 }
  0xe2   : > { %v2180_v42 = vadd.f32 %v750_v32, %v646_v37  ;;  %v940_v32 = vpack.c.bf16 %v1676_v17, %v1676_v17 }
  0xe3   : > { %v369_v38 = vpop.f32.mrf.mxu1 }
  0xe4   : > { %v370_v40 = vadd.f32 %v369_v38, %v2101_v3 }
  0xe6   : > { %v515_v43 = vadd.f32 %v488_v34, %v370_v40  ;;  %v1720_v40 = vld [vmem:[%s1905_s23 + $0x75] sm:$0xff] }
  0xe7   : > { %v620_v51 = vpop.f32.mrf.mxu3  ;;  %v1072_v49 = vpack.c.bf16 %v1720_v40, %v1720_v40 }
  0xe8   : > { %v647_v55 = vadd.f32 %v620_v51, %v515_v43  ;;  %v755_v57 = vpop.f32.mrf.mxu0  ;;  %v808_v43 = vpack.c.bf16 %v2188_v50, %v2188_v50 }
  0xe9   : > { %v493_v59 = vpop.f32.mrf.mxu2 }
  0xea   : > { %v2193_v61 = vadd.f32 %v752_v39, %v647_v55  ;;  %v1764_v39 = vld [vmem:[%s1905_s23 + $0x76] sm:$0xff]  ;;  %s146_s23 = smul.u32 13, %s1416_s13 }
  0xeb   : > { %v372_v56 = vpop.f32.mrf.mxu1  ;;  %1793 = vmatmul.msk.bf16.gmra.mxu0 %vm238_vm0, %v1202_v54  ;;  %v1204_v44 = vpack.c.bf16 %v1764_v39, %v1764_v39 }
  0xec   : > { %v373_v3 = vadd.f32 %v372_v56, %v2116_v16  ;;  %1749 = vmatmul.msk.bf16.gmra.mxu3 %vm238_vm0, %v1070_v58  ;;  %p147_p3 = scmp.lt.s32.totalorder %s146_s23, 25 }
  0xee   : > { %1661 = vmatmul.msk.bf16.gmra.mxu1 %vm238_vm0, %v806_v52  ;;  %v516_v53 = vadd.f32 %v491_v41, %v373_v3  ;;  %1706 = vmatmul.msk.bf16.gmra.mxu2 %vm238_vm0, %v939_v60  ;;  %s2308_s23 = smov (!%p147_p3, %s146_s23), 25 }
  0xef   : > { %v623_v16 = vpop.f32.mrf.mxu3  ;;  %s1420_s17 = sshll.u32 %s2308_s23, 3 }
  0xf0   : > { %v648_v63 = vadd.f32 %v623_v16, %v516_v53  ;;  %v757_v5 = vpop.f32.mrf.mxu0  ;;  %s2248_s21 = scalar_lea.vmem %s2306_s3, %s1420_s17 }
  0xf1   : > { %v496_v7 = vpop.f32.mrf.mxu2 }
  0xf2   : > { %v2200_v8 = vadd.f32 %v755_v57, %v648_v63 }
  0xf3   : > { %v374_v0 = vpop.f32.mrf.mxu1 }
  0xf4   : > { %v375_v6 = vadd.f32 %v374_v0, %v2127_v22 }
  0xf6   : > { %v517_v9 = vadd.f32 %v493_v59, %v375_v6 }
  0xf7   : > { %v625_v19 = vpop.f32.mrf.mxu3 }
  0xf8   : > { %v649_v26 = vadd.f32 %v625_v19, %v517_v9  ;;  %v760_v28 = vpop.f32.mrf.mxu0 }
  0xf9   : > { %v498_v22 = vpop.f32.mrf.mxu2 }
  0xfa   : > { %v2209_v33 = vadd.f32 %v757_v5, %v649_v26 }
  0xfb   : > { %v377_v27 = vpop.f32.mrf.mxu1  ;;  %1794 = vmatmul.msk.bf16.gmra.mxu0 %vm238_vm0, %v1203_v24 }
  0xfc   : > { %v378_v31 = vadd.f32 %v377_v27, %v2103_v4  ;;  %1750 = vmatmul.msk.bf16.gmra.mxu3 %vm238_vm0, %v1071_v30  ;;  %v2242_v30 = vld [vmem:[%s2305_s2] ss:$0 sm:$0xff] }
  0xfe   : > { %1662 = vmatmul.msk.bf16.gmra.mxu1 %vm238_vm0, %v807_v23  ;;  %v518_v21 = vadd.f32 %v496_v7, %v378_v31  ;;  %1707 = vmatmul.msk.bf16.gmra.mxu2 %vm238_vm0, %v940_v32 }
  0xff   : > { %v628_v25 = vpop.f32.mrf.mxu3 }
 0x100   : > { %v650_v34 = vadd.f32 %v628_v25, %v518_v21  ;;  %v762_v29 = vpop.f32.mrf.mxu0 }
 0x101   : > { %v501_v62 = vpop.f32.mrf.mxu2 }
 0x102   : > { %v2216_v37 = vadd.f32 %v760_v28, %v650_v34 }
 0x103   : > { %v379_v35 = vpop.f32.mrf.mxu1 }
 0x104   : > { %v380_v4 = vadd.f32 %v379_v35, %v2118_v18 }
 0x106   : > { %v519_v38 = vadd.f32 %v498_v22, %v380_v4 }
 0x107   : > { %v630_v41 = vpop.f32.mrf.mxu3 }
 0x108   : > { %v651_v45 = vadd.f32 %v630_v41, %v519_v38  ;;  %v765_v48 = vpop.f32.mrf.mxu0 }
 0x109   : > { %v503_v52 = vpop.f32.mrf.mxu2 }
 0x10a   : > { %v2223_v54 = vadd.f32 %v762_v29, %v651_v45 }
 0x10b   : > { %v382_v47 = vpop.f32.mrf.mxu1  ;;  %1795 = vmatmul.msk.bf16.gmra.mxu0 %vm238_vm0, %v1204_v44 }
 0x10c   : > { %v383_v51 = vadd.f32 %v382_v47, %v2099_v1  ;;  %1751 = vmatmul.msk.bf16.gmra.mxu3 %vm238_vm0, %v1072_v49 }
 0x10e   : > { %1663 = vmatmul.msk.bf16.gmra.mxu1 %vm238_vm0, %v808_v43  ;;  %v520_v18 = vadd.f32 %v501_v62, %v383_v51 }
 0x10f   : > { %v633_v55 = vpop.f32.mrf.mxu3 }
 0x110   : > { %v652_v56 = vadd.f32 %v633_v55, %v520_v18  ;;  %v767_v57 = vpop.f32.mrf.mxu0 }
 0x111   : > { %v506_v3 = vpop.f32.mrf.mxu2 }
 0x112   : > { %v2229_v59 = vadd.f32 %v765_v48, %v652_v56 }
 0x113   : > { %v384_v50 = vpop.f32.mrf.mxu1 }
 0x114   : > { %v385_v58 = vadd.f32 %v384_v50, %v2114_v12 }
 0x116   : > { %v521_v1 = vadd.f32 %v503_v52, %v385_v58 }
 0x117   : > { %v635_v60 = vpop.f32.mrf.mxu3 }
 0x118   : > { %v653_v53 = vadd.f32 %v635_v60, %v521_v1  ;;  %v770_v63 = vpop.f32.mrf.mxu0 }
 0x119   : > { %v508_v5 = vpop.f32.mrf.mxu2 }
 0x11a   : > { %v2232_v6 = vadd.f32 %v767_v57, %v653_v53 }
 0x11b   : > { %v387_v16 = vpop.f32.mrf.mxu1 }
 0x11c   : > { %v388_v0 = vadd.f32 %v387_v16, %v2125_v20 }
 0x11e   : > { %v522_v7 = vadd.f32 %v506_v3, %v388_v0 }
 0x11f   : > { %v638_v9 = vpop.f32.mrf.mxu3 }
 0x120   : > { %v654_v10 = vadd.f32 %v638_v9, %v522_v7  ;;  %v772_v14 = vpop.f32.mrf.mxu0 }
 0x121   : > { %v1004_v12 = vpop.f32.mrf.mxu2 }
 0x122   : > { %v2234_v15 = vadd.f32 %v770_v63, %v654_v10 }
 0x123   : > { %v389_v11 = vpop.f32.mrf.mxu1 }
 0x127   : > { %v640_v17 = vpop.f32.mrf.mxu3 }
 0x128   : > { %v1268_v23 = vpop.f32.mrf.mxu0 }
 0x129   : > { %v1006_v24 = vpop.f32.mrf.mxu2 }
 0x12b   : > { %v872_v19 = vpop.f32.mrf.mxu1 }
 0x12c   : > { %v906_v20 = vadd.f32 %v872_v19, %v2142_v46 }
 0x12e   : > { %v1038_v26 = vadd.f32 %v1004_v12, %v906_v20 }
 0x12f   : > { %v1136_v27 = vpop.f32.mrf.mxu3 }
 0x130   : > { %v1170_v28 = vadd.f32 %v1136_v27, %v1038_v26  ;;  %v1270_v22 = vpop.f32.mrf.mxu0 }
 0x131   : > { %v1009_v32 = vpop.f32.mrf.mxu2 }
 0x132   : > { %v1302_v21 = vadd.f32 %v1268_v23, %v1170_v28 }
 0x133   : > { %v874_v31 = vpop.f32.mrf.mxu1 }
 0x134   : > { %v907_v25 = vadd.f32 %v874_v31, %v2154_v2  ;;  %v1319_v46 = vadd.f32 %v2242_v30, %v1302_v21 }
 0x136   : > { %1333 = vst.msk [vmem:[%s2248_s21] sm:$0xff] %vm1332_vm1, %v1319_v46  ;;  %v1039_v34 = vadd.f32 %v1006_v24, %v907_v25 }
 0x137   : > { %v1138_v35 = vpop.f32.mrf.mxu3 }
 0x138   : > { %v1171_v29 = vadd.f32 %v1138_v35, %v1039_v34  ;;  %v1273_v62 = vpop.f32.mrf.mxu0 }
 0x139   : > { %v1011_v38 = vpop.f32.mrf.mxu2 }
 0x13a   : > { %v1303_v2 = vadd.f32 %v1270_v22, %v1171_v29 }
 0x13b   : > { %v877_v4 = vpop.f32.mrf.mxu1 }
 0x13c   : > { %v908_v39 = vadd.f32 %v877_v4, %v2160_v13  ;;  %v1320_v40 = vadd.f32 %v2242_v30, %v1303_v2 }
 0x13e   : > { %1334 = vst.msk [vmem:[%s2248_s21 + $0x8] sm:$0xff] %vm1332_vm1, %v1320_v40  ;;  %v1040_v41 = vadd.f32 %v1009_v32, %v908_v39 }
 0x13f   : > { %v1141_v43 = vpop.f32.mrf.mxu3 }
 0x140   : > { %v1172_v44 = vadd.f32 %v1141_v43, %v1040_v41  ;;  %v1275_v47 = vpop.f32.mrf.mxu0 }
 0x141   : > { %v1014_v48 = vpop.f32.mrf.mxu2 }
 0x142   : > { %v1304_v49 = vadd.f32 %v1273_v62, %v1172_v44 }
 0x143   : > { %v879_v45 = vpop.f32.mrf.mxu1 }
 0x144   : > { %v909_v51 = vadd.f32 %v879_v45, %v2173_v36  ;;  %v1321_v52 = vadd.f32 %v2242_v30, %v1304_v49 }
 0x146   : > { %1335 = vst.msk [vmem:[%s2248_s21 + $0x10] sm:$0xff] %vm1332_vm1, %v1321_v52  ;;  %v1041_v18 = vadd.f32 %v1011_v38, %v909_v51 }
 0x147   : > { %v1143_v13 = vpop.f32.mrf.mxu3 }
 0x148   : > { %v1173_v55 = vadd.f32 %v1143_v13, %v1041_v18  ;;  %v1278_v50 = vpop.f32.mrf.mxu0 }
 0x149   : > { %v1016_v57 = vpop.f32.mrf.mxu2 }
 0x14a   : > { %v1305_v58 = vadd.f32 %v1275_v47, %v1173_v55 }
 0x14b   : > { %v882_v56 = vpop.f32.mrf.mxu1 }
 0x14c   : > { %v910_v3 = vadd.f32 %v882_v56, %v2180_v42  ;;  %v1322_v1 = vadd.f32 %v2242_v30, %v1305_v58 }
 0x14e   : > { %1336 = vst.msk [vmem:[%s2248_s21 + $0x18] sm:$0xff] %vm1332_vm1, %v1322_v1  ;;  %v1042_v60 = vadd.f32 %v1014_v48, %v910_v3 }
 0x14f   : > { %v1146_v36 = vpop.f32.mrf.mxu3 }
 0x150   : > { %v1174_v53 = vadd.f32 %v1146_v36, %v1042_v60  ;;  %v1280_v63 = vpop.f32.mrf.mxu0 }
 0x151   : > { %v1019_v0 = vpop.f32.mrf.mxu2 }
 0x152   : > { %v1306_v5 = vadd.f32 %v1278_v50, %v1174_v53 }
 0x153   : > { %v884_v16 = vpop.f32.mrf.mxu1 }
 0x154   : > { %v911_v7 = vadd.f32 %v884_v16, %v2193_v61  ;;  %v1323_v9 = vadd.f32 %v2242_v30, %v1306_v5 }
 0x156   : > { %1337 = vst.msk [vmem:[%s2248_s21 + $0x20] sm:$0xff] %vm1332_vm1, %v1323_v9  ;;  %v1043_v10 = vadd.f32 %v1016_v57, %v911_v7 }
 0x157   : > { %v1148_v42 = vpop.f32.mrf.mxu3 }
 0x158   : > { %v1175_v11 = vadd.f32 %v1148_v42, %v1043_v10  ;;  %v1283_v12 = vpop.f32.mrf.mxu0 }
 0x159   : > { %v1021_v17 = vpop.f32.mrf.mxu2 }
 0x15a   : > { %v1307_v19 = vadd.f32 %v1280_v63, %v1175_v11 }
 0x15b   : > { %v887_v14 = vpop.f32.mrf.mxu1 }
 0x15c   : > { %v912_v23 = vadd.f32 %v887_v14, %v2200_v8  ;;  %v1324_v24 = vadd.f32 %v2242_v30, %v1307_v19 }
 0x15e   : > { %1338 = vst.msk [vmem:[%s2248_s21 + $0x28] sm:$0xff] %vm1332_vm1, %v1324_v24  ;;  %v1044_v20 = vadd.f32 %v1019_v0, %v912_v23 }
 0x15f   : > { %v1151_v61 = vpop.f32.mrf.mxu3 }
 0x160   : > { %v1176_v26 = vadd.f32 %v1151_v61, %v1044_v20  ;;  %v1285_v28 = vpop.f32.mrf.mxu0 }
 0x161   : > { %v1024_v31 = vpop.f32.mrf.mxu2 }
 0x162   : > { %v1308_v22 = vadd.f32 %v1283_v12, %v1176_v26 }
 0x163   : > { %v889_v27 = vpop.f32.mrf.mxu1 }
 0x164   : > { %v913_v32 = vadd.f32 %v889_v27, %v2209_v33  ;;  %v1325_v21 = vadd.f32 %v2242_v30, %v1308_v22 }
 0x166   : > { %1339 = vst.msk [vmem:[%s2248_s21 + $0x30] sm:$0xff] %vm1332_vm1, %v1325_v21  ;;  %v1045_v25 = vadd.f32 %v1021_v17, %v913_v32 }
 0x167   : > { %v1153_v8 = vpop.f32.mrf.mxu3 }
 0x168   : > { %v1177_v46 = vadd.f32 %v1153_v8, %v1045_v25  ;;  %v1288_v35 = vpop.f32.mrf.mxu0 }
 0x169   : > { %v1026_v29 = vpop.f32.mrf.mxu2 }
 0x16a   : > { %v1309_v4 = vadd.f32 %v1285_v28, %v1177_v46 }
 0x16b   : > { %v892_v34 = vpop.f32.mrf.mxu1 }
 0x16c   : > { %v914_v62 = vadd.f32 %v892_v34, %v2216_v37  ;;  %v1326_v38 = vadd.f32 %v2242_v30, %v1309_v4 }
 0x16e   : > { %1340 = vst.msk [vmem:[%s2248_s21 + $0x38] sm:$0xff] %vm1332_vm1, %v1326_v38  ;;  %v1046_v2 = vadd.f32 %v1024_v31, %v914_v62 }
 0x16f   : > { %v1156_v33 = vpop.f32.mrf.mxu3 }
 0x170   : > { %v1178_v39 = vadd.f32 %v1156_v33, %v1046_v2  ;;  %v1290_v41 = vpop.f32.mrf.mxu0 }
 0x171   : > { %v1029_v43 = vpop.f32.mrf.mxu2 }
 0x172   : > { %v1310_v44 = vadd.f32 %v1288_v35, %v1178_v39 }
 0x173   : > { %v894_v40 = vpop.f32.mrf.mxu1 }
 0x174   : > { %v915_v45 = vadd.f32 %v894_v40, %v2223_v54  ;;  %v1327_v47 = vadd.f32 %v2242_v30, %v1310_v44 }
 0x176   : > { %1341 = vst.msk [vmem:[%s2248_s21 + $0x40] sm:$0xff] %vm1332_vm1, %v1327_v47  ;;  %v1047_v48 = vadd.f32 %v1026_v29, %v915_v45 }
 0x177   : > { %v1158_v37 = vpop.f32.mrf.mxu3 }
 0x178   : > { %v1179_v49 = vadd.f32 %v1158_v37, %v1047_v48  ;;  %v1293_v52 = vpop.f32.mrf.mxu0 }
 0x179   : > { %v1031_v18 = vpop.f32.mrf.mxu2 }
 0x17a   : > { %v1311_v13 = vadd.f32 %v1290_v41, %v1179_v49 }
 0x17b   : > { %v897_v51 = vpop.f32.mrf.mxu1 }
 0x17c   : > { %v916_v55 = vadd.f32 %v897_v51, %v2229_v59  ;;  %v1328_v56 = vadd.f32 %v2242_v30, %v1311_v13 }
 0x17e   : > { %1342 = vst.msk [vmem:[%s2248_s21 + $0x48] sm:$0xff] %vm1332_vm1, %v1328_v56  ;;  %v1048_v50 = vadd.f32 %v1029_v43, %v916_v55 }
 0x17f   : > { %v1161_v54 = vpop.f32.mrf.mxu3 }
 0x180   : > { %v1180_v57 = vadd.f32 %v1161_v54, %v1048_v50  ;;  %v1295_v3 = vpop.f32.mrf.mxu0 }
 0x181   : > { %v1034_v1 = vpop.f32.mrf.mxu2 }
 0x182   : > { %v1312_v60 = vadd.f32 %v1293_v52, %v1180_v57 }
 0x183   : > { %v899_v58 = vpop.f32.mrf.mxu1 }
 0x184   : > { %v917_v36 = vadd.f32 %v899_v58, %v2232_v6  ;;  %v1329_v53 = vadd.f32 %v2242_v30, %v1312_v60 }
 0x186   : > { %1343 = vst.msk [vmem:[%s2248_s21 + $0x50] sm:$0xff] %vm1332_vm1, %v1329_v53  ;;  %v1049_v16 = vadd.f32 %v1031_v18, %v917_v36 }
 0x187   : > { %v1163_v59 = vpop.f32.mrf.mxu3 }
 0x188   : > { %v1181_v63 = vadd.f32 %v1163_v59, %v1049_v16  ;;  %v1298_v5 = vpop.f32.mrf.mxu0 }
 0x189   : > { %v1036_v7 = vpop.f32.mrf.mxu2 }
 0x18a   : > { %v1313_v9 = vadd.f32 %v1295_v3, %v1181_v63 }
 0x18b   : > { %v902_v0 = vpop.f32.mrf.mxu1 }
 0x18c   : > { %v918_v10 = vadd.f32 %v902_v0, %v2234_v15  ;;  %v1330_v42 = vadd.f32 %v2242_v30, %v1313_v9 }
 0x18e   : > { %1344 = vst.msk [vmem:[%s2248_s21 + $0x58] sm:$0xff] %vm1332_vm1, %v1330_v42  ;;  %v1050_v11 = vadd.f32 %v1034_v1, %v918_v10 }
 0x18f   : > { %v1166_v6 = vpop.f32.mrf.mxu3 }
 0x190   : > { %v1182_v14 = vadd.f32 %v1166_v6, %v1050_v11  ;;  %v1300_v17 = vpop.f32.mrf.mxu0 }
 0x192   : > { %v1314_v19 = vadd.f32 %v1298_v5, %v1182_v14 }
 0x193   : > { %v904_v12 = vpop.f32.mrf.mxu1 }
 0x194   : > { %v1331_v23 = vadd.f32 %v2242_v30, %v1314_v19 }
 0x196   : > { %1345 = vst.msk [vmem:[%s2248_s21 + $0x60] sm:$0xff] %vm1332_vm1, %v1331_v23 }
 0x197   : > { %v1168_v24 = vpop.f32.mrf.mxu3 }
 0x198 PF: > { %s13_s12 = sadd.s32 1, %s1861_s12  }
 0x199   : > { %p10_p4 = scmp.ge.s32.totalorder %s13_s12, 4  }
 0x19b   :  { %12 = sbr.rel (!%p10_p4) target bundleno = 1 (0x1), region = 76 }

// kernel: forward.17
= control target key start
LH: loop header
LB: loop body
LE: loop exit
PB: predicated region body
PF: predicated region fallthrough
CT: control target
= control target key end

     0   :  { %s1311_s12 = smov 0   ;;  %s1552_s0 = inlined_call_operand.vmem [shape: f32[96,64], index: 0, kind: input, shape index: {}]   ;;  %s1553_s1 = inlined_call_operand.vmem [shape: bf16[9,64,16], index: 1, kind: input, shape index: {}]   ;;  %s1554_s2 = inlined_call_operand.vmem [shape: f32[1,16], index: 2, kind: input, shape index: {}]   ;;  %s1555_s3 = inlined_call_operand.vmem [shape: f32[80,16], index: 3, kind: output, shape index: {}]  }
   0x1 LB: > { %s948_s13 = sadd.s32 4294967295, %s1289_s12   ;;  %p951_p0 = scmp.ge.s32.totalorder %s1289_s12, 1  ;;  %s1289_s12 = sphi %s1311_s12, %s13_s12  }
   0x2   : > { %p127_p1 = scmp.lt.s32.totalorder %s1289_s12, 3 }
   0x4   : > { %p128_p2 = pnand %p951_p0, %p127_p1 }
   0x5   : > { %s153_s20 = smul.u32 (!%p128_p2), 40, %s948_s13 }
   0x6   : > { %131 = sbr.rel (%p128_p2) target bundleno = 267 (0x10b), region = 32 }
   0x7   : > { %s1339_s27 = scalar_lea.vmem (!%p128_p2), %s1552_s0, %s153_s20 }
   0xb   : > { %v1237_v0 = vld [vmem:[%s1553_s1 + $0x38] sm:$0xff]  ;;  %v1236_v2 = vld [vmem:[%s1553_s1 + $0x30] sm:$0xff]  ;;  %v1235_v4 = vld [vmem:[%s1553_s1 + $0x28] sm:$0xff]  ;;  %vm214_vm0 = vcmask 523264   ;;  %vm872_vm1 = vcmask 130048  }
   0xc   : > { %v1245_v1 = vld [vmem:[%s1553_s1 + $0x78] sm:$0xff]  ;;  %228 = vmatpush.bf16.msra.mxu0 %v1237_v0  ;;  %1266 = vmatpush.bf16.msra.mxu1 %v1237_v0  ;;  %v1244_v3 = vld [vmem:[%s1553_s1 + $0x70] sm:$0xff]  ;;  %v1243_v5 = vld [vmem:[%s1553_s1 + $0x68] sm:$0xff] }
   0xd   : > { %1267 = vmatpush.bf16.msra.mxu2 %v1237_v0  ;;  %439 = vmatpush.bf16.msra.mxu3 %v1245_v1  ;;  %v1234_v6 = vld [vmem:[%s1553_s1 + $0x20] sm:$0xff]  ;;  %v954_v8 = vld [vmem:[%s1339_s27 + $0x9] sm:$0xff]  ;;  %v955_v9 = vld [vmem:[%s1339_s27 + $0x11] sm:$0xff] }
   0xe   : > { %v953_v7 = vld [vmem:[%s1339_s27 + $0x1] sm:$0xff]  ;;  %v956_v10 = vld [vmem:[%s1339_s27 + $0x19] sm:$0xff]  ;;  %v1366_v20 = vld [vmem:[%s1339_s27 + $0xe] sm:$0xff] }
   0xf   : > { %v957_v11 = vld [vmem:[%s1339_s27 + $0x21] sm:$0xff]  ;;  %v1233_v12 = vld [vmem:[%s1553_s1 + $0x18] sm:$0xff]  ;;  %v178_v15 = vpack.c.bf16 %v954_v8, %v953_v7  ;;  %v179_v16 = vpack.c.bf16 %v956_v10, %v955_v9  ;;  %v1232_v21 = vld [vmem:[%s1553_s1 + $0x10] sm:$0xff] }
  0x10   : > { %229 = vmatpush.bf16.msra.mxu0 %v1236_v2  ;;  %1268 = vmatpush.bf16.msra.mxu1 %v1236_v2  ;;  %v1241_v13 = vld [vmem:[%s1553_s1 + $0x58] sm:$0xff]  ;;  %v1242_v17 = vld [vmem:[%s1553_s1 + $0x60] sm:$0xff]  ;;  %v180_v18 = vpack.c.bf16 %v957_v11, %v957_v11  ;;  %v1240_v23 = vld [vmem:[%s1553_s1 + $0x50] sm:$0xff] }
  0x11   : > { %1269 = vmatpush.bf16.msra.mxu2 %v1236_v2  ;;  %440 = vmatpush.bf16.msra.mxu3 %v1244_v3  ;;  %v1249_v14 = vld [vmem:[%s1553_s1 + $0x98] sm:$0xff]  ;;  %v1036_v19 = vld [vmem:[%s1339_s27 + $0x6] sm:$0xff]  ;;  %v1248_v24 = vld [vmem:[%s1553_s1 + $0x90] sm:$0xff] }
  0x12   : > { %v1261_v22 = vld [vmem:[%s1553_s1 + $0xf8] sm:$0xff]  ;;  %v390_v25 = vpack.c.bf16 %v1366_v20, %v1036_v19  ;;  %v1231_v26 = vld [vmem:[%s1553_s1 + $0x8] sm:$0xff]  ;;  %v1260_v27 = vld [vmem:[%s1553_s1 + $0xf0] sm:$0xff] }
  0x13   : > { %v1239_v28 = vld [vmem:[%s1553_s1 + $0x48] sm:$0xff]  ;;  %v1230_v30 = vld [vmem:[%s1553_s1] sm:$0xff]  ;;  %v1257_v36 = vld [vmem:[%s1553_s1 + $0xd8] sm:$0xff] }
  0x14   : > { %230 = vmatpush.bf16.msra.mxu0 %v1235_v4  ;;  %1270 = vmatpush.bf16.msra.mxu1 %v1235_v4  ;;  %v1247_v29 = vld [vmem:[%s1553_s1 + $0x88] sm:$0xff]  ;;  %v1238_v32 = vld [vmem:[%s1553_s1 + $0x40] sm:$0xff]  ;;  %v1253_v37 = vld [vmem:[%s1553_s1 + $0xb8] sm:$0xff] }
  0x15   : > { %1271 = vmatpush.bf16.msra.mxu2 %v1235_v4  ;;  %441 = vmatpush.bf16.msra.mxu3 %v1243_v5  ;;  %v1259_v31 = vld [vmem:[%s1553_s1 + $0xe8] sm:$0xff]  ;;  %v1246_v33 = vld [vmem:[%s1553_s1 + $0x80] sm:$0xff]  ;;  %v1265_v40 = vld [vmem:[%s1553_s1 + $0x118] sm:$0xff] }
  0x16   : > { %v155_v34 = vld [vmem:[%s1339_s27] sm:$0xff]  ;;  %v1411_v35 = vld [vmem:[%s1339_s27 + $0x8] sm:$0xff]  ;;  %v1428_v46 = vld [vmem:[%s1339_s27 + $0x16] sm:$0xff] }
  0x17   : > { %v1068_v38 = vld [vmem:[%s1339_s27 + $0x7] sm:$0xff]  ;;  %v1069_v39 = vld [vmem:[%s1339_s27 + $0xf] sm:$0xff]  ;;  %v160_v43 = vpack.c.bf16 %v1411_v35, %v155_v34  ;;  %v1431_v47 = vld [vmem:[%s1339_s27 + $0x1e] sm:$0xff] }
  0x18   : > { %231 = vmatpush.bf16.msra.mxu0 %v1234_v6  ;;  %1272 = vmatpush.bf16.msra.mxu1 %v1234_v6  ;;  %v1004_v41 = vld [vmem:[%s1339_s27 + $0x2] sm:$0xff]  ;;  %v1005_v42 = vld [vmem:[%s1339_s27 + $0xa] sm:$0xff]  ;;  %v470_v44 = vpack.c.bf16 %v1069_v39, %v1068_v38  ;;  %v391_v51 = vpack.c.bf16 %v1431_v47, %v1428_v46  ;;  %v158_v60 = vld [vmem:[%s1339_s27 + $0x18] sm:$0xff] }
  0x19   : > { %1273 = vmatpush.bf16.msra.mxu2 %v1234_v6  ;;  %442 = vmatpush.bf16.msra.mxu3 %v1242_v17  ;;  %v310_v45 = vpack.c.bf16 %v1005_v42, %v1004_v41  ;;  %v1252_v48 = vld [vmem:[%s1553_s1 + $0xb0] sm:$0xff]  ;;  %v1251_v52 = vld [vmem:[%s1553_s1 + $0xa8] sm:$0xff]  ;;  %v1258_v53 = vld [vmem:[%s1553_s1 + $0xe0] sm:$0xff] }
  0x1a   : > { %v1256_v49 = vld [vmem:[%s1553_s1 + $0xd0] sm:$0xff]  ;;  %v1255_v54 = vld [vmem:[%s1553_s1 + $0xc8] sm:$0xff]  ;;  %v1250_v56 = vld [vmem:[%s1553_s1 + $0xa0] sm:$0xff] }
  0x1b   : > { %982 = vmatmul.msk.bf16.vlgmr.msra.gmra.mxu0 %vm214_vm0, %v178_v15  ;;  %983 = vmatmul.msk.bf16.vlgmr.msra.gmra.mxu1 %vm214_vm0, %v179_v16  ;;  %v1264_v50 = vld [vmem:[%s1553_s1 + $0x110] sm:$0xff]  ;;  %v1263_v55 = vld [vmem:[%s1553_s1 + $0x108] sm:$0xff]  ;;  %v1254_v57 = vld [vmem:[%s1553_s1 + $0xc0] sm:$0xff] }
  0x1c   : > { %284 = vmatpush.bf16.msrb.mxu1 %v1233_v12  ;;  %519 = vmatpush.bf16.msrb.mxu0 %v1249_v14  ;;  %v1262_v58 = vld [vmem:[%s1553_s1 + $0x100] sm:$0xff]  ;;  %v157_v59 = vld [vmem:[%s1339_s27 + $0x10] sm:$0xff] }
  0x1d   : > { %359 = vmatpush.bf16.msrb.mxu2 %v1241_v13  ;;  %759 = vmatpush.bf16.msrb.mxu3 %v1261_v22  ;;  %v1070_v61 = vld [vmem:[%s1339_s27 + $0x17] sm:$0xff]  ;;  %v1071_v62 = vld [vmem:[%s1339_s27 + $0x1f] sm:$0xff]  ;;  %v161_v1 = vpack.c.bf16 %v158_v60, %v157_v59  ;;  %v1072_v7 = vld [vmem:[%s1339_s27 + $0x27] sm:$0xff]  ;;  %v550_v17 = vpack.c.bf16 %v157_v59, %v1411_v35 }
  0x1e   : > { %984 = vmatmul.msk.bf16.vlgmr.msra.gmra.mxu2 %vm214_vm0, %v180_v18  ;;  %1065 = vmatmul.msk.bf16.vlgmr.msra.gmra.mxu3 %vm214_vm0, %v390_v25  ;;  %v1006_v63 = vld [vmem:[%s1339_s27 + $0x12] sm:$0xff]  ;;  %v1007_v0 = vld [vmem:[%s1339_s27 + $0x1a] sm:$0xff]  ;;  %v471_v2 = vpack.c.bf16 %v1071_v62, %v1070_v61  ;;  %v1040_v4 = vld [vmem:[%s1339_s27 + $0x26] sm:$0xff]  ;;  %v472_v10 = vpack.c.bf16 %v1072_v7, %v1072_v7  ;;  %v790_v18 = vpack.c.bf16 %v1428_v46, %v1366_v20 }
  0x1f   : > { %v311_v3 = vpack.c.bf16 %v1007_v0, %v1006_v63  ;;  %v392_v5 = vpack.c.bf16 %v1040_v4, %v1040_v4  ;;  %v159_v6 = vld [vmem:[%s1339_s27 + $0x20] sm:$0xff]  ;;  %v1164_v12 = vld [vmem:[%s1339_s27 + $0xd] sm:$0xff]  ;;  %v1165_v13 = vld [vmem:[%s1339_s27 + $0x15] sm:$0xff]  ;;  %v791_v20 = vpack.c.bf16 %v1040_v4, %v1431_v47 }
  0x20   : > { %285 = vmatpush.bf16.msrb.mxu1 %v1232_v21  ;;  %520 = vmatpush.bf16.msrb.mxu0 %v1248_v24  ;;  %v1008_v8 = vld [vmem:[%s1339_s27 + $0x22] sm:$0xff]  ;;  %v162_v9 = vpack.c.bf16 %v159_v6, %v159_v6  ;;  %v710_v14 = vpack.c.bf16 %v1165_v13, %v1164_v12  ;;  %v1132_v15 = vld [vmem:[%s1339_s27 + $0xc] sm:$0xff]  ;;  %v1133_v16 = vld [vmem:[%s1339_s27 + $0x14] sm:$0xff] }
  0x21   : > { %360 = vmatpush.bf16.msrb.mxu2 %v1240_v23  ;;  %760 = vmatpush.bf16.msrb.mxu3 %v1260_v27  ;;  %v312_v11 = vpack.c.bf16 %v1008_v8, %v1008_v8  ;;  %v630_v19 = vpack.c.bf16 %v1133_v16, %v1132_v15  ;;  %v1166_v21 = vld [vmem:[%s1339_s27 + $0x1d] sm:$0xff]  ;;  %v1167_v22 = vld [vmem:[%s1339_s27 + $0x25] sm:$0xff] }
  0x22   : > { %v711_v23 = vpack.c.bf16 %v1167_v22, %v1166_v21  ;;  %v1134_v24 = vld [vmem:[%s1339_s27 + $0x1c] sm:$0xff]  ;;  %v1135_v25 = vld [vmem:[%s1339_s27 + $0x24] sm:$0xff] }
  0x23   : > { %v631_v27 = vpack.c.bf16 %v1135_v25, %v1134_v24  ;;  %v1282_v21 = vld [vmem:[%s1554_s2] ss:$0 sm:$0xff] }
  0x24   : > { %286 = vmatpush.bf16.msrb.mxu1 %v1231_v26  ;;  %521 = vmatpush.bf16.msrb.mxu0 %v1247_v29  ;;  %v551_v26 = vpack.c.bf16 %v159_v6, %v158_v60 }
  0x25   : > { %361 = vmatpush.bf16.msrb.mxu2 %v1239_v28  ;;  %761 = vmatpush.bf16.msrb.mxu3 %v1259_v31  ;;  %v1168_v28 = vld [vmem:[%s1339_s27 + $0x2d] sm:$0xff] }
  0x26   : > { %v712_v29 = vpack.c.bf16 %v1168_v28, %v1168_v28  ;;  %v1200_v31 = vld [vmem:[%s1339_s27 + $0x2e] sm:$0xff] }
  0x27   : > { %v792_v34 = vpack.c.bf16 %v1200_v31, %v1200_v31 }
  0x28   : > { %287 = vmatpush.bf16.msrb.mxu1 %v1230_v30  ;;  %522 = vmatpush.bf16.msrb.mxu0 %v1246_v33  ;;  %v1104_v30 = vld [vmem:[%s1339_s27 + $0x28] sm:$0xff] }
  0x29   : > { %362 = vmatpush.bf16.msrb.mxu2 %v1238_v32  ;;  %762 = vmatpush.bf16.msrb.mxu3 %v1258_v53  ;;  %v1136_v32 = vld [vmem:[%s1339_s27 + $0x2c] sm:$0xff]  ;;  %v552_v33 = vpack.c.bf16 %v1104_v30, %v1104_v30  ;;  %s146_s27 = smul.u32 5, %s948_s13 }
  0x2a   : > { %v632_v35 = vpack.c.bf16 %v1136_v32, %v1136_v32 }
  0x2b   : > { %1001 = vmatmul.msk.bf16.vlgmr.msrb.gmra.mxu1 %vm214_vm0, %v160_v43  ;;  %1097 = vmatmul.msk.bf16.vlgmr.msrb.gmra.mxu0 %vm214_vm0, %v470_v44  ;;  %p147_p3 = scmp.lt.s32.totalorder %s146_s27, 9 }
  0x2c   : > { %599 = vmatpush.bf16.msra.mxu1 %v1253_v37  ;;  %839 = vmatpush.bf16.msra.mxu0 %v1265_v40 }
  0x2d   : > { %679 = vmatpush.bf16.msra.mxu2 %v1257_v36  ;;  %s1557_s27 = smov (!%p147_p3, %s146_s27), 9 }
  0x2e   : > { %1033 = vmatmul.msk.bf16.vlgmr.msrb.gmra.mxu2 %vm214_vm0, %v310_v45  ;;  %1066 = vmatmul.msk.bf16.gmra.mxu3 %vm214_vm0, %v391_v51  ;;  %s952_s17 = sshll.u32 %s1557_s27, 3 }
  0x2f   : > { %s1532_s21 = scalar_lea.vmem %s1555_s3, %s952_s17 }
  0x30   : > { %600 = vmatpush.bf16.msra.mxu1 %v1252_v48  ;;  %840 = vmatpush.bf16.msra.mxu0 %v1264_v50 }
  0x31   : > { %680 = vmatpush.bf16.msra.mxu2 %v1256_v49 }
  0x34   : > { %601 = vmatpush.bf16.msra.mxu1 %v1251_v52  ;;  %841 = vmatpush.bf16.msra.mxu0 %v1263_v55 }
  0x35   : > { %681 = vmatpush.bf16.msra.mxu2 %v1255_v54 }
  0x38   : > { %602 = vmatpush.bf16.msra.mxu1 %v1250_v56  ;;  %842 = vmatpush.bf16.msra.mxu0 %v1262_v58 }
  0x39   : > { %682 = vmatpush.bf16.msra.mxu2 %v1254_v57 }
  0x3b   : > { %1002 = vmatmul.msk.bf16.gmra.mxu1 %vm214_vm0, %v161_v1  ;;  %1098 = vmatmul.msk.bf16.gmra.mxu0 %vm214_vm0, %v471_v2 }
  0x3e   : > { %1034 = vmatmul.msk.bf16.gmra.mxu2 %vm214_vm0, %v311_v3  ;;  %1067 = vmatmul.msk.bf16.gmra.mxu3 %vm214_vm0, %v392_v5 }
  0x4b   : > { %1003 = vmatmul.msk.bf16.gmra.mxu1 %vm214_vm0, %v162_v9  ;;  %1099 = vmatmul.msk.bf16.gmra.mxu0 %vm214_vm0, %v472_v10 }
  0x4e   : > { %1035 = vmatmul.msk.bf16.gmra.mxu2 %vm214_vm0, %v312_v11  ;;  %1193 = vmatmul.msk.bf16.vlgmr.msrb.gmra.mxu3 %vm214_vm0, %v710_v14 }
  0x5b   : > { %1129 = vmatmul.msk.bf16.vlgmr.msra.gmra.mxu1 %vm214_vm0, %v550_v17  ;;  %1225 = vmatmul.msk.bf16.vlgmr.msra.gmra.mxu0 %vm214_vm0, %v790_v18 }
  0x5e   : > { %1161 = vmatmul.msk.bf16.vlgmr.msra.gmra.mxu2 %vm214_vm0, %v630_v19  ;;  %1194 = vmatmul.msk.bf16.gmra.mxu3 %vm214_vm0, %v711_v23 }
  0x6b   : > { %1130 = vmatmul.msk.bf16.gmra.mxu1 %vm214_vm0, %v551_v26  ;;  %1226 = vmatmul.msk.bf16.gmra.mxu0 %vm214_vm0, %v791_v20 }
  0x6e   : > { %1162 = vmatmul.msk.bf16.gmra.mxu2 %vm214_vm0, %v631_v27  ;;  %1195 = vmatmul.msk.bf16.gmra.mxu3 %vm214_vm0, %v712_v29 }
  0x7b   : > { %1131 = vmatmul.msk.bf16.gmra.mxu1 %vm214_vm0, %v552_v33  ;;  %1227 = vmatmul.msk.bf16.gmra.mxu0 %vm214_vm0, %v792_v34 }
  0x7e   : > { %1163 = vmatmul.msk.bf16.gmra.mxu2 %vm214_vm0, %v632_v35 }
  0x98   : > { %v233_v36 = vpop.f32.mrf.mxu0  ;;  %v238_v37 = vpop.f32.mrf.mxu1 }
  0xa0   : > { %v235_v39 = vpop.f32.mrf.mxu0  ;;  %v1516_v40 = vpop.f32.mrf.mxu1 }
  0xa1   : > { %v1514_v38 = vpop.f32.mrf.mxu2  ;;  %v444_v41 = vpop.f32.mrf.mxu3 }
  0xa8   : > { %v289_v43 = vpop.f32.mrf.mxu1  ;;  %v524_v44 = vpop.f32.mrf.mxu0 }
  0xa9   : > { %v245_v42 = vpop.f32.mrf.mxu2  ;;  %v446_v45 = vpop.f32.mrf.mxu3  ;;  %v290_v1 = vadd.f32 %v289_v43, %v233_v36 }
  0xb0   : > { %v291_v47 = vpop.f32.mrf.mxu1  ;;  %v526_v48 = vpop.f32.mrf.mxu0 }
  0xb1   : > { %v364_v46 = vpop.f32.mrf.mxu2  ;;  %v449_v49 = vpop.f32.mrf.mxu3  ;;  %v292_v8 = vadd.f32 %v291_v47, %v235_v39 }
  0xb2   : > { %v378_v3 = vadd.f32 %v364_v46, %v290_v1 }
  0xb4   : > { %v458_v5 = vadd.f32 %v444_v41, %v378_v3 }
  0xb6   : > { %v538_v11 = vadd.f32 %v524_v44, %v458_v5 }
  0xb8   : > { %v294_v51 = vpop.f32.mrf.mxu1  ;;  %v529_v52 = vpop.f32.mrf.mxu0 }
  0xb9   : > { %v366_v50 = vpop.f32.mrf.mxu2  ;;  %v451_v53 = vpop.f32.mrf.mxu3  ;;  %v295_v18 = vadd.f32 %v294_v51, %v238_v37 }
  0xba   : > { %v379_v10 = vadd.f32 %v366_v50, %v292_v8 }
  0xbc   : > { %v459_v14 = vadd.f32 %v446_v45, %v379_v10 }
  0xbe   : > { %v539_v25 = vadd.f32 %v526_v48, %v459_v14 }
  0xc0   : > { %v296_v55 = vpop.f32.mrf.mxu1  ;;  %v1518_v56 = vpop.f32.mrf.mxu0 }
  0xc1   : > { %v369_v54 = vpop.f32.mrf.mxu2  ;;  %v1520_v57 = vpop.f32.mrf.mxu3  ;;  %v297_v32 = vadd.f32 %v296_v55, %v1516_v40 }
  0xc2   : > { %v380_v23 = vadd.f32 %v369_v54, %v295_v18 }
  0xc4   : > { %v460_v28 = vadd.f32 %v449_v49, %v380_v23 }
  0xc6   : > { %v540_v37 = vadd.f32 %v529_v52, %v460_v28 }
  0xc8   : > { %v299_v59 = vpop.f32.mrf.mxu1  ;;  %v1522_v60 = vpop.f32.mrf.mxu0 }
  0xc9   : > { %v371_v58 = vpop.f32.mrf.mxu2  ;;  %v456_v61 = vpop.f32.mrf.mxu3  ;;  %v300_v47 = vadd.f32 %v299_v59, %v1514_v38 }
  0xca   : > { %v381_v35 = vadd.f32 %v371_v58, %v297_v32 }
  0xcc   : > { %v461_v43 = vadd.f32 %v451_v53, %v381_v35 }
  0xce   : > { %v541_v51 = vadd.f32 %v1518_v56, %v461_v43 }
  0xd0   : > { %v301_v63 = vpop.f32.mrf.mxu1  ;;  %v536_v0 = vpop.f32.mrf.mxu0 }
  0xd1   : > { %v374_v62 = vpop.f32.mrf.mxu2  ;;  %v764_v2 = vpop.f32.mrf.mxu3 }
  0xd2   : > { %v382_v40 = vadd.f32 %v374_v62, %v300_v47 }
  0xd4   : > { %v462_v58 = vadd.f32 %v1520_v57, %v382_v40 }
  0xd6   : > { %v542_v62 = vadd.f32 %v1522_v60, %v462_v58 }
  0xd8   : > { %v604_v6 = vpop.f32.mrf.mxu1  ;;  %v844_v7 = vpop.f32.mrf.mxu0 }
  0xd9   : > { %v376_v4 = vpop.f32.mrf.mxu2  ;;  %v766_v9 = vpop.f32.mrf.mxu3  ;;  %v618_v12 = vadd.f32 %v604_v6, %v538_v11 }
  0xe0   : > { %v606_v16 = vpop.f32.mrf.mxu1  ;;  %v846_v17 = vpop.f32.mrf.mxu0 }
  0xe1   : > { %v684_v13 = vpop.f32.mrf.mxu2  ;;  %v769_v22 = vpop.f32.mrf.mxu3  ;;  %v619_v20 = vadd.f32 %v606_v16, %v539_v25 }
  0xe2   : > { %v698_v15 = vadd.f32 %v684_v13, %v618_v12 }
  0xe4   : > { %v778_v19 = vadd.f32 %v764_v2, %v698_v15 }
  0xe6   : > { %v858_v24 = vadd.f32 %v844_v7, %v778_v19 }
  0xe8   : > { %v867_v26 = vadd.f32 %v1282_v21, %v858_v24  ;;  %v609_v30 = vpop.f32.mrf.mxu1  ;;  %v849_v31 = vpop.f32.mrf.mxu0 }
  0xe9   : > { %v686_v27 = vpop.f32.mrf.mxu2  ;;  %v771_v34 = vpop.f32.mrf.mxu3  ;;  %v620_v41 = vadd.f32 %v609_v30, %v540_v37 }
  0xea   : > { %873 = vst.msk [vmem:[%s1532_s21] sm:$0xff] %vm872_vm1, %v867_v26  ;;  %v699_v29 = vadd.f32 %v686_v27, %v619_v20 }
  0xec   : > { %v779_v33 = vadd.f32 %v766_v9, %v699_v29 }
  0xee   : > { %v859_v36 = vadd.f32 %v846_v17, %v779_v33 }
  0xf0   : > { %v868_v39 = vadd.f32 %v1282_v21, %v859_v36  ;;  %v611_v45 = vpop.f32.mrf.mxu1  ;;  %v851_v46 = vpop.f32.mrf.mxu0 }
  0xf1   : > { %v689_v42 = vpop.f32.mrf.mxu2  ;;  %v774_v49 = vpop.f32.mrf.mxu3  ;;  %v621_v54 = vadd.f32 %v611_v45, %v541_v51 }
  0xf2   : > { %874 = vst.msk [vmem:[%s1532_s21 + $0x8] sm:$0xff] %vm872_vm1, %v868_v39  ;;  %v700_v44 = vadd.f32 %v689_v42, %v620_v41 }
  0xf4   : > { %v780_v48 = vadd.f32 %v769_v22, %v700_v44 }
  0xf6   : > { %v860_v50 = vadd.f32 %v849_v31, %v780_v48 }
  0xf8   : > { %v869_v52 = vadd.f32 %v1282_v21, %v860_v50  ;;  %v614_v61 = vpop.f32.mrf.mxu1  ;;  %v854_v63 = vpop.f32.mrf.mxu0 }
  0xf9   : > { %v691_v55 = vpop.f32.mrf.mxu2  ;;  %v776_v38 = vpop.f32.mrf.mxu3  ;;  %v622_v2 = vadd.f32 %v614_v61, %v542_v62 }
  0xfa   : > { %875 = vst.msk [vmem:[%s1532_s21 + $0x10] sm:$0xff] %vm872_vm1, %v869_v52  ;;  %v701_v53 = vadd.f32 %v691_v55, %v621_v54 }
  0xfc   : > { %v781_v0 = vadd.f32 %v771_v34, %v701_v53 }
  0xfe   : > { %v861_v59 = vadd.f32 %v851_v46, %v781_v0 }
 0x100   : > { %v870_v1 = vadd.f32 %v1282_v21, %v861_v59  ;;  %v616_v4 = vpop.f32.mrf.mxu1  ;;  %v856_v5 = vpop.f32.mrf.mxu0 }
 0x101   : > { %v694_v56 = vpop.f32.mrf.mxu2 }
 0x102   : > { %876 = vst.msk [vmem:[%s1532_s21 + $0x18] sm:$0xff] %vm872_vm1, %v870_v1  ;;  %v702_v3 = vadd.f32 %v694_v56, %v622_v2 }
 0x104   : > { %v782_v57 = vadd.f32 %v774_v49, %v702_v3 }
 0x106   : > { %v862_v6 = vadd.f32 %v854_v63, %v782_v57 }
 0x108   : > { %v871_v7 = vadd.f32 %v1282_v21, %v862_v6 }
 0x109   : > { %v696_v8 = vpop.f32.mrf.mxu2 }
 0x10a   : > { %877 = vst.msk [vmem:[%s1532_s21 + $0x20] sm:$0xff] %vm872_vm1, %v871_v7 }
 0x10b PF: > { %s13_s12 = sadd.s32 1, %s1289_s12  }
 0x10c   : > { %p10_p4 = scmp.ge.s32.totalorder %s13_s12, 4  }
 0x10e   :  { %12 = sbr.rel (!%p10_p4) target bundleno = 1 (0x1), region = 76 }

// kernel: forward.18
= control target key start
LH: loop header
LB: loop body
LE: loop exit
PB: predicated region body
PF: predicated region fallthrough
CT: control target
= control target key end

     0   :  { %s733_s15 = smov 0   ;;  %s852_s0 = inlined_call_operand.vmem [shape: f32[2,4,4,16], index: 0, kind: input, shape index: {}]   ;;  %s853_s1 = inlined_call_operand.vmem [shape: f32[1,16], index: 1, kind: input, shape index: {}]   ;;  %s854_s2 = inlined_call_operand.vmem [shape: f32[1,16], index: 2, kind: input, shape index: {}]   ;;  %s855_s3 = inlined_call_operand.vmem [shape: f32[8,16], index: 3, kind: input, shape index: {}]   ;;  %s856_s4 = inlined_call_operand.vmem [shape: f32[2,4,4,16], index: 4, kind: output, shape index: {}]  }
   0x1 LB: > { %s643_s16 = sadd.s32 4294967295, %s706_s15   ;;  %p647_p0 = scmp.ge.s32.totalorder %s706_s15, 1  ;;  %s706_s15 = sphi %s733_s15, %s14_s15  }
   0x2   : > { %p162_p1 = scmp.lt.s32.totalorder %s706_s15, 3 }
   0x4   : > { %p163_p2 = pnand %p647_p0, %p162_p1 }
   0x5   : > { %p188_p3 = scmp.lt.s32.totalorder (!%p163_p2), %s643_s16, 1 }
   0x6   : > { %166 = sbr.rel (%p163_p2) target bundleno = 513 (0x201), region = 36 }
   0xb   : > { %s858_s16 = smov (!%p188_p3, %s643_s16), 1  ;;  %vm207_vm0 = vcmask 125952   ;;  %v769_v17 = vld [vmem:[%s855_s3] sm:$0xff]  ;;  %vm223_vm1 = vcmask 122880  }
   0xc   : > { %s654_s17 = sshll.u32 %s858_s16, 4 }
   0xd   : > { %s192_s20 = scalar_lea.vmem %s852_s0, %s654_s17 }
   0xe   : > { %v749_v0 = vld [vmem:[%s192_s20] sm:$0xf]  ;;  %v751_v1 = vld [vmem:[%s192_s20 + $0x4] sm:$0xf]  ;;  %v753_v2 = vld [vmem:[%s192_s20 + $0x8] sm:$0xf] }
   0xf   : > { %v755_v3 = vld [vmem:[%s192_s20 + $0xc] sm:$0xf]  ;;  %v208_v4 = vsel %vm207_vm0, %v749_v0, 0.0  ;;  %v209_v5 = vsel %vm207_vm0, %v751_v1, 0.0  ;;  %v211_v6 = vsel %vm207_vm0, %v753_v2, 0.0 }
  0x10   : > { %v210_v7 = vadd.f32 %v209_v5, %v208_v4  ;;  %v213_v8 = vsel %vm207_vm0, %v755_v3, 0.0 }
  0x12   : > { %v212_v9 = vadd.f32 %v211_v6, %v210_v7 }
  0x14   : > { %v214_v10 = vadd.f32 %v213_v8, %v212_v9 }
  0x16   : > { %v215_v11 = vsel %vm207_vm0, %v214_v10, 0.0 }
  0x17   : > { %v216_v12 = vrot.slane %v215_v11, 4 }
  0x19   : > { %v217_v13 = vadd.f32 %v216_v12, %v215_v11 }
  0x1b   : > { %v218_v14 = vrot.slane %v217_v13, 2 }
  0x1d   : > { %v219_v15 = vadd.f32 %v218_v14, %v217_v13 }
  0x1f   : > { %v220_v16 = vrot.slane %v219_v15, 1 }
  0x21   : > { %v221_v18 = vadd.f32 %v220_v16, %v219_v15 }
  0x23   : > { %v222_v19 = vmul.f32 %v221_v18, %v769_v17 }
  0x25   : > { %v224_v20 = vsel %vm223_vm1, %v222_v19, 0.0  ;;  %v296_v21 = vrot.slane %v222_v19, 4  ;;  %v258_v22 = vrot.slane %v222_v19, 2  ;;  %v239_v25 = vrot.slane %v222_v19, 1 }
  0x26   : > { %225 = vadd.xlane.f32.xlu0 %v224_v20  ;;  %v315_v26 = vrot.slane %v222_v19, 5  ;;  %v277_v27 = vrot.slane %v222_v19, 3  ;;  %v334_v31 = vrot.slane %v222_v19, 6  ;;  %v353_v32 = vrot.slane %v222_v19, 7 }
  0x27   : > { %v298_v23 = vsel %vm223_vm1, %v296_v21, 0.0  ;;  %v260_v24 = vsel %vm223_vm1, %v258_v22, 0.0  ;;  %v241_v28 = vsel %vm223_vm1, %v239_v25, 0.0 }
  0x28   : > { %299 = vadd.xlane.f32.xlu2 %v298_v23  ;;  %261 = vadd.xlane.f32.xlu1 %v260_v24  ;;  %v317_v29 = vsel %vm223_vm1, %v315_v26, 0.0  ;;  %v279_v30 = vsel %vm223_vm1, %v277_v27, 0.0  ;;  %v336_v33 = vsel %vm223_vm1, %v334_v31, 0.0  ;;  %v355_v34 = vsel %vm223_vm1, %v353_v32, 0.0 }
  0x2e   : > { %242 = vadd.xlane.f32.xlu0 %v241_v28 }
  0x30   : > { %318 = vadd.xlane.f32.xlu2 %v317_v29  ;;  %280 = vadd.xlane.f32.xlu1 %v279_v30 }
  0x36   : > { %337 = vadd.xlane.f32.xlu0 %v336_v33 }
  0x38   : > { %356 = vadd.xlane.f32.xlu1 %v355_v34 }
  0x99   : > { %v226_v35 = vpop.xlane.xlu0 %225 }
  0x9a   : > { %v227_v36 = vrot.slane %v226_v35, 4 }
  0x9b   : > { %v300_v37 = vpop.xlane.xlu2 %299  ;;  %v262_v38 = vpop.xlane.xlu1 %261 }
  0x9c   : > { %v228_v39 = vadd.f32 %v227_v36, %v226_v35  ;;  %v301_v40 = vrot.slane %v300_v37, 4  ;;  %v263_v41 = vrot.slane %v262_v38, 4 }
  0x9e   : > { %v229_v42 = vrot.slane %v228_v39, 2  ;;  %v264_v43 = vadd.f32 %v263_v41, %v262_v38  ;;  %v302_v44 = vadd.f32 %v301_v40, %v300_v37 }
  0xa0   : > { %v230_v45 = vadd.f32 %v229_v42, %v228_v39  ;;  %v265_v46 = vrot.slane %v264_v43, 2  ;;  %v303_v50 = vrot.slane %v302_v44, 2 }
  0xa1   : > { %v243_v47 = vpop.xlane.xlu0 %242 }
  0xa2   : > { %v244_v48 = vrot.slane %v243_v47, 4  ;;  %v231_v49 = vrot.slane %v230_v45, 1  ;;  %v266_v57 = vadd.f32 %v265_v46, %v264_v43  ;;  %v304_v61 = vadd.f32 %v303_v50, %v302_v44 }
  0xa3   : > { %v319_v51 = vpop.xlane.xlu2 %318  ;;  %v281_v52 = vpop.xlane.xlu1 %280 }
  0xa4   : > { %v245_v53 = vadd.f32 %v244_v48, %v243_v47  ;;  %v320_v54 = vrot.slane %v319_v51, 4  ;;  %v282_v55 = vrot.slane %v281_v52, 4  ;;  %v232_v56 = vadd.f32 %v231_v49, %v230_v45 }
  0xa5   : > { %v267_v6 = vrot.slane %v266_v57, 1  ;;  %v305_v12 = vrot.slane %v304_v61, 1 }
  0xa6   : > { %v246_v58 = vrot.slane %v245_v53, 2  ;;  %v321_v59 = vadd.f32 %v320_v54, %v319_v51  ;;  %v283_v60 = vadd.f32 %v282_v55, %v281_v52  ;;  %656 = vpush %v232_v56 }
  0xa7   : > { %v268_v18 = vadd.f32 %v267_v6, %v266_v57  ;;  %v306_v23 = vadd.f32 %v305_v12, %v304_v61 }
  0xa8   : > { %v322_v62 = vrot.slane %v321_v59, 2  ;;  %v284_v63 = vrot.slane %v283_v60, 2  ;;  %v247_v4 = vadd.f32 %v246_v58, %v245_v53 }
  0xa9   : > { %v338_v5 = vpop.xlane.xlu0 %337 }
  0xaa   : > { %v339_v7 = vrot.slane %v338_v5, 4  ;;  %v248_v8 = vrot.slane %v247_v4, 1  ;;  %v285_v9 = vadd.f32 %v284_v63, %v283_v60  ;;  %v323_v10 = vadd.f32 %v322_v62, %v321_v59 }
  0xab   : > { %v357_v11 = vpop.xlane.xlu1 %356 }
  0xac   : > { %v340_v13 = vadd.f32 %v339_v7, %v338_v5  ;;  %v358_v14 = vrot.slane %v357_v11, 4  ;;  %v249_v15 = vadd.f32 %v248_v8, %v247_v4  ;;  %v286_v16 = vrot.slane %v285_v9, 1 }
  0xad   : > { %v324_v19 = vrot.slane %v323_v10, 1 }
  0xae   : > { %v341_v20 = vrot.slane %v340_v13, 2  ;;  %v359_v21 = vadd.f32 %v358_v14, %v357_v11  ;;  %658 = vpush %v249_v15  ;;  %v287_v22 = vadd.f32 %v286_v16, %v285_v9 }
  0xaf   : > { %660 = vpush %v268_v18  ;;  %v325_v24 = vadd.f32 %v324_v19, %v323_v10 }
  0xb0   : > { %v360_v25 = vrot.slane %v359_v21, 2  ;;  %662 = vpush %v287_v22  ;;  %v342_v26 = vadd.f32 %v341_v20, %v340_v13 }
  0xb1   : > { %664 = vpush %v306_v23 }
  0xb2   : > { %666 = vpush %v325_v24  ;;  %v343_v27 = vrot.slane %v342_v26, 1  ;;  %v361_v28 = vadd.f32 %v360_v25, %v359_v21 }
  0xb4   : > { %v344_v29 = vadd.f32 %v343_v27, %v342_v26  ;;  %v362_v30 = vrot.slane %v361_v28, 1 }
  0xb6   : > { %668 = vpush %v344_v29  ;;  %v363_v31 = vadd.f32 %v362_v30, %v361_v28 }
  0xb8   : > { %670 = vpush %v363_v31 }
  0xd7   : > { %s657_s23 = spop %656 }
  0xd8   : > { %s234_s24 = smul.f32 0.03125, %s657_s23 }
  0xda   : > { %v235_v32 = vstv %s234_s24 }
  0xdb   : > { %v236_v38 = vmul.f32 %v235_v32, %v769_v17 }
  0xdf   : > { %s659_s25 = spop %658 }
  0xe0   : > { %s251_s26 = smul.f32 0.03125, %s659_s25  ;;  %s661_s27 = spop %660 }
  0xe1   : > { %s270_s28 = smul.f32 0.03125, %s661_s27  ;;  %s663_s29 = spop %662 }
  0xe2   : > { %v252_v33 = vstv %s251_s26  ;;  %s289_s30 = smul.f32 0.03125, %s663_s29  ;;  %s665_s5 = spop %664 }
  0xe3   : > { %v253_v34 = vmul.f32 %v252_v33, %v769_v17  ;;  %v271_v35 = vstv %s270_s28  ;;  %s308_s6 = smul.f32 0.03125, %s665_s5  ;;  %s667_s7 = spop %666 }
  0xe4   : > { %v272_v36 = vmul.f32 %v271_v35, %v769_v17  ;;  %v290_v37 = vstv %s289_s30  ;;  %s327_s8 = smul.f32 0.03125, %s667_s7 }
  0xe5   : > { %v255_v39 = vrot.slane %v253_v34, 1  ;;  %v291_v40 = vmul.f32 %v290_v37, %v769_v17  ;;  %v309_v41 = vstv %s308_s6 }
  0xe6   : > { %v328_v42 = vstv %s327_s8  ;;  %v274_v44 = vrot.slane %v272_v36, 2  ;;  %v310_v45 = vmul.f32 %v309_v41, %v769_v17 }
  0xe7   : > { %v257_v43 = vadd.f32 %v255_v39, %v236_v38  ;;  %s669_s9 = spop %668  ;;  %v293_v47 = vrot.slane %v291_v40, 3  ;;  %v329_v48 = vmul.f32 %v328_v42, %v769_v17 }
  0xe8   : > { %s346_s10 = smul.f32 0.03125, %s669_s9  ;;  %v312_v51 = vrot.slane %v310_v45, 4 }
  0xe9   : > { %v276_v46 = vadd.f32 %v274_v44, %v257_v43  ;;  %s671_s11 = spop %670  ;;  %v331_v55 = vrot.slane %v329_v48, 5 }
  0xea   : > { %v347_v49 = vstv %s346_s10  ;;  %s365_s12 = smul.f32 0.03125, %s671_s11 }
  0xeb   : > { %v295_v50 = vadd.f32 %v293_v47, %v276_v46  ;;  %v348_v52 = vmul.f32 %v347_v49, %v769_v17 }
  0xec   : > { %v366_v53 = vstv %s365_s12  ;;  %s197_s12 = scalar_lea.vmem %s856_s4, %s654_s17 }
  0xed   : > { %v314_v54 = vadd.f32 %v312_v51, %v295_v50  ;;  %v367_v56 = vmul.f32 %v366_v53, %v769_v17  ;;  %v350_v58 = vrot.slane %v348_v52, 6 }
  0xef   : > { %v333_v57 = vadd.f32 %v331_v55, %v314_v54  ;;  %v369_v60 = vrot.slane %v367_v56, 7 }
  0xf1   : > { %v352_v59 = vadd.f32 %v350_v58, %v333_v57 }
  0xf3   : > { %v371_v61 = vadd.f32 %v369_v60, %v352_v59 }
  0xf5   : > { %v372_v62 = vperm.slane %v371_v61, 0 }
  0xf7   : > { %v789_v63 = vsub.f32 %v749_v0, %v372_v62  ;;  %v792_v4 = vsub.f32 %v751_v1, %v372_v62  ;;  %v795_v5 = vsub.f32 %v753_v2, %v372_v62  ;;  %v798_v6 = vsub.f32 %v755_v3, %v372_v62 }
  0xf9   : > { %v377_v7 = vmul.f32 %v789_v63, %v789_v63  ;;  %v378_v8 = vmul.f32 %v792_v4, %v792_v4  ;;  %v379_v9 = vmul.f32 %v795_v5, %v795_v5  ;;  %v380_v0 = vmul.f32 %v798_v6, %v798_v6 }
  0xfb   : > { %v385_v1 = vsel %vm207_vm0, %v377_v7, 0.0  ;;  %v386_v2 = vsel %vm207_vm0, %v378_v8, 0.0  ;;  %v388_v3 = vsel %vm207_vm0, %v379_v9, 0.0  ;;  %v390_v12 = vsel %vm207_vm0, %v380_v0, 0.0 }
  0xfc   : > { %v387_v10 = vadd.f32 %v386_v2, %v385_v1 }
  0xfe   : > { %v389_v11 = vadd.f32 %v388_v3, %v387_v10 }
 0x100   : > { %v391_v13 = vadd.f32 %v390_v12, %v389_v11 }
 0x102   : > { %v392_v14 = vsel %vm207_vm0, %v391_v13, 0.0 }
 0x103   : > { %v393_v15 = vrot.slane %v392_v14, 4 }
 0x105   : > { %v394_v16 = vadd.f32 %v393_v15, %v392_v14 }
 0x107   : > { %v395_v18 = vrot.slane %v394_v16, 2 }
 0x109   : > { %v396_v19 = vadd.f32 %v395_v18, %v394_v16 }
 0x10b   : > { %v397_v20 = vrot.slane %v396_v19, 1 }
 0x10d   : > { %v398_v21 = vadd.f32 %v397_v20, %v396_v19 }
 0x10f   : > { %v399_v22 = vmul.f32 %v398_v21, %v769_v17 }
 0x111   : > { %v400_v23 = vsel %vm223_vm1, %v399_v22, 0.0  ;;  %v434_v24 = vrot.slane %v399_v22, 2  ;;  %v415_v25 = vrot.slane %v399_v22, 1  ;;  %v453_v28 = vrot.slane %v399_v22, 3 }
 0x112   : > { %401 = vadd.xlane.f32.xlu2 %v400_v23  ;;  %v491_v29 = vrot.slane %v399_v22, 5  ;;  %v472_v30 = vrot.slane %v399_v22, 4  ;;  %v510_v34 = vrot.slane %v399_v22, 6  ;;  %v529_v35 = vrot.slane %v399_v22, 7 }
 0x113   : > { %v436_v26 = vsel %vm223_vm1, %v434_v24, 0.0  ;;  %v417_v27 = vsel %vm223_vm1, %v415_v25, 0.0  ;;  %v455_v31 = vsel %vm223_vm1, %v453_v28, 0.0 }
 0x114   : > { %437 = vadd.xlane.f32.xlu1 %v436_v26  ;;  %418 = vadd.xlane.f32.xlu0 %v417_v27  ;;  %v493_v32 = vsel %vm223_vm1, %v491_v29, 0.0  ;;  %v474_v33 = vsel %vm223_vm1, %v472_v30, 0.0  ;;  %v512_v36 = vsel %vm223_vm1, %v510_v34, 0.0  ;;  %v531_v37 = vsel %vm223_vm1, %v529_v35, 0.0 }
 0x11a   : > { %456 = vadd.xlane.f32.xlu2 %v455_v31 }
 0x11c   : > { %494 = vadd.xlane.f32.xlu1 %v493_v32  ;;  %475 = vadd.xlane.f32.xlu0 %v474_v33 }
 0x122   : > { %513 = vadd.xlane.f32.xlu2 %v512_v36 }
 0x124   : > { %532 = vadd.xlane.f32.xlu0 %v531_v37 }
 0x185   : > { %v402_v38 = vpop.xlane.xlu2 %401 }
 0x186   : > { %v403_v39 = vrot.slane %v402_v38, 4 }
 0x187   : > { %v438_v40 = vpop.xlane.xlu1 %437  ;;  %v419_v41 = vpop.xlane.xlu0 %418 }
 0x188   : > { %v404_v42 = vadd.f32 %v403_v39, %v402_v38  ;;  %v439_v43 = vrot.slane %v438_v40, 4  ;;  %v420_v44 = vrot.slane %v419_v41, 4 }
 0x18a   : > { %v405_v45 = vrot.slane %v404_v42, 2  ;;  %v440_v46 = vadd.f32 %v439_v43, %v438_v40  ;;  %v421_v47 = vadd.f32 %v420_v44, %v419_v41 }
 0x18c   : > { %v441_v48 = vrot.slane %v440_v46, 2  ;;  %v422_v49 = vrot.slane %v421_v47, 2  ;;  %v406_v50 = vadd.f32 %v405_v45, %v404_v42 }
 0x18d   : > { %v457_v51 = vpop.xlane.xlu2 %456 }
 0x18e   : > { %v458_v52 = vrot.slane %v457_v51, 4  ;;  %v407_v53 = vrot.slane %v406_v50, 1  ;;  %v423_v54 = vadd.f32 %v422_v49, %v421_v47  ;;  %v442_v55 = vadd.f32 %v441_v48, %v440_v46 }
 0x18f   : > { %v495_v56 = vpop.xlane.xlu1 %494  ;;  %v476_v57 = vpop.xlane.xlu0 %475 }
 0x190   : > { %v459_v58 = vadd.f32 %v458_v52, %v457_v51  ;;  %v496_v59 = vrot.slane %v495_v56, 4  ;;  %v477_v60 = vrot.slane %v476_v57, 4  ;;  %v408_v61 = vadd.f32 %v407_v53, %v406_v50 }
 0x191   : > { %v424_v62 = vrot.slane %v423_v54, 1  ;;  %v443_v7 = vrot.slane %v442_v55, 1 }
 0x192   : > { %v460_v8 = vrot.slane %v459_v58, 2  ;;  %v497_v9 = vadd.f32 %v496_v59, %v495_v56  ;;  %v478_v0 = vadd.f32 %v477_v60, %v476_v57  ;;  %672 = vpush %v408_v61 }
 0x193   : > { %v425_v1 = vadd.f32 %v424_v62, %v423_v54  ;;  %v444_v2 = vadd.f32 %v443_v7, %v442_v55 }
 0x194   : > { %v498_v10 = vrot.slane %v497_v9, 2  ;;  %v479_v3 = vrot.slane %v478_v0, 2  ;;  %v461_v11 = vadd.f32 %v460_v8, %v459_v58 }
 0x195   : > { %674 = vpush %v425_v1  ;;  %v514_v12 = vpop.xlane.xlu2 %513 }
 0x196   : > { %v499_v13 = vadd.f32 %v498_v10, %v497_v9  ;;  %676 = vpush %v444_v2  ;;  %v515_v14 = vrot.slane %v514_v12, 4  ;;  %v462_v15 = vrot.slane %v461_v11, 1  ;;  %v480_v16 = vadd.f32 %v479_v3, %v478_v0 }
 0x197   : > { %v533_v18 = vpop.xlane.xlu0 %532 }
 0x198   : > { %v516_v19 = vadd.f32 %v515_v14, %v514_v12  ;;  %v534_v20 = vrot.slane %v533_v18, 4  ;;  %v463_v21 = vadd.f32 %v462_v15, %v461_v11  ;;  %v481_v22 = vrot.slane %v480_v16, 1 }
 0x199   : > { %v500_v23 = vrot.slane %v499_v13, 1 }
 0x19a   : > { %v517_v24 = vrot.slane %v516_v19, 2  ;;  %v535_v25 = vadd.f32 %v534_v20, %v533_v18  ;;  %678 = vpush %v463_v21  ;;  %v482_v26 = vadd.f32 %v481_v22, %v480_v16 }
 0x19b   : > { %v501_v27 = vadd.f32 %v500_v23, %v499_v13 }
 0x19c   : > { %v518_v28 = vadd.f32 %v517_v24, %v516_v19  ;;  %v536_v29 = vrot.slane %v535_v25, 2  ;;  %680 = vpush %v482_v26  ;;  %v697_v19 = vld [vmem:[%s854_s2] ss:$0 sm:$0xff] }
 0x19d   : > { %682 = vpush %v501_v27 }
 0x19e   : > { %v537_v30 = vadd.f32 %v536_v29, %v535_v25  ;;  %v519_v31 = vrot.slane %v518_v28, 1 }
 0x1a0   : > { %v520_v32 = vadd.f32 %v519_v31, %v518_v28  ;;  %v538_v33 = vrot.slane %v537_v30, 1 }
 0x1a2   : > { %684 = vpush %v520_v32  ;;  %v539_v34 = vadd.f32 %v538_v33, %v537_v30 }
 0x1a4   : > { %686 = vpush %v539_v34 }
 0x1c3   : > { %s673_s13 = spop %672 }
 0x1c4   : > { %s410_s14 = smul.f32 0.03125, %s673_s13 }
 0x1c6   : > { %s675_s18 = spop %674  ;;  %v411_v35 = vstv %s410_s14 }
 0x1c7   : > { %s427_s19 = smul.f32 0.03125, %s675_s18  ;;  %s677_s20 = spop %676  ;;  %v412_v40 = vmul.f32 %v411_v35, %v769_v17 }
 0x1c8   : > { %s446_s21 = smul.f32 0.03125, %s677_s20 }
 0x1c9   : > { %v428_v36 = vstv %s427_s19 }
 0x1ca   : > { %v429_v37 = vmul.f32 %v428_v36, %v769_v17  ;;  %v447_v38 = vstv %s446_s21 }
 0x1cb   : > { %v448_v39 = vmul.f32 %v447_v38, %v769_v17  ;;  %s679_s22 = spop %678 }
 0x1cc   : > { %v431_v41 = vrot.slane %v429_v37, 1  ;;  %s465_s23 = smul.f32 0.03125, %s679_s22 }
 0x1cd   : > { %s681_s24 = spop %680  ;;  %v450_v44 = vrot.slane %v448_v39, 2 }
 0x1ce   : > { %v433_v42 = vadd.f32 %v431_v41, %v412_v40  ;;  %v466_v43 = vstv %s465_s23  ;;  %s484_s25 = smul.f32 0.03125, %s681_s24  ;;  %s683_s26 = spop %682 }
 0x1cf   : > { %v467_v45 = vmul.f32 %v466_v43, %v769_v17  ;;  %s503_s27 = smul.f32 0.03125, %s683_s26 }
 0x1d0   : > { %v485_v46 = vstv %s484_s25  ;;  %v452_v47 = vadd.f32 %v450_v44, %v433_v42 }
 0x1d1   : > { %v469_v48 = vrot.slane %v467_v45, 3  ;;  %v486_v49 = vmul.f32 %v485_v46, %v769_v17  ;;  %v504_v50 = vstv %s503_s27 }
 0x1d2   : > { %v505_v53 = vmul.f32 %v504_v50, %v769_v17 }
 0x1d3   : > { %v471_v51 = vadd.f32 %v469_v48, %v452_v47  ;;  %v488_v52 = vrot.slane %v486_v49, 4  ;;  %s685_s28 = spop %684 }
 0x1d4   : > { %s522_s29 = smul.f32 0.03125, %s685_s28  ;;  %v507_v56 = vrot.slane %v505_v53, 5 }
 0x1d5   : > { %v490_v54 = vadd.f32 %v488_v52, %v471_v51  ;;  %s687_s30 = spop %686 }
 0x1d6   : > { %v523_v55 = vstv %s522_s29  ;;  %s541_s5 = smul.f32 0.03125, %s687_s30 }
 0x1d7   : > { %v524_v57 = vmul.f32 %v523_v55, %v769_v17  ;;  %v509_v59 = vadd.f32 %v507_v56, %v490_v54 }
 0x1d8   : > { %v542_v58 = vstv %s541_s5 }
 0x1d9   : > { %v526_v60 = vrot.slane %v524_v57, 6  ;;  %v543_v61 = vmul.f32 %v542_v58, %v769_v17  ;;  %v696_v17 = vld [vmem:[%s853_s1] ss:$0 sm:$0xff] }
 0x1db   : > { %v528_v62 = vadd.f32 %v526_v60, %v509_v59  ;;  %v545_v7 = vrot.slane %v543_v61, 7 }
 0x1dd   : > { %v547_v8 = vadd.f32 %v545_v7, %v528_v62 }
 0x1df   : > { %v548_v9 = vadd.f32 1e-05, %v547_v8 }
 0x1e1   : > { %698 = vrsqrt.f32 %v548_v9  ;;  %vm555_vm3 = vweird.f32 %v548_v9 }
 0x1e7   : > { %v699_v0 = vpop.eup %698 }
 0x1e8   : > { %v550_v1 = vmul.f32 %v699_v0, %v548_v9  ;;  %vm556_vm2 = vweird.f32 %v699_v0 }
 0x1e9   : > { %vm557_vm4 = vmor %vm555_vm3, %vm556_vm2 }
 0x1ea   : > { %v551_v2 = vmul.f32 %v699_v0, %v550_v1 }
 0x1ec   : > { %v552_v10 = vmul.f32 0.5, %v551_v2 }
 0x1ee   : > { %v553_v3 = vsub.f32 1.5, %v552_v10 }
 0x1f0   : > { %v554_v11 = vmul.f32 %v699_v0, %v553_v3 }
 0x1f2   : > { %v558_v12 = vsel %vm557_vm4, %v699_v0, %v554_v11 }
 0x1f3   : > { %v559_v13 = vperm.slane %v558_v12, 0 }
 0x1f5   : > { %v560_v14 = vmul.f32 %v559_v13, %v789_v63  ;;  %v561_v15 = vmul.f32 %v559_v13, %v792_v4  ;;  %v562_v16 = vmul.f32 %v559_v13, %v795_v5  ;;  %v563_v18 = vmul.f32 %v559_v13, %v798_v6 }
 0x1f7   : > { %v568_v20 = vmul.f32 %v696_v17, %v560_v14  ;;  %v569_v21 = vmul.f32 %v696_v17, %v561_v15  ;;  %v570_v22 = vmul.f32 %v696_v17, %v562_v16  ;;  %v571_v23 = vmul.f32 %v696_v17, %v563_v18 }
 0x1f9   : > { %v576_v24 = vadd.f32 %v697_v19, %v568_v20  ;;  %v577_v25 = vadd.f32 %v697_v19, %v569_v21  ;;  %v578_v26 = vadd.f32 %v697_v19, %v570_v22  ;;  %v579_v27 = vadd.f32 %v697_v19, %v571_v23 }
 0x1fb   : > { %v580_v63 = vmax.f32 %v576_v24, 0.0  ;;  %v581_v4 = vmax.f32 %v577_v25, 0.0  ;;  %v582_v5 = vmax.f32 %v578_v26, 0.0  ;;  %v583_v6 = vmax.f32 %v579_v27, 0.0 }
 0x1fd   : > { %584 = vst.msk [vmem:[%s197_s12] sm:$0xf] %vm207_vm0, %v580_v63 }
 0x1fe   : > { %585 = vst.msk [vmem:[%s197_s12 + $0x4] sm:$0xf] %vm207_vm0, %v581_v4 }
 0x1ff   : > { %586 = vst.msk [vmem:[%s197_s12 + $0x8] sm:$0xf] %vm207_vm0, %v582_v5 }
 0x200   : > { %587 = vst.msk [vmem:[%s197_s12 + $0xc] sm:$0xf] %vm207_vm0, %v583_v6 }
 0x201 PF: > { %s14_s15 = sadd.s32 1, %s706_s15  }
 0x202   : > { %p11_p4 = scmp.ge.s32.totalorder %s14_s15, 4  }
 0x204   :  { %13 = sbr.rel (!%p11_p4) target bundleno = 1 (0x1), region = 66 }

// kernel: forward.19
= control target key start
LH: loop header
LB: loop body
LE: loop exit
PB: predicated region body
PF: predicated region fallthrough
CT: control target
= control target key end

     0   :  { %s905_s12 = smov 0   ;;  %s1050_s0 = inlined_call_operand.vmem [shape: f32[96,16], index: 0, kind: input, shape index: {}]   ;;  %s1051_s1 = inlined_call_operand.vmem [shape: bf16[9,16,16], index: 1, kind: input, shape index: {}]   ;;  %s1052_s2 = inlined_call_operand.vmem [shape: f32[1,16], index: 2, kind: input, shape index: {}]   ;;  %s1053_s3 = inlined_call_operand.vmem [shape: f32[80,16], index: 3, kind: output, shape index: {}]  }
   0x1 LB: > { %s731_s13 = sadd.s32 4294967295, %s883_s12   ;;  %p734_p0 = scmp.ge.s32.totalorder %s883_s12, 1  ;;  %s883_s12 = sphi %s905_s12, %s13_s12  }
   0x2   : > { %p127_p1 = scmp.lt.s32.totalorder %s883_s12, 3 }
   0x4   : > { %p128_p2 = pnand %p734_p0, %p127_p1 }
   0x5   : > { %s153_s16 = smul.u32 (!%p128_p2), 40, %s731_s13 }
   0x6   : > { %131 = sbr.rel (%p128_p2) target bundleno = 256 (0x100), region = 32 }
   0x7   : > { %s933_s27 = scalar_lea.vmem (!%p128_p2), %s1050_s0, %s153_s16  ;;  %s146_s9 = smul.u32 (!%p128_p2), 5, %s731_s13 }
   0x9   : > { %p147_p3 = scmp.lt.s32.totalorder (!%p128_p2), %s146_s9, 9 }
   0xb   : > { %v858_v0 = vld [vmem:[%s1051_s1 + $0x8] sm:$0xff]  ;;  %v859_v1 = vld [vmem:[%s1051_s1 + $0x10] sm:$0xff]  ;;  %v857_v2 = vld [vmem:[%s1051_s1] sm:$0xff]  ;;  %vm184_vm0 = vcmask 130048   ;;  %s1055_s9 = smov (!%p147_p3, %s146_s9), 9 }
   0xc   : > { %v860_v3 = vld [vmem:[%s1051_s1 + $0x18] sm:$0xff]  ;;  %v861_v4 = vld [vmem:[%s1051_s1 + $0x20] sm:$0xff]  ;;  %201 = vmatpush.bf16.msra.mxu0 %v858_v0  ;;  %866 = vmatpush.bf16.msra.mxu1 %v858_v0  ;;  %v863_v5 = vld [vmem:[%s1051_s1 + $0x30] sm:$0xff]  ;;  %s735_s10 = sshll.u32 %s1055_s9, 3 }
   0xd   : > { %v864_v6 = vld [vmem:[%s1051_s1 + $0x38] sm:$0xff]  ;;  %867 = vmatpush.bf16.msra.mxu2 %v858_v0  ;;  %v736_v7 = vld [vmem:[%s933_s27 + $0x1] sm:$0xff]  ;;  %v737_v8 = vld [vmem:[%s933_s27 + $0x9] sm:$0xff]  ;;  %346 = vmatpush.bf16.msra.mxu3 %v860_v3  ;;  %s1031_s16 = scalar_lea.vmem %s1053_s3, %s735_s10 }
   0xe   : > { %v738_v9 = vld [vmem:[%s933_s27 + $0x11] sm:$0xff]  ;;  %v172_v10 = vpack.c.bf16 %v737_v8, %v736_v7  ;;  %v739_v11 = vld [vmem:[%s933_s27 + $0x19] sm:$0xff]  ;;  %v740_v12 = vld [vmem:[%s933_s27 + $0x21] sm:$0xff] }
   0xf   : > { %v771_v13 = vld [vmem:[%s933_s27 + $0x6] sm:$0xff]  ;;  %v173_v14 = vpack.c.bf16 %v739_v11, %v738_v9  ;;  %v174_v15 = vpack.c.bf16 %v740_v12, %v740_v12  ;;  %v948_v16 = vld [vmem:[%s933_s27 + $0xe] sm:$0xff]  ;;  %v773_v26 = vld [vmem:[%s933_s27 + $0x16] sm:$0xff] }
  0x10   : > { %239 = vmatpush.bf16.msrb.mxu1 %v857_v2  ;;  %402 = vmatpush.bf16.msrb.mxu0 %v861_v4  ;;  %v862_v17 = vld [vmem:[%s1051_s1 + $0x28] sm:$0xff]  ;;  %v865_v18 = vld [vmem:[%s1051_s1 + $0x40] sm:$0xff]  ;;  %v318_v19 = vpack.c.bf16 %v948_v16, %v771_v13  ;;  %v157_v32 = vld [vmem:[%s933_s27 + $0x10] sm:$0xff]  ;;  %v598_v56 = vpack.c.bf16 %v773_v26, %v948_v16 }
  0x11   : > { %290 = vmatpush.bf16.msrb.mxu2 %v859_v1  ;;  %570 = vmatpush.bf16.msrb.mxu3 %v864_v6  ;;  %v155_v20 = vld [vmem:[%s933_s27] sm:$0xff]  ;;  %v786_v22 = vld [vmem:[%s933_s27 + $0xf] sm:$0xff]  ;;  %v787_v33 = vld [vmem:[%s933_s27 + $0x17] sm:$0xff] }
  0x12   : > { %747 = vmatmul.msk.bf16.vlgmr.msra.gmra.mxu0 %vm184_vm0, %v172_v10  ;;  %748 = vmatmul.msk.bf16.vlgmr.msra.gmra.mxu1 %vm184_vm0, %v173_v14  ;;  %v785_v21 = vld [vmem:[%s933_s27 + $0x7] sm:$0xff]  ;;  %v774_v27 = vld [vmem:[%s933_s27 + $0x1e] sm:$0xff]  ;;  %v759_v36 = vld [vmem:[%s933_s27 + $0x12] sm:$0xff] }
  0x13   : > { %749 = vmatmul.msk.bf16.vlgmr.msra.gmra.mxu2 %vm184_vm0, %v174_v15  ;;  %782 = vmatmul.msk.bf16.vlgmr.msra.gmra.mxu3 %vm184_vm0, %v318_v19  ;;  %v156_v23 = vld [vmem:[%s933_s27 + $0x8] sm:$0xff]  ;;  %v374_v28 = vpack.c.bf16 %v786_v22, %v785_v21  ;;  %v319_v31 = vpack.c.bf16 %v774_v27, %v773_v26  ;;  %v788_v34 = vld [vmem:[%s933_s27 + $0x1f] sm:$0xff]  ;;  %v828_v47 = vld [vmem:[%s933_s27 + $0x15] sm:$0xff] }
  0x14   : > { %458 = vmatpush.bf16.msra.mxu1 %v862_v17  ;;  %626 = vmatpush.bf16.msra.mxu0 %v865_v18  ;;  %v757_v24 = vld [vmem:[%s933_s27 + $0x2] sm:$0xff]  ;;  %v758_v25 = vld [vmem:[%s933_s27 + $0xa] sm:$0xff]  ;;  %v160_v29 = vpack.c.bf16 %v156_v23, %v155_v20  ;;  %v158_v35 = vld [vmem:[%s933_s27 + $0x18] sm:$0xff]  ;;  %v375_v39 = vpack.c.bf16 %v788_v34, %v787_v33  ;;  %v430_v57 = vpack.c.bf16 %v157_v32, %v156_v23 }
  0x15   : > { %514 = vmatpush.bf16.msra.mxu2 %v863_v5  ;;  %v262_v30 = vpack.c.bf16 %v758_v25, %v757_v24  ;;  %v760_v37 = vld [vmem:[%s933_s27 + $0x1a] sm:$0xff]  ;;  %v775_v38 = vld [vmem:[%s933_s27 + $0x26] sm:$0xff]  ;;  %v161_v40 = vpack.c.bf16 %v158_v35, %v157_v32  ;;  %v845_v3 = vld [vmem:[%s933_s27 + $0x2e] sm:$0xff] }
  0x16   : > { %v263_v41 = vpack.c.bf16 %v760_v37, %v759_v36  ;;  %v320_v42 = vpack.c.bf16 %v775_v38, %v775_v38  ;;  %v789_v43 = vld [vmem:[%s933_s27 + $0x27] sm:$0xff]  ;;  %v814_v53 = vld [vmem:[%s933_s27 + $0x14] sm:$0xff]  ;;  %v829_v54 = vld [vmem:[%s933_s27 + $0x1d] sm:$0xff]  ;;  %v599_v63 = vpack.c.bf16 %v775_v38, %v774_v27  ;;  %v600_v6 = vpack.c.bf16 %v845_v3, %v845_v3 }
  0x17   : > { %v159_v44 = vld [vmem:[%s933_s27 + $0x20] sm:$0xff]  ;;  %v827_v46 = vld [vmem:[%s933_s27 + $0xd] sm:$0xff]  ;;  %v376_v48 = vpack.c.bf16 %v789_v43, %v789_v43 }
  0x18   : > { %v761_v45 = vld [vmem:[%s933_s27 + $0x22] sm:$0xff]  ;;  %v162_v49 = vpack.c.bf16 %v159_v44, %v159_v44  ;;  %v542_v51 = vpack.c.bf16 %v828_v47, %v827_v46  ;;  %v813_v52 = vld [vmem:[%s933_s27 + $0xc] sm:$0xff]  ;;  %v431_v0 = vpack.c.bf16 %v159_v44, %v158_v35 }
  0x19   : > { %v264_v50 = vpack.c.bf16 %v761_v45, %v761_v45  ;;  %v830_v55 = vld [vmem:[%s933_s27 + $0x25] sm:$0xff]  ;;  %v486_v58 = vpack.c.bf16 %v814_v53, %v813_v52  ;;  %v815_v60 = vld [vmem:[%s933_s27 + $0x1c] sm:$0xff]  ;;  %v831_v62 = vld [vmem:[%s933_s27 + $0x2d] sm:$0xff] }
  0x1a   : > { %v543_v59 = vpack.c.bf16 %v830_v55, %v829_v54  ;;  %v816_v61 = vld [vmem:[%s933_s27 + $0x24] sm:$0xff]  ;;  %v544_v2 = vpack.c.bf16 %v831_v62, %v831_v62  ;;  %v817_v5 = vld [vmem:[%s933_s27 + $0x2c] sm:$0xff] }
  0x1b   : > { %v487_v1 = vpack.c.bf16 %v816_v61, %v815_v60  ;;  %v803_v4 = vld [vmem:[%s933_s27 + $0x28] sm:$0xff]  ;;  %v488_v8 = vpack.c.bf16 %v817_v5, %v817_v5 }
  0x1c   : > { %v432_v7 = vpack.c.bf16 %v803_v4, %v803_v4 }
  0x22   : > { %796 = vmatmul.msk.bf16.vlgmr.msrb.gmra.mxu0 %vm184_vm0, %v374_v28  ;;  %754 = vmatmul.msk.bf16.vlgmr.msrb.gmra.mxu1 %vm184_vm0, %v160_v29 }
  0x23   : > { %768 = vmatmul.msk.bf16.vlgmr.msrb.gmra.mxu2 %vm184_vm0, %v262_v30  ;;  %783 = vmatmul.msk.bf16.gmra.mxu3 %vm184_vm0, %v319_v31 }
  0x32   : > { %797 = vmatmul.msk.bf16.gmra.mxu0 %vm184_vm0, %v375_v39  ;;  %755 = vmatmul.msk.bf16.gmra.mxu1 %vm184_vm0, %v161_v40 }
  0x33   : > { %769 = vmatmul.msk.bf16.gmra.mxu2 %vm184_vm0, %v263_v41  ;;  %784 = vmatmul.msk.bf16.gmra.mxu3 %vm184_vm0, %v320_v42 }
  0x42   : > { %798 = vmatmul.msk.bf16.gmra.mxu0 %vm184_vm0, %v376_v48  ;;  %756 = vmatmul.msk.bf16.gmra.mxu1 %vm184_vm0, %v162_v49 }
  0x43   : > { %770 = vmatmul.msk.bf16.gmra.mxu2 %vm184_vm0, %v264_v50  ;;  %838 = vmatmul.msk.bf16.vlgmr.msrb.gmra.mxu3 %vm184_vm0, %v542_v51 }
  0x52   : > { %852 = vmatmul.msk.bf16.vlgmr.msra.gmra.mxu0 %vm184_vm0, %v598_v56  ;;  %810 = vmatmul.msk.bf16.vlgmr.msra.gmra.mxu1 %vm184_vm0, %v430_v57 }
  0x53   : > { %824 = vmatmul.msk.bf16.vlgmr.msra.gmra.mxu2 %vm184_vm0, %v486_v58  ;;  %839 = vmatmul.msk.bf16.gmra.mxu3 %vm184_vm0, %v543_v59  ;;  %v876_v58 = vld [vmem:[%s1052_s2] ss:$0 sm:$0xff] }
  0x62   : > { %853 = vmatmul.msk.bf16.gmra.mxu0 %vm184_vm0, %v599_v63  ;;  %811 = vmatmul.msk.bf16.gmra.mxu1 %vm184_vm0, %v431_v0 }
  0x63   : > { %825 = vmatmul.msk.bf16.gmra.mxu2 %vm184_vm0, %v487_v1  ;;  %840 = vmatmul.msk.bf16.gmra.mxu3 %vm184_vm0, %v544_v2 }
  0x72   : > { %854 = vmatmul.msk.bf16.gmra.mxu0 %vm184_vm0, %v600_v6  ;;  %812 = vmatmul.msk.bf16.gmra.mxu1 %vm184_vm0, %v432_v7 }
  0x73   : > { %826 = vmatmul.msk.bf16.gmra.mxu2 %vm184_vm0, %v488_v8 }
  0x8f   : > { %v203_v9 = vpop.f32.mrf.mxu0  ;;  %v208_v10 = vpop.f32.mrf.mxu1 }
  0x96   : > { %v1015_v11 = vpop.f32.mrf.mxu2  ;;  %v348_v13 = vpop.f32.mrf.mxu3 }
  0x97   : > { %v205_v12 = vpop.f32.mrf.mxu0  ;;  %v210_v14 = vpop.f32.mrf.mxu1 }
  0x9e   : > { %v215_v15 = vpop.f32.mrf.mxu2  ;;  %v350_v17 = vpop.f32.mrf.mxu3 }
  0x9f   : > { %v404_v16 = vpop.f32.mrf.mxu0  ;;  %v241_v18 = vpop.f32.mrf.mxu1 }
  0xa0   : > { %v242_v39 = vadd.f32 %v241_v18, %v203_v9 }
  0xa6   : > { %v292_v19 = vpop.f32.mrf.mxu2  ;;  %v353_v21 = vpop.f32.mrf.mxu3 }
  0xa7   : > { %v406_v20 = vpop.f32.mrf.mxu0  ;;  %v243_v22 = vpop.f32.mrf.mxu1  ;;  %v306_v40 = vadd.f32 %v292_v19, %v242_v39 }
  0xa8   : > { %v244_v46 = vadd.f32 %v243_v22, %v205_v12 }
  0xa9   : > { %v362_v42 = vadd.f32 %v348_v13, %v306_v40 }
  0xab   : > { %v418_v48 = vadd.f32 %v404_v16, %v362_v42 }
  0xae   : > { %v294_v23 = vpop.f32.mrf.mxu2  ;;  %v355_v25 = vpop.f32.mrf.mxu3 }
  0xaf   : > { %v409_v24 = vpop.f32.mrf.mxu0  ;;  %v246_v26 = vpop.f32.mrf.mxu1  ;;  %v307_v47 = vadd.f32 %v294_v23, %v244_v46 }
  0xb0   : > { %v247_v56 = vadd.f32 %v246_v26, %v208_v10 }
  0xb1   : > { %v363_v51 = vadd.f32 %v350_v17, %v307_v47 }
  0xb3   : > { %v419_v61 = vadd.f32 %v406_v20, %v363_v51 }
  0xb6   : > { %v297_v27 = vpop.f32.mrf.mxu2  ;;  %v1019_v29 = vpop.f32.mrf.mxu3 }
  0xb7   : > { %v1017_v28 = vpop.f32.mrf.mxu0  ;;  %v248_v30 = vpop.f32.mrf.mxu1  ;;  %v308_v59 = vadd.f32 %v297_v27, %v247_v56 }
  0xb8   : > { %v249_v6 = vadd.f32 %v248_v30, %v210_v14 }
  0xb9   : > { %v364_v1 = vadd.f32 %v353_v21, %v308_v59 }
  0xbb   : > { %v420_v10 = vadd.f32 %v409_v24, %v364_v1 }
  0xbe   : > { %v299_v31 = vpop.f32.mrf.mxu2  ;;  %v360_v33 = vpop.f32.mrf.mxu3 }
  0xbf   : > { %v1021_v32 = vpop.f32.mrf.mxu0  ;;  %v251_v34 = vpop.f32.mrf.mxu1  ;;  %v309_v8 = vadd.f32 %v299_v31, %v249_v6 }
  0xc0   : > { %v252_v21 = vadd.f32 %v251_v34, %v1015_v11 }
  0xc1   : > { %v365_v16 = vadd.f32 %v355_v25, %v309_v8 }
  0xc3   : > { %v421_v26 = vadd.f32 %v1017_v28, %v365_v16 }
  0xc6   : > { %v302_v35 = vpop.f32.mrf.mxu2  ;;  %v572_v37 = vpop.f32.mrf.mxu3 }
  0xc7   : > { %v416_v36 = vpop.f32.mrf.mxu0  ;;  %v253_v38 = vpop.f32.mrf.mxu1  ;;  %v310_v23 = vadd.f32 %v302_v35, %v252_v21 }
  0xc9   : > { %v366_v31 = vadd.f32 %v1019_v29, %v310_v23 }
  0xcb   : > { %v422_v34 = vadd.f32 %v1021_v32, %v366_v31 }
  0xce   : > { %v304_v41 = vpop.f32.mrf.mxu2  ;;  %v574_v44 = vpop.f32.mrf.mxu3 }
  0xcf   : > { %v628_v43 = vpop.f32.mrf.mxu0  ;;  %v460_v45 = vpop.f32.mrf.mxu1 }
  0xd0   : > { %v474_v49 = vadd.f32 %v460_v45, %v418_v48 }
  0xd6   : > { %v516_v50 = vpop.f32.mrf.mxu2  ;;  %v577_v54 = vpop.f32.mrf.mxu3 }
  0xd7   : > { %v530_v52 = vadd.f32 %v516_v50, %v474_v49  ;;  %v630_v53 = vpop.f32.mrf.mxu0  ;;  %v462_v55 = vpop.f32.mrf.mxu1 }
  0xd8   : > { %v475_v63 = vadd.f32 %v462_v55, %v419_v61 }
  0xd9   : > { %v586_v57 = vadd.f32 %v572_v37, %v530_v52 }
  0xdb   : > { %v642_v60 = vadd.f32 %v628_v43, %v586_v57 }
  0xdd   : > { %v651_v62 = vadd.f32 %v876_v58, %v642_v60 }
  0xde   : > { %v518_v0 = vpop.f32.mrf.mxu2  ;;  %v579_v4 = vpop.f32.mrf.mxu3 }
  0xdf   : > { %656 = vst.msk [vmem:[%s1031_s16] sm:$0xff] %vm184_vm0, %v651_v62  ;;  %v531_v2 = vadd.f32 %v518_v0, %v475_v63  ;;  %v633_v3 = vpop.f32.mrf.mxu0  ;;  %v465_v5 = vpop.f32.mrf.mxu1 }
  0xe0   : > { %v476_v13 = vadd.f32 %v465_v5, %v420_v10 }
  0xe1   : > { %v587_v7 = vadd.f32 %v574_v44, %v531_v2 }
  0xe3   : > { %v643_v9 = vadd.f32 %v630_v53, %v587_v7 }
  0xe5   : > { %v652_v12 = vadd.f32 %v876_v58, %v643_v9 }
  0xe6   : > { %v521_v15 = vpop.f32.mrf.mxu2  ;;  %v582_v19 = vpop.f32.mrf.mxu3 }
  0xe7   : > { %657 = vst.msk [vmem:[%s1031_s16 + $0x8] sm:$0xff] %vm184_vm0, %v652_v12  ;;  %v532_v17 = vadd.f32 %v521_v15, %v476_v13  ;;  %v635_v18 = vpop.f32.mrf.mxu0  ;;  %v467_v20 = vpop.f32.mrf.mxu1 }
  0xe8   : > { %v477_v27 = vadd.f32 %v467_v20, %v421_v26 }
  0xe9   : > { %v588_v22 = vadd.f32 %v577_v54, %v532_v17 }
  0xeb   : > { %v644_v14 = vadd.f32 %v633_v3, %v588_v22 }
  0xed   : > { %v653_v24 = vadd.f32 %v876_v58, %v644_v14 }
  0xee   : > { %v523_v30 = vpop.f32.mrf.mxu2  ;;  %v584_v36 = vpop.f32.mrf.mxu3 }
  0xef   : > { %658 = vst.msk [vmem:[%s1031_s16 + $0x10] sm:$0xff] %vm184_vm0, %v653_v24  ;;  %v533_v25 = vadd.f32 %v523_v30, %v477_v27  ;;  %v638_v33 = vpop.f32.mrf.mxu0  ;;  %v470_v37 = vpop.f32.mrf.mxu1 }
  0xf0   : > { %v478_v39 = vadd.f32 %v470_v37, %v422_v34 }
  0xf1   : > { %v589_v38 = vadd.f32 %v579_v4, %v533_v25 }
  0xf3   : > { %v645_v11 = vadd.f32 %v635_v18, %v589_v38 }
  0xf5   : > { %v654_v35 = vadd.f32 %v876_v58, %v645_v11 }
  0xf6   : > { %v526_v28 = vpop.f32.mrf.mxu2 }
  0xf7   : > { %659 = vst.msk [vmem:[%s1031_s16 + $0x18] sm:$0xff] %vm184_vm0, %v654_v35  ;;  %v534_v40 = vadd.f32 %v526_v28, %v478_v39  ;;  %v640_v41 = vpop.f32.mrf.mxu0  ;;  %v472_v42 = vpop.f32.mrf.mxu1 }
  0xf9   : > { %v590_v29 = vadd.f32 %v582_v19, %v534_v40 }
  0xfb   : > { %v646_v43 = vadd.f32 %v638_v33, %v590_v29 }
  0xfd   : > { %v655_v44 = vadd.f32 %v876_v58, %v646_v43 }
  0xfe   : > { %v528_v45 = vpop.f32.mrf.mxu2 }
  0xff   : > { %660 = vst.msk [vmem:[%s1031_s16 + $0x20] sm:$0xff] %vm184_vm0, %v655_v44 }
 0x100 PF: > { %s13_s12 = sadd.s32 1, %s883_s12  }
 0x101   : > { %p10_p4 = scmp.ge.s32.totalorder %s13_s12, 4  }
 0x103   :  { %12 = sbr.rel (!%p10_p4) target bundleno = 1 (0x1), region = 76 }

// kernel: forward.20
= control target key start
LH: loop header
LB: loop body
LE: loop exit
PB: predicated region body
PF: predicated region fallthrough
CT: control target
= control target key end

     0   :  { %s288_s12 = smov 0   ;;  %s311_s0 = inlined_call_operand.vmem [shape: f32[32,16], index: 0, kind: input, shape index: {}]   ;;  %s312_s1 = inlined_call_operand.vmem [shape: bf16[1,16,16], index: 1, kind: input, shape index: {}]   ;;  %s313_s2 = inlined_call_operand.vmem [shape: f32[1,16], index: 2, kind: input, shape index: {}]   ;;  %s314_s3 = inlined_call_operand.vmem [shape: f32[32,16], index: 3, kind: output, shape index: {}]  }
   0x1 LB: > { %s236_s13 = sadd.s32 4294967295, %s266_s12   ;;  %p239_p0 = scmp.ge.s32.totalorder %s266_s12, 1  ;;  %s266_s12 = sphi %s288_s12, %s13_s12  }
   0x2   : > { %p127_p1 = scmp.lt.s32.totalorder %s266_s12, 3 }
   0x4   : > { %p128_p2 = pnand %p239_p0, %p127_p1 }
   0x5   : > { %s242_s16 = sshll.u32 (!%p128_p2), %s236_s13, 4  ;;  %s240_s20 = sshll.u32 (!%p128_p2), %s236_s13, 1 }
   0x6   : > { %131 = sbr.rel (%p128_p2) target bundleno = 152 (0x98), region = 32  ;;  %s154_s19 = scalar_lea.vmem (!%p128_p2), %s311_s0, %s242_s16 }
   0x7   : > { %p147_p3 = scmp.lt.s32.totalorder (!%p128_p2), %s240_s20, 3 }
   0xb   : > { %v250_v0 = vld [vmem:[%s312_s1] sm:$0xff]  ;;  %v156_v2 = vld [vmem:[%s154_s19 + $0x8] sm:$0xff]  ;;  %vm170_vm0 = vcmask 130048   ;;  %s316_s20 = smov (!%p147_p3, %s240_s20), 3 }
   0xc   : > { %181 = vmatpush.bf16.msra.mxu0 %v250_v0  ;;  %v155_v1 = vld [vmem:[%s154_s19] sm:$0xff]  ;;  %s241_s21 = sshll.u32 %s316_s20, 3 }
   0xd   : > { %v157_v3 = vpack.c.bf16 %v156_v2, %v155_v1  ;;  %v259_v4 = vld [vmem:[%s313_s2] ss:$0 sm:$0xff]  ;;  %s150_s26 = scalar_lea.vmem %s314_s3, %s241_s21 }
   0xf   : > { %247 = vmatmul.msk.bf16.vlgmr.msra.gmra.mxu0 %vm170_vm0, %v157_v3 }
  0x8c   : > { %v183_v5 = vpop.f32.mrf.mxu0 }
  0x8d   : > { %v184_v6 = vadd.f32 %v259_v4, %v183_v5 }
  0x8f   : > { %188 = vst.msk [vmem:[%s150_s26] sm:$0xff] %vm170_vm0, %v184_v6 }
  0x94   : > { %v185_v7 = vpop.f32.mrf.mxu0 }
  0x95   : > { %v186_v8 = vadd.f32 %v259_v4, %v185_v7 }
  0x97   : > { %189 = vst.msk [vmem:[%s150_s26 + $0x8] sm:$0xff] %vm170_vm0, %v186_v8 }
  0x98 PF: > { %s13_s12 = sadd.s32 1, %s266_s12  }
  0x99   : > { %p10_p4 = scmp.ge.s32.totalorder %s13_s12, 4  }
  0x9b   :  { %12 = sbr.rel (!%p10_p4) target bundleno = 1 (0x1), region = 60 }

// kernel: forward.21
= control target key start
LH: loop header
LB: loop body
LE: loop exit
PB: predicated region body
PF: predicated region fallthrough
CT: control target
= control target key end

     0   :  { %s808_s18 = smov 0   ;;  %s928_s0 = inlined_call_operand.vmem [shape: f32[2,4,4,16], index: 0, kind: input, shape index: {}]   ;;  %s929_s1 = inlined_call_operand.vmem [shape: f32[1,16], index: 1, kind: input, shape index: {}]   ;;  %s930_s2 = inlined_call_operand.vmem [shape: f32[1,16], index: 2, kind: input, shape index: {}]   ;;  %s931_s3 = inlined_call_operand.vmem [shape: f32[8,16], index: 3, kind: input, shape index: {}]   ;;  %s932_s4 = inlined_call_operand.vmem [shape: f32[2,4,4,16], index: 4, kind: input, shape index: {}]   ;;  %s933_s5 = inlined_call_operand.vmem [shape: f32[2,4,4,16], index: 5, kind: output, shape index: {}]  }
   0x1 LB: > { %s710_s19 = sadd.s32 4294967295, %s776_s18   ;;  %p714_p0 = scmp.ge.s32.totalorder %s776_s18, 1  ;;  %s776_s18 = sphi %s808_s18, %s15_s18  }
   0x2   : > { %p197_p1 = scmp.lt.s32.totalorder %s776_s18, 3 }
   0x4   : > { %p198_p2 = pnand %p714_p0, %p197_p1 }
   0x5   : > { %p230_p3 = scmp.lt.s32.totalorder (!%p198_p2), %s710_s19, 1 }
   0x6   : > { %201 = sbr.rel (%p198_p2) target bundleno = 515 (0x203), region = 40 }
   0xb   : > { %s935_s19 = smov (!%p230_p3, %s710_s19), 1  ;;  %vm254_vm0 = vcmask 125952   ;;  %v842_v17 = vld [vmem:[%s931_s3] sm:$0xff]  ;;  %vm270_vm1 = vcmask 122880  }
   0xc   : > { %s816_s20 = sshll.u32 %s935_s19, 4 }
   0xd   : > { %s234_s23 = scalar_lea.vmem %s928_s0, %s816_s20 }
   0xe   : > { %v822_v0 = vld [vmem:[%s234_s23] sm:$0xf]  ;;  %v824_v1 = vld [vmem:[%s234_s23 + $0x4] sm:$0xf]  ;;  %v826_v2 = vld [vmem:[%s234_s23 + $0x8] sm:$0xf] }
   0xf   : > { %v828_v3 = vld [vmem:[%s234_s23 + $0xc] sm:$0xf]  ;;  %v255_v4 = vsel %vm254_vm0, %v822_v0, 0.0  ;;  %v256_v5 = vsel %vm254_vm0, %v824_v1, 0.0  ;;  %v258_v6 = vsel %vm254_vm0, %v826_v2, 0.0 }
  0x10   : > { %v257_v7 = vadd.f32 %v256_v5, %v255_v4  ;;  %v260_v8 = vsel %vm254_vm0, %v828_v3, 0.0 }
  0x12   : > { %v259_v9 = vadd.f32 %v258_v6, %v257_v7 }
  0x14   : > { %v261_v10 = vadd.f32 %v260_v8, %v259_v9 }
  0x16   : > { %v262_v11 = vsel %vm254_vm0, %v261_v10, 0.0 }
  0x17   : > { %v263_v12 = vrot.slane %v262_v11, 4 }
  0x19   : > { %v264_v13 = vadd.f32 %v263_v12, %v262_v11 }
  0x1b   : > { %v265_v14 = vrot.slane %v264_v13, 2 }
  0x1d   : > { %v266_v15 = vadd.f32 %v265_v14, %v264_v13 }
  0x1f   : > { %v267_v16 = vrot.slane %v266_v15, 1 }
  0x21   : > { %v268_v18 = vadd.f32 %v267_v16, %v266_v15 }
  0x23   : > { %v269_v19 = vmul.f32 %v268_v18, %v842_v17 }
  0x25   : > { %v271_v20 = vsel %vm270_vm1, %v269_v19, 0.0  ;;  %v343_v21 = vrot.slane %v269_v19, 4  ;;  %v305_v22 = vrot.slane %v269_v19, 2  ;;  %v286_v25 = vrot.slane %v269_v19, 1 }
  0x26   : > { %272 = vadd.xlane.f32.xlu0 %v271_v20  ;;  %v362_v26 = vrot.slane %v269_v19, 5  ;;  %v324_v27 = vrot.slane %v269_v19, 3  ;;  %v381_v31 = vrot.slane %v269_v19, 6  ;;  %v400_v32 = vrot.slane %v269_v19, 7 }
  0x27   : > { %v345_v23 = vsel %vm270_vm1, %v343_v21, 0.0  ;;  %v307_v24 = vsel %vm270_vm1, %v305_v22, 0.0  ;;  %v288_v28 = vsel %vm270_vm1, %v286_v25, 0.0 }
  0x28   : > { %346 = vadd.xlane.f32.xlu2 %v345_v23  ;;  %308 = vadd.xlane.f32.xlu1 %v307_v24  ;;  %v364_v29 = vsel %vm270_vm1, %v362_v26, 0.0  ;;  %v326_v30 = vsel %vm270_vm1, %v324_v27, 0.0  ;;  %v383_v33 = vsel %vm270_vm1, %v381_v31, 0.0  ;;  %v402_v34 = vsel %vm270_vm1, %v400_v32, 0.0 }
  0x2e   : > { %289 = vadd.xlane.f32.xlu0 %v288_v28 }
  0x30   : > { %365 = vadd.xlane.f32.xlu2 %v364_v29  ;;  %327 = vadd.xlane.f32.xlu1 %v326_v30 }
  0x36   : > { %384 = vadd.xlane.f32.xlu0 %v383_v33 }
  0x38   : > { %403 = vadd.xlane.f32.xlu1 %v402_v34 }
  0x99   : > { %v273_v35 = vpop.xlane.xlu0 %272 }
  0x9a   : > { %v274_v36 = vrot.slane %v273_v35, 4 }
  0x9b   : > { %v347_v37 = vpop.xlane.xlu2 %346  ;;  %v309_v38 = vpop.xlane.xlu1 %308 }
  0x9c   : > { %v275_v39 = vadd.f32 %v274_v36, %v273_v35  ;;  %v348_v40 = vrot.slane %v347_v37, 4  ;;  %v310_v41 = vrot.slane %v309_v38, 4 }
  0x9e   : > { %v276_v42 = vrot.slane %v275_v39, 2  ;;  %v311_v43 = vadd.f32 %v310_v41, %v309_v38  ;;  %v349_v44 = vadd.f32 %v348_v40, %v347_v37 }
  0xa0   : > { %v277_v45 = vadd.f32 %v276_v42, %v275_v39  ;;  %v312_v46 = vrot.slane %v311_v43, 2  ;;  %v350_v50 = vrot.slane %v349_v44, 2 }
  0xa1   : > { %v290_v47 = vpop.xlane.xlu0 %289 }
  0xa2   : > { %v291_v48 = vrot.slane %v290_v47, 4  ;;  %v278_v49 = vrot.slane %v277_v45, 1  ;;  %v313_v57 = vadd.f32 %v312_v46, %v311_v43  ;;  %v351_v61 = vadd.f32 %v350_v50, %v349_v44 }
  0xa3   : > { %v366_v51 = vpop.xlane.xlu2 %365  ;;  %v328_v52 = vpop.xlane.xlu1 %327 }
  0xa4   : > { %v292_v53 = vadd.f32 %v291_v48, %v290_v47  ;;  %v367_v54 = vrot.slane %v366_v51, 4  ;;  %v329_v55 = vrot.slane %v328_v52, 4  ;;  %v279_v56 = vadd.f32 %v278_v49, %v277_v45 }
  0xa5   : > { %v314_v6 = vrot.slane %v313_v57, 1  ;;  %v352_v12 = vrot.slane %v351_v61, 1 }
  0xa6   : > { %v293_v58 = vrot.slane %v292_v53, 2  ;;  %v368_v59 = vadd.f32 %v367_v54, %v366_v51  ;;  %v330_v60 = vadd.f32 %v329_v55, %v328_v52  ;;  %726 = vpush %v279_v56 }
  0xa7   : > { %v315_v18 = vadd.f32 %v314_v6, %v313_v57  ;;  %v353_v23 = vadd.f32 %v352_v12, %v351_v61 }
  0xa8   : > { %v369_v62 = vrot.slane %v368_v59, 2  ;;  %v331_v63 = vrot.slane %v330_v60, 2  ;;  %v294_v4 = vadd.f32 %v293_v58, %v292_v53 }
  0xa9   : > { %v385_v5 = vpop.xlane.xlu0 %384 }
  0xaa   : > { %v386_v7 = vrot.slane %v385_v5, 4  ;;  %v295_v8 = vrot.slane %v294_v4, 1  ;;  %v332_v9 = vadd.f32 %v331_v63, %v330_v60  ;;  %v370_v10 = vadd.f32 %v369_v62, %v368_v59 }
  0xab   : > { %v404_v11 = vpop.xlane.xlu1 %403 }
  0xac   : > { %v387_v13 = vadd.f32 %v386_v7, %v385_v5  ;;  %v405_v14 = vrot.slane %v404_v11, 4  ;;  %v296_v15 = vadd.f32 %v295_v8, %v294_v4  ;;  %v333_v16 = vrot.slane %v332_v9, 1 }
  0xad   : > { %v371_v19 = vrot.slane %v370_v10, 1 }
  0xae   : > { %v388_v20 = vrot.slane %v387_v13, 2  ;;  %v406_v21 = vadd.f32 %v405_v14, %v404_v11  ;;  %728 = vpush %v296_v15  ;;  %v334_v22 = vadd.f32 %v333_v16, %v332_v9 }
  0xaf   : > { %730 = vpush %v315_v18  ;;  %v372_v24 = vadd.f32 %v371_v19, %v370_v10 }
  0xb0   : > { %v407_v25 = vrot.slane %v406_v21, 2  ;;  %732 = vpush %v334_v22  ;;  %v389_v26 = vadd.f32 %v388_v20, %v387_v13 }
  0xb1   : > { %734 = vpush %v353_v23 }
  0xb2   : > { %736 = vpush %v372_v24  ;;  %v390_v27 = vrot.slane %v389_v26, 1  ;;  %v408_v28 = vadd.f32 %v407_v25, %v406_v21 }
  0xb4   : > { %v391_v29 = vadd.f32 %v390_v27, %v389_v26  ;;  %v409_v30 = vrot.slane %v408_v28, 1 }
  0xb6   : > { %738 = vpush %v391_v29  ;;  %v410_v31 = vadd.f32 %v409_v30, %v408_v28 }
  0xb8   : > { %740 = vpush %v410_v31 }
  0xd7   : > { %s727_s26 = spop %726 }
  0xd8   : > { %s281_s27 = smul.f32 0.03125, %s727_s26 }
  0xda   : > { %v282_v32 = vstv %s281_s27 }
  0xdb   : > { %v283_v38 = vmul.f32 %v282_v32, %v842_v17 }
  0xdf   : > { %s729_s28 = spop %728 }
  0xe0   : > { %s298_s29 = smul.f32 0.03125, %s729_s28  ;;  %s731_s30 = spop %730 }
  0xe1   : > { %s317_s6 = smul.f32 0.03125, %s731_s30  ;;  %s733_s7 = spop %732 }
  0xe2   : > { %v299_v33 = vstv %s298_s29  ;;  %s336_s8 = smul.f32 0.03125, %s733_s7  ;;  %s735_s9 = spop %734 }
  0xe3   : > { %v300_v34 = vmul.f32 %v299_v33, %v842_v17  ;;  %v318_v35 = vstv %s317_s6  ;;  %s355_s10 = smul.f32 0.03125, %s735_s9  ;;  %s737_s11 = spop %736 }
  0xe4   : > { %v319_v36 = vmul.f32 %v318_v35, %v842_v17  ;;  %v337_v37 = vstv %s336_s8  ;;  %s374_s12 = smul.f32 0.03125, %s737_s11 }
  0xe5   : > { %v302_v39 = vrot.slane %v300_v34, 1  ;;  %v338_v40 = vmul.f32 %v337_v37, %v842_v17  ;;  %v356_v41 = vstv %s355_s10 }
  0xe6   : > { %v375_v42 = vstv %s374_s12  ;;  %v321_v44 = vrot.slane %v319_v36, 2  ;;  %v357_v45 = vmul.f32 %v356_v41, %v842_v17 }
  0xe7   : > { %v304_v43 = vadd.f32 %v302_v39, %v283_v38  ;;  %s739_s13 = spop %738  ;;  %v340_v47 = vrot.slane %v338_v40, 3  ;;  %v376_v48 = vmul.f32 %v375_v42, %v842_v17 }
  0xe8   : > { %s393_s14 = smul.f32 0.03125, %s739_s13  ;;  %v359_v51 = vrot.slane %v357_v45, 4 }
  0xe9   : > { %v323_v46 = vadd.f32 %v321_v44, %v304_v43  ;;  %s741_s15 = spop %740  ;;  %v378_v55 = vrot.slane %v376_v48, 5 }
  0xea   : > { %v394_v49 = vstv %s393_s14  ;;  %s412_s16 = smul.f32 0.03125, %s741_s15  ;;  %s239_s14 = scalar_lea.vmem %s932_s4, %s816_s20 }
  0xeb   : > { %v342_v50 = vadd.f32 %v340_v47, %v323_v46  ;;  %v395_v52 = vmul.f32 %v394_v49, %v842_v17 }
  0xec   : > { %v413_v53 = vstv %s412_s16 }
  0xed   : > { %v361_v54 = vadd.f32 %v359_v51, %v342_v50  ;;  %v414_v56 = vmul.f32 %v413_v53, %v842_v17  ;;  %v397_v58 = vrot.slane %v395_v52, 6 }
  0xef   : > { %v380_v57 = vadd.f32 %v378_v55, %v361_v54  ;;  %v416_v60 = vrot.slane %v414_v56, 7 }
  0xf1   : > { %v399_v59 = vadd.f32 %v397_v58, %v380_v57 }
  0xf3   : > { %v418_v61 = vadd.f32 %v416_v60, %v399_v59 }
  0xf5   : > { %v419_v62 = vperm.slane %v418_v61, 0 }
  0xf7   : > { %v862_v63 = vsub.f32 %v822_v0, %v419_v62  ;;  %v865_v4 = vsub.f32 %v824_v1, %v419_v62  ;;  %v868_v5 = vsub.f32 %v826_v2, %v419_v62  ;;  %v871_v6 = vsub.f32 %v828_v3, %v419_v62 }
  0xf9   : > { %v424_v7 = vmul.f32 %v862_v63, %v862_v63  ;;  %v425_v8 = vmul.f32 %v865_v4, %v865_v4  ;;  %v426_v9 = vmul.f32 %v868_v5, %v868_v5  ;;  %v427_v0 = vmul.f32 %v871_v6, %v871_v6 }
  0xfb   : > { %v432_v1 = vsel %vm254_vm0, %v424_v7, 0.0  ;;  %v433_v2 = vsel %vm254_vm0, %v425_v8, 0.0  ;;  %v435_v3 = vsel %vm254_vm0, %v426_v9, 0.0  ;;  %v437_v12 = vsel %vm254_vm0, %v427_v0, 0.0 }
  0xfc   : > { %v434_v10 = vadd.f32 %v433_v2, %v432_v1 }
  0xfe   : > { %v436_v11 = vadd.f32 %v435_v3, %v434_v10 }
 0x100   : > { %v438_v13 = vadd.f32 %v437_v12, %v436_v11 }
 0x102   : > { %v439_v14 = vsel %vm254_vm0, %v438_v13, 0.0 }
 0x103   : > { %v440_v15 = vrot.slane %v439_v14, 4 }
 0x105   : > { %v441_v16 = vadd.f32 %v440_v15, %v439_v14 }
 0x107   : > { %v442_v18 = vrot.slane %v441_v16, 2 }
 0x109   : > { %v443_v19 = vadd.f32 %v442_v18, %v441_v16 }
 0x10b   : > { %v444_v20 = vrot.slane %v443_v19, 1 }
 0x10d   : > { %v445_v21 = vadd.f32 %v444_v20, %v443_v19 }
 0x10f   : > { %v446_v22 = vmul.f32 %v445_v21, %v842_v17 }
 0x111   : > { %v447_v23 = vsel %vm270_vm1, %v446_v22, 0.0  ;;  %v481_v24 = vrot.slane %v446_v22, 2  ;;  %v462_v25 = vrot.slane %v446_v22, 1  ;;  %v500_v28 = vrot.slane %v446_v22, 3 }
 0x112   : > { %448 = vadd.xlane.f32.xlu2 %v447_v23  ;;  %v538_v29 = vrot.slane %v446_v22, 5  ;;  %v519_v30 = vrot.slane %v446_v22, 4  ;;  %v557_v34 = vrot.slane %v446_v22, 6  ;;  %v576_v35 = vrot.slane %v446_v22, 7 }
 0x113   : > { %v483_v26 = vsel %vm270_vm1, %v481_v24, 0.0  ;;  %v464_v27 = vsel %vm270_vm1, %v462_v25, 0.0  ;;  %v502_v31 = vsel %vm270_vm1, %v500_v28, 0.0 }
 0x114   : > { %484 = vadd.xlane.f32.xlu1 %v483_v26  ;;  %465 = vadd.xlane.f32.xlu0 %v464_v27  ;;  %v540_v32 = vsel %vm270_vm1, %v538_v29, 0.0  ;;  %v521_v33 = vsel %vm270_vm1, %v519_v30, 0.0  ;;  %v559_v36 = vsel %vm270_vm1, %v557_v34, 0.0  ;;  %v578_v37 = vsel %vm270_vm1, %v576_v35, 0.0 }
 0x11a   : > { %503 = vadd.xlane.f32.xlu2 %v502_v31 }
 0x11c   : > { %541 = vadd.xlane.f32.xlu1 %v540_v32  ;;  %522 = vadd.xlane.f32.xlu0 %v521_v33 }
 0x122   : > { %560 = vadd.xlane.f32.xlu2 %v559_v36 }
 0x124   : > { %579 = vadd.xlane.f32.xlu0 %v578_v37 }
 0x185   : > { %v449_v38 = vpop.xlane.xlu2 %448 }
 0x186   : > { %v450_v39 = vrot.slane %v449_v38, 4 }
 0x187   : > { %v485_v40 = vpop.xlane.xlu1 %484  ;;  %v466_v41 = vpop.xlane.xlu0 %465 }
 0x188   : > { %v451_v42 = vadd.f32 %v450_v39, %v449_v38  ;;  %v486_v43 = vrot.slane %v485_v40, 4  ;;  %v467_v44 = vrot.slane %v466_v41, 4 }
 0x18a   : > { %v452_v45 = vrot.slane %v451_v42, 2  ;;  %v487_v46 = vadd.f32 %v486_v43, %v485_v40  ;;  %v468_v47 = vadd.f32 %v467_v44, %v466_v41 }
 0x18c   : > { %v488_v48 = vrot.slane %v487_v46, 2  ;;  %v469_v49 = vrot.slane %v468_v47, 2  ;;  %v453_v50 = vadd.f32 %v452_v45, %v451_v42 }
 0x18d   : > { %v504_v51 = vpop.xlane.xlu2 %503 }
 0x18e   : > { %v505_v52 = vrot.slane %v504_v51, 4  ;;  %v454_v53 = vrot.slane %v453_v50, 1  ;;  %v470_v54 = vadd.f32 %v469_v49, %v468_v47  ;;  %v489_v55 = vadd.f32 %v488_v48, %v487_v46 }
 0x18f   : > { %v542_v56 = vpop.xlane.xlu1 %541  ;;  %v523_v57 = vpop.xlane.xlu0 %522 }
 0x190   : > { %v506_v58 = vadd.f32 %v505_v52, %v504_v51  ;;  %v543_v59 = vrot.slane %v542_v56, 4  ;;  %v524_v60 = vrot.slane %v523_v57, 4  ;;  %v455_v61 = vadd.f32 %v454_v53, %v453_v50 }
 0x191   : > { %v471_v62 = vrot.slane %v470_v54, 1  ;;  %v490_v7 = vrot.slane %v489_v55, 1 }
 0x192   : > { %v507_v8 = vrot.slane %v506_v58, 2  ;;  %v544_v9 = vadd.f32 %v543_v59, %v542_v56  ;;  %v525_v0 = vadd.f32 %v524_v60, %v523_v57  ;;  %742 = vpush %v455_v61 }
 0x193   : > { %v472_v1 = vadd.f32 %v471_v62, %v470_v54  ;;  %v491_v2 = vadd.f32 %v490_v7, %v489_v55 }
 0x194   : > { %v545_v10 = vrot.slane %v544_v9, 2  ;;  %v526_v3 = vrot.slane %v525_v0, 2  ;;  %v508_v11 = vadd.f32 %v507_v8, %v506_v58 }
 0x195   : > { %744 = vpush %v472_v1  ;;  %v561_v12 = vpop.xlane.xlu2 %560 }
 0x196   : > { %v546_v13 = vadd.f32 %v545_v10, %v544_v9  ;;  %746 = vpush %v491_v2  ;;  %v562_v14 = vrot.slane %v561_v12, 4  ;;  %v509_v15 = vrot.slane %v508_v11, 1  ;;  %v527_v16 = vadd.f32 %v526_v3, %v525_v0 }
 0x197   : > { %v580_v18 = vpop.xlane.xlu0 %579 }
 0x198   : > { %v563_v19 = vadd.f32 %v562_v14, %v561_v12  ;;  %v581_v20 = vrot.slane %v580_v18, 4  ;;  %v510_v21 = vadd.f32 %v509_v15, %v508_v11  ;;  %v528_v22 = vrot.slane %v527_v16, 1 }
 0x199   : > { %v547_v23 = vrot.slane %v546_v13, 1 }
 0x19a   : > { %v564_v24 = vrot.slane %v563_v19, 2  ;;  %v582_v25 = vadd.f32 %v581_v20, %v580_v18  ;;  %748 = vpush %v510_v21  ;;  %v529_v26 = vadd.f32 %v528_v22, %v527_v16 }
 0x19b   : > { %v548_v27 = vadd.f32 %v547_v23, %v546_v13 }
 0x19c   : > { %v565_v28 = vadd.f32 %v564_v24, %v563_v19  ;;  %v583_v29 = vrot.slane %v582_v25, 2  ;;  %750 = vpush %v529_v26  ;;  %v767_v19 = vld [vmem:[%s930_s2] ss:$0 sm:$0xff]  ;;  %v629_v26 = vld [vmem:[%s239_s14 + $0x8] sm:$0xf] }
 0x19d   : > { %752 = vpush %v548_v27  ;;  %v627_v24 = vld [vmem:[%s239_s14] sm:$0xf]  ;;  %v630_v27 = vld [vmem:[%s239_s14 + $0xc] sm:$0xf] }
 0x19e   : > { %v584_v30 = vadd.f32 %v583_v29, %v582_v25  ;;  %v566_v31 = vrot.slane %v565_v28, 1  ;;  %v628_v25 = vld [vmem:[%s239_s14 + $0x4] sm:$0xf] }
 0x1a0   : > { %v567_v32 = vadd.f32 %v566_v31, %v565_v28  ;;  %v585_v33 = vrot.slane %v584_v30, 1 }
 0x1a2   : > { %754 = vpush %v567_v32  ;;  %v586_v34 = vadd.f32 %v585_v33, %v584_v30 }
 0x1a4   : > { %756 = vpush %v586_v34 }
 0x1c3   : > { %s743_s17 = spop %742 }
 0x1c4   : > { %s457_s19 = smul.f32 0.03125, %s743_s17 }
 0x1c6   : > { %s745_s21 = spop %744  ;;  %v458_v35 = vstv %s457_s19 }
 0x1c7   : > { %s474_s22 = smul.f32 0.03125, %s745_s21  ;;  %s747_s23 = spop %746  ;;  %v459_v40 = vmul.f32 %v458_v35, %v842_v17 }
 0x1c8   : > { %s493_s24 = smul.f32 0.03125, %s747_s23  ;;  %s244_s21 = scalar_lea.vmem %s933_s5, %s816_s20 }
 0x1c9   : > { %v475_v36 = vstv %s474_s22 }
 0x1ca   : > { %v476_v37 = vmul.f32 %v475_v36, %v842_v17  ;;  %v494_v38 = vstv %s493_s24 }
 0x1cb   : > { %v495_v39 = vmul.f32 %v494_v38, %v842_v17  ;;  %s749_s25 = spop %748 }
 0x1cc   : > { %v478_v41 = vrot.slane %v476_v37, 1  ;;  %s512_s26 = smul.f32 0.03125, %s749_s25 }
 0x1cd   : > { %s751_s27 = spop %750  ;;  %v497_v44 = vrot.slane %v495_v39, 2 }
 0x1ce   : > { %v480_v42 = vadd.f32 %v478_v41, %v459_v40  ;;  %v513_v43 = vstv %s512_s26  ;;  %s531_s28 = smul.f32 0.03125, %s751_s27  ;;  %s753_s29 = spop %752 }
 0x1cf   : > { %v514_v45 = vmul.f32 %v513_v43, %v842_v17  ;;  %s550_s30 = smul.f32 0.03125, %s753_s29 }
 0x1d0   : > { %v532_v46 = vstv %s531_s28  ;;  %v499_v47 = vadd.f32 %v497_v44, %v480_v42 }
 0x1d1   : > { %v516_v48 = vrot.slane %v514_v45, 3  ;;  %v533_v49 = vmul.f32 %v532_v46, %v842_v17  ;;  %v551_v50 = vstv %s550_s30 }
 0x1d2   : > { %v552_v53 = vmul.f32 %v551_v50, %v842_v17 }
 0x1d3   : > { %v518_v51 = vadd.f32 %v516_v48, %v499_v47  ;;  %v535_v52 = vrot.slane %v533_v49, 4  ;;  %s755_s6 = spop %754 }
 0x1d4   : > { %s569_s7 = smul.f32 0.03125, %s755_s6  ;;  %v554_v56 = vrot.slane %v552_v53, 5 }
 0x1d5   : > { %v537_v54 = vadd.f32 %v535_v52, %v518_v51  ;;  %s757_s8 = spop %756 }
 0x1d6   : > { %v570_v55 = vstv %s569_s7  ;;  %s588_s9 = smul.f32 0.03125, %s757_s8 }
 0x1d7   : > { %v571_v57 = vmul.f32 %v570_v55, %v842_v17  ;;  %v556_v59 = vadd.f32 %v554_v56, %v537_v54 }
 0x1d8   : > { %v589_v58 = vstv %s588_s9 }
 0x1d9   : > { %v573_v60 = vrot.slane %v571_v57, 6  ;;  %v590_v61 = vmul.f32 %v589_v58, %v842_v17  ;;  %v766_v17 = vld [vmem:[%s929_s1] ss:$0 sm:$0xff] }
 0x1db   : > { %v575_v62 = vadd.f32 %v573_v60, %v556_v59  ;;  %v592_v7 = vrot.slane %v590_v61, 7 }
 0x1dd   : > { %v594_v8 = vadd.f32 %v592_v7, %v575_v62 }
 0x1df   : > { %v595_v9 = vadd.f32 1e-05, %v594_v8 }
 0x1e1   : > { %768 = vrsqrt.f32 %v595_v9  ;;  %vm602_vm3 = vweird.f32 %v595_v9 }
 0x1e7   : > { %v769_v0 = vpop.eup %768 }
 0x1e8   : > { %v597_v1 = vmul.f32 %v769_v0, %v595_v9  ;;  %vm603_vm2 = vweird.f32 %v769_v0 }
 0x1e9   : > { %vm604_vm4 = vmor %vm602_vm3, %vm603_vm2 }
 0x1ea   : > { %v598_v2 = vmul.f32 %v769_v0, %v597_v1 }
 0x1ec   : > { %v599_v10 = vmul.f32 0.5, %v598_v2 }
 0x1ee   : > { %v600_v3 = vsub.f32 1.5, %v599_v10 }
 0x1f0   : > { %v601_v11 = vmul.f32 %v769_v0, %v600_v3 }
 0x1f2   : > { %v605_v12 = vsel %vm604_vm4, %v769_v0, %v601_v11 }
 0x1f3   : > { %v606_v13 = vperm.slane %v605_v12, 0 }
 0x1f5   : > { %v607_v14 = vmul.f32 %v606_v13, %v862_v63  ;;  %v608_v15 = vmul.f32 %v606_v13, %v865_v4  ;;  %v609_v16 = vmul.f32 %v606_v13, %v868_v5  ;;  %v610_v18 = vmul.f32 %v606_v13, %v871_v6 }
 0x1f7   : > { %v615_v20 = vmul.f32 %v766_v17, %v607_v14  ;;  %v616_v21 = vmul.f32 %v766_v17, %v608_v15  ;;  %v617_v22 = vmul.f32 %v766_v17, %v609_v16  ;;  %v618_v23 = vmul.f32 %v766_v17, %v610_v18 }
 0x1f9   : > { %v623_v63 = vadd.f32 %v767_v19, %v615_v20  ;;  %v624_v28 = vadd.f32 %v767_v19, %v616_v21  ;;  %v625_v4 = vadd.f32 %v767_v19, %v617_v22  ;;  %v626_v29 = vadd.f32 %v767_v19, %v618_v23 }
 0x1fb   : > { %v631_v5 = vadd.f32 %v627_v24, %v623_v63  ;;  %v632_v30 = vadd.f32 %v628_v25, %v624_v28  ;;  %v633_v6 = vadd.f32 %v629_v26, %v625_v4  ;;  %v634_v31 = vadd.f32 %v630_v27, %v626_v29 }
 0x1fd   : > { %v635_v32 = vmax.f32 %v631_v5, 0.0  ;;  %v636_v33 = vmax.f32 %v632_v30, 0.0  ;;  %v637_v34 = vmax.f32 %v633_v6, 0.0  ;;  %v638_v35 = vmax.f32 %v634_v31, 0.0 }
 0x1ff   : > { %639 = vst.msk [vmem:[%s244_s21] sm:$0xf] %vm254_vm0, %v635_v32 }
 0x200   : > { %640 = vst.msk [vmem:[%s244_s21 + $0x4] sm:$0xf] %vm254_vm0, %v636_v33 }
 0x201   : > { %641 = vst.msk [vmem:[%s244_s21 + $0x8] sm:$0xf] %vm254_vm0, %v637_v34 }
 0x202   : > { %642 = vst.msk [vmem:[%s244_s21 + $0xc] sm:$0xf] %vm254_vm0, %v638_v35 }
 0x203 PF: > { %s15_s18 = sadd.s32 1, %s776_s18  }
 0x204   : > { %p12_p4 = scmp.ge.s32.totalorder %s15_s18, 4  }
 0x206   :  { %14 = sbr.rel (!%p12_p4) target bundleno = 1 (0x1), region = 73 }

// kernel: forward.22
= control target key start
LH: loop header
LB: loop body
LE: loop exit
PB: predicated region body
PF: predicated region fallthrough
CT: control target
= control target key end

     0   :  { %6 = vsyncpa [#allocation4], 0  ;;  %s268_s6 = smov 0   ;;  %s290_s0 = inlined_call_operand.vmem [shape: f32[32,16], index: 0, kind: input, shape index: {}]   ;;  %s291_s1 = inlined_call_operand.hbm [shape: f32[1,1], index: 1, kind: output, shape index: {}]  }
   0x1 LB: > { %s274_s7 = sadd.s32 4294967295, %s254_s6   ;;  %p197_p0 = scmp.ge.s32.totalorder %s254_s6, 1  ;;  %s254_s6 = sphi %s268_s6, %s12_s6  }
   0x2   : > { %p84_p1 = scmp.lt.s32.totalorder %s254_s6, 3 }
   0x4   : > { %p85_p2 = pnand %p197_p0, %p84_p1 }
   0x5   : > { %s198_s8 = sshll.u32 (!%p85_p2), %s274_s7, 1  ;;  %p216_p4 = scmp.eq.s32.totalorder (!%p85_p2), %s274_s7, 0 }
   0x6   : > { %88 = sbr.rel (%p85_p2) target bundleno = 211 (0xd3), region = 24  ;;  %p100_p3 = scmp.lt.s32.totalorder (!%p85_p2), %s198_s8, 3 }
   0x7   : > { %s256_s13 = smov (!%p85_p2), 0.0   ;;  %s153_s20 = sshll.u32 (!%p85_p2), %s291_s1, 4  ;;  %s154_s20 = int_to_ptr.hbm [resolvable:$true] %s153_s20 }
   0x8   : > { %p217_p8 = scmp.eq.s32.totalorder (!%p85_p2), %s274_s7, 1  ;;  %s257_s21 = smov (!%p85_p2), [#allocation3]  }
   0xb   : > { %s293_s8 = smov (!%p100_p3, %s198_s8), 3  ;;  %vm116_vm0 = vcmask 130048   ;;  %209 = sst [smem:[#allocation2]] (%p216_p4), %s256_s13 }
   0xc   : > { %s199_s9 = sshll.u32 %s293_s8, 3  ;;  %s111_s14 = sld [smem:[#allocation2]] }
   0xd   : > { %s103_s12 = scalar_lea.vmem %s290_s0, %s199_s9 }
   0xe   : > { %v112_v0 = vld [vmem:[%s103_s12] sm:$0xff]  ;;  %v113_v1 = vld [vmem:[%s103_s12 + $0x8] sm:$0xff] }
   0xf   : > { %v114_v2 = vand.u32 2147483647, %v112_v0  ;;  %v115_v3 = vand.u32 2147483647, %v113_v1 }
  0x11   : > { %v117_v4 = vsel %vm116_vm0, %v114_v2, -inf  ;;  %v118_v5 = vsel %vm116_vm0, %v115_v3, -inf }
  0x12   : > { %v119_v6 = vmax.f32 %v117_v4, %v118_v5 }
  0x14   : > { %120 = vmax.xlane.f32.xlu0 %v119_v6 }
  0x87   : > { %v121_v7 = vpop.xlane.xlu0 %120 }
  0x88   : > { %v122_v8 = vrot.slane %v121_v7, 4 }
  0x8a   : > { %v123_v9 = vmax.f32 %v121_v7, %v122_v8 }
  0x8c   : > { %v124_v10 = vrot.slane %v123_v9, 2 }
  0x8e   : > { %v125_v11 = vmax.f32 %v123_v9, %v124_v10 }
  0x90   : > { %v126_v12 = vrot.slane %v125_v11, 1 }
  0x92   : > { %v127_v13 = vmax.f32 %v125_v11, %v126_v12 }
  0x94   : > { %206 = vpush %v127_v13 }
  0xc5   : > { %s207_s15 = spop %206 }
  0xc6   : > { %s129_s16 = smax.f32 %s207_s15, %s111_s14 }
  0xc7   : > { %131 = sst [smem:[#allocation2]] %s129_s16  ;;  %p140_p5 = scmp.lt.f32.partialorder %s129_s16, 0.5 }
  0xc8   : > { %p139_p6 = scmp.lt.f32.partialorder %s129_s16, 0.1  ;;  %p138_p7 = scmp.lt.f32.partialorder %s129_s16, 0.05 }
  0xc9   : > { %s141_s17 = scalar_select %p140_p5, 4.0, 1.0 }
  0xca   : > { %p137_p9 = scmp.lt.f32.partialorder %s129_s16, 0.02 }
  0xcb   : > { %s295_s17 = smov (%p139_p6, %s141_s17), 10.0 }
  0xcc   : > { %s297_s17 = smov (%p138_p7, %s295_s17), 20.0 }
  0xcd   : > { %s299_s17 = smov (%p137_p9, %s297_s17), 50.0 }
  0xce   : > { %211 = sst [smem:[#allocation3]] (%p217_p8), %s299_s17 }
  0xcf   : > { %213 = dma.smem_to_hbm (%p217_p8), %s257_s21, 16, %s154_s20, [#allocation4]  }
  0xd0   : > { %249 = dma.done.wait (%p217_p8), [#allocation4], 16  }
  0xd1   : > { %251 = vsyncadd (%p217_p8), [#allocation4], 4294967280 }
  0xd2   : > { %162 = sfence }
  0xd3 PF: > { %s12_s6 = sadd.s32 1, %s254_s6  }
  0xd4   : > { %p9_p10 = scmp.ge.s32.totalorder %s12_s6, 4  }
  0xd6   :  { %11 = sbr.rel (!%p9_p10) target bundleno = 1 (0x1), region = 62 }
  0xdb   :  { %168 = vsyncpa [#allocation4], 1 }
  0xdc   :  { %170 = vsyncpa [#allocation4 + $0x1], 1 }

// kernel: forward.26
= control target key start
LH: loop header
LB: loop body
LE: loop exit
PB: predicated region body
PF: predicated region fallthrough
CT: control target
= control target key end

     0   :  { %s906_s12 = smov 0   ;;  %s1054_s0 = inlined_call_operand.vmem [shape: f32[96,16], index: 0, kind: input, shape index: {}]   ;;  %s1055_s1 = inlined_call_operand.vmem [shape: bf16[9,16,64], index: 1, kind: input, shape index: {}]   ;;  %s1056_s2 = inlined_call_operand.vmem [shape: f32[1,64], index: 2, kind: input, shape index: {}]   ;;  %s1057_s3 = inlined_call_operand.vmem [shape: f32[80,64], index: 3, kind: output, shape index: {}]  }
   0x1 LB: > { %s732_s13 = sadd.s32 4294967295, %s884_s12   ;;  %p735_p0 = scmp.ge.s32.totalorder %s884_s12, 1  ;;  %s884_s12 = sphi %s906_s12, %s13_s12  }
   0x2   : > { %p127_p1 = scmp.lt.s32.totalorder %s884_s12, 3 }
   0x4   : > { %p128_p2 = pnand %p735_p0, %p127_p1 }
   0x5   : > { %s153_s16 = smul.u32 (!%p128_p2), 40, %s732_s13 }
   0x6   : > { %131 = sbr.rel (%p128_p2) target bundleno = 256 (0x100), region = 32 }
   0x7   : > { %s934_s27 = scalar_lea.vmem (!%p128_p2), %s1054_s0, %s153_s16  ;;  %s146_s9 = smul.u32 (!%p128_p2), 5, %s732_s13 }
   0x9   : > { %p147_p3 = scmp.lt.s32.totalorder (!%p128_p2), %s146_s9, 9 }
   0xb   : > { %v859_v0 = vld [vmem:[%s1055_s1 + $0x8] sm:$0xff]  ;;  %v860_v1 = vld [vmem:[%s1055_s1 + $0x10] sm:$0xff]  ;;  %v858_v2 = vld [vmem:[%s1055_s1] sm:$0xff]  ;;  %vm184_vm0 = vcmask 130048   ;;  %s1059_s9 = smov (!%p147_p3, %s146_s9), 9  ;;  %vm656_vm1 = vcmask 523264  }
   0xc   : > { %v861_v3 = vld [vmem:[%s1055_s1 + $0x18] sm:$0xff]  ;;  %v862_v4 = vld [vmem:[%s1055_s1 + $0x20] sm:$0xff]  ;;  %201 = vmatpush.bf16.msra.mxu0 %v859_v0  ;;  %867 = vmatpush.bf16.msra.mxu1 %v859_v0  ;;  %v864_v5 = vld [vmem:[%s1055_s1 + $0x30] sm:$0xff]  ;;  %s736_s10 = sshll.u32 %s1059_s9, 3 }
   0xd   : > { %v865_v6 = vld [vmem:[%s1055_s1 + $0x38] sm:$0xff]  ;;  %868 = vmatpush.bf16.msra.mxu2 %v859_v0  ;;  %v737_v7 = vld [vmem:[%s934_s27 + $0x1] sm:$0xff]  ;;  %v738_v8 = vld [vmem:[%s934_s27 + $0x9] sm:$0xff]  ;;  %346 = vmatpush.bf16.msra.mxu3 %v861_v3  ;;  %s1034_s16 = scalar_lea.vmem %s1057_s3, %s736_s10 }
   0xe   : > { %v739_v9 = vld [vmem:[%s934_s27 + $0x11] sm:$0xff]  ;;  %v172_v10 = vpack.c.bf16 %v738_v8, %v737_v7  ;;  %v740_v11 = vld [vmem:[%s934_s27 + $0x19] sm:$0xff]  ;;  %v741_v12 = vld [vmem:[%s934_s27 + $0x21] sm:$0xff] }
   0xf   : > { %v772_v13 = vld [vmem:[%s934_s27 + $0x6] sm:$0xff]  ;;  %v173_v14 = vpack.c.bf16 %v740_v11, %v739_v9  ;;  %v174_v15 = vpack.c.bf16 %v741_v12, %v741_v12  ;;  %v949_v16 = vld [vmem:[%s934_s27 + $0xe] sm:$0xff]  ;;  %v774_v26 = vld [vmem:[%s934_s27 + $0x16] sm:$0xff] }
  0x10   : > { %239 = vmatpush.bf16.msrb.mxu1 %v858_v2  ;;  %402 = vmatpush.bf16.msrb.mxu0 %v862_v4  ;;  %v863_v17 = vld [vmem:[%s1055_s1 + $0x28] sm:$0xff]  ;;  %v866_v18 = vld [vmem:[%s1055_s1 + $0x40] sm:$0xff]  ;;  %v318_v19 = vpack.c.bf16 %v949_v16, %v772_v13  ;;  %v157_v32 = vld [vmem:[%s934_s27 + $0x10] sm:$0xff]  ;;  %v598_v56 = vpack.c.bf16 %v774_v26, %v949_v16 }
  0x11   : > { %290 = vmatpush.bf16.msrb.mxu2 %v860_v1  ;;  %570 = vmatpush.bf16.msrb.mxu3 %v865_v6  ;;  %v155_v20 = vld [vmem:[%s934_s27] sm:$0xff]  ;;  %v787_v22 = vld [vmem:[%s934_s27 + $0xf] sm:$0xff]  ;;  %v788_v33 = vld [vmem:[%s934_s27 + $0x17] sm:$0xff] }
  0x12   : > { %748 = vmatmul.msk.bf16.vlgmr.msra.gmra.mxu0 %vm184_vm0, %v172_v10  ;;  %749 = vmatmul.msk.bf16.vlgmr.msra.gmra.mxu1 %vm184_vm0, %v173_v14  ;;  %v786_v21 = vld [vmem:[%s934_s27 + $0x7] sm:$0xff]  ;;  %v775_v27 = vld [vmem:[%s934_s27 + $0x1e] sm:$0xff]  ;;  %v760_v36 = vld [vmem:[%s934_s27 + $0x12] sm:$0xff] }
  0x13   : > { %750 = vmatmul.msk.bf16.vlgmr.msra.gmra.mxu2 %vm184_vm0, %v174_v15  ;;  %783 = vmatmul.msk.bf16.vlgmr.msra.gmra.mxu3 %vm184_vm0, %v318_v19  ;;  %v156_v23 = vld [vmem:[%s934_s27 + $0x8] sm:$0xff]  ;;  %v374_v28 = vpack.c.bf16 %v787_v22, %v786_v21  ;;  %v319_v31 = vpack.c.bf16 %v775_v27, %v774_v26  ;;  %v789_v34 = vld [vmem:[%s934_s27 + $0x1f] sm:$0xff]  ;;  %v829_v47 = vld [vmem:[%s934_s27 + $0x15] sm:$0xff] }
  0x14   : > { %458 = vmatpush.bf16.msra.mxu1 %v863_v17  ;;  %626 = vmatpush.bf16.msra.mxu0 %v866_v18  ;;  %v758_v24 = vld [vmem:[%s934_s27 + $0x2] sm:$0xff]  ;;  %v759_v25 = vld [vmem:[%s934_s27 + $0xa] sm:$0xff]  ;;  %v160_v29 = vpack.c.bf16 %v156_v23, %v155_v20  ;;  %v158_v35 = vld [vmem:[%s934_s27 + $0x18] sm:$0xff]  ;;  %v375_v39 = vpack.c.bf16 %v789_v34, %v788_v33  ;;  %v430_v57 = vpack.c.bf16 %v157_v32, %v156_v23 }
  0x15   : > { %514 = vmatpush.bf16.msra.mxu2 %v864_v5  ;;  %v262_v30 = vpack.c.bf16 %v759_v25, %v758_v24  ;;  %v761_v37 = vld [vmem:[%s934_s27 + $0x1a] sm:$0xff]  ;;  %v776_v38 = vld [vmem:[%s934_s27 + $0x26] sm:$0xff]  ;;  %v161_v40 = vpack.c.bf16 %v158_v35, %v157_v32  ;;  %v846_v3 = vld [vmem:[%s934_s27 + $0x2e] sm:$0xff] }
  0x16   : > { %v263_v41 = vpack.c.bf16 %v761_v37, %v760_v36  ;;  %v320_v42 = vpack.c.bf16 %v776_v38, %v776_v38  ;;  %v790_v43 = vld [vmem:[%s934_s27 + $0x27] sm:$0xff]  ;;  %v815_v53 = vld [vmem:[%s934_s27 + $0x14] sm:$0xff]  ;;  %v830_v54 = vld [vmem:[%s934_s27 + $0x1d] sm:$0xff]  ;;  %v599_v63 = vpack.c.bf16 %v776_v38, %v775_v27  ;;  %v600_v6 = vpack.c.bf16 %v846_v3, %v846_v3 }
  0x17   : > { %v159_v44 = vld [vmem:[%s934_s27 + $0x20] sm:$0xff]  ;;  %v828_v46 = vld [vmem:[%s934_s27 + $0xd] sm:$0xff]  ;;  %v376_v48 = vpack.c.bf16 %v790_v43, %v790_v43 }
  0x18   : > { %v762_v45 = vld [vmem:[%s934_s27 + $0x22] sm:$0xff]  ;;  %v162_v49 = vpack.c.bf16 %v159_v44, %v159_v44  ;;  %v542_v51 = vpack.c.bf16 %v829_v47, %v828_v46  ;;  %v814_v52 = vld [vmem:[%s934_s27 + $0xc] sm:$0xff]  ;;  %v431_v0 = vpack.c.bf16 %v159_v44, %v158_v35 }
  0x19   : > { %v264_v50 = vpack.c.bf16 %v762_v45, %v762_v45  ;;  %v831_v55 = vld [vmem:[%s934_s27 + $0x25] sm:$0xff]  ;;  %v486_v58 = vpack.c.bf16 %v815_v53, %v814_v52  ;;  %v816_v60 = vld [vmem:[%s934_s27 + $0x1c] sm:$0xff]  ;;  %v832_v62 = vld [vmem:[%s934_s27 + $0x2d] sm:$0xff] }
  0x1a   : > { %v543_v59 = vpack.c.bf16 %v831_v55, %v830_v54  ;;  %v817_v61 = vld [vmem:[%s934_s27 + $0x24] sm:$0xff]  ;;  %v544_v2 = vpack.c.bf16 %v832_v62, %v832_v62  ;;  %v818_v5 = vld [vmem:[%s934_s27 + $0x2c] sm:$0xff] }
  0x1b   : > { %v487_v1 = vpack.c.bf16 %v817_v61, %v816_v60  ;;  %v804_v4 = vld [vmem:[%s934_s27 + $0x28] sm:$0xff]  ;;  %v488_v8 = vpack.c.bf16 %v818_v5, %v818_v5 }
  0x1c   : > { %v432_v7 = vpack.c.bf16 %v804_v4, %v804_v4 }
  0x22   : > { %797 = vmatmul.msk.bf16.vlgmr.msrb.gmra.mxu0 %vm184_vm0, %v374_v28  ;;  %755 = vmatmul.msk.bf16.vlgmr.msrb.gmra.mxu1 %vm184_vm0, %v160_v29 }
  0x23   : > { %769 = vmatmul.msk.bf16.vlgmr.msrb.gmra.mxu2 %vm184_vm0, %v262_v30  ;;  %784 = vmatmul.msk.bf16.gmra.mxu3 %vm184_vm0, %v319_v31 }
  0x32   : > { %798 = vmatmul.msk.bf16.gmra.mxu0 %vm184_vm0, %v375_v39  ;;  %756 = vmatmul.msk.bf16.gmra.mxu1 %vm184_vm0, %v161_v40 }
  0x33   : > { %770 = vmatmul.msk.bf16.gmra.mxu2 %vm184_vm0, %v263_v41  ;;  %785 = vmatmul.msk.bf16.gmra.mxu3 %vm184_vm0, %v320_v42 }
  0x42   : > { %799 = vmatmul.msk.bf16.gmra.mxu0 %vm184_vm0, %v376_v48  ;;  %757 = vmatmul.msk.bf16.gmra.mxu1 %vm184_vm0, %v162_v49 }
  0x43   : > { %771 = vmatmul.msk.bf16.gmra.mxu2 %vm184_vm0, %v264_v50  ;;  %839 = vmatmul.msk.bf16.vlgmr.msrb.gmra.mxu3 %vm184_vm0, %v542_v51 }
  0x52   : > { %853 = vmatmul.msk.bf16.vlgmr.msra.gmra.mxu0 %vm184_vm0, %v598_v56  ;;  %811 = vmatmul.msk.bf16.vlgmr.msra.gmra.mxu1 %vm184_vm0, %v430_v57 }
  0x53   : > { %825 = vmatmul.msk.bf16.vlgmr.msra.gmra.mxu2 %vm184_vm0, %v486_v58  ;;  %840 = vmatmul.msk.bf16.gmra.mxu3 %vm184_vm0, %v543_v59  ;;  %v877_v58 = vld [vmem:[%s1056_s2] ss:$0 sm:$0xff] }
  0x62   : > { %854 = vmatmul.msk.bf16.gmra.mxu0 %vm184_vm0, %v599_v63  ;;  %812 = vmatmul.msk.bf16.gmra.mxu1 %vm184_vm0, %v431_v0 }
  0x63   : > { %826 = vmatmul.msk.bf16.gmra.mxu2 %vm184_vm0, %v487_v1  ;;  %841 = vmatmul.msk.bf16.gmra.mxu3 %vm184_vm0, %v544_v2 }
  0x72   : > { %855 = vmatmul.msk.bf16.gmra.mxu0 %vm184_vm0, %v600_v6  ;;  %813 = vmatmul.msk.bf16.gmra.mxu1 %vm184_vm0, %v432_v7 }
  0x73   : > { %827 = vmatmul.msk.bf16.gmra.mxu2 %vm184_vm0, %v488_v8 }
  0x8f   : > { %v203_v9 = vpop.f32.mrf.mxu0  ;;  %v208_v10 = vpop.f32.mrf.mxu1 }
  0x96   : > { %v1016_v11 = vpop.f32.mrf.mxu2  ;;  %v348_v13 = vpop.f32.mrf.mxu3 }
  0x97   : > { %v205_v12 = vpop.f32.mrf.mxu0  ;;  %v1018_v14 = vpop.f32.mrf.mxu1 }
  0x9e   : > { %v215_v15 = vpop.f32.mrf.mxu2  ;;  %v350_v17 = vpop.f32.mrf.mxu3 }
  0x9f   : > { %v404_v16 = vpop.f32.mrf.mxu0  ;;  %v241_v18 = vpop.f32.mrf.mxu1 }
  0xa0   : > { %v242_v39 = vadd.f32 %v241_v18, %v203_v9 }
  0xa6   : > { %v292_v19 = vpop.f32.mrf.mxu2  ;;  %v353_v21 = vpop.f32.mrf.mxu3 }
  0xa7   : > { %v406_v20 = vpop.f32.mrf.mxu0  ;;  %v243_v22 = vpop.f32.mrf.mxu1  ;;  %v306_v40 = vadd.f32 %v292_v19, %v242_v39 }
  0xa8   : > { %v244_v46 = vadd.f32 %v243_v22, %v205_v12 }
  0xa9   : > { %v362_v42 = vadd.f32 %v348_v13, %v306_v40 }
  0xab   : > { %v418_v48 = vadd.f32 %v404_v16, %v362_v42 }
  0xae   : > { %v294_v23 = vpop.f32.mrf.mxu2  ;;  %v355_v25 = vpop.f32.mrf.mxu3 }
  0xaf   : > { %v409_v24 = vpop.f32.mrf.mxu0  ;;  %v246_v26 = vpop.f32.mrf.mxu1  ;;  %v307_v47 = vadd.f32 %v294_v23, %v244_v46 }
  0xb0   : > { %v247_v56 = vadd.f32 %v246_v26, %v208_v10 }
  0xb1   : > { %v363_v51 = vadd.f32 %v350_v17, %v307_v47 }
  0xb3   : > { %v419_v61 = vadd.f32 %v406_v20, %v363_v51 }
  0xb6   : > { %v297_v27 = vpop.f32.mrf.mxu2  ;;  %v1022_v29 = vpop.f32.mrf.mxu3 }
  0xb7   : > { %v1020_v28 = vpop.f32.mrf.mxu0  ;;  %v248_v30 = vpop.f32.mrf.mxu1  ;;  %v308_v59 = vadd.f32 %v297_v27, %v247_v56 }
  0xb8   : > { %v249_v6 = vadd.f32 %v248_v30, %v1018_v14 }
  0xb9   : > { %v364_v1 = vadd.f32 %v353_v21, %v308_v59 }
  0xbb   : > { %v420_v10 = vadd.f32 %v409_v24, %v364_v1 }
  0xbe   : > { %v299_v31 = vpop.f32.mrf.mxu2  ;;  %v360_v33 = vpop.f32.mrf.mxu3 }
  0xbf   : > { %v1024_v32 = vpop.f32.mrf.mxu0  ;;  %v251_v34 = vpop.f32.mrf.mxu1  ;;  %v309_v8 = vadd.f32 %v299_v31, %v249_v6 }
  0xc0   : > { %v252_v21 = vadd.f32 %v251_v34, %v1016_v11 }
  0xc1   : > { %v365_v16 = vadd.f32 %v355_v25, %v309_v8 }
  0xc3   : > { %v421_v26 = vadd.f32 %v1020_v28, %v365_v16 }
  0xc6   : > { %v302_v35 = vpop.f32.mrf.mxu2  ;;  %v572_v37 = vpop.f32.mrf.mxu3 }
  0xc7   : > { %v416_v36 = vpop.f32.mrf.mxu0  ;;  %v253_v38 = vpop.f32.mrf.mxu1  ;;  %v310_v23 = vadd.f32 %v302_v35, %v252_v21 }
  0xc9   : > { %v366_v31 = vadd.f32 %v1022_v29, %v310_v23 }
  0xcb   : > { %v422_v34 = vadd.f32 %v1024_v32, %v366_v31 }
  0xce   : > { %v304_v41 = vpop.f32.mrf.mxu2  ;;  %v574_v44 = vpop.f32.mrf.mxu3 }
  0xcf   : > { %v628_v43 = vpop.f32.mrf.mxu0  ;;  %v460_v45 = vpop.f32.mrf.mxu1 }
  0xd0   : > { %v474_v49 = vadd.f32 %v460_v45, %v418_v48 }
  0xd6   : > { %v516_v50 = vpop.f32.mrf.mxu2  ;;  %v577_v54 = vpop.f32.mrf.mxu3 }
  0xd7   : > { %v530_v52 = vadd.f32 %v516_v50, %v474_v49  ;;  %v630_v53 = vpop.f32.mrf.mxu0  ;;  %v462_v55 = vpop.f32.mrf.mxu1 }
  0xd8   : > { %v475_v63 = vadd.f32 %v462_v55, %v419_v61 }
  0xd9   : > { %v586_v57 = vadd.f32 %v572_v37, %v530_v52 }
  0xdb   : > { %v642_v60 = vadd.f32 %v628_v43, %v586_v57 }
  0xdd   : > { %v651_v62 = vadd.f32 %v877_v58, %v642_v60 }
  0xde   : > { %v518_v0 = vpop.f32.mrf.mxu2  ;;  %v579_v4 = vpop.f32.mrf.mxu3 }
  0xdf   : > { %657 = vst.msk [vmem:[%s1034_s16] sm:$0xff] %vm656_vm1, %v651_v62  ;;  %v531_v2 = vadd.f32 %v518_v0, %v475_v63  ;;  %v633_v3 = vpop.f32.mrf.mxu0  ;;  %v465_v5 = vpop.f32.mrf.mxu1 }
  0xe0   : > { %v476_v13 = vadd.f32 %v465_v5, %v420_v10 }
  0xe1   : > { %v587_v7 = vadd.f32 %v574_v44, %v531_v2 }
  0xe3   : > { %v643_v9 = vadd.f32 %v630_v53, %v587_v7 }
  0xe5   : > { %v652_v12 = vadd.f32 %v877_v58, %v643_v9 }
  0xe6   : > { %v521_v15 = vpop.f32.mrf.mxu2  ;;  %v582_v19 = vpop.f32.mrf.mxu3 }
  0xe7   : > { %658 = vst.msk [vmem:[%s1034_s16 + $0x8] sm:$0xff] %vm656_vm1, %v652_v12  ;;  %v532_v17 = vadd.f32 %v521_v15, %v476_v13  ;;  %v635_v18 = vpop.f32.mrf.mxu0  ;;  %v467_v20 = vpop.f32.mrf.mxu1 }
  0xe8   : > { %v477_v27 = vadd.f32 %v467_v20, %v421_v26 }
  0xe9   : > { %v588_v22 = vadd.f32 %v577_v54, %v532_v17 }
  0xeb   : > { %v644_v14 = vadd.f32 %v633_v3, %v588_v22 }
  0xed   : > { %v653_v24 = vadd.f32 %v877_v58, %v644_v14 }
  0xee   : > { %v523_v30 = vpop.f32.mrf.mxu2  ;;  %v584_v36 = vpop.f32.mrf.mxu3 }
  0xef   : > { %659 = vst.msk [vmem:[%s1034_s16 + $0x10] sm:$0xff] %vm656_vm1, %v653_v24  ;;  %v533_v25 = vadd.f32 %v523_v30, %v477_v27  ;;  %v638_v33 = vpop.f32.mrf.mxu0  ;;  %v470_v37 = vpop.f32.mrf.mxu1 }
  0xf0   : > { %v478_v39 = vadd.f32 %v470_v37, %v422_v34 }
  0xf1   : > { %v589_v38 = vadd.f32 %v579_v4, %v533_v25 }
  0xf3   : > { %v645_v11 = vadd.f32 %v635_v18, %v589_v38 }
  0xf5   : > { %v654_v35 = vadd.f32 %v877_v58, %v645_v11 }
  0xf6   : > { %v526_v28 = vpop.f32.mrf.mxu2 }
  0xf7   : > { %660 = vst.msk [vmem:[%s1034_s16 + $0x18] sm:$0xff] %vm656_vm1, %v654_v35  ;;  %v534_v40 = vadd.f32 %v526_v28, %v478_v39  ;;  %v640_v41 = vpop.f32.mrf.mxu0  ;;  %v472_v42 = vpop.f32.mrf.mxu1 }
  0xf9   : > { %v590_v29 = vadd.f32 %v582_v19, %v534_v40 }
  0xfb   : > { %v646_v43 = vadd.f32 %v638_v33, %v590_v29 }
  0xfd   : > { %v655_v44 = vadd.f32 %v877_v58, %v646_v43 }
  0xfe   : > { %v528_v45 = vpop.f32.mrf.mxu2 }
  0xff   : > { %661 = vst.msk [vmem:[%s1034_s16 + $0x20] sm:$0xff] %vm656_vm1, %v655_v44 }
 0x100 PF: > { %s13_s12 = sadd.s32 1, %s884_s12  }
 0x101   : > { %p10_p4 = scmp.ge.s32.totalorder %s13_s12, 4  }
 0x103   :  { %12 = sbr.rel (!%p10_p4) target bundleno = 1 (0x1), region = 76 }

// kernel: forward.23
= control target key start
LH: loop header
LB: loop body
LE: loop exit
PB: predicated region body
PF: predicated region fallthrough
CT: control target
= control target key end

     0   :  { %s2193_s0 = inlined_call_operand.<no memory space> [shape: f32[1,1], index: 0, kind: input, shape index: {}]   ;;  %s2194_s1 = inlined_call_operand.vmem [shape: f32[32,16], index: 1, kind: input, shape index: {}]   ;;  %s2195_s2 = inlined_call_operand.vmem [shape: f32[1,16], index: 2, kind: input, shape index: {}]   ;;  %s2196_s3 = inlined_call_operand.vmem [shape: f32[3,16], index: 3, kind: input, shape index: {}]   ;;  %s2197_s4 = inlined_call_operand.vmem [shape: f32[27,16], index: 4, kind: input, shape index: {}]   ;;  %s2198_s5 = inlined_call_operand.vmem [shape: f32[3,16], index: 5, kind: input, shape index: {}]   ;;  %s2199_s6 = inlined_call_operand.vmem [shape: f32[12,16], index: 6, kind: input, shape index: {}]   ;;  %s2200_s7 = inlined_call_operand.vmem [shape: f32[1,16], index: 7, kind: input, shape index: {}]   ;;  %s2201_s8 = inlined_call_operand.vmem [shape: f32[12,16], index: 8, kind: input, shape index: {}]   ;;  %s2202_s9 = inlined_call_operand.hbm [shape: f32[32,16], index: 9, kind: output, shape index: {0}]   ;;  %s2203_s10 = inlined_call_operand.vmem [shape: f32[32,16], index: 10, kind: output, shape index: {1}]   ;;  %s2204_s11 = inlined_call_operand.hbm [shape: f32[32,16], index: 11, kind: output, shape index: {2}]  }
   0x1   :  { %2206 = sst [smem:[#allocation9_spill]] %s2194_s1 }
   0x2   :  { %2207 = sst [smem:[#allocation10_spill]] %s2195_s2 }
   0x3   :  { %2208 = sst [smem:[#allocation11_spill]] %s2196_s3 }
   0x4   :  { %17 = sst [smem:[#allocation2]] %s2193_s0 }
   0x5   :  { %18 = vsyncpa [#allocation4], 0 }
   0x6   :  { %20 = vsyncpa [#allocation4 + $0x1], 0 }
   0x7   :  { %21 = vsyncpa [#allocation6], 0 }
   0x8   :  { %23 = vsyncpa [#allocation6 + $0x1], 0  ;;  %s1584_s19 = smov 0   ;;  %s1586_s20 = smov 0  }
   0x9   :  { %s1588_s21 = smov 0   ;;  %s1590_s22 = smov 0  }
   0xa LB: > { %s1605_s0 = sadd.s32 4294967295, %s1516_s22   ;;  %s1201_s23 = sadd.s32 4294967294, %s1516_s22   ;;  %s1516_s22 = sphi %s1590_s22, %s2222_s22   ;;  %s1512_s21 = sphi %s1588_s21, %s2221_s21   ;;  %s1508_s20 = sphi %s1586_s20, %s2220_s20   ;;  %s1504_s19 = sphi %s1584_s19, %s2219_s19  }
   0xb   : > { %s1609_s24 = sadd.s32 1, %s1516_s22   ;;  %s230_s25 = sadd.s32 1, %s1512_s21 }
   0xc   : > { %s227_s26 = ssub.s32 %s1516_s22, %s1609_s24  ;;  %p240_p0 = scmp.ne.s32.totalorder %s1512_s21, %s1508_s20 }
   0xd   : > { %p228_p1 = scmp.eq.s32.totalorder %s227_s26, 0  ;;  %p241_p2 = scmp.eq.s32.totalorder %s1605_s0, 1 }
   0xe   : > { %p246_p3 = scmp.ne.s32.totalorder %s1508_s20, %s1504_s19  ;;  %p247_p4 = scmp.eq.s32.totalorder %s1201_s23, 1 }
   0xf   : > { %s1620_s27 = scalar_select %p228_p1, %s1512_s21, %s230_s25  }
  0x10   : > { %p1622_p5 = por %p241_p2, %p240_p0  ;;  %p1626_p6 = por %p247_p4, %p246_p3 }
  0x11   : > { %p1204_p7 = scmp.ge.s32.totalorder %s1516_s22, 1  ;;  %p350_p8 = scmp.lt.s32.totalorder %s1516_s22, 3 }
  0x13   : > { %p351_p9 = pnand %p1204_p7, %p350_p8 }
  0x14   : > { %s1207_s30 = sshll.u32 (!%p351_p9), %s1605_s0, 1  ;;  %s414_s12 = sld [smem:[#allocation2]] (!%p351_p9) }
  0x15   : > { %354 = sbr.rel (%p351_p9) target bundleno = 229 (0xe5), region = 56  ;;  %p401_p10 = scmp.lt.s32.totalorder (!%p351_p9), %s1207_s30, 3 }
  0x16   : > { %s2211_s1 = sld [smem:[#allocation9_spill]] (!%p351_p9)  ;;  %s2080_s14 = sand.u32 (!%p351_p9), 1, %s1508_s20  }
  0x17   : > { %s2212_s2 = sld [smem:[#allocation10_spill]] (!%p351_p9)  ;;  %s2205_s15 = sshll.u32 (!%p351_p9), %s2080_s14, 4 }
  0x18   : > { %s2213_s3 = sld [smem:[#allocation11_spill]] (!%p351_p9)  ;;  %s385_s25 = scalar_lea.vmem (!%p351_p9), [#allocation3], %s2205_s15 }
  0x19   : > { %s1057_s26 = sshll.u32 (!%p351_p9), %s385_s25, 4  ;;  %s1442_s18 = scalar_lea.hbm (!%p351_p9), %s2202_s9, 32  ;;  %s2098_s26 = int_to_ptr.vmem [resolvable:$true] %s1057_s26 }
  0x1a   : > { %s2224_s30 = smov (!%p401_p10, %s1207_s30), 3  ;;  %v417_v2 = vstv %s414_s12  ;;  %v1656_v48 = vld [vmem:[%s2199_s6] sm:$0xff]  ;;  %vm1027_vm12 = vcmask 130048  }
  0x1b   : > { %s1208_s13 = sshll.u32 %s2224_s30, 3  ;;  %1308 = vrcp.f32 %v417_v2  ;;  %v433_v17 = vand.u32 2147483648, %v417_v2  ;;  %vm427_vm0 = vweird.f32 %v417_v2  ;;  %v431_v19 = vand.u32 2147483647, %v417_v2  ;;  %v1663_v51 = vld [vmem:[%s2201_s8] sm:$0xff] }
  0x1c   : > { %s404_s16 = scalar_lea.vmem %s2211_s1, %s1208_s13  ;;  %v468_v57 = vperm.slane %v1656_v48, 0  ;;  %v1673_v60 = vperm.slane %v1663_v51, 0  ;;  %v491_v61 = vperm.slane %v1656_v48, 1  ;;  %s1035_s1 = scalar_lea.sflag [#allocation4], %s2080_s14 }
  0x1d   : > { %v415_v0 = vld [vmem:[%s404_s16] sm:$0xff]  ;;  %v416_v1 = vld [vmem:[%s404_s16 + $0x8] sm:$0xff]  ;;  %v434_v23 = vor.u32 1.1754944e-38, %v433_v17  ;;  %vm432_vm5 = vcmp.eq.f32.partialorder %v431_v19, 8.507059e+37  ;;  %s1225_s16 = sshll.u32 %s1605_s0, 4 }
  0x1e   : > { %v418_v3 = vmul.f32 %v417_v2, %v415_v0  ;;  %v419_v4 = vmul.f32 %v417_v2, %v416_v1  ;;  %v1306_v28 = vld [vmem:[%s2212_s2] ss:$0 sm:$0xff]  ;;  %s1056_s23 = scalar_lea.hbm %s2202_s9, %s1225_s16 }
  0x1f   : > { %v452_v45 = vld [vmem:[%s2213_s3] sm:$0x7]  ;;  %s1059_s12 = sshll.u32 %s1056_s23, 4  ;;  %s411_s3 = scalar_lea.vmem %s2203_s10, %s1208_s13  ;;  %s1060_s12 = int_to_ptr.hbm [resolvable:$true] %s1059_s12 }
  0x20   : > { %v1229_v5 = vcvt.f32.s32 %v418_v3  ;;  %v1237_v6 = vcvt.f32.s32 %v419_v4  ;;  %v1232_v11 = vand.u32 2147483648, %v418_v3  ;;  %v1240_v12 = vand.u32 2147483648, %v419_v4  ;;  %s1436_s2 = sshra.s32 %s1060_s12, 4  ;;  %s1437_s2 = int_to_ptr.hbm [resolvable:$true] %s1436_s2 }
  0x21   : > { %v1309_v9 = vpop.eup %1308  ;;  %v1227_v13 = vand.u32 2147483647, %v418_v3  ;;  %v1235_v14 = vand.u32 2147483647, %v419_v4  ;;  %v463_v52 = vperm.slane %v452_v45, 0  ;;  %v486_v53 = vperm.slane %v452_v45, 1  ;;  %p1443_p0 = scmp.lt.s32.totalorder %s1437_s2, %s2202_s9 }
  0x22   : > { %v1230_v7 = vcvt.s32.f32 %v1229_v5  ;;  %v1238_v8 = vcvt.s32.f32 %v1237_v6  ;;  %v423_v16 = vmul.f32 %v1309_v9, %v417_v2  ;;  %vm428_vm1 = vweird.f32 %v1309_v9  ;;  %v453_v2 = vld [vmem:[%s2197_s4] sm:$0xff]  ;;  %s1438_s30 = scalar_lea.hbm %s1437_s2, 16 }
  0x23   : > { %vm1228_vm2 = vcmp.lt.f32.partialorder %v1227_v13, 8388608.0  ;;  %vm1236_vm3 = vcmp.lt.f32.partialorder %v1235_v14, 8388608.0  ;;  %vm429_vm4 = vmor %vm427_vm0, %vm428_vm1  ;;  %v509_v1 = vperm.slane %v452_v45, 2  ;;  %v514_v6 = vperm.slane %v1656_v48, 2  ;;  %p1439_p11 = scmp.ne.s32.totalorder %s1437_s2, %s1438_s30  ;;  %p1444_p1 = scmp.lt.s32.totalorder %s1442_s18, %s1438_s30 }
  0x24   : > { %v1231_v10 = vand.u32 2147483647, %v1230_v7  ;;  %v1239_v15 = vand.u32 2147483647, %v1238_v8  ;;  %v424_v18 = vsub.f32 1.0, %v423_v16  ;;  %v1684_v14 = vperm.slane %v1663_v51, 2 }
  0x25   : > { %v1686_v17 = vperm.slane %v453_v2, 0  ;;  %p1440_p12 = pnand %p1439_p11, %p1622_p5  ;;  %p1445_p2 = por %p1444_p1, %p1443_p0 }
  0x26   : > { %v1233_v20 = vor.u32 %v1232_v11, %v1231_v10  ;;  %v1241_v21 = vor.u32 %v1240_v12, %v1239_v15  ;;  %v425_v22 = vmul.f32 %v1309_v9, %v424_v18  ;;  %v1681_v10 = vperm.slane %v1663_v51, 1 }
  0x27   : > { %p1441_p13 = pneg %p1440_p12 }
  0x28   : > { %v426_v24 = vadd.f32 %v1309_v9, %v425_v22  ;;  %v1234_v25 = vsel %vm1228_vm2, %v1233_v20, %v418_v3  ;;  %v1242_v26 = vsel %vm1236_vm3, %v1241_v21, %v419_v4  ;;  %v1689_v20 = vperm.slane %v1656_v48, 3 }
  0x29   : > { %p1446_p3 = pnand %p1445_p2, %p1441_p13 }
  0x2a   : > { %v430_v27 = vsel %vm429_vm4, %v1309_v9, %v426_v24 }
  0x2b   : > { %v435_v29 = vsel %vm432_vm5, %v434_v23, %v430_v27  ;;  %v1691_v23 = vperm.slane %v453_v2, 1 }
  0x2c   : > { %v1644_v30 = vmul.f32 %v1234_v25, %v435_v29  ;;  %v1646_v31 = vmul.f32 %v1242_v26, %v435_v29  ;;  %v1695_v26 = vperm.slane %v453_v2, 3  ;;  %v1702_v29 = vperm.slane %v1656_v48, 4 }
  0x2e   : > { %v442_v32 = vsub.f32 %v1644_v30, %v1306_v28  ;;  %v443_v33 = vsub.f32 %v1646_v31, %v1306_v28  ;;  %1028 = vst.msk [vmem:[%s385_s25] sm:$0xff] %vm1027_vm12, %v1644_v30 }
  0x2f   : > { %1029 = vst.msk [vmem:[%s385_s25 + $0x8] sm:$0xff] %vm1027_vm12, %v1646_v31 }
  0x30   : > { %v1245_v34 = vcvt.f32.s32 %v442_v32  ;;  %v1243_v35 = vand.u32 2147483647, %v442_v32  ;;  %v1253_v36 = vcvt.f32.s32 %v443_v33  ;;  %v1248_v38 = vand.u32 2147483648, %v442_v32 }
  0x31   : > { %v1251_v39 = vand.u32 2147483647, %v443_v33  ;;  %v1256_v41 = vand.u32 2147483648, %v443_v33 }
  0x32   : > { %v1246_v37 = vcvt.s32.f32 %v1245_v34  ;;  %v1254_v40 = vcvt.s32.f32 %v1253_v36  ;;  %vm1244_vm6 = vcmp.lt.f32.partialorder %v1243_v35, 8388608.0  ;;  %v1708_v34 = vperm.slane %v453_v2, 6  ;;  %v1713_v36 = vld [vmem:[%s2197_s4 + $0x8] sm:$0xff] }
  0x33   : > { %vm1252_vm7 = vcmp.lt.f32.partialorder %v1251_v39, 8388608.0  ;;  %v1718_v39 = vperm.slane %v453_v2, 5 }
  0x34   : > { %v1247_v42 = vand.u32 2147483647, %v1246_v37  ;;  %v1255_v43 = vand.u32 2147483647, %v1254_v40 }
  0x36   : > { %v1249_v44 = vor.u32 %v1248_v38, %v1247_v42  ;;  %v1257_v46 = vor.u32 %v1256_v41, %v1255_v43  ;;  %v1716_v38 = vperm.slane %v1663_v51, 3  ;;  %v1723_v43 = vperm.slane %v1656_v48, 5 }
  0x38   : > { %v1250_v47 = vsel %vm1244_vm6, %v1249_v44, %v442_v32  ;;  %v1258_v49 = vsel %vm1252_vm7, %v1257_v46, %v443_v33  ;;  %v1706_v33 = vperm.slane %v453_v2, 4  ;;  %v1728_v46 = vperm.slane %v1663_v51, 4 }
  0x39   : > { %v1658_v50 = vadd.f32 %v1306_v28, %v1250_v47  ;;  %v1665_v54 = vadd.f32 %v1306_v28, %v1258_v49  ;;  %v1699_v28 = vperm.slane %v453_v2, 2  ;;  %v1730_v47 = vperm.slane %v453_v2, 7 }
  0x3b   : > { %v1211_v55 = vadd.f32 -0.5, %v1658_v50  ;;  %v450_v56 = vadd.f32 0.5, %v1658_v50  ;;  %v1212_v58 = vadd.f32 -0.5, %v1665_v54  ;;  %v451_v59 = vadd.f32 0.5, %v1665_v54  ;;  %1030 = vst.msk [vmem:[%s411_s3] sm:$0xff] %vm1027_vm12, %v1658_v50 }
  0x3c   : > { %1031 = vst.msk [vmem:[%s411_s3 + $0x8] sm:$0xff] %vm1027_vm12, %v1665_v54 }
  0x3d   : > { %v464_v62 = vmul.f32 %v1211_v55, %v463_v52  ;;  %v466_v63 = vmul.f32 %v463_v52, %v450_v56  ;;  %v487_v0 = vmul.f32 %v1211_v55, %v486_v53  ;;  %v465_v3 = vmul.f32 %v1212_v58, %v463_v52 }
  0x3e   : > { %v467_v4 = vmul.f32 %v463_v52, %v451_v59  ;;  %v488_v5 = vmul.f32 %v1212_v58, %v486_v53  ;;  %v489_v9 = vmul.f32 %v486_v53, %v450_v56  ;;  %v490_v13 = vmul.f32 %v486_v53, %v451_v59 }
  0x3f   : > { %v469_v7 = vadd.f32 %v468_v57, %v464_v62  ;;  %v471_v8 = vadd.f32 %v468_v57, %v466_v63  ;;  %v470_v11 = vadd.f32 %v468_v57, %v465_v3  ;;  %v492_v15 = vadd.f32 %v491_v61, %v487_v0 }
  0x40   : > { %v472_v12 = vadd.f32 %v468_v57, %v467_v4  ;;  %v510_v16 = vmul.f32 %v1211_v55, %v509_v1  ;;  %v493_v18 = vadd.f32 %v491_v61, %v488_v5  ;;  %v511_v19 = vmul.f32 %v1212_v58, %v509_v1 }
  0x41   : > { %1310 = vtanh.f32 %v469_v7  ;;  %v494_v21 = vadd.f32 %v491_v61, %v489_v9  ;;  %v512_v22 = vmul.f32 %v509_v1, %v450_v56  ;;  %v1693_v24 = vadd.f32 %v491_v61, %v490_v13 }
  0x42   : > { %1312 = vtanh.f32 %v470_v11  ;;  %v513_v25 = vmul.f32 %v509_v1, %v451_v59  ;;  %v1697_v27 = vadd.f32 %v514_v6, %v510_v16  ;;  %v1704_v32 = vadd.f32 %v514_v6, %v511_v19 }
  0x43   : > { %1314 = vtanh.f32 %v471_v8  ;;  %v517_v37 = vadd.f32 %v514_v6, %v512_v22  ;;  %v1737_v55 = vperm.slane %v1713_v36, 0  ;;  %v1743_v59 = vperm.slane %v1663_v51, 5 }
  0x44   : > { %1316 = vtanh.f32 %v472_v12  ;;  %v518_v42 = vadd.f32 %v514_v6, %v513_v25 }
  0x45   : > { %1318 = vtanh.f32 %v492_v15 }
  0x46   : > { %1320 = vtanh.f32 %v493_v18 }
  0x47   : > { %v1311_v35 = vpop.eup %1310  ;;  %1322 = vtanh.f32 %v494_v21 }
  0x48   : > { %v1313_v40 = vpop.eup %1312  ;;  %v478_v41 = vmul.f32 %v1311_v35, %v1673_v60  ;;  %1324 = vtanh.f32 %v1693_v24 }
  0x49   : > { %v1315_v44 = vpop.eup %1314  ;;  %v479_v45 = vmul.f32 %v1313_v40, %v1673_v60  ;;  %1326 = vtanh.f32 %v1697_v27 }
  0x4a   : > { %v1317_v49 = vpop.eup %1316  ;;  %v480_v52 = vmul.f32 %v1315_v44, %v1673_v60  ;;  %v1733_v53 = vadd.f32 %v478_v41, %v469_v7  ;;  %1328 = vtanh.f32 %v1704_v32 }
  0x4b   : > { %v1319_v56 = vpop.eup %1318  ;;  %v481_v57 = vmul.f32 %v1317_v49, %v1673_v60  ;;  %v1740_v58 = vadd.f32 %v479_v45, %v470_v11  ;;  %1330 = vtanh.f32 %v517_v37 }
  0x4c   : > { %v1321_v61 = vpop.eup %1320  ;;  %v1745_v62 = vadd.f32 %v480_v52, %v471_v8  ;;  %v501_v63 = vmul.f32 %v1319_v56, %v1681_v10  ;;  %1332 = vtanh.f32 %v518_v42  ;;  %v533_v0 = vmul.f32 %v1686_v17, %v1733_v53 }
  0x4d   : > { %v1323_v1 = vpop.eup %1322  ;;  %v1750_v2 = vadd.f32 %v481_v57, %v472_v12  ;;  %v502_v60 = vmul.f32 %v1321_v61, %v1681_v10  ;;  %v534_v3 = vmul.f32 %v1686_v17, %v1740_v58  ;;  %v574_v4 = vmul.f32 %v1695_v26, %v1733_v53 }
  0x4e   : > { %v1325_v5 = vpop.eup %1324  ;;  %v503_v6 = vmul.f32 %v1323_v1, %v1681_v10  ;;  %v1758_v7 = vadd.f32 %v501_v63, %v492_v15  ;;  %v535_v8 = vmul.f32 %v1686_v17, %v1745_v62  ;;  %v538_v9 = vadd.f32 %v1689_v20, %v533_v0 }
  0x4f   : > { %v1327_v11 = vpop.eup %1326  ;;  %v504_v12 = vmul.f32 %v1325_v5, %v1681_v10  ;;  %v1764_v13 = vadd.f32 %v502_v60, %v493_v18  ;;  %v536_v16 = vmul.f32 %v1686_v17, %v1750_v2  ;;  %v539_v19 = vadd.f32 %v1689_v20, %v534_v3 }
  0x50   : > { %v1329_v22 = vpop.eup %1328  ;;  %v1769_v25 = vadd.f32 %v503_v6, %v494_v21  ;;  %v524_v15 = vmul.f32 %v1327_v11, %v1684_v14  ;;  %v540_v35 = vadd.f32 %v1689_v20, %v535_v8  ;;  %v543_v40 = vmul.f32 %v1691_v23, %v1758_v7 }
  0x51   : > { %v1331_v41 = vpop.eup %1330  ;;  %v1776_v10 = vadd.f32 %v504_v12, %v1693_v24  ;;  %v525_v18 = vmul.f32 %v1329_v22, %v1684_v14  ;;  %v541_v17 = vadd.f32 %v1689_v20, %v536_v16  ;;  %v544_v44 = vmul.f32 %v1691_v23, %v1764_v13 }
  0x52   : > { %v1333_v21 = vpop.eup %1332  ;;  %v526_v45 = vmul.f32 %v1331_v41, %v1684_v14  ;;  %v1784_v49 = vadd.f32 %v524_v15, %v1697_v27  ;;  %v545_v52 = vmul.f32 %v1691_v23, %v1769_v25  ;;  %v547_v56 = vadd.f32 %v543_v40, %v538_v9 }
  0x53   : > { %v527_v24 = vmul.f32 %v1333_v21, %v1684_v14  ;;  %v1790_v57 = vadd.f32 %v525_v18, %v1704_v32  ;;  %v546_v20 = vmul.f32 %v1691_v23, %v1776_v10  ;;  %v548_v61 = vadd.f32 %v544_v44, %v539_v19 }
  0x54   : > { %v1794_v63 = vadd.f32 %v526_v45, %v517_v37  ;;  %v549_v0 = vadd.f32 %v545_v52, %v540_v35  ;;  %v552_v27 = vmul.f32 %v1699_v28, %v1784_v49  ;;  %v575_v1 = vmul.f32 %v1695_v26, %v1740_v58 }
  0x55   : > { %v1800_v60 = vadd.f32 %v527_v24, %v518_v42  ;;  %v550_v3 = vadd.f32 %v546_v20, %v541_v17  ;;  %v553_v14 = vmul.f32 %v1699_v28, %v1790_v57  ;;  %v576_v32 = vmul.f32 %v1695_v26, %v1745_v62 }
  0x56   : > { %v554_v23 = vmul.f32 %v1699_v28, %v1794_v63  ;;  %v556_v37 = vadd.f32 %v552_v27, %v547_v56  ;;  %v577_v5 = vmul.f32 %v1695_v26, %v1750_v2  ;;  %v579_v6 = vadd.f32 %v1702_v29, %v574_v4 }
  0x57   : > { %v555_v42 = vmul.f32 %v1699_v28, %v1800_v60  ;;  %v557_v8 = vadd.f32 %v553_v14, %v548_v61  ;;  %v580_v9 = vadd.f32 %v1702_v29, %v575_v1  ;;  %v581_v11 = vadd.f32 %v1702_v29, %v576_v32 }
  0x58   : > { %v558_v12 = vadd.f32 %v554_v23, %v549_v0  ;;  %1334 = vtanh.f32 %v556_v37  ;;  %v582_v16 = vadd.f32 %v1702_v29, %v577_v5  ;;  %v584_v19 = vmul.f32 %v1706_v33, %v1758_v7 }
  0x59   : > { %v559_v22 = vadd.f32 %v555_v42, %v550_v3  ;;  %1336 = vtanh.f32 %v557_v8  ;;  %v585_v26 = vmul.f32 %v1706_v33, %v1764_v13  ;;  %v586_v28 = vmul.f32 %v1706_v33, %v1769_v25 }
  0x5a   : > { %1338 = vtanh.f32 %v558_v12  ;;  %v587_v4 = vmul.f32 %v1706_v33, %v1776_v10  ;;  %v588_v15 = vadd.f32 %v584_v19, %v579_v6  ;;  %v593_v35 = vmul.f32 %v1718_v39, %v1784_v49 }
  0x5b   : > { %1340 = vtanh.f32 %v559_v22  ;;  %v589_v29 = vadd.f32 %v585_v26, %v580_v9  ;;  %v590_v40 = vadd.f32 %v586_v28, %v581_v11  ;;  %v594_v41 = vmul.f32 %v1718_v39, %v1790_v57 }
  0x5c   : > { %v591_v18 = vadd.f32 %v587_v4, %v582_v16  ;;  %v595_v17 = vmul.f32 %v1718_v39, %v1794_v63  ;;  %v596_v44 = vmul.f32 %v1718_v39, %v1800_v60  ;;  %v597_v21 = vadd.f32 %v593_v35, %v588_v15 }
  0x5d   : > { %v598_v45 = vadd.f32 %v594_v41, %v589_v29  ;;  %v615_v33 = vmul.f32 %v1708_v34, %v1733_v53  ;;  %v616_v52 = vmul.f32 %v1708_v34, %v1740_v58  ;;  %v617_v56 = vmul.f32 %v1708_v34, %v1745_v62 }
  0x5e   : > { %v1335_v24 = vpop.eup %1334  ;;  %v599_v20 = vadd.f32 %v595_v17, %v590_v40  ;;  %v600_v61 = vadd.f32 %v596_v44, %v591_v18  ;;  %1342 = vtanh.f32 %v597_v21  ;;  %v618_v0 = vmul.f32 %v1708_v34, %v1750_v2 }
  0x5f   : > { %v1337_v27 = vpop.eup %1336  ;;  %v565_v39 = vmul.f32 %v1335_v24, %v1716_v38  ;;  %1344 = vtanh.f32 %v598_v45  ;;  %v620_v1 = vadd.f32 %v1723_v43, %v615_v33  ;;  %v621_v53 = vadd.f32 %v1723_v43, %v616_v52 }
  0x60   : > { %v1339_v3 = vpop.eup %1338  ;;  %v566_v58 = vmul.f32 %v1337_v27, %v1716_v38  ;;  %1346 = vtanh.f32 %v599_v20  ;;  %v622_v62 = vadd.f32 %v1723_v43, %v617_v56  ;;  %v623_v14 = vadd.f32 %v1723_v43, %v618_v0 }
  0x61   : > { %v1341_v32 = vpop.eup %1340  ;;  %v567_v23 = vmul.f32 %v1339_v3, %v1716_v38  ;;  %v1847_v34 = vadd.f32 %v565_v39, %v556_v37  ;;  %1348 = vtanh.f32 %v600_v61  ;;  %v625_v2 = vmul.f32 %v1730_v47, %v1758_v7 }
  0x62   : > { %v568_v5 = vmul.f32 %v1341_v32, %v1716_v38  ;;  %v1852_v6 = vadd.f32 %v566_v58, %v557_v8  ;;  %v626_v42 = vmul.f32 %v1730_v47, %v1764_v13  ;;  %v627_v9 = vmul.f32 %v1730_v47, %v1769_v25 }
  0x63   : > { %v1858_v43 = vadd.f32 %v567_v23, %v558_v12  ;;  %v628_v37 = vmul.f32 %v1730_v47, %v1776_v10  ;;  %v629_v11 = vadd.f32 %v625_v2, %v620_v1  ;;  %v634_v16 = vmul.f32 %v1737_v55, %v1784_v49 }
  0x64   : > { %v1343_v7 = vpop.eup %1342  ;;  %v1864_v19 = vadd.f32 %v568_v5, %v559_v22  ;;  %v630_v38 = vadd.f32 %v626_v42, %v621_v53  ;;  %v631_v8 = vadd.f32 %v627_v9, %v622_v62  ;;  %v635_v13 = vmul.f32 %v1737_v55, %v1790_v57 }
  0x65   : > { %v1345_v26 = vpop.eup %1344  ;;  %v606_v25 = vmul.f32 %v1343_v7, %v1728_v46  ;;  %v632_v12 = vadd.f32 %v628_v37, %v623_v14  ;;  %v636_v28 = vmul.f32 %v1737_v55, %v1794_v63  ;;  %v637_v47 = vmul.f32 %v1737_v55, %v1800_v60 }
  0x66   : > { %v1347_v10 = vpop.eup %1346  ;;  %v607_v49 = vmul.f32 %v1345_v26, %v1728_v46  ;;  %v638_v22 = vadd.f32 %v634_v16, %v629_v11  ;;  %v639_v4 = vadd.f32 %v635_v13, %v630_v38  ;;  %v655_v15 = vperm.slane %v1713_v36, 1 }
  0x67   : > { %v1349_v35 = vpop.eup %1348  ;;  %v608_v57 = vmul.f32 %v1347_v10, %v1728_v46  ;;  %v1876_v29 = vadd.f32 %v606_v25, %v597_v21  ;;  %v640_v40 = vadd.f32 %v636_v28, %v631_v8  ;;  %v641_v41 = vadd.f32 %v637_v47, %v632_v12 }
  0x68   : > { %v609_v18 = vmul.f32 %v1349_v35, %v1728_v46  ;;  %v1879_v63 = vadd.f32 %v607_v49, %v598_v45  ;;  %1350 = vtanh.f32 %v638_v22  ;;  %v656_v55 = vmul.f32 %v655_v15, %v1847_v34 }
  0x69   : > { %v1882_v60 = vadd.f32 %v608_v57, %v599_v20  ;;  %1352 = vtanh.f32 %v639_v4  ;;  %v657_v17 = vmul.f32 %v655_v15, %v1852_v6  ;;  %v658_v44 = vmul.f32 %v655_v15, %v1858_v43 }
  0x6a   : > { %v1886_v33 = vadd.f32 %v609_v18, %v600_v61  ;;  %1354 = vtanh.f32 %v640_v40  ;;  %v659_v21 = vmul.f32 %v655_v15, %v1864_v19  ;;  %v660_v52 = vperm.slane %v1656_v48, 6 }
  0x6b   : > { %1356 = vtanh.f32 %v641_v41  ;;  %v665_v46 = vperm.slane %v1713_v36, 2  ;;  %v674_v45 = vperm.slane %v1713_v36, 3  ;;  %v1893_v56 = vperm.slane %v1663_v51, 6 }
  0x6c   : > { %v661_v24 = vadd.f32 %v660_v52, %v656_v55  ;;  %v662_v20 = vadd.f32 %v660_v52, %v657_v17  ;;  %v663_v0 = vadd.f32 %v660_v52, %v658_v44  ;;  %v664_v27 = vadd.f32 %v660_v52, %v659_v21 }
  0x6d   : > { %v666_v61 = vmul.f32 %v665_v46, %v1876_v29  ;;  %v667_v39 = vmul.f32 %v665_v46, %v1879_v63  ;;  %v668_v1 = vmul.f32 %v665_v46, %v1882_v60  ;;  %v669_v53 = vmul.f32 %v665_v46, %v1886_v33 }
  0x6e   : > { %v1351_v3 = vpop.eup %1350  ;;  %v696_v58 = vperm.slane %v1713_v36, 4  ;;  %v701_v62 = vperm.slane %v1656_v48, 7  ;;  %v706_v14 = vperm.slane %v1713_v36, 5  ;;  %v715_v32 = vperm.slane %v1713_v36, 6 }
  0x6f   : > { %v1353_v23 = vpop.eup %1352  ;;  %v647_v2 = vmul.f32 %v1351_v3, %v1743_v59  ;;  %v670_v5 = vadd.f32 %v666_v61, %v661_v24  ;;  %v671_v42 = vadd.f32 %v667_v39, %v662_v20  ;;  %v672_v9 = vadd.f32 %v668_v1, %v663_v0  ;;  %v1935_v61 = vld [vmem:[%s2199_s6 + $0x8] sm:$0xf] }
  0x70   : > { %v1355_v37 = vpop.eup %1354  ;;  %v648_v11 = vmul.f32 %v1353_v23, %v1743_v59  ;;  %v673_v16 = vadd.f32 %v669_v53, %v664_v27  ;;  %v697_v7 = vmul.f32 %v696_v58, %v1847_v34  ;;  %v698_v38 = vmul.f32 %v696_v58, %v1852_v6  ;;  %v1930_v27 = vld [vmem:[%s2197_s4 + $0x10] sm:$0xff] }
  0x71   : > { %v1357_v8 = vpop.eup %1356  ;;  %v649_v48 = vmul.f32 %v1355_v37, %v1743_v59  ;;  %v1908_v13 = vadd.f32 %v647_v2, %v638_v22  ;;  %v699_v26 = vmul.f32 %v696_v58, %v1858_v43  ;;  %v700_v25 = vmul.f32 %v696_v58, %v1864_v19 }
  0x72   : > { %v650_v12 = vmul.f32 %v1357_v8, %v1743_v59  ;;  %v1913_v28 = vadd.f32 %v648_v11, %v639_v4  ;;  %v702_v47 = vadd.f32 %v701_v62, %v697_v7  ;;  %v703_v10 = vadd.f32 %v701_v62, %v698_v38 }
  0x73   : > { %v1915_v49 = vadd.f32 %v649_v48, %v640_v40  ;;  %v675_v15 = vmul.f32 %v674_v45, %v1908_v13  ;;  %v704_v35 = vadd.f32 %v701_v62, %v699_v26  ;;  %v705_v57 = vadd.f32 %v701_v62, %v700_v25 }
  0x74   : > { %v1918_v18 = vadd.f32 %v650_v12, %v641_v41  ;;  %v676_v22 = vmul.f32 %v674_v45, %v1913_v28  ;;  %v707_v55 = vmul.f32 %v706_v14, %v1876_v29  ;;  %v708_v17 = vmul.f32 %v706_v14, %v1879_v63 }
  0x75   : > { %v677_v59 = vmul.f32 %v674_v45, %v1915_v49  ;;  %v679_v4 = vadd.f32 %v675_v15, %v670_v5  ;;  %v709_v44 = vmul.f32 %v706_v14, %v1882_v60  ;;  %v710_v40 = vmul.f32 %v706_v14, %v1886_v33 }
  0x76   : > { %v678_v21 = vmul.f32 %v674_v45, %v1918_v18  ;;  %v680_v52 = vadd.f32 %v676_v22, %v671_v42  ;;  %v711_v46 = vadd.f32 %v707_v55, %v702_v47  ;;  %v712_v24 = vadd.f32 %v708_v17, %v703_v10 }
  0x77   : > { %v681_v41 = vadd.f32 %v677_v59, %v672_v9  ;;  %1358 = vtanh.f32 %v679_v4  ;;  %v713_v20 = vadd.f32 %v709_v44, %v704_v35  ;;  %v714_v0 = vadd.f32 %v710_v40, %v705_v57 }
  0x78   : > { %v682_v39 = vadd.f32 %v678_v21, %v673_v16  ;;  %1360 = vtanh.f32 %v680_v52  ;;  %v716_v45 = vmul.f32 %v715_v32, %v1908_v13  ;;  %v717_v1 = vmul.f32 %v715_v32, %v1913_v28 }
  0x79   : > { %1362 = vtanh.f32 %v681_v41  ;;  %v718_v53 = vmul.f32 %v715_v32, %v1915_v49  ;;  %v719_v3 = vmul.f32 %v715_v32, %v1918_v18  ;;  %v728_v58 = vperm.slane %v1663_v51, 7 }
  0x7a   : > { %1364 = vtanh.f32 %v682_v39  ;;  %v720_v62 = vadd.f32 %v716_v45, %v711_v46  ;;  %v721_v14 = vadd.f32 %v717_v1, %v712_v24  ;;  %v737_v23 = vperm.slane %v1713_v36, 7 }
  0x7b   : > { %v722_v2 = vadd.f32 %v718_v53, %v713_v20  ;;  %v723_v5 = vadd.f32 %v719_v3, %v714_v0  ;;  %v742_v42 = vperm.slane %v1935_v61, 0  ;;  %v747_v9 = vperm.slane %v1930_v27, 0 }
  0x7c   : > { %1366 = vtanh.f32 %v720_v62  ;;  %v738_v37 = vmul.f32 %v737_v23, %v1847_v34  ;;  %v739_v11 = vmul.f32 %v737_v23, %v1852_v6  ;;  %v740_v32 = vmul.f32 %v737_v23, %v1858_v43 }
  0x7d   : > { %v1359_v16 = vpop.eup %1358  ;;  %1368 = vtanh.f32 %v721_v14  ;;  %v741_v51 = vmul.f32 %v737_v23, %v1864_v19  ;;  %v748_v7 = vmul.f32 %v747_v9, %v1876_v29  ;;  %v749_v36 = vmul.f32 %v747_v9, %v1879_v63  ;;  %v1956_v19 = vld [vmem:[%s2201_s8 + $0x8] sm:$0xf] }
  0x7e   : > { %v1361_v38 = vpop.eup %1360  ;;  %v688_v8 = vmul.f32 %v1359_v16, %v1893_v56  ;;  %1370 = vtanh.f32 %v722_v2  ;;  %v743_v48 = vadd.f32 %v742_v42, %v738_v37  ;;  %v744_v26 = vadd.f32 %v742_v42, %v739_v11 }
  0x7f   : > { %v1363_v25 = vpop.eup %1362  ;;  %v689_v34 = vmul.f32 %v1361_v38, %v1893_v56  ;;  %1372 = vtanh.f32 %v723_v5  ;;  %v745_v6 = vadd.f32 %v742_v42, %v740_v32  ;;  %v746_v43 = vadd.f32 %v742_v42, %v741_v51 }
  0x80   : > { %v1365_v12 = vpop.eup %1364  ;;  %v690_v29 = vmul.f32 %v1363_v25, %v1893_v56  ;;  %v1959_v63 = vadd.f32 %v688_v8, %v679_v4  ;;  %v750_v47 = vmul.f32 %v747_v9, %v1882_v60  ;;  %v751_v10 = vmul.f32 %v747_v9, %v1886_v33 }
  0x81   : > { %v691_v15 = vmul.f32 %v1365_v12, %v1893_v56  ;;  %v1964_v35 = vadd.f32 %v689_v34, %v680_v52  ;;  %v752_v57 = vadd.f32 %v748_v7, %v743_v48  ;;  %v753_v22 = vadd.f32 %v749_v36, %v744_v26 }
  0x82   : > { %v1367_v55 = vpop.eup %1366  ;;  %v1966_v17 = vadd.f32 %v690_v29, %v681_v41  ;;  %v754_v59 = vadd.f32 %v750_v47, %v745_v6  ;;  %v755_v44 = vadd.f32 %v751_v10, %v746_v43  ;;  %v756_v40 = vperm.slane %v1930_v27, 1 }
  0x83   : > { %v1369_v21 = vpop.eup %1368  ;;  %v1969_v4 = vadd.f32 %v691_v15, %v682_v39  ;;  %v729_v46 = vmul.f32 %v1367_v55, %v728_v58  ;;  %v1972_v60 = vperm.slane %v1956_v19, 0  ;;  %v778_v33 = vperm.slane %v1930_v27, 2 }
  0x84   : > { %v1371_v56 = vpop.eup %1370  ;;  %v730_v52 = vmul.f32 %v1369_v21, %v728_v58  ;;  %v757_v24 = vmul.f32 %v756_v40, %v1908_v13  ;;  %v758_v41 = vmul.f32 %v756_v40, %v1913_v28  ;;  %v759_v20 = vmul.f32 %v756_v40, %v1915_v49 }
  0x85   : > { %v1373_v0 = vpop.eup %1372  ;;  %v731_v45 = vmul.f32 %v1371_v56, %v728_v58  ;;  %v1978_v1 = vadd.f32 %v729_v46, %v720_v62  ;;  %v760_v39 = vmul.f32 %v756_v40, %v1918_v18  ;;  %v779_v53 = vmul.f32 %v778_v33, %v1959_v63 }
  0x86   : > { %v732_v3 = vmul.f32 %v1373_v0, %v728_v58  ;;  %v1982_v23 = vadd.f32 %v730_v52, %v721_v14  ;;  %v761_v42 = vadd.f32 %v757_v24, %v752_v57  ;;  %v762_v9 = vadd.f32 %v758_v41, %v753_v22 }
  0x87   : > { %v1984_v37 = vadd.f32 %v731_v45, %v722_v2  ;;  %v763_v13 = vadd.f32 %v759_v20, %v754_v59  ;;  %v764_v11 = vadd.f32 %v760_v39, %v755_v44  ;;  %v780_v28 = vmul.f32 %v778_v33, %v1964_v35 }
  0x88   : > { %v1987_v49 = vadd.f32 %v732_v3, %v723_v5  ;;  %1374 = vtanh.f32 %v761_v42  ;;  %v781_v62 = vmul.f32 %v778_v33, %v1966_v17  ;;  %v782_v18 = vmul.f32 %v778_v33, %v1969_v4 }
  0x89   : > { %1376 = vtanh.f32 %v762_v9  ;;  %v783_v58 = vperm.slane %v1935_v61, 1  ;;  %v788_v14 = vperm.slane %v1930_v27, 3  ;;  %v797_v32 = vperm.slane %v1930_v27, 4 }
  0x8a   : > { %1378 = vtanh.f32 %v763_v13  ;;  %v1995_v2 = vperm.slane %v1956_v19, 1  ;;  %v819_v16 = vperm.slane %v1930_v27, 5  ;;  %v824_v5 = vperm.slane %v1935_v61, 2 }
  0x8b   : > { %1380 = vtanh.f32 %v764_v11  ;;  %v784_v51 = vadd.f32 %v783_v58, %v779_v53  ;;  %v785_v7 = vadd.f32 %v783_v58, %v780_v28  ;;  %v786_v36 = vadd.f32 %v783_v58, %v781_v62 }
  0x8c   : > { %v787_v38 = vadd.f32 %v783_v58, %v782_v18  ;;  %v789_v8 = vmul.f32 %v788_v14, %v1978_v1  ;;  %v790_v48 = vmul.f32 %v788_v14, %v1982_v23  ;;  %v791_v26 = vmul.f32 %v788_v14, %v1984_v37 }
  0x8d   : > { %v792_v25 = vmul.f32 %v788_v14, %v1987_v49  ;;  %v820_v34 = vmul.f32 %v819_v16, %v1959_v63  ;;  %v821_v6 = vmul.f32 %v819_v16, %v1964_v35  ;;  %v822_v43 = vmul.f32 %v819_v16, %v1966_v17 }
  0x8e   : > { %v1375_v12 = vpop.eup %1374  ;;  %v793_v29 = vadd.f32 %v789_v8, %v784_v51  ;;  %v794_v47 = vadd.f32 %v790_v48, %v785_v7  ;;  %v795_v10 = vadd.f32 %v791_v26, %v786_v36  ;;  %v823_v15 = vmul.f32 %v819_v16, %v1969_v4 }
  0x8f   : > { %v1377_v57 = vpop.eup %1376  ;;  %v770_v22 = vmul.f32 %v1375_v12, %v1972_v60  ;;  %v796_v55 = vadd.f32 %v792_v25, %v787_v38  ;;  %v825_v59 = vadd.f32 %v824_v5, %v820_v34  ;;  %v826_v44 = vadd.f32 %v824_v5, %v821_v6 }
  0x90   : > { %v1379_v40 = vpop.eup %1378  ;;  %v771_v21 = vmul.f32 %v1377_v57, %v1972_v60  ;;  %v827_v46 = vadd.f32 %v824_v5, %v822_v43  ;;  %v828_v33 = vadd.f32 %v824_v5, %v823_v15  ;;  %v829_v56 = vperm.slane %v1930_v27, 6 }
  0x91   : > { %v1381_v52 = vpop.eup %1380  ;;  %v772_v24 = vmul.f32 %v1379_v40, %v1972_v60  ;;  %v2011_v41 = vadd.f32 %v770_v22, %v761_v42  ;;  %v838_v20 = vperm.slane %v1930_v27, 7  ;;  %v2015_v0 = vperm.slane %v1956_v19, 2 }
  0x92   : > { %v773_v45 = vmul.f32 %v1381_v52, %v1972_v60  ;;  %v2018_v39 = vadd.f32 %v771_v21, %v762_v9  ;;  %v830_v53 = vmul.f32 %v829_v56, %v1978_v1  ;;  %v831_v3 = vmul.f32 %v829_v56, %v1982_v23 }
  0x93   : > { %v2022_v28 = vadd.f32 %v772_v24, %v763_v13  ;;  %v798_v62 = vmul.f32 %v797_v32, %v2011_v41  ;;  %v832_v42 = vmul.f32 %v829_v56, %v1984_v37  ;;  %v833_v18 = vmul.f32 %v829_v56, %v1987_v49  ;;  %v456_v13 = vld [vmem:[%s2197_s4 + $0x18] sm:$0x7] }
  0x94   : > { %v2027_v27 = vadd.f32 %v773_v45, %v764_v11  ;;  %v799_v58 = vmul.f32 %v797_v32, %v2018_v39  ;;  %v834_v14 = vadd.f32 %v830_v53, %v825_v59  ;;  %v835_v60 = vadd.f32 %v831_v3, %v826_v44 }
  0x95   : > { %v800_v9 = vmul.f32 %v797_v32, %v2022_v28  ;;  %v802_v16 = vadd.f32 %v798_v62, %v793_v29  ;;  %v836_v5 = vadd.f32 %v832_v42, %v827_v46  ;;  %v837_v51 = vadd.f32 %v833_v18, %v828_v33 }
  0x96   : > { %v801_v7 = vmul.f32 %v797_v32, %v2027_v27  ;;  %v803_v36 = vadd.f32 %v799_v58, %v794_v47  ;;  %v839_v38 = vmul.f32 %v838_v20, %v2011_v41  ;;  %v840_v11 = vmul.f32 %v838_v20, %v2018_v39 }
  0x97   : > { %v804_v8 = vadd.f32 %v800_v9, %v795_v10  ;;  %1382 = vtanh.f32 %v802_v16  ;;  %v841_v48 = vmul.f32 %v838_v20, %v2022_v28  ;;  %v842_v26 = vmul.f32 %v838_v20, %v2027_v27 }
  0x98   : > { %v805_v25 = vadd.f32 %v801_v7, %v796_v55  ;;  %1384 = vtanh.f32 %v803_v36  ;;  %v843_v34 = vadd.f32 %v839_v38, %v834_v14  ;;  %v2039_v6 = vadd.f32 %v840_v11, %v835_v60 }
  0x99   : > { %1386 = vtanh.f32 %v804_v8  ;;  %v2041_v43 = vadd.f32 %v841_v48, %v836_v5  ;;  %v2043_v32 = vadd.f32 %v842_v26, %v837_v51  ;;  %v860_v12 = vperm.slane %v456_v13, 0  ;;  %v457_v5 = vld [vmem:[%s2198_s5] sm:$0x7] }
  0x9a   : > { %1388 = vtanh.f32 %v805_v25  ;;  %v865_v29 = vperm.slane %v1935_v61, 3  ;;  %v870_v47 = vperm.slane %v456_v13, 1  ;;  %v879_v10 = vperm.slane %v456_v13, 2 }
  0x9b   : > { %1390 = vtanh.f32 %v843_v34  ;;  %v861_v15 = vmul.f32 %v860_v12, %v1959_v63  ;;  %v862_v57 = vmul.f32 %v860_v12, %v1964_v35  ;;  %v863_v22 = vmul.f32 %v860_v12, %v1966_v17 }
  0x9c   : > { %1392 = vtanh.f32 %v2039_v6  ;;  %v864_v55 = vmul.f32 %v860_v12, %v1969_v4  ;;  %v871_v59 = vmul.f32 %v870_v47, %v1978_v1  ;;  %v872_v44 = vmul.f32 %v870_v47, %v1982_v23 }
  0x9d   : > { %v1383_v40 = vpop.eup %1382  ;;  %1394 = vtanh.f32 %v2041_v43  ;;  %v866_v61 = vadd.f32 %v865_v29, %v861_v15  ;;  %v867_v21 = vadd.f32 %v865_v29, %v862_v57  ;;  %v868_v46 = vadd.f32 %v865_v29, %v863_v22 }
  0x9e   : > { %v1385_v33 = vpop.eup %1384  ;;  %v811_v63 = vmul.f32 %v1383_v40, %v1995_v2  ;;  %1396 = vtanh.f32 %v2043_v32  ;;  %v869_v35 = vadd.f32 %v865_v29, %v864_v55  ;;  %v873_v17 = vmul.f32 %v870_v47, %v1984_v37 }
  0x9f   : > { %v1387_v56 = vpop.eup %1386  ;;  %v812_v4 = vmul.f32 %v1385_v33, %v1995_v2  ;;  %v874_v1 = vmul.f32 %v870_v47, %v1987_v49  ;;  %v875_v23 = vadd.f32 %v871_v59, %v866_v61  ;;  %v876_v52 = vadd.f32 %v872_v44, %v867_v21 }
  0xa0   : > { %v1389_v24 = vpop.eup %1388  ;;  %v813_v20 = vmul.f32 %v1387_v56, %v1995_v2  ;;  %v877_v45 = vadd.f32 %v873_v17, %v868_v46  ;;  %v880_v53 = vmul.f32 %v879_v10, %v2011_v41  ;;  %v881_v18 = vmul.f32 %v879_v10, %v2018_v39 }
  0xa1   : > { %v1391_v3 = vpop.eup %1390  ;;  %v814_v62 = vmul.f32 %v1389_v24, %v1995_v2  ;;  %v878_v42 = vadd.f32 %v874_v1, %v869_v35  ;;  %v815_v58 = vadd.f32 %v811_v63, %v802_v16  ;;  %v882_v49 = vmul.f32 %v879_v10, %v2022_v28 }
  0xa2   : > { %v1393_v37 = vpop.eup %1392  ;;  %v852_v14 = vmul.f32 %v1391_v3, %v2015_v0  ;;  %v883_v60 = vmul.f32 %v879_v10, %v2027_v27  ;;  %v816_v41 = vadd.f32 %v812_v4, %v803_v36  ;;  %v884_v2 = vadd.f32 %v880_v53, %v875_v23  ;;  %v1307_v36 = vld [vmem:[%s2200_s7] ss:$0 sm:$0xff] }
  0xa3   : > { %v1395_v9 = vpop.eup %1394  ;;  %v853_v51 = vmul.f32 %v1393_v37, %v2015_v0  ;;  %v885_v13 = vadd.f32 %v881_v18, %v876_v52  ;;  %v817_v39 = vadd.f32 %v813_v20, %v804_v8  ;;  %v886_v38 = vadd.f32 %v882_v49, %v877_v45 }
  0xa4   : > { %v1397_v7 = vpop.eup %1396  ;;  %v854_v16 = vmul.f32 %v1395_v9, %v2015_v0  ;;  %v887_v11 = vadd.f32 %v883_v60, %v878_v42  ;;  %v818_v48 = vadd.f32 %v814_v62, %v805_v25  ;;  %1398 = vtanh.f32 %v884_v2 }
  0xa5   : > { %v855_v28 = vmul.f32 %v1397_v7, %v2015_v0  ;;  %v856_v27 = vadd.f32 %v852_v14, %v843_v34  ;;  %1400 = vtanh.f32 %v885_v13  ;;  %v901_v26 = vperm.slane %v457_v5, 0 }
  0xa6   : > { %v913_v12 = vperm.slane %v457_v5, 1  ;;  %v857_v29 = vadd.f32 %v853_v51, %v2039_v6  ;;  %v858_v8 = vadd.f32 %v854_v16, %v2041_v43  ;;  %1402 = vtanh.f32 %v886_v38 }
  0xa7   : > { %v892_v47 = vperm.slane %v1956_v19, 3  ;;  %1404 = vtanh.f32 %v887_v11  ;;  %v902_v25 = vmul.f32 %v901_v26, %v815_v58  ;;  %v903_v10 = vmul.f32 %v901_v26, %v816_v41 }
  0xa8   : > { %v904_v0 = vmul.f32 %v901_v26, %v817_v39  ;;  %v859_v34 = vadd.f32 %v855_v28, %v2043_v32  ;;  %v905_v15 = vmul.f32 %v901_v26, %v818_v48  ;;  %v914_v22 = vmul.f32 %v913_v12, %v856_v27 }
  0xa9   : > { %v909_v57 = vadd.f32 %v1307_v36, %v902_v25  ;;  %v910_v59 = vadd.f32 %v1307_v36, %v903_v10  ;;  %v915_v44 = vmul.f32 %v913_v12, %v857_v29  ;;  %v916_v21 = vmul.f32 %v913_v12, %v858_v8 }
  0xaa   : > { %v1399_v55 = vpop.eup %1398  ;;  %v911_v6 = vadd.f32 %v1307_v36, %v904_v0  ;;  %v922_v43 = vperm.slane %v457_v5, 2  ;;  %v912_v19 = vadd.f32 %v1307_v36, %v905_v15  ;;  %v917_v63 = vmul.f32 %v913_v12, %v859_v34 }
  0xab   : > { %v1401_v40 = vpop.eup %1400  ;;  %v893_v61 = vmul.f32 %v1399_v55, %v892_v47  ;;  %v918_v4 = vadd.f32 %v914_v22, %v909_v57  ;;  %v919_v23 = vadd.f32 %v915_v44, %v910_v59  ;;  %v1518_v9 = vmov 0.0  }
  0xac   : > { %v1403_v46 = vpop.eup %1402  ;;  %v894_v33 = vmul.f32 %v1401_v40, %v892_v47  ;;  %v920_v24 = vadd.f32 %v916_v21, %v911_v6  ;;  %v921_v53 = vadd.f32 %v917_v63, %v912_v19 }
  0xad   : > { %v1405_v35 = vpop.eup %1404  ;;  %v895_v17 = vmul.f32 %v1403_v46, %v892_v47  ;;  %v897_v56 = vadd.f32 %v893_v61, %v884_v2 }
  0xae   : > { %v896_v32 = vmul.f32 %v1405_v35, %v892_v47  ;;  %v898_v1 = vadd.f32 %v894_v33, %v885_v13 }
  0xaf   : > { %v899_v52 = vadd.f32 %v895_v17, %v886_v38  ;;  %v923_v20 = vmul.f32 %v922_v43, %v897_v56 }
  0xb0   : > { %v900_v45 = vadd.f32 %v896_v32, %v887_v11  ;;  %v924_v3 = vmul.f32 %v922_v43, %v898_v1 }
  0xb1   : > { %v925_v62 = vmul.f32 %v922_v43, %v899_v52  ;;  %v927_v42 = vadd.f32 %v923_v20, %v918_v4 }
  0xb2   : > { %v926_v18 = vmul.f32 %v922_v43, %v900_v45  ;;  %v928_v37 = vadd.f32 %v924_v3, %v919_v23 }
  0xb3   : > { %v929_v58 = vadd.f32 %v925_v62, %v920_v24 }
  0xb4   : > { %v930_v14 = vadd.f32 %v926_v18, %v921_v53 }
  0xb5   : > { %v931_v49 = vadd.f32 %v929_v58, %v927_v42 }
  0xb6   : > { %v932_v60 = vadd.f32 %v930_v14, %v928_v37 }
  0xb7   : > { %vm933_vm8 = vcmp.gt.f32.partialorder %v931_v49, 0.0  ;;  %vm935_vm9 = vcmp.lt.f32.partialorder %v931_v49, 0.0 }
  0xb8   : > { %vm934_vm10 = vcmp.gt.f32.partialorder %v932_v60, 0.0  ;;  %vm936_vm11 = vcmp.lt.f32.partialorder %v932_v60, 0.0  ;;  %v937_v5 = vsel %vm935_vm9, 1.0, %v1518_v9 }
  0xb9   : > { %v938_v41 = vsel %vm936_vm11, 1.0, %v1518_v9  ;;  %v939_v51 = vsel %vm933_vm8, -1.0, %v937_v5 }
  0xba   : > { %v940_v2 = vsel %vm934_vm10, -1.0, %v938_v41  ;;  %v941_v13 = vmul.f32 %v939_v51, %v929_v58  ;;  %v981_v7 = vmul.f32 %v939_v51, %v927_v42 }
  0xbb   : > { %v942_v39 = vmul.f32 %v940_v2, %v930_v14  ;;  %v982_v16 = vmul.f32 %v940_v2, %v928_v37 }
  0xbc   : > { %v1213_v38 = vmul.f32 -1.442695, %v941_v13  ;;  %v1215_v11 = vmul.f32 -1.442695, %v981_v7 }
  0xbd   : > { %v1214_v48 = vmul.f32 -1.442695, %v942_v39  ;;  %v1216_v28 = vmul.f32 -1.442695, %v982_v16 }
  0xbe   : > { %1406 = vpow2.f32 %v1213_v38 }
  0xbf   : > { %1408 = vpow2.f32 %v1214_v48 }
  0xc0   : > { %1410 = vpow2.f32 %v1215_v11 }
  0xc1   : > { %1412 = vpow2.f32 %v1216_v28 }
  0xc4   : > { %v1407_v27 = vpop.eup %1406 }
  0xc5   : > { %v1409_v26 = vpop.eup %1408  ;;  %v2104_v36 = vadd.f32 1.0, %v1407_v27 }
  0xc6   : > { %v1411_v12 = vpop.eup %1410  ;;  %v2108_v29 = vadd.f32 1.0, %v1409_v26 }
  0xc7   : > { %1449 = shalt.err (!%p1446_p3)
}
  0xc8   : > { %s1519_s3 = smov 128   ;;  %s1520_s15 = smov 8   ;;  %v1413_v30 = vpop.eup %1412  ;;  %1414 = vrcp.f32 %v2104_v36  ;;  %v989_v31 = vadd.f32 1.0, %v1411_v12  ;;  %v962_v8 = vand.u32 2147483648, %v2104_v36  ;;  %vm956_vm13 = vweird.f32 %v2104_v36 }
  0xc9   : > { %1259 = dma.vmem_to_hbm [thread:$0]  (%p1622_p5), %s2098_s26, 256, %s1060_s12, %s1035_s1, %s1519_s3, %s1519_s3, %s1520_s15   ;;  %1416 = vrcp.f32 %v2108_v29  ;;  %v990_v50 = vadd.f32 1.0, %v1413_v30  ;;  %v960_v10 = vand.u32 2147483647, %v2104_v36  ;;  %vm971_vm15 = vweird.f32 %v2108_v29 }
  0xca   : > { %1418 = vrcp.f32 %v989_v31  ;;  %v975_v15 = vand.u32 2147483647, %v2108_v29  ;;  %v963_v22 = vor.u32 1.1754944e-38, %v962_v8  ;;  %v977_v59 = vand.u32 2147483648, %v2108_v29  ;;  %s1077_s1 = scalar_lea.hbm %s2204_s11, %s1225_s16  ;;  %s2218_s2 = sshll.u32 %s2080_s14, 4 }
  0xcb   : > { %1420 = vrcp.f32 %v990_v50  ;;  %vm996_vm1 = vweird.f32 %v989_v31  ;;  %v1000_v6 = vand.u32 2147483647, %v989_v31  ;;  %v1002_v46 = vand.u32 2147483648, %v989_v31  ;;  %s399_s30 = scalar_lea.vmem [#allocation5], %s2218_s2  ;;  %s1080_s17 = sshll.u32 %s1077_s1, 4  ;;  %s1081_s17 = int_to_ptr.hbm [resolvable:$true] %s1080_s17 }
  0xcc   : > { %vm1011_vm3 = vweird.f32 %v990_v50  ;;  %v1017_v17 = vand.u32 2147483648, %v990_v50  ;;  %v1015_v32 = vand.u32 2147483647, %v990_v50  ;;  %vm961_vm7 = vcmp.eq.f32.partialorder %v960_v10, 8.507059e+37  ;;  %s1078_s13 = sshll.u32 %s399_s30, 4  ;;  %s1045_s0 = scalar_lea.sflag [#allocation6], %s2080_s14  ;;  %s1079_s13 = int_to_ptr.vmem [resolvable:$true] %s1078_s13 }
  0xcd   : > { %v978_v23 = vor.u32 1.1754944e-38, %v977_v59  ;;  %vm976_vm8 = vcmp.eq.f32.partialorder %v975_v15, 8.507059e+37  ;;  %v1003_v20 = vor.u32 1.1754944e-38, %v1002_v46  ;;  %vm1001_vm10 = vcmp.eq.f32.partialorder %v1000_v6, 8.507059e+37  ;;  %s1464_s16 = sshra.s32 %s1081_s17, 4  ;;  %s1470_s26 = scalar_lea.hbm %s2204_s11, 32  ;;  %s1465_s16 = int_to_ptr.hbm [resolvable:$true] %s1464_s16 }
  0xce   : > { %v1415_v54 = vpop.eup %1414  ;;  %v1018_v3 = vor.u32 1.1754944e-38, %v1017_v17  ;;  %s1466_s18 = scalar_lea.hbm %s1465_s16, 16  ;;  %p1471_p9 = scmp.lt.s32.totalorder %s1465_s16, %s2204_s11 }
  0xcf   : > { %v1417_v47 = vpop.eup %1416  ;;  %v952_v25 = vmul.f32 %v1415_v54, %v2104_v36  ;;  %vm957_vm14 = vweird.f32 %v1415_v54  ;;  %p1467_p4 = scmp.ne.s32.totalorder %s1465_s16, %s1466_s18  ;;  %p1472_p10 = scmp.lt.s32.totalorder %s1470_s26, %s1466_s18 }
  0xd0   : > { %v967_v0 = vmul.f32 %v1417_v47, %v2108_v29  ;;  %v1419_v57 = vpop.eup %1418  ;;  %vm972_vm0 = vweird.f32 %v1417_v47  ;;  %vm2137_vm2 = vmor %vm956_vm13, %vm957_vm14  ;;  %vm1016_vm13 = vcmp.eq.f32.partialorder %v1015_v32, 8.507059e+37 }
  0xd1   : > { %v953_v34 = vsub.f32 1.0, %v952_v25  ;;  %v1421_v44 = vpop.eup %1420  ;;  %v992_v61 = vmul.f32 %v1419_v57, %v989_v31  ;;  %vm2143_vm4 = vmor %vm971_vm15, %vm972_vm0  ;;  %vm997_vm5 = vweird.f32 %v1419_v57  ;;  %p1468_p7 = pnand %p1467_p4, %p1622_p5  ;;  %p1473_p11 = por %p1472_p10, %p1471_p9 }
  0xd2   : > { %v968_v55 = vsub.f32 1.0, %v967_v0  ;;  %v1007_v33 = vmul.f32 %v1421_v44, %v990_v50  ;;  %vm1012_vm6 = vweird.f32 %v1421_v44  ;;  %vm998_vm9 = vmor %vm996_vm1, %vm997_vm5 }
  0xd3   : > { %v954_v40 = vmul.f32 %v1415_v54, %v953_v34  ;;  %v993_v35 = vsub.f32 1.0, %v992_v61  ;;  %vm1013_vm11 = vmor %vm1011_vm3, %vm1012_vm6  ;;  %p1469_p8 = pneg %p1468_p7 }
  0xd4   : > { %v969_v43 = vmul.f32 %v1417_v47, %v968_v55  ;;  %v1008_v4 = vsub.f32 1.0, %v1007_v33 }
  0xd5   : > { %v955_v19 = vadd.f32 %v1415_v54, %v954_v40  ;;  %v994_v52 = vmul.f32 %v1419_v57, %v993_v35  ;;  %p1474_p12 = pnand %p1473_p11, %p1469_p8 }
  0xd6   : > { %v970_v56 = vadd.f32 %v1417_v47, %v969_v43  ;;  %v1009_v45 = vmul.f32 %v1421_v44, %v1008_v4 }
  0xd7   : > { %v959_v1 = vsel %vm2137_vm2, %v1415_v54, %v955_v19  ;;  %v995_v53 = vadd.f32 %v1419_v57, %v994_v52 }
  0xd8   : > { %v974_v24 = vsel %vm2143_vm4, %v1417_v47, %v970_v56  ;;  %v964_v62 = vsel %vm961_vm7, %v963_v22, %v959_v1  ;;  %v1010_v42 = vadd.f32 %v1421_v44, %v1009_v45 }
  0xd9   : > { %v979_v18 = vsel %vm976_vm8, %v978_v23, %v974_v24  ;;  %v999_v37 = vsel %vm998_vm9, %v1419_v57, %v995_v53 }
  0xda   : > { %v1004_v58 = vsel %vm1001_vm10, %v1003_v20, %v999_v37  ;;  %v1014_v14 = vsel %vm1013_vm11, %v1421_v44, %v1010_v42 }
  0xdb   : > { %v1019_v49 = vsel %vm1016_vm13, %v1018_v3, %v1014_v14  ;;  %v1021_v60 = vsub.f32 %v964_v62, %v1004_v58 }
  0xdc   : > { %v1022_v9 = vsub.f32 %v979_v18, %v1019_v49 }
  0xdd   : > { %v1023_v5 = vand.u32 2147483647, %v1021_v60 }
  0xde   : > { %v1024_v41 = vand.u32 2147483647, %v1022_v9 }
  0xdf   : > { %v1025_v51 = vmax.f32 %v1023_v5, 1e-09 }
  0xe0   : > { %v1026_v2 = vmax.f32 %v1024_v41, 1e-09 }
  0xe1   : > { %1032 = vst.msk [vmem:[%s399_s30] sm:$0xff] %vm1027_vm12, %v1025_v51 }
  0xe2   : > { %1033 = vst.msk [vmem:[%s399_s30 + $0x8] sm:$0xff] %vm1027_vm12, %v1026_v2 }
  0xe3   : > { %1477 = shalt.err (!%p1474_p12)
}
  0xe4   : > { %1260 = dma.vmem_to_hbm [thread:$0]  (%p1622_p5), %s1079_s13, 256, %s1081_s17, %s1045_s0, %s1519_s3, %s1519_s3, %s1520_s15  }
  0xe5 PF: > { %p1270_p13 = scmp.ge.s32.totalorder %s1516_s22, 2  ;;  %s1095_s14 = sand.u32 1, %s1504_s19  }
  0xe6   : > { %s1096_s2 = scalar_lea.sflag [#allocation4], %s1095_s14 }
  0xe7   : > { %p1264_p0 = pnand %p1270_p13, %p1626_p6 }
  0xe9   : > { %p1265_p1 = pneg %p1264_p0 }
  0xeb   : > { %1495 = dma.done.wait (%p1265_p1), %s1096_s2, 256  }
  0xec   : > { %1497 = vsyncadd (%p1265_p1), %s1096_s2, 4294967040  ;;  %s1114_s30 = scalar_lea.sflag [#allocation6], %s1095_s14 }
  0xed   : > { %1499 = dma.done.wait (%p1265_p1), %s1114_s30, 256  }
  0xee   : > { %1501 = vsyncadd (%p1265_p1), %s1114_s30, 4294967040  ;;  %p26_p5 = scmp.ge.s32.totalorder %s1609_s24, 4   ;;  %s2219_s19 = smov %s1508_s20 }
  0xef   : > { %s2220_s20 = smov %s1512_s21  ;;  %s2221_s21 = smov %s1620_s27 }
  0xf0   : > { %s2222_s22 = smov %s1609_s24  ;;  %28 = sbr.rel (!%p26_p5) target bundleno = 10 (0xa), region = 120 }
  0xf5   :  { %1120 = vsyncpa [#allocation4], 1 }
  0xf6   :  { %1122 = vsyncpa [#allocation4 + $0x1], 1 }
  0xf7   :  { %1123 = vsyncpa [#allocation6], 1 }
  0xf8   :  { %1125 = vsyncpa [#allocation6 + $0x1], 1 }

// kernel: forward.28
= control target key start
LH: loop header
LB: loop body
LE: loop exit
PB: predicated region body
PF: predicated region fallthrough
CT: control target
= control target key end

     0   :  { %s1475_s12 = smov 0   ;;  %s1814_s0 = inlined_call_operand.vmem [shape: f32[232,16], index: 0, kind: input, shape index: {}]   ;;  %s1815_s1 = inlined_call_operand.vmem [shape: bf16[9,16,64], index: 1, kind: input, shape index: {}]   ;;  %s1816_s2 = inlined_call_operand.vmem [shape: f32[1,64], index: 2, kind: input, shape index: {}]   ;;  %s1817_s3 = inlined_call_operand.vmem [shape: f32[208,64], index: 3, kind: output, shape index: {}]  }
   0x1 LB: > { %s1200_s13 = sadd.s32 4294967295, %s1453_s12   ;;  %p1203_p0 = scmp.ge.s32.totalorder %s1453_s12, 1  ;;  %s1453_s12 = sphi %s1475_s12, %s13_s12  }
   0x2   : > { %p127_p1 = scmp.lt.s32.totalorder %s1453_s12, 3 }
   0x4   : > { %p128_p2 = pnand %p1203_p0, %p127_p1 }
   0x5   : > { %s153_s16 = smul.u32 (!%p128_p2), 104, %s1200_s13 }
   0x6   : > { %131 = sbr.rel (%p128_p2) target bundleno = 399 (0x18f), region = 32 }
   0x7   : > { %s1503_s27 = scalar_lea.vmem (!%p128_p2), %s1814_s0, %s153_s16  ;;  %s146_s9 = smul.u32 (!%p128_p2), 13, %s1200_s13 }
   0x9   : > { %p147_p3 = scmp.lt.s32.totalorder (!%p128_p2), %s146_s9, 25 }
   0xb   : > { %v1427_v0 = vld [vmem:[%s1815_s1 + $0x8] sm:$0xff]  ;;  %v1429_v1 = vld [vmem:[%s1815_s1 + $0x18] sm:$0xff]  ;;  %v1426_v2 = vld [vmem:[%s1815_s1] sm:$0xff]  ;;  %vm208_vm0 = vcmask 130048   ;;  %s1819_s9 = smov (!%p147_p3, %s146_s9), 25  ;;  %vm1116_vm1 = vcmask 523264  }
   0xc   : > { %v1430_v3 = vld [vmem:[%s1815_s1 + $0x20] sm:$0xff]  ;;  %v1428_v4 = vld [vmem:[%s1815_s1 + $0x10] sm:$0xff]  ;;  %237 = vmatpush.bf16.msra.mxu0 %v1427_v0  ;;  %1435 = vmatpush.bf16.msra.mxu1 %v1427_v0  ;;  %v1433_v18 = vld [vmem:[%s1815_s1 + $0x38] sm:$0xff]  ;;  %s1204_s10 = sshll.u32 %s1819_s9, 3 }
   0xd   : > { %1437 = vmatpush.bf16.msra.mxu3 %v1427_v0  ;;  %v1205_v5 = vld [vmem:[%s1503_s27 + $0x1] sm:$0xff]  ;;  %v1206_v6 = vld [vmem:[%s1503_s27 + $0x9] sm:$0xff]  ;;  %v1215_v10 = vld [vmem:[%s1503_s27 + $0x51] sm:$0xff]  ;;  %1436 = vmatpush.bf16.msra.mxu2 %v1427_v0  ;;  %s1759_s16 = scalar_lea.vmem %s1817_s3, %s1204_s10 }
   0xe   : > { %v1209_v7 = vld [vmem:[%s1503_s27 + $0x21] sm:$0xff]  ;;  %v192_v8 = vpack.c.bf16 %v1206_v6, %v1205_v5  ;;  %v1210_v9 = vld [vmem:[%s1503_s27 + $0x29] sm:$0xff]  ;;  %v1216_v11 = vld [vmem:[%s1503_s27 + $0x59] sm:$0xff] }
   0xf   : > { %v194_v12 = vpack.c.bf16 %v1210_v9, %v1209_v7  ;;  %v197_v13 = vpack.c.bf16 %v1216_v11, %v1215_v10  ;;  %v1213_v14 = vld [vmem:[%s1503_s27 + $0x41] sm:$0xff]  ;;  %v1214_v15 = vld [vmem:[%s1503_s27 + $0x49] sm:$0xff]  ;;  %v1207_v21 = vld [vmem:[%s1503_s27 + $0x11] sm:$0xff] }
  0x10   : > { %307 = vmatpush.bf16.msrb.mxu1 %v1426_v2  ;;  %618 = vmatpush.bf16.msrb.mxu0 %v1430_v3  ;;  %v1432_v16 = vld [vmem:[%s1815_s1 + $0x30] sm:$0xff]  ;;  %v196_v17 = vpack.c.bf16 %v1214_v15, %v1213_v14  ;;  %v1431_v19 = vld [vmem:[%s1815_s1 + $0x28] sm:$0xff]  ;;  %v1434_v20 = vld [vmem:[%s1815_s1 + $0x40] sm:$0xff] }
  0x11   : > { %510 = vmatpush.bf16.msrb.mxu3 %v1429_v1  ;;  %402 = vmatpush.bf16.msrb.mxu2 %v1428_v4  ;;  %v1208_v22 = vld [vmem:[%s1503_s27 + $0x19] sm:$0xff]  ;;  %v1211_v23 = vld [vmem:[%s1503_s27 + $0x31] sm:$0xff]  ;;  %v1217_v25 = vld [vmem:[%s1503_s27 + $0x61] sm:$0xff] }
  0x12   : > { %1224 = vmatmul.msk.bf16.vlgmr.msra.gmra.mxu0 %vm208_vm0, %v192_v8  ;;  %1226 = vmatmul.msk.bf16.vlgmr.msra.gmra.mxu1 %vm208_vm0, %v194_v12  ;;  %v1212_v24 = vld [vmem:[%s1503_s27 + $0x39] sm:$0xff]  ;;  %v1242_v26 = vld [vmem:[%s1503_s27 + $0x2] sm:$0xff]  ;;  %v1243_v27 = vld [vmem:[%s1503_s27 + $0xa] sm:$0xff]  ;;  %v193_v28 = vpack.c.bf16 %v1208_v22, %v1207_v21  ;;  %v198_v30 = vpack.c.bf16 %v1217_v25, %v1217_v25 }
  0x13   : > { %1229 = vmatmul.msk.bf16.vlgmr.msra.gmra.mxu3 %vm208_vm0, %v197_v13  ;;  %1228 = vmatmul.msk.bf16.vlgmr.msra.gmra.mxu2 %vm208_vm0, %v196_v17  ;;  %v195_v29 = vpack.c.bf16 %v1212_v24, %v1211_v23  ;;  %v358_v31 = vpack.c.bf16 %v1243_v27, %v1242_v26  ;;  %v1294_v32 = vld [vmem:[%s1503_s27 + $0xb] sm:$0xff]  ;;  %v1295_v33 = vld [vmem:[%s1503_s27 + $0x13] sm:$0xff]  ;;  %v155_v34 = vld [vmem:[%s1503_s27] sm:$0xff] }
  0x14   : > { %726 = vmatpush.bf16.msra.mxu1 %v1431_v19  ;;  %1050 = vmatpush.bf16.msra.mxu0 %v1434_v20  ;;  %v156_v35 = vld [vmem:[%s1503_s27 + $0x8] sm:$0xff]  ;;  %v1269_v36 = vld [vmem:[%s1503_s27 + $0x12] sm:$0xff]  ;;  %v1245_v37 = vld [vmem:[%s1503_s27 + $0x1a] sm:$0xff]  ;;  %v574_v38 = vpack.c.bf16 %v1295_v33, %v1294_v32 }
  0x15   : > { %834 = vmatpush.bf16.msra.mxu2 %v1432_v16  ;;  %942 = vmatpush.bf16.msra.mxu3 %v1433_v18  ;;  %v168_v39 = vpack.c.bf16 %v156_v35, %v155_v34  ;;  %v466_v40 = vpack.c.bf16 %v1269_v36, %v1243_v27  ;;  %v359_v41 = vpack.c.bf16 %v1245_v37, %v1269_v36  ;;  %v1296_v42 = vld [vmem:[%s1503_s27 + $0x1b] sm:$0xff]  ;;  %v1297_v43 = vld [vmem:[%s1503_s27 + $0x23] sm:$0xff]  ;;  %v157_v44 = vld [vmem:[%s1503_s27 + $0x10] sm:$0xff] }
  0x16   : > { %v158_v45 = vld [vmem:[%s1503_s27 + $0x18] sm:$0xff]  ;;  %v1271_v46 = vld [vmem:[%s1503_s27 + $0x22] sm:$0xff]  ;;  %v1247_v47 = vld [vmem:[%s1503_s27 + $0x2a] sm:$0xff]  ;;  %v575_v48 = vpack.c.bf16 %v1297_v43, %v1296_v42 }
  0x17   : > { %v169_v49 = vpack.c.bf16 %v158_v45, %v157_v44  ;;  %v467_v50 = vpack.c.bf16 %v1271_v46, %v1245_v37  ;;  %v360_v51 = vpack.c.bf16 %v1247_v47, %v1271_v46  ;;  %v1298_v52 = vld [vmem:[%s1503_s27 + $0x2b] sm:$0xff]  ;;  %v1299_v53 = vld [vmem:[%s1503_s27 + $0x33] sm:$0xff]  ;;  %v159_v54 = vld [vmem:[%s1503_s27 + $0x20] sm:$0xff] }
  0x18   : > { %v160_v55 = vld [vmem:[%s1503_s27 + $0x28] sm:$0xff]  ;;  %v1273_v56 = vld [vmem:[%s1503_s27 + $0x32] sm:$0xff]  ;;  %v1249_v57 = vld [vmem:[%s1503_s27 + $0x3a] sm:$0xff]  ;;  %v576_v58 = vpack.c.bf16 %v1299_v53, %v1298_v52 }
  0x19   : > { %v170_v59 = vpack.c.bf16 %v160_v55, %v159_v54  ;;  %v468_v60 = vpack.c.bf16 %v1273_v56, %v1247_v47  ;;  %v361_v61 = vpack.c.bf16 %v1249_v57, %v1273_v56  ;;  %v1300_v62 = vld [vmem:[%s1503_s27 + $0x3b] sm:$0xff]  ;;  %v1301_v63 = vld [vmem:[%s1503_s27 + $0x43] sm:$0xff]  ;;  %v161_v0 = vld [vmem:[%s1503_s27 + $0x30] sm:$0xff] }
  0x1a   : > { %v162_v1 = vld [vmem:[%s1503_s27 + $0x38] sm:$0xff]  ;;  %v1275_v2 = vld [vmem:[%s1503_s27 + $0x42] sm:$0xff]  ;;  %v1251_v3 = vld [vmem:[%s1503_s27 + $0x4a] sm:$0xff]  ;;  %v577_v4 = vpack.c.bf16 %v1301_v63, %v1300_v62 }
  0x1b   : > { %v171_v5 = vpack.c.bf16 %v162_v1, %v161_v0  ;;  %v469_v6 = vpack.c.bf16 %v1275_v2, %v1249_v57  ;;  %v362_v7 = vpack.c.bf16 %v1251_v3, %v1275_v2  ;;  %v1302_v8 = vld [vmem:[%s1503_s27 + $0x4b] sm:$0xff]  ;;  %v1303_v9 = vld [vmem:[%s1503_s27 + $0x53] sm:$0xff]  ;;  %v163_v10 = vld [vmem:[%s1503_s27 + $0x40] sm:$0xff] }
  0x1c   : > { %v164_v11 = vld [vmem:[%s1503_s27 + $0x48] sm:$0xff]  ;;  %v1277_v12 = vld [vmem:[%s1503_s27 + $0x52] sm:$0xff]  ;;  %v1253_v13 = vld [vmem:[%s1503_s27 + $0x5a] sm:$0xff]  ;;  %v578_v14 = vpack.c.bf16 %v1303_v9, %v1302_v8 }
  0x1d   : > { %v172_v15 = vpack.c.bf16 %v164_v11, %v163_v10  ;;  %v470_v16 = vpack.c.bf16 %v1277_v12, %v1251_v3  ;;  %v363_v17 = vpack.c.bf16 %v1253_v13, %v1277_v12  ;;  %v1304_v18 = vld [vmem:[%s1503_s27 + $0x5b] sm:$0xff]  ;;  %v1305_v19 = vld [vmem:[%s1503_s27 + $0x63] sm:$0xff]  ;;  %v165_v20 = vld [vmem:[%s1503_s27 + $0x50] sm:$0xff] }
  0x1e   : > { %v166_v21 = vld [vmem:[%s1503_s27 + $0x58] sm:$0xff]  ;;  %v1279_v22 = vld [vmem:[%s1503_s27 + $0x62] sm:$0xff]  ;;  %v579_v23 = vpack.c.bf16 %v1305_v19, %v1304_v18  ;;  %v1306_v27 = vld [vmem:[%s1503_s27 + $0x6b] sm:$0xff] }
  0x1f   : > { %v173_v24 = vpack.c.bf16 %v166_v21, %v165_v20  ;;  %v471_v25 = vpack.c.bf16 %v1279_v22, %v1253_v13  ;;  %v364_v26 = vpack.c.bf16 %v1279_v22, %v1279_v22  ;;  %v580_v32 = vpack.c.bf16 %v1306_v27, %v1306_v27  ;;  %v1398_v42 = vld [vmem:[%s1503_s27 + $0x16] sm:$0xff]  ;;  %v1399_v43 = vld [vmem:[%s1503_s27 + $0x1e] sm:$0xff]  ;;  %v1320_v44 = vld [vmem:[%s1503_s27 + $0xc] sm:$0xff] }
  0x20   : > { %v1372_v45 = vld [vmem:[%s1503_s27 + $0x15] sm:$0xff]  ;;  %v1373_v46 = vld [vmem:[%s1503_s27 + $0x1d] sm:$0xff]  ;;  %v1374_v63 = vld [vmem:[%s1503_s27 + $0x25] sm:$0xff] }
  0x21   : > { %v1348_v47 = vld [vmem:[%s1503_s27 + $0x24] sm:$0xff]  ;;  %v898_v53 = vpack.c.bf16 %v1373_v46, %v1372_v45  ;;  %v1401_v62 = vld [vmem:[%s1503_s27 + $0x2e] sm:$0xff]  ;;  %v1646_v2 = vld [vmem:[%s1503_s27 + $0x3c] sm:$0xff] }
  0x22   : > { %1225 = vmatmul.msk.bf16.gmra.mxu0 %vm208_vm0, %v193_v28  ;;  %1227 = vmatmul.msk.bf16.gmra.mxu1 %vm208_vm0, %v195_v29  ;;  %v167_v28 = vld [vmem:[%s1503_s27 + $0x60] sm:$0xff]  ;;  %v1280_v29 = vld [vmem:[%s1503_s27 + $0x6a] sm:$0xff]  ;;  %v1350_v1 = vld [vmem:[%s1503_s27 + $0x34] sm:$0xff] }
  0x23   : > { %1230 = vmatmul.msk.bf16.gmra.mxu3 %vm208_vm0, %v198_v30  ;;  %1261 = vmatmul.msk.bf16.vlgmr.msrb.gmra.mxu2 %vm208_vm0, %v358_v31  ;;  %v1346_v30 = vld [vmem:[%s1503_s27 + $0x14] sm:$0xff]  ;;  %v1347_v31 = vld [vmem:[%s1503_s27 + $0x1c] sm:$0xff]  ;;  %v174_v34 = vpack.c.bf16 %v167_v28, %v167_v28  ;;  %v472_v35 = vpack.c.bf16 %v1280_v29, %v1280_v29  ;;  %v792_v10 = vpack.c.bf16 %v1646_v2, %v1350_v1 }
  0x24   : > { %v790_v37 = vpack.c.bf16 %v1347_v31, %v1346_v30  ;;  %v682_v52 = vpack.c.bf16 %v1346_v30, %v1320_v44  ;;  %v1375_v0 = vld [vmem:[%s1503_s27 + $0x2d] sm:$0xff]  ;;  %v1402_v21 = vld [vmem:[%s1503_s27 + $0x36] sm:$0xff]  ;;  %v1403_v22 = vld [vmem:[%s1503_s27 + $0x3e] sm:$0xff] }
  0x25   : > { %v1008_v28 = vpack.c.bf16 %v1403_v22, %v1402_v21  ;;  %v1381_v21 = vld [vmem:[%s1503_s27 + $0x5d] sm:$0xff] }
  0x26   : > { %v1356_v22 = vld [vmem:[%s1503_s27 + $0x64] sm:$0xff] }
  0x32   : > { %1313 = vmatmul.msk.bf16.vlgmr.msrb.gmra.mxu0 %vm208_vm0, %v574_v38  ;;  %1235 = vmatmul.msk.bf16.vlgmr.msrb.gmra.mxu1 %vm208_vm0, %v168_v39 }
  0x33   : > { %1287 = vmatmul.msk.bf16.vlgmr.msrb.gmra.mxu3 %vm208_vm0, %v466_v40  ;;  %1262 = vmatmul.msk.bf16.gmra.mxu2 %vm208_vm0, %v359_v41 }
  0x42   : > { %1314 = vmatmul.msk.bf16.gmra.mxu0 %vm208_vm0, %v575_v48  ;;  %1236 = vmatmul.msk.bf16.gmra.mxu1 %vm208_vm0, %v169_v49  ;;  %v1623_v48 = vld [vmem:[%s1503_s27 + $0x2c] sm:$0xff] }
  0x43   : > { %1288 = vmatmul.msk.bf16.gmra.mxu3 %vm208_vm0, %v467_v50  ;;  %1263 = vmatmul.msk.bf16.gmra.mxu2 %vm208_vm0, %v360_v51  ;;  %v1006_v50 = vpack.c.bf16 %v1399_v43, %v1398_v42  ;;  %v791_v56 = vpack.c.bf16 %v1623_v48, %v1348_v47 }
  0x52   : > { %1315 = vmatmul.msk.bf16.gmra.mxu0 %vm208_vm0, %v576_v58  ;;  %1237 = vmatmul.msk.bf16.gmra.mxu1 %vm208_vm0, %v170_v59 }
  0x53   : > { %1289 = vmatmul.msk.bf16.gmra.mxu3 %vm208_vm0, %v468_v60  ;;  %1264 = vmatmul.msk.bf16.gmra.mxu2 %vm208_vm0, %v361_v61  ;;  %v1400_v61 = vld [vmem:[%s1503_s27 + $0x26] sm:$0xff] }
  0x62   : > { %1316 = vmatmul.msk.bf16.gmra.mxu0 %vm208_vm0, %v577_v4  ;;  %1238 = vmatmul.msk.bf16.gmra.mxu1 %vm208_vm0, %v171_v5  ;;  %v1007_v4 = vpack.c.bf16 %v1401_v62, %v1400_v61  ;;  %v1354_v61 = vld [vmem:[%s1503_s27 + $0x54] sm:$0xff]  ;;  %v1679_v62 = vld [vmem:[%s1503_s27 + $0x5c] sm:$0xff] }
  0x63   : > { %1290 = vmatmul.msk.bf16.gmra.mxu3 %vm208_vm0, %v469_v6  ;;  %1265 = vmatmul.msk.bf16.gmra.mxu2 %vm208_vm0, %v362_v7  ;;  %v683_v6 = vpack.c.bf16 %v1348_v47, %v1347_v31  ;;  %v899_v7 = vpack.c.bf16 %v1375_v0, %v1374_v63  ;;  %v684_v31 = vpack.c.bf16 %v1350_v1, %v1623_v48 }
  0x72   : > { %1317 = vmatmul.msk.bf16.gmra.mxu0 %vm208_vm0, %v578_v14  ;;  %1239 = vmatmul.msk.bf16.gmra.mxu1 %vm208_vm0, %v172_v15 }
  0x73   : > { %1291 = vmatmul.msk.bf16.gmra.mxu3 %vm208_vm0, %v470_v16  ;;  %1266 = vmatmul.msk.bf16.gmra.mxu2 %vm208_vm0, %v363_v17 }
  0x82   : > { %1318 = vmatmul.msk.bf16.gmra.mxu0 %vm208_vm0, %v579_v23  ;;  %1240 = vmatmul.msk.bf16.gmra.mxu1 %vm208_vm0, %v173_v24  ;;  %v1376_v23 = vld [vmem:[%s1503_s27 + $0x35] sm:$0xff]  ;;  %v1377_v24 = vld [vmem:[%s1503_s27 + $0x3d] sm:$0xff] }
  0x83   : > { %1292 = vmatmul.msk.bf16.gmra.mxu3 %vm208_vm0, %v471_v25  ;;  %1267 = vmatmul.msk.bf16.gmra.mxu2 %vm208_vm0, %v364_v26  ;;  %v1352_v25 = vld [vmem:[%s1503_s27 + $0x44] sm:$0xff]  ;;  %v1661_v26 = vld [vmem:[%s1503_s27 + $0x4c] sm:$0xff] }
  0x8f   : > { %v239_v33 = vpop.f32.mrf.mxu0  ;;  %v1604_v36 = vpop.f32.mrf.mxu1 }
  0x92   : > { %1319 = vmatmul.msk.bf16.gmra.mxu0 %vm208_vm0, %v580_v32  ;;  %1241 = vmatmul.msk.bf16.gmra.mxu1 %vm208_vm0, %v174_v34  ;;  %v900_v32 = vpack.c.bf16 %v1377_v24, %v1376_v23  ;;  %v1699_v23 = vld [vmem:[%s1503_s27 + $0x6c] sm:$0xff] }
  0x93   : > { %1293 = vmatmul.msk.bf16.gmra.mxu3 %vm208_vm0, %v472_v35  ;;  %1365 = vmatmul.msk.bf16.vlgmr.msra.gmra.mxu2 %vm208_vm0, %v790_v37  ;;  %v793_v35 = vpack.c.bf16 %v1661_v26, %v1352_v25 }
  0x96   : > { %v1610_v38 = vpop.f32.mrf.mxu3  ;;  %v1612_v40 = vpop.f32.mrf.mxu2 }
  0x97   : > { %v241_v39 = vpop.f32.mrf.mxu0  ;;  %v1614_v41 = vpop.f32.mrf.mxu1 }
  0x9e   : > { %v1625_v49 = vpop.f32.mrf.mxu3  ;;  %v1627_v54 = vpop.f32.mrf.mxu2 }
  0x9f   : > { %v244_v51 = vpop.f32.mrf.mxu0  ;;  %v1629_v55 = vpop.f32.mrf.mxu1 }
  0xa2   : > { %1417 = vmatmul.msk.bf16.vlgmr.msra.gmra.mxu0 %vm208_vm0, %v1006_v50  ;;  %1339 = vmatmul.msk.bf16.vlgmr.msra.gmra.mxu1 %vm208_vm0, %v682_v52  ;;  %v1404_v52 = vld [vmem:[%s1503_s27 + $0x46] sm:$0xff] }
  0xa3   : > { %1391 = vmatmul.msk.bf16.vlgmr.msra.gmra.mxu3 %vm208_vm0, %v898_v53  ;;  %1366 = vmatmul.msk.bf16.gmra.mxu2 %vm208_vm0, %v791_v56  ;;  %v1405_v53 = vld [vmem:[%s1503_s27 + $0x4e] sm:$0xff]  ;;  %v1378_v56 = vld [vmem:[%s1503_s27 + $0x45] sm:$0xff] }
  0xa4   : > { %v1009_v0 = vpack.c.bf16 %v1405_v53, %v1404_v52  ;;  %v1383_v52 = vld [vmem:[%s1503_s27 + $0x6d] sm:$0xff] }
  0xa5   : > { %v1358_v53 = vld [vmem:[%s1503_s27 + $0x74] sm:$0xff] }
  0xa6   : > { %v1636_v57 = vpop.f32.mrf.mxu3  ;;  %v404_v59 = vpop.f32.mrf.mxu2 }
  0xa7   : > { %v246_v58 = vpop.f32.mrf.mxu0  ;;  %v1638_v60 = vpop.f32.mrf.mxu1 }
  0xae   : > { %v271_v3 = vpop.f32.mrf.mxu3  ;;  %v406_v8 = vpop.f32.mrf.mxu2 }
  0xaf   : > { %v620_v5 = vpop.f32.mrf.mxu0  ;;  %v309_v9 = vpop.f32.mrf.mxu1 }
  0xb0   : > { %v310_v11 = vadd.f32 %v309_v9, %v239_v33 }
  0xb2   : > { %1418 = vmatmul.msk.bf16.gmra.mxu0 %vm208_vm0, %v1007_v4  ;;  %1340 = vmatmul.msk.bf16.gmra.mxu1 %vm208_vm0, %v683_v6  ;;  %v438_v12 = vadd.f32 %v404_v59, %v310_v11  ;;  %v1379_v59 = vld [vmem:[%s1503_s27 + $0x4d] sm:$0xff]  ;;  %v685_v4 = vpack.c.bf16 %v1352_v25, %v1646_v2 }
  0xb3   : > { %1392 = vmatmul.msk.bf16.gmra.mxu3 %vm208_vm0, %v899_v7  ;;  %1367 = vmatmul.msk.bf16.gmra.mxu2 %vm208_vm0, %v792_v10 }
  0xb6   : > { %v512_v13 = vpop.f32.mrf.mxu3  ;;  %v409_v16 = vpop.f32.mrf.mxu2 }
  0xb7   : > { %v546_v14 = vadd.f32 %v512_v13, %v438_v12  ;;  %v622_v15 = vpop.f32.mrf.mxu0  ;;  %v311_v17 = vpop.f32.mrf.mxu1 }
  0xb8   : > { %v312_v18 = vadd.f32 %v311_v17, %v241_v39  ;;  %v1406_v17 = vld [vmem:[%s1503_s27 + $0x56] sm:$0xff] }
  0xb9   : > { %v1653_v19 = vadd.f32 %v620_v5, %v546_v14  ;;  %v901_v5 = vpack.c.bf16 %v1379_v59, %v1378_v56 }
  0xba   : > { %v439_v20 = vadd.f32 %v406_v8, %v312_v18  ;;  %v1407_v18 = vld [vmem:[%s1503_s27 + $0x5e] sm:$0xff] }
  0xbb   : > { %v1010_v25 = vpack.c.bf16 %v1407_v18, %v1406_v17 }
  0xbe   : > { %v514_v27 = vpop.f32.mrf.mxu3  ;;  %v411_v33 = vpop.f32.mrf.mxu2 }
  0xbf   : > { %v547_v29 = vadd.f32 %v514_v27, %v439_v20  ;;  %v625_v30 = vpop.f32.mrf.mxu0  ;;  %v314_v34 = vpop.f32.mrf.mxu1  ;;  %v1380_v20 = vld [vmem:[%s1503_s27 + $0x55] sm:$0xff] }
  0xc0   : > { %v315_v37 = vadd.f32 %v314_v34, %v244_v51 }
  0xc1   : > { %v1665_v39 = vadd.f32 %v622_v15, %v547_v29  ;;  %v686_v29 = vpack.c.bf16 %v1354_v61, %v1661_v26 }
  0xc2   : > { %1419 = vmatmul.msk.bf16.gmra.mxu0 %vm208_vm0, %v1008_v28  ;;  %1341 = vmatmul.msk.bf16.gmra.mxu1 %vm208_vm0, %v684_v31  ;;  %v440_v42 = vadd.f32 %v409_v16, %v315_v37 }
  0xc3   : > { %1393 = vmatmul.msk.bf16.gmra.mxu3 %vm208_vm0, %v900_v32  ;;  %1368 = vmatmul.msk.bf16.gmra.mxu2 %vm208_vm0, %v793_v35 }
  0xc6   : > { %v517_v43 = vpop.f32.mrf.mxu3  ;;  %v414_v46 = vpop.f32.mrf.mxu2 }
  0xc7   : > { %v548_v44 = vadd.f32 %v517_v43, %v440_v42  ;;  %v627_v45 = vpop.f32.mrf.mxu0  ;;  %v316_v47 = vpop.f32.mrf.mxu1 }
  0xc8   : > { %v317_v48 = vadd.f32 %v316_v47, %v246_v58  ;;  %v794_v58 = vpack.c.bf16 %v1679_v62, %v1354_v61  ;;  %v1408_v47 = vld [vmem:[%s1503_s27 + $0x66] sm:$0xff] }
  0xc9   : > { %v1671_v50 = vadd.f32 %v625_v30, %v548_v44  ;;  %v902_v30 = vpack.c.bf16 %v1381_v21, %v1380_v20  ;;  %v688_v20 = vpack.c.bf16 %v1699_v23, %v1699_v23 }
  0xca   : > { %v441_v51 = vadd.f32 %v411_v33, %v317_v48  ;;  %v1409_v48 = vld [vmem:[%s1503_s27 + $0x6e] sm:$0xff] }
  0xcb   : > { %v1011_v59 = vpack.c.bf16 %v1409_v48, %v1408_v47 }
  0xce   : > { %v519_v63 = vpop.f32.mrf.mxu3  ;;  %v416_v6 = vpop.f32.mrf.mxu2 }
  0xcf   : > { %v549_v1 = vadd.f32 %v519_v63, %v441_v51  ;;  %v630_v3 = vpop.f32.mrf.mxu0  ;;  %v319_v7 = vpop.f32.mrf.mxu1  ;;  %v1382_v51 = vld [vmem:[%s1503_s27 + $0x65] sm:$0xff] }
  0xd0   : > { %v320_v8 = vadd.f32 %v319_v7, %v1604_v36 }
  0xd1   : > { %v1684_v9 = vadd.f32 %v627_v45, %v549_v1  ;;  %v903_v1 = vpack.c.bf16 %v1383_v52, %v1382_v51 }
  0xd2   : > { %1420 = vmatmul.msk.bf16.gmra.mxu0 %vm208_vm0, %v1009_v0  ;;  %1342 = vmatmul.msk.bf16.gmra.mxu1 %vm208_vm0, %v685_v4  ;;  %v442_v2 = vadd.f32 %v414_v46, %v320_v8  ;;  %v687_v0 = vpack.c.bf16 %v1356_v22, %v1679_v62 }
  0xd3   : > { %1394 = vmatmul.msk.bf16.gmra.mxu3 %vm208_vm0, %v901_v5  ;;  %1369 = vmatmul.msk.bf16.gmra.mxu2 %vm208_vm0, %v794_v58  ;;  %v796_v5 = vpack.c.bf16 %v1358_v53, %v1358_v53 }
  0xd6   : > { %v522_v10 = vpop.f32.mrf.mxu3  ;;  %v419_v36 = vpop.f32.mrf.mxu2 }
  0xd7   : > { %v550_v11 = vadd.f32 %v522_v10, %v442_v2  ;;  %v632_v12 = vpop.f32.mrf.mxu0  ;;  %v321_v13 = vpop.f32.mrf.mxu1 }
  0xd8   : > { %v322_v14 = vadd.f32 %v321_v13, %v1614_v41  ;;  %v795_v41 = vpack.c.bf16 %v1699_v23, %v1356_v22  ;;  %v1384_v13 = vld [vmem:[%s1503_s27 + $0x75] sm:$0xff] }
  0xd9   : > { %v1691_v15 = vadd.f32 %v630_v3, %v550_v11  ;;  %v904_v21 = vpack.c.bf16 %v1384_v13, %v1384_v13 }
  0xda   : > { %v443_v16 = vadd.f32 %v416_v6, %v322_v14 }
  0xde   : > { %v524_v24 = vpop.f32.mrf.mxu3  ;;  %v421_v31 = vpop.f32.mrf.mxu2 }
  0xdf   : > { %v551_v27 = vadd.f32 %v524_v24, %v443_v16  ;;  %v635_v28 = vpop.f32.mrf.mxu0  ;;  %v324_v32 = vpop.f32.mrf.mxu1 }
  0xe0   : > { %v325_v33 = vadd.f32 %v324_v32, %v1629_v55 }
  0xe1   : > { %v1705_v34 = vadd.f32 %v632_v12, %v551_v27 }
  0xe2   : > { %1421 = vmatmul.msk.bf16.gmra.mxu0 %vm208_vm0, %v1010_v25  ;;  %1343 = vmatmul.msk.bf16.gmra.mxu1 %vm208_vm0, %v686_v29  ;;  %v444_v26 = vadd.f32 %v419_v36, %v325_v33  ;;  %v1410_v36 = vld [vmem:[%s1503_s27 + $0x76] sm:$0xff] }
  0xe3   : > { %1395 = vmatmul.msk.bf16.gmra.mxu3 %vm208_vm0, %v902_v30  ;;  %1370 = vmatmul.msk.bf16.gmra.mxu2 %vm208_vm0, %v795_v41  ;;  %v1012_v16 = vpack.c.bf16 %v1410_v36, %v1410_v36 }
  0xe6   : > { %v527_v35 = vpop.f32.mrf.mxu3  ;;  %v424_v43 = vpop.f32.mrf.mxu2 }
  0xe7   : > { %v552_v37 = vadd.f32 %v527_v35, %v444_v26  ;;  %v637_v42 = vpop.f32.mrf.mxu0  ;;  %v326_v55 = vpop.f32.mrf.mxu1 }
  0xe8   : > { %v327_v44 = vadd.f32 %v326_v55, %v1638_v60 }
  0xe9   : > { %v1711_v45 = vadd.f32 %v635_v28, %v552_v37 }
  0xea   : > { %v445_v46 = vadd.f32 %v421_v31, %v327_v44 }
  0xee   : > { %v529_v56 = vpop.f32.mrf.mxu3  ;;  %v426_v3 = vpop.f32.mrf.mxu2 }
  0xef   : > { %v553_v61 = vadd.f32 %v529_v56, %v445_v46  ;;  %v640_v63 = vpop.f32.mrf.mxu0  ;;  %v329_v4 = vpop.f32.mrf.mxu1 }
  0xf0   : > { %v330_v60 = vadd.f32 %v329_v4, %v1612_v40 }
  0xf1   : > { %v1720_v6 = vadd.f32 %v637_v42, %v553_v61 }
  0xf2   : > { %1422 = vmatmul.msk.bf16.gmra.mxu0 %vm208_vm0, %v1011_v59  ;;  %1344 = vmatmul.msk.bf16.gmra.mxu1 %vm208_vm0, %v687_v0  ;;  %v446_v7 = vadd.f32 %v424_v43, %v330_v60 }
  0xf3   : > { %1396 = vmatmul.msk.bf16.gmra.mxu3 %vm208_vm0, %v903_v1  ;;  %1371 = vmatmul.msk.bf16.gmra.mxu2 %vm208_vm0, %v796_v5 }
  0xf6   : > { %v532_v62 = vpop.f32.mrf.mxu3  ;;  %v429_v2 = vpop.f32.mrf.mxu2 }
  0xf7   : > { %v554_v58 = vadd.f32 %v532_v62, %v446_v7  ;;  %v642_v8 = vpop.f32.mrf.mxu0  ;;  %v331_v10 = vpop.f32.mrf.mxu1 }
  0xf8   : > { %v332_v11 = vadd.f32 %v331_v10, %v1627_v54 }
  0xf9   : > { %v1727_v40 = vadd.f32 %v640_v63, %v554_v58 }
  0xfa   : > { %v447_v12 = vadd.f32 %v426_v3, %v332_v11  ;;  %v1753_v3 = vld [vmem:[%s1816_s2] ss:$0 sm:$0xff] }
  0xfe   : > { %v534_v14 = vpop.f32.mrf.mxu3  ;;  %v431_v22 = vpop.f32.mrf.mxu2 }
  0xff   : > { %v555_v17 = vadd.f32 %v534_v14, %v447_v12  ;;  %v645_v18 = vpop.f32.mrf.mxu0  ;;  %v334_v24 = vpop.f32.mrf.mxu1 }
 0x100   : > { %v335_v25 = vadd.f32 %v334_v24, %v1610_v38 }
 0x101   : > { %v1734_v27 = vadd.f32 %v642_v8, %v555_v17 }
 0x102   : > { %1423 = vmatmul.msk.bf16.gmra.mxu0 %vm208_vm0, %v1012_v16  ;;  %1345 = vmatmul.msk.bf16.gmra.mxu1 %vm208_vm0, %v688_v20  ;;  %v448_v54 = vadd.f32 %v429_v2, %v335_v25 }
 0x103   : > { %1397 = vmatmul.msk.bf16.gmra.mxu3 %vm208_vm0, %v904_v21 }
 0x106   : > { %v537_v28 = vpop.f32.mrf.mxu3  ;;  %v434_v31 = vpop.f32.mrf.mxu2 }
 0x107   : > { %v556_v29 = vadd.f32 %v537_v28, %v448_v54  ;;  %v647_v30 = vpop.f32.mrf.mxu0  ;;  %v336_v32 = vpop.f32.mrf.mxu1 }
 0x108   : > { %v337_v23 = vadd.f32 %v336_v32, %v1625_v49 }
 0x109   : > { %v1740_v41 = vadd.f32 %v645_v18, %v556_v29 }
 0x10a   : > { %v449_v38 = vadd.f32 %v431_v22, %v337_v23 }
 0x10e   : > { %v539_v33 = vpop.f32.mrf.mxu3  ;;  %v436_v37 = vpop.f32.mrf.mxu2 }
 0x10f   : > { %v557_v26 = vadd.f32 %v539_v33, %v449_v38  ;;  %v650_v35 = vpop.f32.mrf.mxu0  ;;  %v339_v42 = vpop.f32.mrf.mxu1 }
 0x110   : > { %v340_v43 = vadd.f32 %v339_v42, %v1636_v57 }
 0x111   : > { %v1743_v55 = vadd.f32 %v647_v30, %v557_v26 }
 0x112   : > { %v450_v44 = vadd.f32 %v434_v31, %v340_v43 }
 0x116   : > { %v542_v46 = vpop.f32.mrf.mxu3  ;;  %v836_v51 = vpop.f32.mrf.mxu2 }
 0x117   : > { %v558_v47 = vadd.f32 %v542_v46, %v450_v44  ;;  %v652_v48 = vpop.f32.mrf.mxu0  ;;  %v341_v52 = vpop.f32.mrf.mxu1 }
 0x119   : > { %v1745_v49 = vadd.f32 %v650_v35, %v558_v47 }
 0x11e   : > { %v544_v53 = vpop.f32.mrf.mxu3  ;;  %v838_v59 = vpop.f32.mrf.mxu2 }
 0x11f   : > { %v1052_v56 = vpop.f32.mrf.mxu0  ;;  %v728_v61 = vpop.f32.mrf.mxu1 }
 0x120   : > { %v762_v63 = vadd.f32 %v728_v61, %v1653_v19 }
 0x122   : > { %v870_v57 = vadd.f32 %v836_v51, %v762_v63 }
 0x126   : > { %v944_v0 = vpop.f32.mrf.mxu3  ;;  %v841_v5 = vpop.f32.mrf.mxu2 }
 0x127   : > { %v978_v1 = vadd.f32 %v944_v0, %v870_v57  ;;  %v1054_v4 = vpop.f32.mrf.mxu0  ;;  %v730_v60 = vpop.f32.mrf.mxu1 }
 0x128   : > { %v763_v62 = vadd.f32 %v730_v60, %v1665_v39 }
 0x129   : > { %v1086_v7 = vadd.f32 %v1052_v56, %v978_v1 }
 0x12a   : > { %v871_v58 = vadd.f32 %v838_v59, %v763_v62 }
 0x12b   : > { %v1103_v19 = vadd.f32 %v1753_v3, %v1086_v7 }
 0x12d   : > { %1117 = vst.msk [vmem:[%s1759_s16] sm:$0xff] %vm1116_vm1, %v1103_v19 }
 0x12e   : > { %v946_v8 = vpop.f32.mrf.mxu3  ;;  %v843_v11 = vpop.f32.mrf.mxu2 }
 0x12f   : > { %v979_v2 = vadd.f32 %v946_v8, %v871_v58  ;;  %v1057_v10 = vpop.f32.mrf.mxu0  ;;  %v733_v12 = vpop.f32.mrf.mxu1 }
 0x130   : > { %v764_v36 = vadd.f32 %v733_v12, %v1671_v50 }
 0x131   : > { %v1087_v39 = vadd.f32 %v1054_v4, %v979_v2 }
 0x132   : > { %v872_v14 = vadd.f32 %v841_v5, %v764_v36 }
 0x133   : > { %v1104_v13 = vadd.f32 %v1753_v3, %v1087_v39 }
 0x135   : > { %1118 = vst.msk [vmem:[%s1759_s16 + $0x8] sm:$0xff] %vm1116_vm1, %v1104_v13 }
 0x136   : > { %v949_v16 = vpop.f32.mrf.mxu3  ;;  %v846_v20 = vpop.f32.mrf.mxu2 }
 0x137   : > { %v980_v17 = vadd.f32 %v949_v16, %v872_v14  ;;  %v1059_v18 = vpop.f32.mrf.mxu0  ;;  %v735_v21 = vpop.f32.mrf.mxu1 }
 0x138   : > { %v765_v24 = vadd.f32 %v735_v21, %v1684_v9 }
 0x139   : > { %v1088_v22 = vadd.f32 %v1057_v10, %v980_v17 }
 0x13a   : > { %v873_v54 = vadd.f32 %v843_v11, %v765_v24 }
 0x13b   : > { %v1105_v25 = vadd.f32 %v1753_v3, %v1088_v22 }
 0x13d   : > { %1119 = vst.msk [vmem:[%s1759_s16 + $0x10] sm:$0xff] %vm1116_vm1, %v1105_v25 }
 0x13e   : > { %v951_v50 = vpop.f32.mrf.mxu3  ;;  %v848_v30 = vpop.f32.mrf.mxu2 }
 0x13f   : > { %v981_v28 = vadd.f32 %v951_v50, %v873_v54  ;;  %v1062_v29 = vpop.f32.mrf.mxu0  ;;  %v738_v31 = vpop.f32.mrf.mxu1 }
 0x140   : > { %v766_v23 = vadd.f32 %v738_v31, %v1691_v15 }
 0x141   : > { %v1089_v32 = vadd.f32 %v1059_v18, %v981_v28 }
 0x142   : > { %v874_v33 = vadd.f32 %v846_v20, %v766_v23 }
 0x143   : > { %v1106_v38 = vadd.f32 %v1753_v3, %v1089_v32 }
 0x145   : > { %1120 = vst.msk [vmem:[%s1759_s16 + $0x18] sm:$0xff] %vm1116_vm1, %v1106_v38 }
 0x146   : > { %v954_v9 = vpop.f32.mrf.mxu3  ;;  %v851_v37 = vpop.f32.mrf.mxu2 }
 0x147   : > { %v982_v26 = vadd.f32 %v954_v9, %v874_v33  ;;  %v1064_v35 = vpop.f32.mrf.mxu0  ;;  %v740_v42 = vpop.f32.mrf.mxu1 }
 0x148   : > { %v767_v44 = vadd.f32 %v740_v42, %v1705_v34 }
 0x149   : > { %v1090_v43 = vadd.f32 %v1062_v29, %v982_v26 }
 0x14a   : > { %v875_v47 = vadd.f32 %v848_v30, %v767_v44 }
 0x14b   : > { %v1107_v46 = vadd.f32 %v1753_v3, %v1090_v43 }
 0x14d   : > { %1121 = vst.msk [vmem:[%s1759_s16 + $0x20] sm:$0xff] %vm1116_vm1, %v1107_v46 }
 0x14e   : > { %v956_v15 = vpop.f32.mrf.mxu3  ;;  %v853_v52 = vpop.f32.mrf.mxu2 }
 0x14f   : > { %v983_v48 = vadd.f32 %v956_v15, %v875_v47  ;;  %v1067_v51 = vpop.f32.mrf.mxu0  ;;  %v743_v53 = vpop.f32.mrf.mxu1 }
 0x150   : > { %v768_v59 = vadd.f32 %v743_v53, %v1711_v45 }
 0x151   : > { %v1091_v56 = vadd.f32 %v1064_v35, %v983_v48 }
 0x152   : > { %v876_v63 = vadd.f32 %v851_v37, %v768_v59 }
 0x153   : > { %v1108_v61 = vadd.f32 %v1753_v3, %v1091_v56 }
 0x155   : > { %1122 = vst.msk [vmem:[%s1759_s16 + $0x28] sm:$0xff] %vm1116_vm1, %v1108_v61 }
 0x156   : > { %v959_v34 = vpop.f32.mrf.mxu3  ;;  %v856_v1 = vpop.f32.mrf.mxu2 }
 0x157   : > { %v984_v57 = vadd.f32 %v959_v34, %v876_v63  ;;  %v1069_v0 = vpop.f32.mrf.mxu0  ;;  %v745_v4 = vpop.f32.mrf.mxu1 }
 0x158   : > { %v769_v60 = vadd.f32 %v745_v4, %v1720_v6 }
 0x159   : > { %v1092_v5 = vadd.f32 %v1067_v51, %v984_v57 }
 0x15a   : > { %v877_v62 = vadd.f32 %v853_v52, %v769_v60 }
 0x15b   : > { %v1109_v7 = vadd.f32 %v1753_v3, %v1092_v5 }
 0x15d   : > { %1123 = vst.msk [vmem:[%s1759_s16 + $0x30] sm:$0xff] %vm1116_vm1, %v1109_v7 }
 0x15e   : > { %v961_v45 = vpop.f32.mrf.mxu3  ;;  %v858_v8 = vpop.f32.mrf.mxu2 }
 0x15f   : > { %v985_v19 = vadd.f32 %v961_v45, %v877_v62  ;;  %v1072_v58 = vpop.f32.mrf.mxu0  ;;  %v748_v2 = vpop.f32.mrf.mxu1 }
 0x160   : > { %v770_v11 = vadd.f32 %v748_v2, %v1727_v40 }
 0x161   : > { %v1093_v10 = vadd.f32 %v1069_v0, %v985_v19 }
 0x162   : > { %v878_v39 = vadd.f32 %v856_v1, %v770_v11 }
 0x163   : > { %v1110_v12 = vadd.f32 %v1753_v3, %v1093_v10 }
 0x165   : > { %1124 = vst.msk [vmem:[%s1759_s16 + $0x38] sm:$0xff] %vm1116_vm1, %v1110_v12 }
 0x166   : > { %v964_v6 = vpop.f32.mrf.mxu3  ;;  %v861_v14 = vpop.f32.mrf.mxu2 }
 0x167   : > { %v986_v36 = vadd.f32 %v964_v6, %v878_v39  ;;  %v1074_v13 = vpop.f32.mrf.mxu0  ;;  %v750_v16 = vpop.f32.mrf.mxu1 }
 0x168   : > { %v771_v18 = vadd.f32 %v750_v16, %v1734_v27 }
 0x169   : > { %v1094_v17 = vadd.f32 %v1072_v58, %v986_v36 }
 0x16a   : > { %v879_v21 = vadd.f32 %v858_v8, %v771_v18 }
 0x16b   : > { %v1111_v20 = vadd.f32 %v1753_v3, %v1094_v17 }
 0x16d   : > { %1125 = vst.msk [vmem:[%s1759_s16 + $0x40] sm:$0xff] %vm1116_vm1, %v1111_v20 }
 0x16e   : > { %v966_v40 = vpop.f32.mrf.mxu3  ;;  %v863_v25 = vpop.f32.mrf.mxu2 }
 0x16f   : > { %v987_v22 = vadd.f32 %v966_v40, %v879_v21  ;;  %v1077_v24 = vpop.f32.mrf.mxu0  ;;  %v753_v54 = vpop.f32.mrf.mxu1 }
 0x170   : > { %v772_v28 = vadd.f32 %v753_v54, %v1740_v41 }
 0x171   : > { %v1095_v50 = vadd.f32 %v1074_v13, %v987_v22 }
 0x172   : > { %v880_v30 = vadd.f32 %v861_v14, %v772_v28 }
 0x173   : > { %v1112_v29 = vadd.f32 %v1753_v3, %v1095_v50 }
 0x175   : > { %1126 = vst.msk [vmem:[%s1759_s16 + $0x48] sm:$0xff] %vm1116_vm1, %v1112_v29 }
 0x176   : > { %v969_v27 = vpop.f32.mrf.mxu3  ;;  %v866_v23 = vpop.f32.mrf.mxu2 }
 0x177   : > { %v988_v31 = vadd.f32 %v969_v27, %v880_v30  ;;  %v1079_v32 = vpop.f32.mrf.mxu0  ;;  %v755_v38 = vpop.f32.mrf.mxu1 }
 0x178   : > { %v773_v9 = vadd.f32 %v755_v38, %v1743_v55 }
 0x179   : > { %v1096_v33 = vadd.f32 %v1077_v24, %v988_v31 }
 0x17a   : > { %v881_v35 = vadd.f32 %v863_v25, %v773_v9 }
 0x17b   : > { %v1113_v26 = vadd.f32 %v1753_v3, %v1096_v33 }
 0x17d   : > { %1127 = vst.msk [vmem:[%s1759_s16 + $0x50] sm:$0xff] %vm1116_vm1, %v1113_v26 }
 0x17e   : > { %v971_v41 = vpop.f32.mrf.mxu3  ;;  %v868_v43 = vpop.f32.mrf.mxu2 }
 0x17f   : > { %v989_v37 = vadd.f32 %v971_v41, %v881_v35  ;;  %v1082_v42 = vpop.f32.mrf.mxu0  ;;  %v758_v44 = vpop.f32.mrf.mxu1 }
 0x180   : > { %v774_v47 = vadd.f32 %v758_v44, %v1745_v49 }
 0x181   : > { %v1097_v46 = vadd.f32 %v1079_v32, %v989_v37 }
 0x182   : > { %v882_v48 = vadd.f32 %v866_v23, %v774_v47 }
 0x183   : > { %v1114_v15 = vadd.f32 %v1753_v3, %v1097_v46 }
 0x185   : > { %1128 = vst.msk [vmem:[%s1759_s16 + $0x58] sm:$0xff] %vm1116_vm1, %v1114_v15 }
 0x186   : > { %v974_v55 = vpop.f32.mrf.mxu3 }
 0x187   : > { %v990_v51 = vadd.f32 %v974_v55, %v882_v48  ;;  %v1084_v52 = vpop.f32.mrf.mxu0  ;;  %v760_v53 = vpop.f32.mrf.mxu1 }
 0x189   : > { %v1098_v56 = vadd.f32 %v1082_v42, %v990_v51 }
 0x18b   : > { %v1115_v59 = vadd.f32 %v1753_v3, %v1098_v56 }
 0x18d   : > { %1129 = vst.msk [vmem:[%s1759_s16 + $0x60] sm:$0xff] %vm1116_vm1, %v1115_v59 }
 0x18e   : > { %v976_v61 = vpop.f32.mrf.mxu3 }
 0x18f PF: > { %s13_s12 = sadd.s32 1, %s1453_s12  }
 0x190   : > { %p10_p4 = scmp.ge.s32.totalorder %s13_s12, 4  }
 0x192   :  { %12 = sbr.rel (!%p10_p4) target bundleno = 1 (0x1), region = 76 }

</bundles_post_ra>
